<compile_context>
chip_gen: v7x
topology: tpu7x:2x2x1
jax: 0.10.0
libtpu: 0.0.40
codegen_flags: <defaults>
</compile_context>

<pallas_src>
import numpy as np
import jax
import jax.numpy as jnp
from jax import lax
from jax.experimental import pallas as pl
from jax.experimental.pallas import tpu as pltpu

L0, L1, P1 = 270, 268, 134
L2, P2 = 132, 66
L3, P3 = 64, 32
C1, C2, C3 = 64, 32, 16
OUT = 8192
K = 3
FC_CHUNK = 2048          # fc1 output produced in 2048-lane slabs (bounds VMEM temps)


def _prelu(v, a):
    return jnp.where(v > 0, v, a * v)


def _net_kernel(alpha_ref,                 # SMEM (7,) PReLU slopes
                x_ref,                     # (B, L1, 3) im2col of the input
                w1_ref, b1_ref,            # (3, 64), (1, 64)
                w2_ref, b2_ref,            # (3, 64, 32), (1, 32)
                w3_ref, b3_ref,            # (3, 32, 16), (1, 16)
                wfc_ref,                   # (32, 8192) fc1 weight, transposed
                o_ref,                     # (B*16, 8192) output slab
                pool_ref,                  # VMEM (L1, C1) scratch for strided pooling
                lhs_ref):                  # VMEM (B*16, 32) fused fc1 LHS
    # NOTE: PrintSize in the PyTorch module is an identity (debug print) -> no-op here.
    B = x_ref.shape[0]

    def per_elem(b, carry):
        # ---- conv1 (im2col matmul) + prelu1 ----
        xi = x_ref[b]                                                   # (268, 3)
        h = jnp.dot(xi, w1_ref[...], preferred_element_type=jnp.float32) + b1_ref[...]
        h = _prelu(h, alpha_ref[0])                                     # (268, 64)

        # ---- maxpool1 (kernel=2) via sublane-strided reads + prelu2 ----
        pool_ref[pl.ds(0, L1), pl.ds(0, C1)] = h
        h = jnp.maximum(pool_ref[pl.ds(0, P1, stride=2), pl.ds(0, C1)],
                        pool_ref[pl.ds(1, P1, stride=2), pl.ds(0, C1)])
        h = _prelu(h, alpha_ref[1])                                     # (134, 64)

        # ---- conv2: K shifted (132,64)@(64,32) MXU matmuls + prelu3 ----
        h2 = jnp.zeros((L2, C2), jnp.float32)
        for k in range(K):
            h2 = h2 + jnp.dot(h[k:k + L2, :], w2_ref[k],
                              preferred_element_type=jnp.float32)
        h2 = _prelu(h2 + b2_ref[...], alpha_ref[2])

        # ---- maxpool2 + prelu4 ----
        pool_ref[pl.ds(0, L2), pl.ds(0, C2)] = h2
        h2 = jnp.maximum(pool_ref[pl.ds(0, P2, stride=2), pl.ds(0, C2)],
                         pool_ref[pl.ds(1, P2, stride=2), pl.ds(0, C2)])
        h2 = _prelu(h2, alpha_ref[3])                                   # (66, 32)

        # ---- conv3: K shifted (64,32)@(32,16) matmuls + prelu5 ----
        h3 = jnp.zeros((L3, C3), jnp.float32)
        for k in range(K):
            h3 = h3 + jnp.dot(h2[k:k + L3, :], w3_ref[k],
                              preferred_element_type=jnp.float32)
        h3 = _prelu(h3 + b3_ref[...], alpha_ref[4])

        # ---- maxpool3 + prelu6 ----
        pool_ref[pl.ds(0, L3), pl.ds(0, C3)] = h3
        h3 = jnp.maximum(pool_ref[pl.ds(0, P3, stride=2), pl.ds(0, C3)],
                         pool_ref[pl.ds(1, P3, stride=2), pl.ds(0, C3)])
        h3 = _prelu(h3, alpha_ref[5])                                   # (32, 16)

        # Channels-major (16, 32) rows go straight into the fused fc1 LHS slab.
        row = pl.multiple_of(b * C3, C3)
        lhs_ref[pl.ds(row, C3), :] = h3.T
        return carry

    lax.fori_loop(0, B, per_elem, 0, unroll=min(2, B))

    # ---- fc1 fused over the batch tile: (B*16, 32) @ (32, 8192), then prelu7 ----
    # Static 2048-lane chunks keep each dot/PReLU intermediate small and the output
    # stores lane-dense & unmasked.
    lhs = lhs_ref[...]
    a6 = alpha_ref[6]
    for c in range(OUT // FC_CHUNK):
        col = c * FC_CHUNK
        blk = jnp.dot(lhs, wfc_ref[:, col:col + FC_CHUNK],
                      preferred_element_type=jnp.float32)
        o_ref[:, col:col + FC_CHUNK] = _prelu(blk, a6)


def fixed_seq_embedding_net(x, params, *, batch_tile=16):
    """x: (N, 1, 270) float32 in PyTorch NCL layout. Returns (N, 16, 8192).

    batch_tile: elements per grid step. 16 gives an 8 MiB lane-dense output block
    per step (good HBM-write efficiency); keep grid length >= 2 on multi-core parts
    (v7x) so both TensorCores get work.
    """
    W1, b1, W2, b2, W3, b3, Wfc, alphas = params
    N = x.shape[0]
    assert x.shape == (N, 1, L0)

    B = min(batch_tile, N)
    n_pad = (-N) % B
    x_f = x.astype(jnp.float32)
    if n_pad:
        x_f = jnp.concatenate([x_f, jnp.zeros((n_pad, 1, L0), jnp.float32)], axis=0)
    Np = N + n_pad
    grid_n = Np // B

    # Glue (plain JAX): im2col for conv1 + weight re-layout for the (L, C) kernel layout.
    x_seq = x_f[:, 0, :]                                              # (Np, 270)
    x_im2col = jnp.stack([x_seq[:, k:k + L1] for k in range(K)], axis=-1)   # (Np, 268, 3)

    w1_r = jnp.transpose(W1[:, 0, :], (1, 0)).astype(jnp.float32)     # (3, 64)
    b1_r = b1.reshape(1, C1).astype(jnp.float32)
    w2_r = jnp.transpose(W2, (2, 1, 0)).astype(jnp.float32)           # (3, 64, 32)
    b2_r = b2.reshape(1, C2).astype(jnp.float32)
    w3_r = jnp.transpose(W3, (2, 1, 0)).astype(jnp.float32)           # (3, 32, 16)
    b3_r = b3.reshape(1, C3).astype(jnp.float32)
    wfc_t = jnp.transpose(Wfc, (1, 0)).astype(jnp.float32)            # (32, 8192)

    def const_spec(shape):
        zeros = (0,) * len(shape)
        return pl.BlockSpec(shape, lambda n, _z=zeros: _z)

    out2d = pl.pallas_call(
        _net_kernel,
        out_shape=jax.ShapeDtypeStruct((Np * C3, OUT), jnp.float32),
        grid=(grid_n,),
        in_specs=[
            pl.BlockSpec(memory_space=pltpu.MemorySpace.SMEM),        # alphas (7,)
            pl.BlockSpec((B, L1, K), lambda n: (n, 0, 0)),            # im2col input
            const_spec((K, C1)), const_spec((1, C1)),
            const_spec((K, C1, C2)), const_spec((1, C2)),
            const_spec((K, C2, C3)), const_spec((1, C3)),
            const_spec((P3, OUT)),
        ],
        out_specs=pl.BlockSpec((B * C3, OUT), lambda n: (n, 0)),
        scratch_shapes=[
            pltpu.VMEM((L1, C1), jnp.float32),        # pooling staging buffer
            pltpu.VMEM((B * C3, P3), jnp.float32),    # fused fc1 LHS
        ],
        compiler_params=pltpu.CompilerParams(
            dimension_semantics=("parallel",),
            vmem_limit_bytes=48 * 1024 * 1024),
    )(alphas, x_im2col, w1_r, b1_r, w2_r, b2_r, w3_r, b3_r, wfc_t)

    return out2d.reshape(Np, C3, OUT)[:N]


def _numpy_reference(x, params):
    """Faithful float64 reference of the PyTorch forward (NCL layout)."""
    x = np.asarray(x, np.float64)
    W1, b1, W2, b2, W3, b3, Wfc, alphas = [np.asarray(p, np.float64) for p in params]

    def conv1d(h, W, b):
        Lout = h.shape[-1] - W.shape[-1] + 1
        out = np.zeros((h.shape[0], W.shape[0], Lout))
        for k in range(W.shape[-1]):
            out += np.einsum('ncl,oc->nol', h[:, :, k:k + Lout], W[:, :, k])
        return out + b[None, :, None]

    def prelu(h, a):
        return np.where(h > 0, h, a * h)

    def pool(h):
        L = (h.shape[-1] // 2) * 2
        return np.maximum(h[..., 0:L:2], h[..., 1:L:2])

    h = conv1d(x, W1, b1)
    h = prelu(h, alphas[0]); h = pool(h); h = prelu(h, alphas[1])
    h = conv1d(h, W2, b2)
    h = prelu(h, alphas[2]); h = pool(h); h = prelu(h, alphas[3])
    h = conv1d(h, W3, b3)
    h = prelu(h, alphas[4]); h = pool(h); h = prelu(h, alphas[5])
    h = np.einsum('ncl,ol->nco', h, Wfc)      # fc1, bias=False, acts on last axis
    return prelu(h, alphas[6])


if __name__ == "__main__":
    key = jax.random.PRNGKey(0)
    kW1, kb1, kW2, kb2, kW3, kb3, kWfc, kx = jax.random.split(key, 8)
    W1 = jax.random.normal(kW1, (C1, 1, K), jnp.float32) * 0.30       # Conv1d(1, 64, 3)
    b1 = jax.random.normal(kb1, (C1,), jnp.float32) * 0.10
    W2 = jax.random.normal(kW2, (C2, C1, K), jnp.float32) * 0.08      # Conv1d(64, 32, 3)
    b2 = jax.random.normal(kb2, (C2,), jnp.float32) * 0.10
    W3 = jax.random.normal(kW3, (C3, C2, K), jnp.float32) * 0.10      # Conv1d(32, 16, 3)
    b3 = jax.random.normal(kb3, (C3,), jnp.float32) * 0.10
    Wfc = jax.random.normal(kWfc, (OUT, 2 * C3), jnp.float32) * 0.10  # Linear(32, 8192, bias=False)
    # Distinct slopes per PReLU so each of the 7 activations is actually verified.
    alphas = jnp.asarray([0.05, 0.10, 0.15, 0.20, 0.25, 0.30, 0.35], jnp.float32)
    params = (W1, b1, W2, b2, W3, b3, Wfc, alphas)

    # Case 1: small single-tile run (grid length 1).
    x = jax.random.normal(kx, (2, 1, L0), jnp.float32)                # (N=2, C=1, L=270)
    out = jax.block_until_ready(fixed_seq_embedding_net(x, params))
    assert out.shape == (2, C3, OUT)
    np.testing.assert_allclose(np.asarray(out), _numpy_reference(x, params),
                               rtol=3e-2, atol=5e-3)

    # Case 2: exercises batch padding and a grid of length 2.
    x3 = jax.random.normal(jax.random.PRNGKey(1), (3, 1, L0), jnp.float32)
    out3 = jax.block_until_ready(fixed_seq_embedding_net(x3, params, batch_tile=2))
    assert out3.shape == (3, C3, OUT)
    np.testing.assert_allclose(np.asarray(out3), _numpy_reference(x3, params),
                               rtol=3e-2, atol=5e-3)

    print("KERNEL_OK")
</pallas_src>

<mosaic_0001>
module attributes {stable_mosaic.version = 11 : i64} {
  func.func @_net_kernel(%arg0: i32, %arg1: memref<7xf32, #tpu.memory_space<smem>>, %arg2: memref<2x268x3xf32, #tpu.memory_space<vmem>>, %arg3: memref<3x64xf32, #tpu.memory_space<vmem>>, %arg4: memref<1x64xf32, #tpu.memory_space<vmem>>, %arg5: memref<3x64x32xf32, #tpu.memory_space<vmem>>, %arg6: memref<1x32xf32, #tpu.memory_space<vmem>>, %arg7: memref<3x32x16xf32, #tpu.memory_space<vmem>>, %arg8: memref<1x16xf32, #tpu.memory_space<vmem>>, %arg9: memref<32x8192xf32, #tpu.memory_space<vmem>>, %arg10: memref<32x8192xf32, #tpu.memory_space<vmem>>, %arg11: memref<268x64xf32, #tpu.memory_space<vmem>>, %arg12: memref<32x32xf32, #tpu.memory_space<vmem>>) attributes {dimension_semantics = [#tpu.dimension_semantics<parallel>], iteration_bounds = array<i64: 1>, scalar_prefetch = 0 : i64, scratch_operands = 2 : i64, tpu.core_type = #tpu.core_type<tc>, window_params = [{transform_indices = @transform_0, window_bounds = array<i64: 7>}, {transform_indices = @transform_1, window_bounds = array<i64: 2, 268, 3>}, {pipeline_mode = #tpu.pipeline_mode<synchronous>, transform_indices = @transform_2, window_bounds = array<i64: 3, 64>}, {pipeline_mode = #tpu.pipeline_mode<synchronous>, transform_indices = @transform_3, window_bounds = array<i64: 1, 64>}, {pipeline_mode = #tpu.pipeline_mode<synchronous>, transform_indices = @transform_4, window_bounds = array<i64: 3, 64, 32>}, {pipeline_mode = #tpu.pipeline_mode<synchronous>, transform_indices = @transform_5, window_bounds = array<i64: 1, 32>}, {pipeline_mode = #tpu.pipeline_mode<synchronous>, transform_indices = @transform_6, window_bounds = array<i64: 3, 32, 16>}, {pipeline_mode = #tpu.pipeline_mode<synchronous>, transform_indices = @transform_7, window_bounds = array<i64: 1, 16>}, {pipeline_mode = #tpu.pipeline_mode<synchronous>, transform_indices = @transform_8, window_bounds = array<i64: 32, 8192>}, {transform_indices = @transform_9, window_bounds = array<i64: 32, 8192>}]} {
    %c0_i32 = arith.constant 0 : i32
    %0 = arith.index_cast %c0_i32 : i32 to index
    %c0 = arith.constant 0 : index
    %c0_0 = arith.constant 0 : index
    %1 = vector.load %arg2[%0, %c0, %c0_0] : memref<2x268x3xf32, #tpu.memory_space<vmem>>, vector<1x268x3xf32>
    %2 = vector.shape_cast %1 : vector<1x268x3xf32> to vector<268x3xf32>
    %c0_1 = arith.constant 0 : index
    %c0_2 = arith.constant 0 : index
    %3 = vector.load %arg3[%c0_1, %c0_2] : memref<3x64xf32, #tpu.memory_space<vmem>>, vector<3x64xf32>
    %cst = arith.constant dense<0.000000e+00> : vector<268x64xf32>
    %4 = tpu.matmul %2, %3, %cst {dimension_numbers = #tpu.dot_dimension_numbers<[1], [0], [0], [1], [0, 0, 1, 1], [], []>} : vector<268x3xf32>, vector<3x64xf32>, vector<268x64xf32> -> vector<268x64xf32>
    %c0_3 = arith.constant 0 : index
    %c0_4 = arith.constant 0 : index
    %5 = vector.load %arg4[%c0_3, %c0_4] : memref<1x64xf32, #tpu.memory_space<vmem>>, vector<1x64xf32>
    %6 = vector.broadcast %5 : vector<1x64xf32> to vector<268x64xf32>
    %7 = arith.addf %4, %6 : vector<268x64xf32>
    %c0_5 = arith.constant 0 : index
    %8 = memref.load %arg1[%c0_5] : memref<7xf32, #tpu.memory_space<smem>>
    %cst_6 = arith.constant 0.000000e+00 : f32
    %9 = vector.broadcast %cst_6 : f32 to vector<268x64xf32>
    %10 = arith.cmpf ogt, %7, %9 : vector<268x64xf32>
    %11 = vector.broadcast %8 : f32 to vector<268x64xf32>
    %12 = arith.mulf %11, %7 : vector<268x64xf32>
    %13 = arith.select %10, %7, %12 : vector<268x64xi1>, vector<268x64xf32>
    %c0_7 = arith.constant 0 : index
    %c0_8 = arith.constant 0 : index
    %14 = vector.load %arg11[%c0_7, %c0_8] : memref<268x64xf32, #tpu.memory_space<vmem>>, vector<268x64xf32>
    tpu.vector_store %arg11[%c0_7, %c0_8], %13 {strides = array<i32>} : memref<268x64xf32, #tpu.memory_space<vmem>>, vector<268x64xf32>,
    %c0_9 = arith.constant 0 : index
    %c0_10 = arith.constant 0 : index
    %15 = tpu.strided_load %arg11[%c0_9, %c0_10] {strides = array<i32: 2, 1>} : memref<268x64xf32, #tpu.memory_space<vmem>>, vector<134x64xf32>
    %c1 = arith.constant 1 : index
    %c0_11 = arith.constant 0 : index
    %16 = tpu.strided_load %arg11[%c1, %c0_11] {strides = array<i32: 2, 1>} : memref<268x64xf32, #tpu.memory_space<vmem>>, vector<134x64xf32>
    %17 = arith.maximumf %15, %16 : vector<134x64xf32>
    %c1_12 = arith.constant 1 : index
    %18 = memref.load %arg1[%c1_12] : memref<7xf32, #tpu.memory_space<smem>>
    %cst_13 = arith.constant 0.000000e+00 : f32
    %19 = vector.broadcast %cst_13 : f32 to vector<134x64xf32>
    %20 = arith.cmpf ogt, %17, %19 : vector<134x64xf32>
    %21 = vector.broadcast %18 : f32 to vector<134x64xf32>
    %22 = arith.mulf %21, %17 : vector<134x64xf32>
    %23 = arith.select %20, %17, %22 : vector<134x64xi1>, vector<134x64xf32>
    %cst_14 = arith.constant 0.000000e+00 : f32
    %24 = vector.broadcast %cst_14 : f32 to vector<132x32xf32>
    %25 = vector.extract_strided_slice %23 {offsets = [0, 0], sizes = [132, 64], strides = [1, 1]} : vector<134x64xf32> to vector<132x64xf32>
    %c0_15 = arith.constant 0 : index
    %c0_16 = arith.constant 0 : index
    %c0_17 = arith.constant 0 : index
    %26 = vector.load %arg5[%c0_15, %c0_16, %c0_17] : memref<3x64x32xf32, #tpu.memory_space<vmem>>, vector<1x64x32xf32>
    %27 = vector.shape_cast %26 : vector<1x64x32xf32> to vector<64x32xf32>
    %cst_18 = arith.constant dense<0.000000e+00> : vector<132x32xf32>
    %28 = tpu.matmul %25, %27, %cst_18 {dimension_numbers = #tpu.dot_dimension_numbers<[1], [0], [0], [1], [0, 0, 1, 1], [], []>} : vector<132x64xf32>, vector<64x32xf32>, vector<132x32xf32> -> vector<132x32xf32>
    %29 = arith.addf %24, %28 : vector<132x32xf32>
    %30 = vector.extract_strided_slice %23 {offsets = [1, 0], sizes = [132, 64], strides = [1, 1]} : vector<134x64xf32> to vector<132x64xf32>
    %c1_19 = arith.constant 1 : index
    %c0_20 = arith.constant 0 : index
    %c0_21 = arith.constant 0 : index
    %31 = vector.load %arg5[%c1_19, %c0_20, %c0_21] : memref<3x64x32xf32, #tpu.memory_space<vmem>>, vector<1x64x32xf32>
    %32 = vector.shape_cast %31 : vector<1x64x32xf32> to vector<64x32xf32>
    %cst_22 = arith.constant dense<0.000000e+00> : vector<132x32xf32>
    %33 = tpu.matmul %30, %32, %cst_22 {dimension_numbers = #tpu.dot_dimension_numbers<[1], [0], [0], [1], [0, 0, 1, 1], [], []>} : vector<132x64xf32>, vector<64x32xf32>, vector<132x32xf32> -> vector<132x32xf32>
    %34 = arith.addf %29, %33 : vector<132x32xf32>
    %35 = vector.extract_strided_slice %23 {offsets = [2, 0], sizes = [132, 64], strides = [1, 1]} : vector<134x64xf32> to vector<132x64xf32>
    %c2 = arith.constant 2 : index
    %c0_23 = arith.constant 0 : index
    %c0_24 = arith.constant 0 : index
    %36 = vector.load %arg5[%c2, %c0_23, %c0_24] : memref<3x64x32xf32, #tpu.memory_space<vmem>>, vector<1x64x32xf32>
    %37 = vector.shape_cast %36 : vector<1x64x32xf32> to vector<64x32xf32>
    %cst_25 = arith.constant dense<0.000000e+00> : vector<132x32xf32>
    %38 = tpu.matmul %35, %37, %cst_25 {dimension_numbers = #tpu.dot_dimension_numbers<[1], [0], [0], [1], [0, 0, 1, 1], [], []>} : vector<132x64xf32>, vector<64x32xf32>, vector<132x32xf32> -> vector<132x32xf32>
    %39 = arith.addf %34, %38 : vector<132x32xf32>
    %c0_26 = arith.constant 0 : index
    %c0_27 = arith.constant 0 : index
    %40 = vector.load %arg6[%c0_26, %c0_27] : memref<1x32xf32, #tpu.memory_space<vmem>>, vector<1x32xf32>
    %41 = vector.broadcast %40 : vector<1x32xf32> to vector<132x32xf32>
    %42 = arith.addf %39, %41 : vector<132x32xf32>
    %c2_28 = arith.constant 2 : index
    %43 = memref.load %arg1[%c2_28] : memref<7xf32, #tpu.memory_space<smem>>
    %cst_29 = arith.constant 0.000000e+00 : f32
    %44 = vector.broadcast %cst_29 : f32 to vector<132x32xf32>
    %45 = arith.cmpf ogt, %42, %44 : vector<132x32xf32>
    %46 = vector.broadcast %43 : f32 to vector<132x32xf32>
    %47 = arith.mulf %46, %42 : vector<132x32xf32>
    %48 = arith.select %45, %42, %47 : vector<132x32xi1>, vector<132x32xf32>
    %c0_30 = arith.constant 0 : index
    %c0_31 = arith.constant 0 : index
    %49 = vector.load %arg11[%c0_30, %c0_31] : memref<268x64xf32, #tpu.memory_space<vmem>>, vector<132x32xf32>
    tpu.vector_store %arg11[%c0_30, %c0_31], %48 {strides = array<i32>} : memref<268x64xf32, #tpu.memory_space<vmem>>, vector<132x32xf32>,
    %c0_32 = arith.constant 0 : index
    %c0_33 = arith.constant 0 : index
    %50 = tpu.strided_load %arg11[%c0_32, %c0_33] {strides = array<i32: 2, 1>} : memref<268x64xf32, #tpu.memory_space<vmem>>, vector<66x32xf32>
    %c1_34 = arith.constant 1 : index
    %c0_35 = arith.constant 0 : index
    %51 = tpu.strided_load %arg11[%c1_34, %c0_35] {strides = array<i32: 2, 1>} : memref<268x64xf32, #tpu.memory_space<vmem>>, vector<66x32xf32>
    %52 = arith.maximumf %50, %51 : vector<66x32xf32>
    %c3 = arith.constant 3 : index
    %53 = memref.load %arg1[%c3] : memref<7xf32, #tpu.memory_space<smem>>
    %cst_36 = arith.constant 0.000000e+00 : f32
    %54 = vector.broadcast %cst_36 : f32 to vector<66x32xf32>
    %55 = arith.cmpf ogt, %52, %54 : vector<66x32xf32>
    %56 = vector.broadcast %53 : f32 to vector<66x32xf32>
    %57 = arith.mulf %56, %52 : vector<66x32xf32>
    %58 = arith.select %55, %52, %57 : vector<66x32xi1>, vector<66x32xf32>
    %cst_37 = arith.constant 0.000000e+00 : f32
    %59 = vector.broadcast %cst_37 : f32 to vector<64x16xf32>
    %60 = vector.extract_strided_slice %58 {offsets = [0, 0], sizes = [64, 32], strides = [1, 1]} : vector<66x32xf32> to vector<64x32xf32>
    %c0_38 = arith.constant 0 : index
    %c0_39 = arith.constant 0 : index
    %c0_40 = arith.constant 0 : index
    %61 = vector.load %arg7[%c0_38, %c0_39, %c0_40] : memref<3x32x16xf32, #tpu.memory_space<vmem>>, vector<1x32x16xf32>
    %62 = vector.shape_cast %61 : vector<1x32x16xf32> to vector<32x16xf32>
    %cst_41 = arith.constant dense<0.000000e+00> : vector<64x16xf32>
    %63 = tpu.matmul %60, %62, %cst_41 {dimension_numbers = #tpu.dot_dimension_numbers<[1], [0], [0], [1], [0, 0, 1, 1], [], []>} : vector<64x32xf32>, vector<32x16xf32>, vector<64x16xf32> -> vector<64x16xf32>
    %64 = arith.addf %59, %63 : vector<64x16xf32>
    %65 = vector.extract_strided_slice %58 {offsets = [1, 0], sizes = [64, 32], strides = [1, 1]} : vector<66x32xf32> to vector<64x32xf32>
    %c1_42 = arith.constant 1 : index
    %c0_43 = arith.constant 0 : index
    %c0_44 = arith.constant 0 : index
    %66 = vector.load %arg7[%c1_42, %c0_43, %c0_44] : memref<3x32x16xf32, #tpu.memory_space<vmem>>, vector<1x32x16xf32>
    %67 = vector.shape_cast %66 : vector<1x32x16xf32> to vector<32x16xf32>
    %cst_45 = arith.constant dense<0.000000e+00> : vector<64x16xf32>
    %68 = tpu.matmul %65, %67, %cst_45 {dimension_numbers = #tpu.dot_dimension_numbers<[1], [0], [0], [1], [0, 0, 1, 1], [], []>} : vector<64x32xf32>, vector<32x16xf32>, vector<64x16xf32> -> vector<64x16xf32>
    %69 = arith.addf %64, %68 : vector<64x16xf32>
    %70 = vector.extract_strided_slice %58 {offsets = [2, 0], sizes = [64, 32], strides = [1, 1]} : vector<66x32xf32> to vector<64x32xf32>
    %c2_46 = arith.constant 2 : index
    %c0_47 = arith.constant 0 : index
    %c0_48 = arith.constant 0 : index
    %71 = vector.load %arg7[%c2_46, %c0_47, %c0_48] : memref<3x32x16xf32, #tpu.memory_space<vmem>>, vector<1x32x16xf32>
    %72 = vector.shape_cast %71 : vector<1x32x16xf32> to vector<32x16xf32>
    %cst_49 = arith.constant dense<0.000000e+00> : vector<64x16xf32>
    %73 = tpu.matmul %70, %72, %cst_49 {dimension_numbers = #tpu.dot_dimension_numbers<[1], [0], [0], [1], [0, 0, 1, 1], [], []>} : vector<64x32xf32>, vector<32x16xf32>, vector<64x16xf32> -> vector<64x16xf32>
    %74 = arith.addf %69, %73 : vector<64x16xf32>
    %c0_50 = arith.constant 0 : index
    %c0_51 = arith.constant 0 : index
    %75 = vector.load %arg8[%c0_50, %c0_51] : memref<1x16xf32, #tpu.memory_space<vmem>>, vector<1x16xf32>
    %76 = vector.broadcast %75 : vector<1x16xf32> to vector<64x16xf32>
    %77 = arith.addf %74, %76 : vector<64x16xf32>
    %c4 = arith.constant 4 : index
    %78 = memref.load %arg1[%c4] : memref<7xf32, #tpu.memory_space<smem>>
    %cst_52 = arith.constant 0.000000e+00 : f32
    %79 = vector.broadcast %cst_52 : f32 to vector<64x16xf32>
    %80 = arith.cmpf ogt, %77, %79 : vector<64x16xf32>
    %81 = vector.broadcast %78 : f32 to vector<64x16xf32>
    %82 = arith.mulf %81, %77 : vector<64x16xf32>
    %83 = arith.select %80, %77, %82 : vector<64x16xi1>, vector<64x16xf32>
    %c0_53 = arith.constant 0 : index
    %c0_54 = arith.constant 0 : index
    %84 = vector.load %arg11[%c0_53, %c0_54] : memref<268x64xf32, #tpu.memory_space<vmem>>, vector<64x16xf32>
    tpu.vector_store %arg11[%c0_53, %c0_54], %83 {strides = array<i32>} : memref<268x64xf32, #tpu.memory_space<vmem>>, vector<64x16xf32>,
    %c0_55 = arith.constant 0 : index
    %c0_56 = arith.constant 0 : index
    %85 = tpu.strided_load %arg11[%c0_55, %c0_56] {strides = array<i32: 2, 1>} : memref<268x64xf32, #tpu.memory_space<vmem>>, vector<32x16xf32>
    %c1_57 = arith.constant 1 : index
    %c0_58 = arith.constant 0 : index
    %86 = tpu.strided_load %arg11[%c1_57, %c0_58] {strides = array<i32: 2, 1>} : memref<268x64xf32, #tpu.memory_space<vmem>>, vector<32x16xf32>
    %87 = arith.maximumf %85, %86 : vector<32x16xf32>
    %c5 = arith.constant 5 : index
    %88 = memref.load %arg1[%c5] : memref<7xf32, #tpu.memory_space<smem>>
    %cst_59 = arith.constant 0.000000e+00 : f32
    %89 = vector.broadcast %cst_59 : f32 to vector<32x16xf32>
    %90 = arith.cmpf ogt, %87, %89 : vector<32x16xf32>
    %91 = vector.broadcast %88 : f32 to vector<32x16xf32>
    %92 = arith.mulf %91, %87 : vector<32x16xf32>
    %93 = arith.select %90, %87, %92 : vector<32x16xi1>, vector<32x16xf32>
    %c16_i32 = arith.constant 16 : i32
    %94 = arith.muli %c0_i32, %c16_i32 : i32
    %95 = tpu.assume_multiple %94, 16 : i32
    %96 = tpu.transpose %93, [1, 0] : vector<32x16xf32> -> vector<16x32xf32>
    %97 = arith.index_cast %95 : i32 to index
    %c0_60 = arith.constant 0 : index
    %98 = vector.load %arg12[%97, %c0_60] : memref<32x32xf32, #tpu.memory_space<vmem>>, vector<16x32xf32>
    tpu.vector_store %arg12[%97, %c0_60], %96 {strides = array<i32>} : memref<32x32xf32, #tpu.memory_space<vmem>>, vector<16x32xf32>,
    %c1_i32 = arith.constant 1 : i32
    %99 = arith.index_cast %c1_i32 : i32 to index
    %c0_61 = arith.constant 0 : index
    %c0_62 = arith.constant 0 : index
    %100 = vector.load %arg2[%99, %c0_61, %c0_62] : memref<2x268x3xf32, #tpu.memory_space<vmem>>, vector<1x268x3xf32>
    %101 = vector.shape_cast %100 : vector<1x268x3xf32> to vector<268x3xf32>
    %c0_63 = arith.constant 0 : index
    %c0_64 = arith.constant 0 : index
    %102 = vector.load %arg3[%c0_63, %c0_64] : memref<3x64xf32, #tpu.memory_space<vmem>>, vector<3x64xf32>
    %cst_65 = arith.constant dense<0.000000e+00> : vector<268x64xf32>
    %103 = tpu.matmul %101, %102, %cst_65 {dimension_numbers = #tpu.dot_dimension_numbers<[1], [0], [0], [1], [0, 0, 1, 1], [], []>} : vector<268x3xf32>, vector<3x64xf32>, vector<268x64xf32> -> vector<268x64xf32>
    %c0_66 = arith.constant 0 : index
    %c0_67 = arith.constant 0 : index
    %104 = vector.load %arg4[%c0_66, %c0_67] : memref<1x64xf32, #tpu.memory_space<vmem>>, vector<1x64xf32>
    %105 = vector.broadcast %104 : vector<1x64xf32> to vector<268x64xf32>
    %106 = arith.addf %103, %105 : vector<268x64xf32>
    %c0_68 = arith.constant 0 : index
    %107 = memref.load %arg1[%c0_68] : memref<7xf32, #tpu.memory_space<smem>>
    %cst_69 = arith.constant 0.000000e+00 : f32
    %108 = vector.broadcast %cst_69 : f32 to vector<268x64xf32>
    %109 = arith.cmpf ogt, %106, %108 : vector<268x64xf32>
    %110 = vector.broadcast %107 : f32 to vector<268x64xf32>
    %111 = arith.mulf %110, %106 : vector<268x64xf32>
    %112 = arith.select %109, %106, %111 : vector<268x64xi1>, vector<268x64xf32>
    %c0_70 = arith.constant 0 : index
    %c0_71 = arith.constant 0 : index
    %113 = vector.load %arg11[%c0_70, %c0_71] : memref<268x64xf32, #tpu.memory_space<vmem>>, vector<268x64xf32>
    tpu.vector_store %arg11[%c0_70, %c0_71], %112 {strides = array<i32>} : memref<268x64xf32, #tpu.memory_space<vmem>>, vector<268x64xf32>,
    %c0_72 = arith.constant 0 : index
    %c0_73 = arith.constant 0 : index
    %114 = tpu.strided_load %arg11[%c0_72, %c0_73] {strides = array<i32: 2, 1>} : memref<268x64xf32, #tpu.memory_space<vmem>>, vector<134x64xf32>
    %c1_74 = arith.constant 1 : index
    %c0_75 = arith.constant 0 : index
    %115 = tpu.strided_load %arg11[%c1_74, %c0_75] {strides = array<i32: 2, 1>} : memref<268x64xf32, #tpu.memory_space<vmem>>, vector<134x64xf32>
    %116 = arith.maximumf %114, %115 : vector<134x64xf32>
    %c1_76 = arith.constant 1 : index
    %117 = memref.load %arg1[%c1_76] : memref<7xf32, #tpu.memory_space<smem>>
    %cst_77 = arith.constant 0.000000e+00 : f32
    %118 = vector.broadcast %cst_77 : f32 to vector<134x64xf32>
    %119 = arith.cmpf ogt, %116, %118 : vector<134x64xf32>
    %120 = vector.broadcast %117 : f32 to vector<134x64xf32>
    %121 = arith.mulf %120, %116 : vector<134x64xf32>
    %122 = arith.select %119, %116, %121 : vector<134x64xi1>, vector<134x64xf32>
    %cst_78 = arith.constant 0.000000e+00 : f32
    %123 = vector.broadcast %cst_78 : f32 to vector<132x32xf32>
    %124 = vector.extract_strided_slice %122 {offsets = [0, 0], sizes = [132, 64], strides = [1, 1]} : vector<134x64xf32> to vector<132x64xf32>
    %c0_79 = arith.constant 0 : index
    %c0_80 = arith.constant 0 : index
    %c0_81 = arith.constant 0 : index
    %125 = vector.load %arg5[%c0_79, %c0_80, %c0_81] : memref<3x64x32xf32, #tpu.memory_space<vmem>>, vector<1x64x32xf32>
    %126 = vector.shape_cast %125 : vector<1x64x32xf32> to vector<64x32xf32>
    %cst_82 = arith.constant dense<0.000000e+00> : vector<132x32xf32>
    %127 = tpu.matmul %124, %126, %cst_82 {dimension_numbers = #tpu.dot_dimension_numbers<[1], [0], [0], [1], [0, 0, 1, 1], [], []>} : vector<132x64xf32>, vector<64x32xf32>, vector<132x32xf32> -> vector<132x32xf32>
    %128 = arith.addf %123, %127 : vector<132x32xf32>
    %129 = vector.extract_strided_slice %122 {offsets = [1, 0], sizes = [132, 64], strides = [1, 1]} : vector<134x64xf32> to vector<132x64xf32>
    %c1_83 = arith.constant 1 : index
    %c0_84 = arith.constant 0 : index
    %c0_85 = arith.constant 0 : index
    %130 = vector.load %arg5[%c1_83, %c0_84, %c0_85] : memref<3x64x32xf32, #tpu.memory_space<vmem>>, vector<1x64x32xf32>
    %131 = vector.shape_cast %130 : vector<1x64x32xf32> to vector<64x32xf32>
    %cst_86 = arith.constant dense<0.000000e+00> : vector<132x32xf32>
    %132 = tpu.matmul %129, %131, %cst_86 {dimension_numbers = #tpu.dot_dimension_numbers<[1], [0], [0], [1], [0, 0, 1, 1], [], []>} : vector<132x64xf32>, vector<64x32xf32>, vector<132x32xf32> -> vector<132x32xf32>
    %133 = arith.addf %128, %132 : vector<132x32xf32>
    %134 = vector.extract_strided_slice %122 {offsets = [2, 0], sizes = [132, 64], strides = [1, 1]} : vector<134x64xf32> to vector<132x64xf32>
    %c2_87 = arith.constant 2 : index
    %c0_88 = arith.constant 0 : index
    %c0_89 = arith.constant 0 : index
    %135 = vector.load %arg5[%c2_87, %c0_88, %c0_89] : memref<3x64x32xf32, #tpu.memory_space<vmem>>, vector<1x64x32xf32>
    %136 = vector.shape_cast %135 : vector<1x64x32xf32> to vector<64x32xf32>
    %cst_90 = arith.constant dense<0.000000e+00> : vector<132x32xf32>
    %137 = tpu.matmul %134, %136, %cst_90 {dimension_numbers = #tpu.dot_dimension_numbers<[1], [0], [0], [1], [0, 0, 1, 1], [], []>} : vector<132x64xf32>, vector<64x32xf32>, vector<132x32xf32> -> vector<132x32xf32>
    %138 = arith.addf %133, %137 : vector<132x32xf32>
    %c0_91 = arith.constant 0 : index
    %c0_92 = arith.constant 0 : index
    %139 = vector.load %arg6[%c0_91, %c0_92] : memref<1x32xf32, #tpu.memory_space<vmem>>, vector<1x32xf32>
    %140 = vector.broadcast %139 : vector<1x32xf32> to vector<132x32xf32>
    %141 = arith.addf %138, %140 : vector<132x32xf32>
    %c2_93 = arith.constant 2 : index
    %142 = memref.load %arg1[%c2_93] : memref<7xf32, #tpu.memory_space<smem>>
    %cst_94 = arith.constant 0.000000e+00 : f32
    %143 = vector.broadcast %cst_94 : f32 to vector<132x32xf32>
    %144 = arith.cmpf ogt, %141, %143 : vector<132x32xf32>
    %145 = vector.broadcast %142 : f32 to vector<132x32xf32>
    %146 = arith.mulf %145, %141 : vector<132x32xf32>
    %147 = arith.select %144, %141, %146 : vector<132x32xi1>, vector<132x32xf32>
    %c0_95 = arith.constant 0 : index
    %c0_96 = arith.constant 0 : index
    %148 = vector.load %arg11[%c0_95, %c0_96] : memref<268x64xf32, #tpu.memory_space<vmem>>, vector<132x32xf32>
    tpu.vector_store %arg11[%c0_95, %c0_96], %147 {strides = array<i32>} : memref<268x64xf32, #tpu.memory_space<vmem>>, vector<132x32xf32>,
    %c0_97 = arith.constant 0 : index
    %c0_98 = arith.constant 0 : index
    %149 = tpu.strided_load %arg11[%c0_97, %c0_98] {strides = array<i32: 2, 1>} : memref<268x64xf32, #tpu.memory_space<vmem>>, vector<66x32xf32>
    %c1_99 = arith.constant 1 : index
    %c0_100 = arith.constant 0 : index
    %150 = tpu.strided_load %arg11[%c1_99, %c0_100] {strides = array<i32: 2, 1>} : memref<268x64xf32, #tpu.memory_space<vmem>>, vector<66x32xf32>
    %151 = arith.maximumf %149, %150 : vector<66x32xf32>
    %c3_101 = arith.constant 3 : index
    %152 = memref.load %arg1[%c3_101] : memref<7xf32, #tpu.memory_space<smem>>
    %cst_102 = arith.constant 0.000000e+00 : f32
    %153 = vector.broadcast %cst_102 : f32 to vector<66x32xf32>
    %154 = arith.cmpf ogt, %151, %153 : vector<66x32xf32>
    %155 = vector.broadcast %152 : f32 to vector<66x32xf32>
    %156 = arith.mulf %155, %151 : vector<66x32xf32>
    %157 = arith.select %154, %151, %156 : vector<66x32xi1>, vector<66x32xf32>
    %cst_103 = arith.constant 0.000000e+00 : f32
    %158 = vector.broadcast %cst_103 : f32 to vector<64x16xf32>
    %159 = vector.extract_strided_slice %157 {offsets = [0, 0], sizes = [64, 32], strides = [1, 1]} : vector<66x32xf32> to vector<64x32xf32>
    %c0_104 = arith.constant 0 : index
    %c0_105 = arith.constant 0 : index
    %c0_106 = arith.constant 0 : index
    %160 = vector.load %arg7[%c0_104, %c0_105, %c0_106] : memref<3x32x16xf32, #tpu.memory_space<vmem>>, vector<1x32x16xf32>
    %161 = vector.shape_cast %160 : vector<1x32x16xf32> to vector<32x16xf32>
    %cst_107 = arith.constant dense<0.000000e+00> : vector<64x16xf32>
    %162 = tpu.matmul %159, %161, %cst_107 {dimension_numbers = #tpu.dot_dimension_numbers<[1], [0], [0], [1], [0, 0, 1, 1], [], []>} : vector<64x32xf32>, vector<32x16xf32>, vector<64x16xf32> -> vector<64x16xf32>
    %163 = arith.addf %158, %162 : vector<64x16xf32>
    %164 = vector.extract_strided_slice %157 {offsets = [1, 0], sizes = [64, 32], strides = [1, 1]} : vector<66x32xf32> to vector<64x32xf32>
    %c1_108 = arith.constant 1 : index
    %c0_109 = arith.constant 0 : index
    %c0_110 = arith.constant 0 : index
    %165 = vector.load %arg7[%c1_108, %c0_109, %c0_110] : memref<3x32x16xf32, #tpu.memory_space<vmem>>, vector<1x32x16xf32>
    %166 = vector.shape_cast %165 : vector<1x32x16xf32> to vector<32x16xf32>
    %cst_111 = arith.constant dense<0.000000e+00> : vector<64x16xf32>
    %167 = tpu.matmul %164, %166, %cst_111 {dimension_numbers = #tpu.dot_dimension_numbers<[1], [0], [0], [1], [0, 0, 1, 1], [], []>} : vector<64x32xf32>, vector<32x16xf32>, vector<64x16xf32> -> vector<64x16xf32>
    %168 = arith.addf %163, %167 : vector<64x16xf32>
    %169 = vector.extract_strided_slice %157 {offsets = [2, 0], sizes = [64, 32], strides = [1, 1]} : vector<66x32xf32> to vector<64x32xf32>
    %c2_112 = arith.constant 2 : index
    %c0_113 = arith.constant 0 : index
    %c0_114 = arith.constant 0 : index
    %170 = vector.load %arg7[%c2_112, %c0_113, %c0_114] : memref<3x32x16xf32, #tpu.memory_space<vmem>>, vector<1x32x16xf32>
    %171 = vector.shape_cast %170 : vector<1x32x16xf32> to vector<32x16xf32>
    %cst_115 = arith.constant dense<0.000000e+00> : vector<64x16xf32>
    %172 = tpu.matmul %169, %171, %cst_115 {dimension_numbers = #tpu.dot_dimension_numbers<[1], [0], [0], [1], [0, 0, 1, 1], [], []>} : vector<64x32xf32>, vector<32x16xf32>, vector<64x16xf32> -> vector<64x16xf32>
    %173 = arith.addf %168, %172 : vector<64x16xf32>
    %c0_116 = arith.constant 0 : index
    %c0_117 = arith.constant 0 : index
    %174 = vector.load %arg8[%c0_116, %c0_117] : memref<1x16xf32, #tpu.memory_space<vmem>>, vector<1x16xf32>
    %175 = vector.broadcast %174 : vector<1x16xf32> to vector<64x16xf32>
    %176 = arith.addf %173, %175 : vector<64x16xf32>
    %c4_118 = arith.constant 4 : index
    %177 = memref.load %arg1[%c4_118] : memref<7xf32, #tpu.memory_space<smem>>
    %cst_119 = arith.constant 0.000000e+00 : f32
    %178 = vector.broadcast %cst_119 : f32 to vector<64x16xf32>
    %179 = arith.cmpf ogt, %176, %178 : vector<64x16xf32>
    %180 = vector.broadcast %177 : f32 to vector<64x16xf32>
    %181 = arith.mulf %180, %176 : vector<64x16xf32>
    %182 = arith.select %179, %176, %181 : vector<64x16xi1>, vector<64x16xf32>
    %c0_120 = arith.constant 0 : index
    %c0_121 = arith.constant 0 : index
    %183 = vector.load %arg11[%c0_120, %c0_121] : memref<268x64xf32, #tpu.memory_space<vmem>>, vector<64x16xf32>
    tpu.vector_store %arg11[%c0_120, %c0_121], %182 {strides = array<i32>} : memref<268x64xf32, #tpu.memory_space<vmem>>, vector<64x16xf32>,
    %c0_122 = arith.constant 0 : index
    %c0_123 = arith.constant 0 : index
    %184 = tpu.strided_load %arg11[%c0_122, %c0_123] {strides = array<i32: 2, 1>} : memref<268x64xf32, #tpu.memory_space<vmem>>, vector<32x16xf32>
    %c1_124 = arith.constant 1 : index
    %c0_125 = arith.constant 0 : index
    %185 = tpu.strided_load %arg11[%c1_124, %c0_125] {strides = array<i32: 2, 1>} : memref<268x64xf32, #tpu.memory_space<vmem>>, vector<32x16xf32>
    %186 = arith.maximumf %184, %185 : vector<32x16xf32>
    %c5_126 = arith.constant 5 : index
    %187 = memref.load %arg1[%c5_126] : memref<7xf32, #tpu.memory_space<smem>>
    %cst_127 = arith.constant 0.000000e+00 : f32
    %188 = vector.broadcast %cst_127 : f32 to vector<32x16xf32>
    %189 = arith.cmpf ogt, %186, %188 : vector<32x16xf32>
    %190 = vector.broadcast %187 : f32 to vector<32x16xf32>
    %191 = arith.mulf %190, %186 : vector<32x16xf32>
    %192 = arith.select %189, %186, %191 : vector<32x16xi1>, vector<32x16xf32>
    %c16_i32_128 = arith.constant 16 : i32
    %193 = arith.muli %c1_i32, %c16_i32_128 : i32
    %194 = tpu.assume_multiple %193, 16 : i32
    %195 = tpu.transpose %192, [1, 0] : vector<32x16xf32> -> vector<16x32xf32>
    %196 = arith.index_cast %194 : i32 to index
    %c0_129 = arith.constant 0 : index
    %197 = vector.load %arg12[%196, %c0_129] : memref<32x32xf32, #tpu.memory_space<vmem>>, vector<16x32xf32>
    tpu.vector_store %arg12[%196, %c0_129], %195 {strides = array<i32>} : memref<32x32xf32, #tpu.memory_space<vmem>>, vector<16x32xf32>,
    %c2_i32 = arith.constant 2 : i32
    %c0_130 = arith.constant 0 : index
    %c0_131 = arith.constant 0 : index
    %198 = vector.load %arg12[%c0_130, %c0_131] : memref<32x32xf32, #tpu.memory_space<vmem>>, vector<32x32xf32>
    %c6 = arith.constant 6 : index
    %199 = memref.load %arg1[%c6] : memref<7xf32, #tpu.memory_space<smem>>
    %c0_132 = arith.constant 0 : index
    %c0_133 = arith.constant 0 : index
    %200 = vector.load %arg9[%c0_132, %c0_133] : memref<32x8192xf32, #tpu.memory_space<vmem>>, vector<32x2048xf32>
    %cst_134 = arith.constant dense<0.000000e+00> : vector<32x2048xf32>
    %201 = tpu.matmul %198, %200, %cst_134 {dimension_numbers = #tpu.dot_dimension_numbers<[1], [0], [0], [1], [0, 0, 1, 1], [], []>} : vector<32x32xf32>, vector<32x2048xf32>, vector<32x2048xf32> -> vector<32x2048xf32>
    %cst_135 = arith.constant 0.000000e+00 : f32
    %202 = vector.broadcast %cst_135 : f32 to vector<32x2048xf32>
    %203 = arith.cmpf ogt, %201, %202 : vector<32x2048xf32>
    %204 = vector.broadcast %199 : f32 to vector<32x2048xf32>
    %205 = arith.mulf %204, %201 : vector<32x2048xf32>
    %206 = arith.select %203, %201, %205 : vector<32x2048xi1>, vector<32x2048xf32>
    %c0_136 = arith.constant 0 : index
    %c0_137 = arith.constant 0 : index
    %207 = vector.load %arg10[%c0_136, %c0_137] : memref<32x8192xf32, #tpu.memory_space<vmem>>, vector<32x2048xf32>
    tpu.vector_store %arg10[%c0_136, %c0_137], %206 {strides = array<i32>} : memref<32x8192xf32, #tpu.memory_space<vmem>>, vector<32x2048xf32>,
    %c0_138 = arith.constant 0 : index
    %c2048 = arith.constant 2048 : index
    %208 = vector.load %arg9[%c0_138, %c2048] : memref<32x8192xf32, #tpu.memory_space<vmem>>, vector<32x2048xf32>
    %cst_139 = arith.constant dense<0.000000e+00> : vector<32x2048xf32>
    %209 = tpu.matmul %198, %208, %cst_139 {dimension_numbers = #tpu.dot_dimension_numbers<[1], [0], [0], [1], [0, 0, 1, 1], [], []>} : vector<32x32xf32>, vector<32x2048xf32>, vector<32x2048xf32> -> vector<32x2048xf32>
    %cst_140 = arith.constant 0.000000e+00 : f32
    %210 = vector.broadcast %cst_140 : f32 to vector<32x2048xf32>
    %211 = arith.cmpf ogt, %209, %210 : vector<32x2048xf32>
    %212 = vector.broadcast %199 : f32 to vector<32x2048xf32>
    %213 = arith.mulf %212, %209 : vector<32x2048xf32>
    %214 = arith.select %211, %209, %213 : vector<32x2048xi1>, vector<32x2048xf32>
    %c0_141 = arith.constant 0 : index
    %c2048_142 = arith.constant 2048 : index
    %215 = vector.load %arg10[%c0_141, %c2048_142] : memref<32x8192xf32, #tpu.memory_space<vmem>>, vector<32x2048xf32>
    tpu.vector_store %arg10[%c0_141, %c2048_142], %214 {strides = array<i32>} : memref<32x8192xf32, #tpu.memory_space<vmem>>, vector<32x2048xf32>,
    %c0_143 = arith.constant 0 : index
    %c4096 = arith.constant 4096 : index
    %216 = vector.load %arg9[%c0_143, %c4096] : memref<32x8192xf32, #tpu.memory_space<vmem>>, vector<32x2048xf32>
    %cst_144 = arith.constant dense<0.000000e+00> : vector<32x2048xf32>
    %217 = tpu.matmul %198, %216, %cst_144 {dimension_numbers = #tpu.dot_dimension_numbers<[1], [0], [0], [1], [0, 0, 1, 1], [], []>} : vector<32x32xf32>, vector<32x2048xf32>, vector<32x2048xf32> -> vector<32x2048xf32>
    %cst_145 = arith.constant 0.000000e+00 : f32
    %218 = vector.broadcast %cst_145 : f32 to vector<32x2048xf32>
    %219 = arith.cmpf ogt, %217, %218 : vector<32x2048xf32>
    %220 = vector.broadcast %199 : f32 to vector<32x2048xf32>
    %221 = arith.mulf %220, %217 : vector<32x2048xf32>
    %222 = arith.select %219, %217, %221 : vector<32x2048xi1>, vector<32x2048xf32>
    %c0_146 = arith.constant 0 : index
    %c4096_147 = arith.constant 4096 : index
    %223 = vector.load %arg10[%c0_146, %c4096_147] : memref<32x8192xf32, #tpu.memory_space<vmem>>, vector<32x2048xf32>
    tpu.vector_store %arg10[%c0_146, %c4096_147], %222 {strides = array<i32>} : memref<32x8192xf32, #tpu.memory_space<vmem>>, vector<32x2048xf32>,
    %c0_148 = arith.constant 0 : index
    %c6144 = arith.constant 6144 : index
    %224 = vector.load %arg9[%c0_148, %c6144] : memref<32x8192xf32, #tpu.memory_space<vmem>>, vector<32x2048xf32>
    %cst_149 = arith.constant dense<0.000000e+00> : vector<32x2048xf32>
    %225 = tpu.matmul %198, %224, %cst_149 {dimension_numbers = #tpu.dot_dimension_numbers<[1], [0], [0], [1], [0, 0, 1, 1], [], []>} : vector<32x32xf32>, vector<32x2048xf32>, vector<32x2048xf32> -> vector<32x2048xf32>
    %cst_150 = arith.constant 0.000000e+00 : f32
    %226 = vector.broadcast %cst_150 : f32 to vector<32x2048xf32>
    %227 = arith.cmpf ogt, %225, %226 : vector<32x2048xf32>
    %228 = vector.broadcast %199 : f32 to vector<32x2048xf32>
    %229 = arith.mulf %228, %225 : vector<32x2048xf32>
    %230 = arith.select %227, %225, %229 : vector<32x2048xi1>, vector<32x2048xf32>
    %c0_151 = arith.constant 0 : index
    %c6144_152 = arith.constant 6144 : index
    %231 = vector.load %arg10[%c0_151, %c6144_152] : memref<32x8192xf32, #tpu.memory_space<vmem>>, vector<32x2048xf32>
    tpu.vector_store %arg10[%c0_151, %c6144_152], %230 {strides = array<i32>} : memref<32x8192xf32, #tpu.memory_space<vmem>>, vector<32x2048xf32>,
    return
  }
  func.func @transform_0(%arg0: i32) -> i32 {
    %c0_i32 = arith.constant 0 : i32
    %c0_i32_0 = arith.constant 0 : i32
    return %c0_i32 : i32
  }
  func.func @transform_1(%arg0: i32) -> (i32, i32, i32) {
    %c0_i32 = arith.constant 0 : i32
    %c0_i32_0 = arith.constant 0 : i32
    %c0_i32_1 = arith.constant 0 : i32
    return %arg0, %c0_i32, %c0_i32_0 : i32, i32, i32
  }
  func.func @transform_2(%arg0: i32) -> (i32, i32) {
    %c0_i32 = arith.constant 0 : i32
    %c0_i32_0 = arith.constant 0 : i32
    %c0_i32_1 = arith.constant 0 : i32
    return %c0_i32, %c0_i32_0 : i32, i32
  }
  func.func @transform_3(%arg0: i32) -> (i32, i32) {
    %c0_i32 = arith.constant 0 : i32
    %c0_i32_0 = arith.constant 0 : i32
    %c0_i32_1 = arith.constant 0 : i32
    return %c0_i32, %c0_i32_0 : i32, i32
  }
  func.func @transform_4(%arg0: i32) -> (i32, i32, i32) {
    %c0_i32 = arith.constant 0 : i32
    %c0_i32_0 = arith.constant 0 : i32
    %c0_i32_1 = arith.constant 0 : i32
    %c0_i32_2 = arith.constant 0 : i32
    return %c0_i32, %c0_i32_0, %c0_i32_1 : i32, i32, i32
  }
  func.func @transform_5(%arg0: i32) -> (i32, i32) {
    %c0_i32 = arith.constant 0 : i32
    %c0_i32_0 = arith.constant 0 : i32
    %c0_i32_1 = arith.constant 0 : i32
    return %c0_i32, %c0_i32_0 : i32, i32
  }
  func.func @transform_6(%arg0: i32) -> (i32, i32, i32) {
    %c0_i32 = arith.constant 0 : i32
    %c0_i32_0 = arith.constant 0 : i32
    %c0_i32_1 = arith.constant 0 : i32
    %c0_i32_2 = arith.constant 0 : i32
    return %c0_i32, %c0_i32_0, %c0_i32_1 : i32, i32, i32
  }
  func.func @transform_7(%arg0: i32) -> (i32, i32) {
    %c0_i32 = arith.constant 0 : i32
    %c0_i32_0 = arith.constant 0 : i32
    %c0_i32_1 = arith.constant 0 : i32
    return %c0_i32, %c0_i32_0 : i32, i32
  }
  func.func @transform_8(%arg0: i32) -> (i32, i32) {
    %c0_i32 = arith.constant 0 : i32
    %c0_i32_0 = arith.constant 0 : i32
    %c0_i32_1 = arith.constant 0 : i32
    return %c0_i32, %c0_i32_0 : i32, i32
  }
  func.func @transform_9(%arg0: i32) -> (i32, i32) {
    %c0_i32 = arith.constant 0 : i32
    %c0_i32_0 = arith.constant 0 : i32
    return %arg0, %c0_i32 : i32, i32
  }
}

</mosaic_0001>

<bundles_post_ra>
// kernel: tpu_custom_call.1
= control target key start
LH: loop header
LB: loop body
LE: loop exit
PB: predicated region body
PF: predicated region fallthrough
CT: control target
= control target key end

     0   :  { %14 = vsyncpa [#allocation7], 0  ;;  %s12629_s0 = inlined_call_operand.vmem [shape: f32[7], index: 0, kind: input, shape index: {}]   ;;  %s12630_s1 = inlined_call_operand.vmem [shape: f32[2,268,3], index: 1, kind: input, shape index: {}]   ;;  %s12631_s2 = inlined_call_operand.vmem [shape: f32[3,64], index: 2, kind: input, shape index: {}]   ;;  %s12632_s3 = inlined_call_operand.vmem [shape: f32[1,64], index: 3, kind: input, shape index: {}]   ;;  %s12633_s4 = inlined_call_operand.vmem [shape: f32[3,64,32], index: 4, kind: input, shape index: {}]   ;;  %s12634_s5 = inlined_call_operand.vmem [shape: f32[1,32], index: 5, kind: input, shape index: {}]   ;;  %s12635_s6 = inlined_call_operand.vmem [shape: f32[3,32,16], index: 6, kind: input, shape index: {}]   ;;  %s12636_s7 = inlined_call_operand.vmem [shape: f32[1,16], index: 7, kind: input, shape index: {}]   ;;  %s12637_s8 = inlined_call_operand.hbm [shape: f32[32,8192], index: 8, kind: input, shape index: {}]   ;;  %s12638_s9 = inlined_call_operand.hbm [shape: f32[32,8192], index: 9, kind: output, shape index: {}]  }
   0x1   :  { %15 = vsyncpa [#allocation5], 0 }
   0x2   :  { %16 = vsyncpa [#allocation6], 0  ;;  %s23_s11 = sshll.u32 %s12629_s0, 4  ;;  %s24_s11 = int_to_ptr.vmem [resolvable:$true] %s23_s11 }
   0x3   :  { %s10033_s12 = scalar_lea.vmem %s24_s11, 16  ;;  %p10038_p1 = scmp.lt.s32.totalorder %s24_s11, %s24_s11 }
   0x4   :  { %p10034_p0 = scmp.ne.s32.totalorder %s24_s11, %s10033_s12  ;;  %p10039_p2 = scmp.lt.s32.totalorder %s10033_s12, %s10033_s12 }
   0x6   :  { %p10040_p3 = por %p10039_p2, %p10038_p1 }
   0x8   :  { %p10041_p4 = pnand %p10040_p3, %p10034_p0 }
   0xa   :  { %10044 = shalt.err (!%p10041_p4)
}
   0xb   :  { %s10095_s13 = smov [#allocation4]   ;;  %s10096_s14 = smov [#allocation8]  }
   0xc   :  { %26 = dma.vmem_to_smem %s24_s11, 16, %s10095_s13, [#allocation7]  }
   0xd   :  { %s46_s15 = sshll.u32 %s10096_s14, 4  ;;  %s10045_s18 = scalar_lea.hbm %s12637_s8, 32768  ;;  %s47_s15 = int_to_ptr.vmem [resolvable:$true] %s46_s15 }
   0xe   :  { %p10046_p5 = scmp.ne.s32.totalorder %s12637_s8, %s10045_s18  ;;  %p10049_p6 = scmp.lt.u32.totalorder %s10045_s18, %s12637_s8 }
  0x10   :  { %p10051_p7 = pnand %p10049_p6, %p10046_p5 }
  0x12   :  { %10054 = shalt.err (!%p10051_p7)
}
  0x13   :  { %s10055_s22 = scalar_lea.vmem %s47_s15, 32768  ;;  %p10060_p9 = scmp.lt.s32.totalorder %s47_s15, %s47_s15 }
  0x14   :  { %p10056_p8 = scmp.ne.s32.totalorder %s47_s15, %s10055_s22  ;;  %p10061_p10 = scmp.lt.s32.totalorder %s10055_s22, %s10055_s22 }
  0x16   :  { %p10062_p11 = por %p10061_p10, %p10060_p9 }
  0x18   :  { %p10063_p12 = pnand %p10062_p11, %p10056_p8 }
  0x1a   :  { %10066 = shalt.err (!%p10063_p12)
}
  0x1b   :  { %s10097_s23 = smov 8192   ;;  %s10098_s24 = smov 512  }
  0x1c   :  { %52 = dma.hbm_to_vmem [thread:$0]  %s12637_s8, 32768, %s47_s15, [#allocation5], %s10097_s23, %s10097_s23, %s10098_s24  }
  0x1d   :  { %10089 = dma.done.wait [#allocation7], 16  }
  0x1e   :  { %10090 = vsyncadd [#allocation7], 4294967280 }
  0x1f   :  { %10091 = dma.done.wait [#allocation5], 32768  }
  0x20   :  { %10092 = vsyncadd [#allocation5], 4294934528 }
  0x21   :  { %59 = sfence }
  0x22   :  { %v94_v0 = vld [vmem:[%s12631_s2] sm:$0x7]  ;;  %vm205_vm0 = vcmask 1042432   ;;  %vm102_vm1 = vcmask 23552   ;;  %v61_v2 = vld [vmem:[%s12630_s1 + $0x8] sm:$0xff]  ;;  %v62_v3 = vld [vmem:[%s12630_s1 + $0x10] sm:$0xff] }
  0x23   :  { %v60_v1 = vld [vmem:[%s12630_s1] sm:$0xff]  ;;  %8981 = vmatprep.subr.msk.mxu0 %vm205_vm0, %v94_v0  ;;  %v63_v4 = vld [vmem:[%s12630_s1 + $0x18] sm:$0xff]  ;;  %v65_v6 = vld [vmem:[%s12630_s1 + $0x28] sm:$0xff]  ;;  %v10099_v38 = vmov 0.0|0.0   ;;  %vm10100_vm2 = vmmov 0   ;;  %v10101_v57 = vmov 0.0  }
  0x24   :  { %8983 = vmatprep.mubr.msk.f32.mxu0 %vm102_vm1, %v60_v1  ;;  %8982 = vmatpush3.msk.msra.mxu0 %vm205_vm0, %v94_v0  ;;  %v64_v5 = vld [vmem:[%s12630_s1 + $0x20] sm:$0xff]  ;;  %v66_v7 = vld [vmem:[%s12630_s1 + $0x30] sm:$0xff]  ;;  %v67_v8 = vld [vmem:[%s12630_s1 + $0x38] sm:$0xff]  ;;  %s444_s22 = sld [smem:[#allocation4]]  ;;  %vm548_vm4 = vcmask 523264   ;;  %s8278_s27 = sld [smem:[#allocation4 + $0x1]] }
  0x25   :  { %8984 = vmatmul.mubr.msk.f32.vlgmr.msra.gmra.mrb[0].mxu0 %vm102_vm1, %v61_v2  ;;  %v68_v9 = vld [vmem:[%s12630_s1 + $0x40] sm:$0xff]  ;;  %v69_v10 = vld [vmem:[%s12630_s1 + $0x48] sm:$0xff]  ;;  %v70_v11 = vld [vmem:[%s12630_s1 + $0x50] sm:$0xff]  ;;  %9621 = vmatprep.subr.bf16.mxu0 %v10099_v38  ;;  %vm755_vm12 = vcmask 1046528   ;;  %vm1166_vm13 = vcmask 1045504   ;;  %s8347_s14 = sld [smem:[#allocation4 + $0x2]] }
  0x26   :  { %8986 = vmatprep.mubr.msk.f32.mxu0 %vm102_vm1, %v62_v3  ;;  %v71_v12 = vld [vmem:[%s12630_s1 + $0x58] sm:$0xff]  ;;  %v72_v13 = vld [vmem:[%s12630_s1 + $0x60] sm:$0xff]  ;;  %v73_v14 = vld [vmem:[%s12630_s1 + $0x68] sm:$0xff]  ;;  %9609 = vmatprep.subr.bf16.mxu1 %v10099_v38  ;;  %s8348_s15 = sld [smem:[#allocation4 + $0x3]]  ;;  %s2474_s11 = sld [smem:[#allocation4]] }
  0x27   :  { %v74_v15 = vld [vmem:[%s12630_s1 + $0x70] sm:$0xff]  ;;  %v75_v16 = vld [vmem:[%s12630_s1 + $0x78] sm:$0xff]  ;;  %v76_v17 = vld [vmem:[%s12630_s1 + $0x80] sm:$0xff]  ;;  %9050 = vmatprep.mubr.msk.f32.mxu1 %vm10100_vm2, %v10101_v57  ;;  %s8382_s19 = sld [smem:[#allocation4 + $0x4]]  ;;  %s8383_s21 = sld [smem:[#allocation4 + $0x5]] }
  0x28   :  { %v77_v18 = vld [vmem:[%s12630_s1 + $0x88] sm:$0xff]  ;;  %v78_v19 = vld [vmem:[%s12630_s1 + $0x90] sm:$0xff]  ;;  %v79_v20 = vld [vmem:[%s12630_s1 + $0x98] sm:$0xff]  ;;  %s10102_s20 = smov [#allocation9]  }
  0x29   :  { %8987 = vmatmul.mubr.msk.f32.gmra.mrb[2].mxu0 %vm102_vm1, %v63_v4  ;;  %v80_v21 = vld [vmem:[%s12630_s1 + $0xa0] sm:$0xff]  ;;  %v81_v22 = vld [vmem:[%s12630_s1 + $0xa8] sm:$0xff]  ;;  %v82_v23 = vld [vmem:[%s12630_s1 + $0xb0] sm:$0xff]  ;;  %s8229_s0 = sshll.u32 %s10102_s20, 4  ;;  %s8230_s0 = int_to_ptr.vmem [resolvable:$true] %s8229_s0 }
  0x2a   :  { %8989 = vmatprep.mubr.msk.f32.mxu0 %vm102_vm1, %v64_v5  ;;  %v83_v24 = vld [vmem:[%s12630_s1 + $0xb8] sm:$0xff]  ;;  %v84_v25 = vld [vmem:[%s12630_s1 + $0xc0] sm:$0xff]  ;;  %v85_v26 = vld [vmem:[%s12630_s1 + $0xc8] sm:$0xff]  ;;  %v10378_v63 = vstv %s444_s22  ;;  %s8454_s22 = sld [smem:[#allocation4 + $0x1]]  ;;  %p10072_p0 = scmp.lt.s32.totalorder %s8230_s0, %s8230_s0 }
  0x2b   :  { %v86_v27 = vld [vmem:[%s12630_s1 + $0xd0] sm:$0xff]  ;;  %v87_v28 = vld [vmem:[%s12630_s1 + $0xd8] sm:$0xff]  ;;  %v88_v29 = vld [vmem:[%s12630_s1 + $0xe0] sm:$0xff] }
  0x2c   :  { %v89_v30 = vld [vmem:[%s12630_s1 + $0xe8] sm:$0xff]  ;;  %v90_v31 = vld [vmem:[%s12630_s1 + $0xf0] sm:$0xff]  ;;  %v91_v32 = vld [vmem:[%s12630_s1 + $0xf8] sm:$0xff] }
  0x2d   :  { %8990 = vmatmul.mubr.msk.f32.gmra.mrb[4].mxu0 %vm102_vm1, %v65_v6  ;;  %v92_v33 = vld [vmem:[%s12630_s1 + $0x100] sm:$0xff]  ;;  %v93_v34 = vld [vmem:[%s12630_s1 + $0x108] sm:$0xf]  ;;  %v723_v39 = vld [vmem:[%s12633_s4 + $0x10] sm:$0xff] }
  0x2e   :  { %8992 = vmatprep.mubr.msk.f32.mxu0 %vm102_vm1, %v66_v7  ;;  %v721_v35 = vld [vmem:[%s12633_s4] sm:$0xff]  ;;  %v722_v36 = vld [vmem:[%s12633_s4 + $0x8] sm:$0xff]  ;;  %v724_v40 = vld [vmem:[%s12633_s4 + $0x18] sm:$0xff] }
  0x2f   :  { %v9622_v37 = vpack.c.bf16 %v722_v36, %v721_v35  ;;  %v9625_v41 = vpack.c.bf16 %v724_v40, %v723_v39  ;;  %v8279_v42 = vld [vmem:[%s12633_s4 + $0x40] sm:$0xff]  ;;  %v8280_v43 = vld [vmem:[%s12633_s4 + $0x48] sm:$0xff]  ;;  %v8281_v48 = vld [vmem:[%s12633_s4 + $0x50] sm:$0xff] }
  0x30   :  { %v9610_v44 = vpack.c.bf16 %v8280_v43, %v8279_v42  ;;  %v725_v45 = vld [vmem:[%s12633_s4 + $0x20] sm:$0xff]  ;;  %v726_v46 = vld [vmem:[%s12633_s4 + $0x28] sm:$0xff]  ;;  %v8282_v49 = vld [vmem:[%s12633_s4 + $0x58] sm:$0xff] }
  0x31   :  { %8993 = vmatmul.mubr.msk.f32.gmra.mrb[6].mxu0 %vm102_vm1, %v67_v8  ;;  %v9628_v47 = vpack.c.bf16 %v726_v46, %v725_v45  ;;  %v9613_v50 = vpack.c.bf16 %v8282_v49, %v8281_v48  ;;  %v727_v51 = vld [vmem:[%s12633_s4 + $0x30] sm:$0xff]  ;;  %v728_v52 = vld [vmem:[%s12633_s4 + $0x38] sm:$0xff]  ;;  %v8283_v54 = vld [vmem:[%s12633_s4 + $0x60] sm:$0xff] }
  0x32   :  { %8995 = vmatprep.mubr.msk.f32.mxu0 %vm102_vm1, %v68_v9  ;;  %9623 = vmatpush3.bf16.msra.mxu0 %v9622_v37  ;;  %v9631_v53 = vpack.c.bf16 %v728_v52, %v727_v51  ;;  %v8284_v55 = vld [vmem:[%s12633_s4 + $0x68] sm:$0xff]  ;;  %v8285_v58 = vld [vmem:[%s12633_s4 + $0x70] sm:$0xff]  ;;  %v8286_v59 = vld [vmem:[%s12633_s4 + $0x78] sm:$0xff] }
  0x33   :  { %9624 = vmatprep.subr.bf16.mxu0 %v10099_v38  ;;  %9611 = vmatpush3.bf16.msra.mxu1 %v9610_v44  ;;  %v9616_v56 = vpack.c.bf16 %v8284_v55, %v8283_v54  ;;  %v9619_v60 = vpack.c.bf16 %v8286_v59, %v8285_v58  ;;  %v10376_v61 = vld [vmem:[%s12632_s3] ss:$0 sm:$0xff]  ;;  %v10421_v35 = vld [vmem:[%s12633_s4 + $0x98] sm:$0xff]  ;;  %v10434_v44 = vld [vmem:[%s12633_s4 + $0xa8] sm:$0xff] }
  0x34   :  { %9612 = vmatprep.subr.bf16.mxu1 %v10099_v38  ;;  %v10427_v39 = vld [vmem:[%s12633_s4 + $0xa0] sm:$0xff]  ;;  %v10439_v45 = vld [vmem:[%s12633_s4 + $0xb0] sm:$0xff]  ;;  %v10444_v46 = vld [vmem:[%s12633_s4 + $0xb8] sm:$0xff] }
  0x35   :  { %8996 = vmatmul.mubr.msk.f32.gmra.mrb[8].mxu0 %vm102_vm1, %v69_v10  ;;  %v9640_v59 = vpack.c.bf16 %v10434_v44, %v10427_v39 }
  0x36   :  { %8998 = vmatprep.mubr.msk.f32.mxu0 %vm102_vm1, %v70_v11  ;;  %9626 = vmatpush3.bf16.msra.mxu0 %v9625_v41 }
  0x37   :  { %9627 = vmatprep.subr.bf16.mxu0 %v10099_v38  ;;  %9614 = vmatpush3.bf16.msra.mxu1 %v9613_v50 }
  0x38   :  { %9615 = vmatprep.subr.bf16.mxu1 %v10099_v38 }
  0x39   :  { %8999 = vmatmul.mubr.msk.f32.gmra.mrb[10].mxu0 %vm102_vm1, %v71_v12 }
  0x3a   :  { %9001 = vmatprep.mubr.msk.f32.mxu0 %vm102_vm1, %v72_v13  ;;  %9629 = vmatpush3.bf16.msra.mxu0 %v9628_v47 }
  0x3b   :  { %9630 = vmatprep.subr.bf16.mxu0 %v10099_v38  ;;  %9617 = vmatpush3.bf16.msra.mxu1 %v9616_v56 }
  0x3c   :  { %9618 = vmatprep.subr.bf16.mxu1 %v10099_v38 }
  0x3d   :  { %9002 = vmatmul.mubr.msk.f32.gmra.mrb[12].mxu0 %vm102_vm1, %v73_v14 }
  0x3e   :  { %9004 = vmatprep.mubr.msk.f32.mxu0 %vm102_vm1, %v74_v15  ;;  %9632 = vmatpush3.bf16.msra.mxu0 %v9631_v53 }
  0x3f   :  { %9620 = vmatpush3.bf16.msra.mxu1 %v9619_v60  ;;  %v9643_v60 = vpack.c.bf16 %v10444_v46, %v10439_v45 }
  0x40   :  { %9633 = vmatprep.subr.bf16.mxu1 %v10099_v38 }
  0x41   :  { %9005 = vmatmul.mubr.msk.f32.gmra.mrb[14].mxu0 %vm102_vm1, %v75_v16 }
  0x42   :  { %9007 = vmatprep.mubr.msk.f32.mxu0 %vm102_vm1, %v76_v17 }
  0x45   :  { %9008 = vmatmul.mubr.msk.f32.gmra.mrb[16].mxu0 %vm102_vm1, %v77_v18 }
  0x46   :  { %9010 = vmatprep.mubr.msk.f32.mxu0 %vm102_vm1, %v78_v19 }
  0x49   :  { %9011 = vmatmul.mubr.msk.f32.gmra.mrb[18].mxu0 %vm102_vm1, %v79_v20 }
  0x4a   :  { %9013 = vmatprep.mubr.msk.f32.mxu0 %vm102_vm1, %v80_v21 }
  0x4d   :  { %9014 = vmatmul.mubr.msk.f32.gmra.mrb[20].mxu0 %vm102_vm1, %v81_v22 }
  0x4e   :  { %9016 = vmatprep.mubr.msk.f32.mxu0 %vm102_vm1, %v82_v23 }
  0x51   :  { %9017 = vmatmul.mubr.msk.f32.gmra.mrb[22].mxu0 %vm102_vm1, %v83_v24 }
  0x52   :  { %9019 = vmatprep.mubr.msk.f32.mxu0 %vm102_vm1, %v84_v25 }
  0x55   :  { %9020 = vmatmul.mubr.msk.f32.gmra.mrb[24].mxu0 %vm102_vm1, %v85_v26 }
  0x56   :  { %9022 = vmatprep.mubr.msk.f32.mxu0 %vm102_vm1, %v86_v27 }
  0x59   :  { %9023 = vmatmul.mubr.msk.f32.gmra.mrb[26].mxu0 %vm102_vm1, %v87_v28 }
  0x5a   :  { %9025 = vmatprep.mubr.msk.f32.mxu0 %vm102_vm1, %v88_v29  ;;  %v10399_v29 = vstv %s8278_s27  ;;  %s8523_s27 = sld [smem:[#allocation4 + $0x2]] }
  0x5d   :  { %9026 = vmatmul.mubr.msk.f32.gmra.mrb[28].mxu0 %vm102_vm1, %v89_v30  ;;  %v10404_v30 = vld [vmem:[%s12633_s4 + $0x80] sm:$0xff] }
  0x5e   :  { %9028 = vmatprep.mubr.msk.f32.mxu0 %vm102_vm1, %v90_v31 }
  0x61   :  { %9029 = vmatmul.mubr.msk.f32.gmra.mrb[30].mxu0 %vm102_vm1, %v91_v32 }
  0x62   :  { %9031 = vmatprep.mubr.msk.f32.mxu0 %vm102_vm1, %v92_v33  ;;  %v10411_v33 = vld [vmem:[%s12633_s4 + $0x88] sm:$0xff] }
  0x63   :  { %v9634_v51 = vpack.c.bf16 %v10411_v33, %v10404_v30 }
  0x65   :  { %9032 = vmatmul.mubr.msk.f32.gmra.mrb[32].mxu0 %vm102_vm1, %v93_v34  ;;  %v10416_v34 = vld [vmem:[%s12633_s4 + $0x90] sm:$0xff] }
  0x66   :  { %9117 = vmatprep.mubr.msk.f32.mxu0 %vm10100_vm2, %v10101_v57  ;;  %v9637_v52 = vpack.c.bf16 %v10421_v35, %v10416_v34 }
  0xf8   :  { %v8985_v62 = vpop.f32.mrb[0].mxu0 }
  0xf9   :  { %v281_v0 = vadd.f32 %v8985_v62, %v10376_v61  ;;  %v275_v1 = vpop.f32.mrb[1].mxu0 }
  0xfa   :  { %v276_v2 = vadd.f32 %v10376_v61, %v275_v1 }
  0xfb   :  { %vm446_vm3 = vcmp.gt.f32.partialorder %v281_v0, 0.0  ;;  %v481_v3 = vmul.f32 %v10378_v63, %v281_v0 }
  0xfc   :  { %vm445_vm5 = vcmp.gt.f32.partialorder %v276_v2, 0.0  ;;  %v480_v4 = vmul.f32 %v10378_v63, %v276_v2  ;;  %v8988_v5 = vpop.f32.mrb[2].mxu0 }
  0xfd   :  { %v515_v6 = vsel %vm446_vm3, %v281_v0, %v481_v3  ;;  %v291_v7 = vadd.f32 %v8988_v5, %v10376_v61  ;;  %v285_v8 = vpop.f32.mrb[3].mxu0 }
  0xfe   :  { %550 = vst.msk [vmem:[#allocation2 + $0x8] sm:$0xff] %vm548_vm4, %v515_v6  ;;  %v514_v9 = vsel %vm445_vm5, %v276_v2, %v480_v4  ;;  %v286_v10 = vadd.f32 %v10376_v61, %v285_v8 }
  0xff   :  { %549 = vst.msk [vmem:[#allocation2] sm:$0xff] %vm548_vm4, %v514_v9  ;;  %vm448_vm6 = vcmp.gt.f32.partialorder %v291_v7, 0.0  ;;  %v483_v11 = vmul.f32 %v10378_v63, %v291_v7 }
 0x100   :  { %vm447_vm7 = vcmp.gt.f32.partialorder %v286_v10, 0.0  ;;  %v482_v12 = vmul.f32 %v10378_v63, %v286_v10  ;;  %v8991_v13 = vpop.f32.mrb[4].mxu0 }
 0x101   :  { %v517_v14 = vsel %vm448_vm6, %v291_v7, %v483_v11  ;;  %v301_v15 = vadd.f32 %v8991_v13, %v10376_v61  ;;  %v295_v16 = vpop.f32.mrb[5].mxu0 }
 0x102   :  { %552 = vst.msk [vmem:[#allocation2 + $0x18] sm:$0xff] %vm548_vm4, %v517_v14  ;;  %v516_v17 = vsel %vm447_vm7, %v286_v10, %v482_v12  ;;  %v296_v18 = vadd.f32 %v10376_v61, %v295_v16 }
 0x103   :  { %551 = vst.msk [vmem:[#allocation2 + $0x10] sm:$0xff] %vm548_vm4, %v516_v17  ;;  %vm450_vm8 = vcmp.gt.f32.partialorder %v301_v15, 0.0  ;;  %v485_v19 = vmul.f32 %v10378_v63, %v301_v15 }
 0x104   :  { %vm449_vm9 = vcmp.gt.f32.partialorder %v296_v18, 0.0  ;;  %v484_v20 = vmul.f32 %v10378_v63, %v296_v18  ;;  %v8994_v21 = vpop.f32.mrb[6].mxu0 }
 0x105   :  { %v519_v22 = vsel %vm450_vm8, %v301_v15, %v485_v19  ;;  %v311_v23 = vadd.f32 %v8994_v21, %v10376_v61  ;;  %v305_v24 = vpop.f32.mrb[7].mxu0 }
 0x106   :  { %v584_v25 = vld [vmem:[#allocation2] ss:$2 sm:$0xff]  ;;  %v618_v26 = vld [vmem:[#allocation2 + $0x1] ss:$2 sm:$0xff]  ;;  %554 = vst.msk [vmem:[#allocation2 + $0x28] sm:$0xff] %vm548_vm4, %v519_v22  ;;  %v518_v27 = vsel %vm449_vm9, %v296_v18, %v484_v20  ;;  %v306_v28 = vadd.f32 %v10376_v61, %v305_v24 }
 0x107   :  { %553 = vst.msk [vmem:[#allocation2 + $0x20] sm:$0xff] %vm548_vm4, %v518_v27  ;;  %vm452_vm10 = vcmp.gt.f32.partialorder %v311_v23, 0.0  ;;  %v487_v31 = vmul.f32 %v10378_v63, %v311_v23  ;;  %v651_v32 = vmax.f32 %v584_v25, %v618_v26 }
 0x108   :  { %vm451_vm11 = vcmp.gt.f32.partialorder %v306_v28, 0.0  ;;  %v486_v36 = vmul.f32 %v10378_v63, %v306_v28  ;;  %v8997_v37 = vpop.f32.mrb[8].mxu0 }
 0x109   :  { %v521_v40 = vsel %vm452_vm10, %v311_v23, %v487_v31  ;;  %v321_v41 = vadd.f32 %v8997_v37, %v10376_v61  ;;  %v315_v42 = vpop.f32.mrb[9].mxu0  ;;  %vm669_vm14 = vcmp.gt.f32.partialorder %v651_v32, 0.0  ;;  %v687_v43 = vmul.f32 %v10399_v29, %v651_v32 }
 0x10a   :  { %556 = vst.msk [vmem:[#allocation2 + $0x38] sm:$0xff] %vm548_vm4, %v521_v40  ;;  %v520_v47 = vsel %vm451_vm11, %v306_v28, %v486_v36  ;;  %v316_v48 = vadd.f32 %v10376_v61, %v315_v42  ;;  %v586_v49 = vld [vmem:[#allocation2 + $0x10] ss:$2 sm:$0xff]  ;;  %v620_v50 = vld [vmem:[#allocation2 + $0x11] ss:$2 sm:$0xff] }
 0x10b   :  { %555 = vst.msk [vmem:[#allocation2 + $0x30] sm:$0xff] %vm548_vm4, %v520_v47  ;;  %vm454_vm15 = vcmp.gt.f32.partialorder %v321_v41, 0.0  ;;  %v489_v53 = vmul.f32 %v10378_v63, %v321_v41  ;;  %v704_v54 = vsel %vm669_vm14, %v651_v32, %v687_v43  ;;  %v652_v55 = vmax.f32 %v586_v49, %v620_v50 }
 0x10c   :  { %vm453_vm3 = vcmp.gt.f32.partialorder %v316_v48, 0.0  ;;  %v488_v56 = vmul.f32 %v10378_v63, %v316_v48  ;;  %v9000_v58 = vpop.f32.mrb[10].mxu0  ;;  %9118 = vmatmul.mubr.msk.f32.vlgmr.msra.gmra.mrb[34].mxu0 %vm548_vm4, %v704_v54  ;;  %v1167_v4 = vrot.slane %v704_v54, 2  ;;  %v756_v6 = vrot.slane %v704_v54, 1 }
 0x10d   :  { %v523_v62 = vsel %vm454_vm15, %v321_v41, %v489_v53  ;;  %v331_v0 = vadd.f32 %v9000_v58, %v10376_v61  ;;  %v325_v1 = vpop.f32.mrb[11].mxu0  ;;  %9120 = vmatprep.mubr.msk.f32.mxu0 %vm10100_vm2, %v10101_v57  ;;  %vm670_vm5 = vcmp.gt.f32.partialorder %v652_v55, 0.0  ;;  %v688_v2 = vmul.f32 %v10399_v29, %v652_v55 }
 0x10e   :  { %558 = vst.msk [vmem:[#allocation2 + $0x48] sm:$0xff] %vm548_vm4, %v523_v62  ;;  %v522_v3 = vsel %vm453_vm3, %v316_v48, %v488_v56  ;;  %v326_v5 = vadd.f32 %v10376_v61, %v325_v1  ;;  %v588_v7 = vld [vmem:[#allocation2 + $0x20] ss:$2 sm:$0xff]  ;;  %v622_v8 = vld [vmem:[#allocation2 + $0x21] ss:$2 sm:$0xff] }
 0x10f   :  { %557 = vst.msk [vmem:[#allocation2 + $0x40] sm:$0xff] %vm548_vm4, %v522_v3  ;;  %vm456_vm6 = vcmp.gt.f32.partialorder %v331_v0, 0.0  ;;  %v491_v9 = vmul.f32 %v10378_v63, %v331_v0  ;;  %v705_v10 = vsel %vm670_vm5, %v652_v55, %v688_v2  ;;  %v653_v11 = vmax.f32 %v588_v7, %v622_v8 }
 0x110   :  { %vm455_vm7 = vcmp.gt.f32.partialorder %v326_v5, 0.0  ;;  %v490_v12 = vmul.f32 %v10378_v63, %v326_v5  ;;  %v9003_v13 = vpop.f32.mrb[12].mxu0  ;;  %v757_v14 = vrot.slane %v705_v10, 1  ;;  %9121 = vmatmul.mubr.msk.f32.gmra.mrb[36].mxu0 %vm548_vm4, %v705_v10  ;;  %v1168_v15 = vrot.slane %v705_v10, 2 }
 0x111   :  { %v525_v16 = vsel %vm456_vm6, %v331_v0, %v491_v9  ;;  %v341_v17 = vadd.f32 %v9003_v13, %v10376_v61  ;;  %v335_v18 = vpop.f32.mrb[13].mxu0  ;;  %9123 = vmatprep.mubr.msk.f32.mxu0 %vm10100_vm2, %v10101_v57  ;;  %vm671_vm8 = vcmp.gt.f32.partialorder %v653_v11, 0.0  ;;  %v689_v19 = vmul.f32 %v10399_v29, %v653_v11 }
 0x112   :  { %560 = vst.msk [vmem:[#allocation2 + $0x58] sm:$0xff] %vm548_vm4, %v525_v16  ;;  %v524_v20 = vsel %vm455_vm7, %v326_v5, %v490_v12  ;;  %v336_v21 = vadd.f32 %v10376_v61, %v335_v18  ;;  %v758_v22 = vsel %vm755_vm12, %v756_v6, %v757_v14  ;;  %v590_v23 = vld [vmem:[#allocation2 + $0x30] ss:$2 sm:$0xff]  ;;  %v624_v24 = vld [vmem:[#allocation2 + $0x31] ss:$2 sm:$0xff]  ;;  %v10478_v25 = vsel %vm1166_vm13, %v1167_v4, %v1168_v15 }
 0x113   :  { %559 = vst.msk [vmem:[#allocation2 + $0x50] sm:$0xff] %vm548_vm4, %v524_v20  ;;  %vm458_vm9 = vcmp.gt.f32.partialorder %v341_v17, 0.0  ;;  %v493_v26 = vmul.f32 %v10378_v63, %v341_v17  ;;  %9051 = vmatmul.mubr.msk.f32.vlgmr.msra.gmra.mrb[0].mxu1 %vm548_vm4, %v758_v22  ;;  %v706_v27 = vsel %vm671_vm8, %v653_v11, %v689_v19  ;;  %v654_v28 = vmax.f32 %v590_v23, %v624_v24 }
 0x114   :  { %vm457_vm10 = vcmp.gt.f32.partialorder %v336_v21, 0.0  ;;  %v492_v30 = vmul.f32 %v10378_v63, %v336_v21  ;;  %9635 = vmatpush3.bf16.msra.mxu1 %v9634_v51  ;;  %v9006_v31 = vpop.f32.mrb[14].mxu0  ;;  %v759_v32 = vrot.slane %v706_v27, 1  ;;  %9124 = vmatmul.mubr.msk.f32.gmra.mrb[38].mxu0 %vm548_vm4, %v706_v27  ;;  %v1170_v33 = vrot.slane %v706_v27, 2 }
 0x115   :  { %v527_v36 = vsel %vm458_vm9, %v341_v17, %v493_v26  ;;  %v351_v37 = vadd.f32 %v9006_v31, %v10376_v61  ;;  %v345_v40 = vpop.f32.mrb[15].mxu0  ;;  %9053 = vmatprep.mubr.msk.f32.mxu1 %vm10100_vm2, %v10101_v57  ;;  %9126 = vmatprep.mubr.msk.f32.mxu0 %vm10100_vm2, %v10101_v57  ;;  %vm672_vm11 = vcmp.gt.f32.partialorder %v654_v28, 0.0  ;;  %v690_v41 = vmul.f32 %v10399_v29, %v654_v28 }
 0x116   :  { %562 = vst.msk [vmem:[#allocation2 + $0x68] sm:$0xff] %vm548_vm4, %v527_v36  ;;  %v526_v42 = vsel %vm457_vm10, %v336_v21, %v492_v30  ;;  %v346_v43 = vadd.f32 %v10376_v61, %v345_v40  ;;  %v760_v47 = vsel %vm755_vm12, %v757_v14, %v759_v32  ;;  %v592_v48 = vld [vmem:[#allocation2 + $0x40] ss:$2 sm:$0xff]  ;;  %v626_v49 = vld [vmem:[#allocation2 + $0x41] ss:$2 sm:$0xff]  ;;  %9636 = vmatprep.subr.bf16.mxu1 %v10099_v38 }
 0x117   :  { %v10496_v50 = vsel %vm1166_vm13, %v1168_v15, %v1170_v33  ;;  %561 = vst.msk [vmem:[#allocation2 + $0x60] sm:$0xff] %vm548_vm4, %v526_v42  ;;  %vm460_vm14 = vcmp.gt.f32.partialorder %v351_v37, 0.0  ;;  %v495_v51 = vmul.f32 %v10378_v63, %v351_v37  ;;  %9054 = vmatmul.mubr.msk.f32.gmra.mrb[2].mxu1 %vm548_vm4, %v760_v47  ;;  %v707_v53 = vsel %vm672_vm11, %v654_v28, %v690_v41 }
 0x118   :  { %v655_v54 = vmax.f32 %v592_v48, %v626_v49  ;;  %vm459_vm15 = vcmp.gt.f32.partialorder %v346_v43, 0.0  ;;  %v494_v55 = vmul.f32 %v10378_v63, %v346_v43  ;;  %v9009_v56 = vpop.f32.mrb[16].mxu0  ;;  %v761_v58 = vrot.slane %v707_v53, 1  ;;  %9127 = vmatmul.mubr.msk.f32.gmra.mrb[40].mxu0 %vm548_vm4, %v707_v53  ;;  %9056 = vmatprep.mubr.msk.f32.mxu1 %vm10100_vm2, %v10101_v57 }
 0x119   :  { %v1172_v62 = vrot.slane %v707_v53, 2  ;;  %v529_v0 = vsel %vm460_vm14, %v351_v37, %v495_v51  ;;  %v361_v1 = vadd.f32 %v9009_v56, %v10376_v61  ;;  %v355_v2 = vpop.f32.mrb[17].mxu0  ;;  %9129 = vmatprep.mubr.msk.f32.mxu0 %vm10100_vm2, %v10101_v57  ;;  %9638 = vmatpush3.bf16.msra.mxu1 %v9637_v52 }
 0x11a   :  { %vm673_vm3 = vcmp.gt.f32.partialorder %v655_v54, 0.0  ;;  %v691_v3 = vmul.f32 %v10399_v29, %v655_v54  ;;  %564 = vst.msk [vmem:[#allocation2 + $0x78] sm:$0xff] %vm548_vm4, %v529_v0  ;;  %v528_v4 = vsel %vm459_vm15, %v346_v43, %v494_v55  ;;  %v356_v5 = vadd.f32 %v10376_v61, %v355_v2  ;;  %v594_v7 = vld [vmem:[#allocation2 + $0x50] ss:$2 sm:$0xff]  ;;  %v628_v8 = vld [vmem:[#allocation2 + $0x51] ss:$2 sm:$0xff]  ;;  %9639 = vmatprep.subr.bf16.mxu1 %v10099_v38 }
 0x11b   :  { %v762_v6 = vsel %vm755_vm12, %v759_v32, %v761_v58  ;;  %v10517_v9 = vsel %vm1166_vm13, %v1170_v33, %v1172_v62  ;;  %563 = vst.msk [vmem:[#allocation2 + $0x70] sm:$0xff] %vm548_vm4, %v528_v4  ;;  %vm462_vm5 = vcmp.gt.f32.partialorder %v361_v1, 0.0  ;;  %v497_v34 = vmul.f32 %v10378_v63, %v361_v1 }
 0x11c   :  { %9057 = vmatmul.mubr.msk.f32.gmra.mrb[4].mxu1 %vm548_vm4, %v762_v6  ;;  %v708_v35 = vsel %vm673_vm3, %v655_v54, %v691_v3  ;;  %v656_v52 = vmax.f32 %v594_v7, %v628_v8  ;;  %vm461_vm6 = vcmp.gt.f32.partialorder %v356_v5, 0.0  ;;  %v496_v10 = vmul.f32 %v10378_v63, %v356_v5  ;;  %v9012_v11 = vpop.f32.mrb[18].mxu0 }
 0x11d   :  { %v763_v12 = vrot.slane %v708_v35, 1  ;;  %9130 = vmatmul.mubr.msk.f32.gmra.mrb[42].mxu0 %vm548_vm4, %v708_v35  ;;  %v1174_v13 = vrot.slane %v708_v35, 2  ;;  %9059 = vmatprep.mubr.msk.f32.mxu1 %vm10100_vm2, %v10101_v57  ;;  %v531_v14 = vsel %vm462_vm5, %v361_v1, %v497_v34  ;;  %v371_v15 = vadd.f32 %v9012_v11, %v10376_v61  ;;  %v365_v16 = vpop.f32.mrb[19].mxu0 }
 0x11e   :  { %9132 = vmatprep.mubr.msk.f32.mxu0 %vm10100_vm2, %v10101_v57  ;;  %vm674_vm7 = vcmp.gt.f32.partialorder %v656_v52, 0.0  ;;  %v692_v17 = vmul.f32 %v10399_v29, %v656_v52  ;;  %9641 = vmatpush3.bf16.msra.mxu1 %v9640_v59  ;;  %566 = vst.msk [vmem:[#allocation2 + $0x88] sm:$0xff] %vm548_vm4, %v531_v14  ;;  %v530_v18 = vsel %vm461_vm6, %v356_v5, %v496_v10  ;;  %v596_v21 = vld [vmem:[#allocation2 + $0x60] ss:$2 sm:$0xff]  ;;  %v630_v22 = vld [vmem:[#allocation2 + $0x61] ss:$2 sm:$0xff] }
 0x11f   :  { %v366_v19 = vadd.f32 %v10376_v61, %v365_v16  ;;  %v764_v20 = vsel %vm755_vm12, %v761_v58, %v763_v12  ;;  %9642 = vmatprep.subr.bf16.mxu1 %v10099_v38  ;;  %v10538_v23 = vsel %vm1166_vm13, %v1172_v62, %v1174_v13  ;;  %565 = vst.msk [vmem:[#allocation2 + $0x80] sm:$0xff] %vm548_vm4, %v530_v18  ;;  %vm464_vm8 = vcmp.gt.f32.partialorder %v371_v15, 0.0 }
 0x120   :  { %v499_v39 = vmul.f32 %v10378_v63, %v371_v15  ;;  %9060 = vmatmul.mubr.msk.f32.gmra.mrb[6].mxu1 %vm548_vm4, %v764_v20  ;;  %v709_v44 = vsel %vm674_vm7, %v656_v52, %v692_v17  ;;  %v657_v59 = vmax.f32 %v596_v21, %v630_v22  ;;  %v9015_v26 = vpop.f32.mrb[20].mxu0 }
 0x121   :  { %vm463_vm9 = vcmp.gt.f32.partialorder %v366_v19, 0.0  ;;  %v498_v24 = vmul.f32 %v10378_v63, %v366_v19  ;;  %v765_v27 = vrot.slane %v709_v44, 1  ;;  %9133 = vmatmul.mubr.msk.f32.gmra.mrb[44].mxu0 %vm548_vm4, %v709_v44  ;;  %v1176_v28 = vrot.slane %v709_v44, 2  ;;  %9062 = vmatprep.mubr.msk.f32.mxu1 %vm10100_vm2, %v10101_v57  ;;  %v375_v32 = vpop.f32.mrb[21].mxu0 }
 0x122   :  { %v533_v30 = vsel %vm464_vm8, %v371_v15, %v499_v39  ;;  %v381_v31 = vadd.f32 %v9015_v26, %v10376_v61  ;;  %9135 = vmatprep.mubr.msk.f32.mxu0 %vm10100_vm2, %v10101_v57  ;;  %vm675_vm10 = vcmp.gt.f32.partialorder %v657_v59, 0.0  ;;  %v693_v33 = vmul.f32 %v10399_v29, %v657_v59  ;;  %9644 = vmatpush3.bf16.msra.mxu1 %v9643_v60  ;;  %v598_v41 = vld [vmem:[#allocation2 + $0x70] ss:$2 sm:$0xff]  ;;  %v632_v42 = vld [vmem:[#allocation2 + $0x71] ss:$2 sm:$0xff] }
 0x123   :  { %568 = vst.msk [vmem:[#allocation2 + $0x98] sm:$0xff] %vm548_vm4, %v533_v30  ;;  %v532_v36 = vsel %vm463_vm9, %v366_v19, %v498_v24  ;;  %v376_v37 = vadd.f32 %v10376_v61, %v375_v32  ;;  %v766_v40 = vsel %vm755_vm12, %v763_v12, %v765_v27  ;;  %v10558_v43 = vsel %vm1166_vm13, %v1174_v13, %v1176_v28 }
 0x124   :  { %567 = vst.msk [vmem:[#allocation2 + $0x90] sm:$0xff] %vm548_vm4, %v532_v36  ;;  %vm466_vm11 = vcmp.gt.f32.partialorder %v381_v31, 0.0  ;;  %v501_v47 = vmul.f32 %v10378_v63, %v381_v31  ;;  %9063 = vmatmul.mubr.msk.f32.gmra.mrb[8].mxu1 %vm548_vm4, %v766_v40  ;;  %v710_v45 = vsel %vm675_vm10, %v657_v59, %v693_v33  ;;  %v658_v46 = vmax.f32 %v598_v41, %v632_v42  ;;  %v9018_v48 = vpop.f32.mrb[22].mxu0 }
 0x125   :  { %vm465_vm14 = vcmp.gt.f32.partialorder %v376_v37, 0.0  ;;  %v500_v60 = vmul.f32 %v10378_v63, %v376_v37  ;;  %v767_v49 = vrot.slane %v710_v45, 1  ;;  %9136 = vmatmul.mubr.msk.f32.gmra.mrb[46].mxu0 %vm548_vm4, %v710_v45  ;;  %v1178_v51 = vrot.slane %v710_v45, 2  ;;  %9065 = vmatprep.mubr.msk.f32.mxu1 %vm10100_vm2, %v10101_v57  ;;  %v385_v55 = vpop.f32.mrb[23].mxu0 }
 0x126   :  { %v535_v53 = vsel %vm466_vm11, %v381_v31, %v501_v47  ;;  %v391_v54 = vadd.f32 %v9018_v48, %v10376_v61  ;;  %9138 = vmatprep.mubr.msk.f32.mxu0 %vm10100_vm2, %v10101_v57  ;;  %vm676_vm15 = vcmp.gt.f32.partialorder %v658_v46, 0.0  ;;  %v694_v56 = vmul.f32 %v10399_v29, %v658_v46  ;;  %v600_v1 = vld [vmem:[#allocation2 + $0x80] ss:$2 sm:$0xff]  ;;  %v634_v2 = vld [vmem:[#allocation2 + $0x81] ss:$2 sm:$0xff] }
 0x127   :  { %570 = vst.msk [vmem:[#allocation2 + $0xa8] sm:$0xff] %vm548_vm4, %v535_v53  ;;  %v534_v58 = vsel %vm465_vm14, %v376_v37, %v500_v60  ;;  %v386_v62 = vadd.f32 %v10376_v61, %v385_v55  ;;  %v768_v0 = vsel %vm755_vm12, %v765_v27, %v767_v49  ;;  %v10575_v3 = vsel %vm1166_vm13, %v1176_v28, %v1178_v51 }
 0x128   :  { %569 = vst.msk [vmem:[#allocation2 + $0xa0] sm:$0xff] %vm548_vm4, %v534_v58  ;;  %vm468_vm3 = vcmp.gt.f32.partialorder %v391_v54, 0.0  ;;  %v503_v4 = vmul.f32 %v10378_v63, %v391_v54  ;;  %9066 = vmatmul.mubr.msk.f32.gmra.mrb[10].mxu1 %vm548_vm4, %v768_v0  ;;  %v711_v5 = vsel %vm676_vm15, %v658_v46, %v694_v56  ;;  %v659_v6 = vmax.f32 %v600_v1, %v634_v2  ;;  %v9021_v8 = vpop.f32.mrb[24].mxu0 }
 0x129   :  { %vm467_vm5 = vcmp.gt.f32.partialorder %v386_v62, 0.0  ;;  %v502_v7 = vmul.f32 %v10378_v63, %v386_v62  ;;  %v769_v34 = vrot.slane %v711_v5, 1  ;;  %9139 = vmatmul.mubr.msk.f32.gmra.mrb[48].mxu0 %vm548_vm4, %v711_v5  ;;  %v1180_v35 = vrot.slane %v711_v5, 2  ;;  %9068 = vmatprep.mubr.msk.f32.mxu1 %vm10100_vm2, %v10101_v57  ;;  %v395_v11 = vpop.f32.mrb[25].mxu0 }
 0x12a   :  { %v537_v52 = vsel %vm468_vm3, %v391_v54, %v503_v4  ;;  %v401_v10 = vadd.f32 %v9021_v8, %v10376_v61  ;;  %9141 = vmatprep.mubr.msk.f32.mxu0 %vm10100_vm2, %v10101_v57  ;;  %vm677_vm6 = vcmp.gt.f32.partialorder %v659_v6, 0.0  ;;  %v695_v12 = vmul.f32 %v10399_v29, %v659_v6 }
 0x12b   :  { %572 = vst.msk [vmem:[#allocation2 + $0xb8] sm:$0xff] %vm548_vm4, %v537_v52  ;;  %v536_v13 = vsel %vm467_vm5, %v386_v62, %v502_v7  ;;  %v396_v14 = vadd.f32 %v10376_v61, %v395_v11  ;;  %v770_v15 = vsel %vm755_vm12, %v767_v49, %v769_v34  ;;  %v602_v16 = vld [vmem:[#allocation2 + $0x90] ss:$2 sm:$0xff]  ;;  %v636_v17 = vld [vmem:[#allocation2 + $0x91] ss:$2 sm:$0xff]  ;;  %v10592_v18 = vsel %vm1166_vm13, %v1178_v51, %v1180_v35 }
 0x12c   :  { %571 = vst.msk [vmem:[#allocation2 + $0xb0] sm:$0xff] %vm548_vm4, %v536_v13  ;;  %vm470_vm7 = vcmp.gt.f32.partialorder %v401_v10, 0.0  ;;  %v505_v19 = vmul.f32 %v10378_v63, %v401_v10  ;;  %9069 = vmatmul.mubr.msk.f32.gmra.mrb[12].mxu1 %vm548_vm4, %v770_v15  ;;  %v712_v20 = vsel %vm677_vm6, %v659_v6, %v695_v12  ;;  %v660_v21 = vmax.f32 %v602_v16, %v636_v17  ;;  %v9024_v39 = vpop.f32.mrb[26].mxu0 }
 0x12d   :  { %vm469_vm8 = vcmp.gt.f32.partialorder %v396_v14, 0.0  ;;  %v504_v22 = vmul.f32 %v10378_v63, %v396_v14  ;;  %v771_v44 = vrot.slane %v712_v20, 1  ;;  %9142 = vmatmul.mubr.msk.f32.gmra.mrb[50].mxu0 %vm548_vm4, %v712_v20  ;;  %v1182_v59 = vrot.slane %v712_v20, 2  ;;  %9071 = vmatprep.mubr.msk.f32.mxu1 %vm10100_vm2, %v10101_v57  ;;  %v405_v27 = vpop.f32.mrb[27].mxu0 }
 0x12e   :  { %v539_v24 = vsel %vm470_vm7, %v401_v10, %v505_v19  ;;  %v411_v26 = vadd.f32 %v9024_v39, %v10376_v61  ;;  %9144 = vmatprep.mubr.msk.f32.mxu0 %vm10100_vm2, %v10101_v57  ;;  %vm678_vm9 = vcmp.gt.f32.partialorder %v660_v21, 0.0  ;;  %v696_v28 = vmul.f32 %v10399_v29, %v660_v21 }
 0x12f   :  { %574 = vst.msk [vmem:[#allocation2 + $0xc8] sm:$0xff] %vm548_vm4, %v539_v24  ;;  %v538_v30 = vsel %vm469_vm8, %v396_v14, %v504_v22  ;;  %v406_v31 = vadd.f32 %v10376_v61, %v405_v27  ;;  %v772_v32 = vsel %vm755_vm12, %v769_v34, %v771_v44  ;;  %v604_v33 = vld [vmem:[#allocation2 + $0xa0] ss:$2 sm:$0xff]  ;;  %v638_v36 = vld [vmem:[#allocation2 + $0xa1] ss:$2 sm:$0xff]  ;;  %v10609_v37 = vsel %vm1166_vm13, %v1180_v35, %v1182_v59 }
 0x130   :  { %573 = vst.msk [vmem:[#allocation2 + $0xc0] sm:$0xff] %vm548_vm4, %v538_v30  ;;  %vm472_vm10 = vcmp.gt.f32.partialorder %v411_v26, 0.0  ;;  %v507_v40 = vmul.f32 %v10378_v63, %v411_v26  ;;  %9072 = vmatmul.mubr.msk.f32.gmra.mrb[14].mxu1 %vm548_vm4, %v772_v32  ;;  %v713_v41 = vsel %vm678_vm9, %v660_v21, %v696_v28  ;;  %v661_v42 = vmax.f32 %v604_v33, %v638_v36  ;;  %v9027_v45 = vpop.f32.mrb[28].mxu0 }
 0x131   :  { %vm471_vm11 = vcmp.gt.f32.partialorder %v406_v31, 0.0  ;;  %v506_v47 = vmul.f32 %v10378_v63, %v406_v31  ;;  %v773_v46 = vrot.slane %v713_v41, 1  ;;  %9145 = vmatmul.mubr.msk.f32.gmra.mrb[52].mxu0 %vm548_vm4, %v713_v41  ;;  %v1184_v60 = vrot.slane %v713_v41, 2  ;;  %9074 = vmatprep.mubr.msk.f32.mxu1 %vm10100_vm2, %v10101_v57  ;;  %v415_v51 = vpop.f32.mrb[29].mxu0 }
 0x132   :  { %v541_v48 = vsel %vm472_vm10, %v411_v26, %v507_v40  ;;  %v421_v49 = vadd.f32 %v9027_v45, %v10376_v61  ;;  %9147 = vmatprep.mubr.msk.f32.mxu0 %vm10100_vm2, %v10101_v57  ;;  %vm679_vm14 = vcmp.gt.f32.partialorder %v661_v42, 0.0  ;;  %v697_v53 = vmul.f32 %v10399_v29, %v661_v42 }
 0x133   :  { %576 = vst.msk [vmem:[#allocation2 + $0xd8] sm:$0xff] %vm548_vm4, %v541_v48  ;;  %v540_v54 = vsel %vm471_vm11, %v406_v31, %v506_v47  ;;  %v416_v55 = vadd.f32 %v10376_v61, %v415_v51  ;;  %v774_v56 = vsel %vm755_vm12, %v771_v44, %v773_v46  ;;  %v606_v58 = vld [vmem:[#allocation2 + $0xb0] ss:$2 sm:$0xff]  ;;  %v640_v62 = vld [vmem:[#allocation2 + $0xb1] ss:$2 sm:$0xff]  ;;  %v10626_v0 = vsel %vm1166_vm13, %v1182_v59, %v1184_v60 }
 0x134   :  { %575 = vst.msk [vmem:[#allocation2 + $0xd0] sm:$0xff] %vm548_vm4, %v540_v54  ;;  %vm474_vm15 = vcmp.gt.f32.partialorder %v421_v49, 0.0  ;;  %v509_v1 = vmul.f32 %v10378_v63, %v421_v49  ;;  %9075 = vmatmul.mubr.msk.f32.gmra.mrb[16].mxu1 %vm548_vm4, %v774_v56  ;;  %v714_v2 = vsel %vm679_vm14, %v661_v42, %v697_v53  ;;  %vm582_vm3 = vcmask 519168   ;;  %v9030_v6 = vpop.f32.mrb[30].mxu0 }
 0x135   :  { %v662_v4 = vmax.f32 %v606_v58, %v640_v62  ;;  %vm473_vm5 = vcmp.gt.f32.partialorder %v416_v55, 0.0  ;;  %v508_v5 = vmul.f32 %v10378_v63, %v416_v55  ;;  %v775_v7 = vrot.slane %v714_v2, 1  ;;  %9148 = vmatmul.mubr.msk.f32.gmra.mrb[54].mxu0 %vm548_vm4, %v714_v2  ;;  %9077 = vmatprep.mubr.msk.f32.mxu1 %vm10100_vm2, %v10101_v57  ;;  %v425_v52 = vpop.f32.mrb[31].mxu0 }
 0x136   :  { %v1186_v8 = vrot.slane %v714_v2, 2  ;;  %v543_v34 = vsel %vm474_vm15, %v421_v49, %v509_v1  ;;  %v431_v35 = vadd.f32 %v9030_v6, %v10376_v61  ;;  %9150 = vmatprep.mubr.msk.f32.mxu0 %vm10100_vm2, %v10101_v57  ;;  %v426_v12 = vadd.f32 %v10376_v61, %v425_v52 }
 0x137   :  { %vm680_vm6 = vcmp.gt.f32.partialorder %v662_v4, 0.0  ;;  %v698_v10 = vmul.f32 %v10399_v29, %v662_v4  ;;  %578 = vst.msk [vmem:[#allocation2 + $0xe8] sm:$0xff] %vm548_vm4, %v543_v34  ;;  %v542_v11 = vsel %vm473_vm5, %v416_v55, %v508_v5  ;;  %v776_v13 = vsel %vm755_vm12, %v773_v46, %v775_v7  ;;  %v608_v14 = vld [vmem:[#allocation2 + $0xc0] ss:$2 sm:$0xff]  ;;  %v642_v15 = vld [vmem:[#allocation2 + $0xc1] ss:$2 sm:$0xff] }
 0x138   :  { %v10643_v16 = vsel %vm1166_vm13, %v1184_v60, %v1186_v8  ;;  %577 = vst.msk [vmem:[#allocation2 + $0xe0] sm:$0xff] %vm548_vm4, %v542_v11  ;;  %vm476_vm7 = vcmp.gt.f32.partialorder %v431_v35, 0.0  ;;  %v511_v17 = vmul.f32 %v10378_v63, %v431_v35  ;;  %9078 = vmatmul.mubr.msk.f32.gmra.mrb[18].mxu1 %vm548_vm4, %v776_v13  ;;  %v663_v20 = vmax.f32 %v608_v14, %v642_v15  ;;  %v9033_v22 = vpop.f32.mrb[32].mxu0 }
 0x139   :  { %v715_v19 = vsel %vm680_vm6, %v662_v4, %v698_v10  ;;  %vm475_vm8 = vcmp.gt.f32.partialorder %v426_v12, 0.0  ;;  %v510_v21 = vmul.f32 %v10378_v63, %v426_v12  ;;  %9080 = vmatprep.mubr.msk.f32.mxu1 %vm10100_vm2, %v10101_v57  ;;  %v441_v24 = vadd.f32 %v9033_v22, %v10376_v61  ;;  %v435_v26 = vpop.f32.mrb[33].mxu0 }
 0x13a   :  { %v777_v39 = vrot.slane %v715_v19, 1  ;;  %9151 = vmatmul.mubr.msk.f32.gmra.mrb[56].mxu0 %vm548_vm4, %v715_v19  ;;  %v1188_v44 = vrot.slane %v715_v19, 2  ;;  %v545_v59 = vsel %vm476_vm7, %v431_v35, %v511_v17  ;;  %vm681_vm9 = vcmp.gt.f32.partialorder %v663_v20, 0.0 }
 0x13b   :  { %9153 = vmatprep.mubr.msk.f32.mxu0 %vm10100_vm2, %v10101_v57  ;;  %v699_v27 = vmul.f32 %v10399_v29, %v663_v20  ;;  %580 = vst.msk [vmem:[#allocation2 + $0xf8] sm:$0xff] %vm548_vm4, %v545_v59  ;;  %v544_v28 = vsel %vm475_vm8, %v426_v12, %v510_v21  ;;  %v436_v30 = vadd.f32 %v10376_v61, %v435_v26  ;;  %v610_v32 = vld [vmem:[#allocation2 + $0xd0] ss:$2 sm:$0xff]  ;;  %v644_v33 = vld [vmem:[#allocation2 + $0xd1] ss:$2 sm:$0xff]  ;;  %vm478_vm10 = vcmp.gt.f32.partialorder %v441_v24, 0.0 }
 0x13c   :  { %v778_v31 = vsel %vm755_vm12, %v775_v7, %v777_v39  ;;  %v10660_v36 = vsel %vm1166_vm13, %v1186_v8, %v1188_v44  ;;  %579 = vst.msk [vmem:[#allocation2 + $0xf0] sm:$0xff] %vm548_vm4, %v544_v28  ;;  %v513_v40 = vmul.f32 %v10378_v63, %v441_v24  ;;  %v664_v42 = vmax.f32 %v610_v32, %v644_v33 }
 0x13d   :  { %9081 = vmatmul.mubr.msk.f32.gmra.mrb[20].mxu1 %vm548_vm4, %v778_v31  ;;  %v716_v41 = vsel %vm681_vm9, %v663_v20, %v699_v27  ;;  %vm477_vm11 = vcmp.gt.f32.partialorder %v436_v30, 0.0  ;;  %v512_v47 = vmul.f32 %v10378_v63, %v436_v30  ;;  %vm1478_vm7 = vcmask 261120  }
 0x13e   :  { %v779_v61 = vrot.slane %v716_v41, 1  ;;  %9154 = vmatmul.mubr.msk.f32.gmra.mrb[58].mxu0 %vm548_vm4, %v716_v41  ;;  %v1190_v45 = vrot.slane %v716_v41, 2  ;;  %9083 = vmatprep.mubr.msk.f32.mxu1 %vm10100_vm2, %v10101_v57  ;;  %v547_v46 = vsel %vm478_vm10, %v441_v24, %v513_v40  ;;  %vm682_vm14 = vcmp.gt.f32.partialorder %v664_v42, 0.0 }
 0x13f   :  { %9156 = vmatprep.mubr.msk.f32.mxu0 %vm10100_vm2, %v10101_v57  ;;  %v700_v60 = vmul.f32 %v10399_v29, %v664_v42  ;;  %583 = vst.msk [vmem:[#allocation2 + $0x108] sm:$0xf] %vm582_vm3, %v547_v46  ;;  %v546_v48 = vsel %vm477_vm11, %v436_v30, %v512_v47  ;;  %v612_v63 = vld [vmem:[#allocation2 + $0xe0] ss:$2 sm:$0xff]  ;;  %v646_v51 = vld [vmem:[#allocation2 + $0xe1] ss:$2 sm:$0xff] }
 0x140   :  { %v780_v49 = vsel %vm755_vm12, %v777_v39, %v779_v61  ;;  %v10675_v53 = vsel %vm1166_vm13, %v1188_v44, %v1190_v45  ;;  %581 = vst.msk [vmem:[#allocation2 + $0x100] sm:$0xff] %vm548_vm4, %v546_v48  ;;  %v665_v55 = vmax.f32 %v612_v63, %v646_v51  ;;  %v1553_v48 = vld [vmem:[%s12635_s6] sm:$0xff] }
 0x141   :  { %9084 = vmatmul.mubr.msk.f32.gmra.mrb[22].mxu1 %vm548_vm4, %v780_v49  ;;  %v717_v54 = vsel %vm682_vm14, %v664_v42, %v700_v60  ;;  %v1554_v49 = vld [vmem:[%s12635_s6 + $0x8] sm:$0xff] }
 0x142   :  { %v781_v56 = vrot.slane %v717_v54, 1  ;;  %9157 = vmatmul.mubr.msk.f32.gmra.mrb[60].mxu0 %vm548_vm4, %v717_v54  ;;  %v1192_v58 = vrot.slane %v717_v54, 2  ;;  %9086 = vmatprep.mubr.msk.f32.mxu1 %vm10100_vm2, %v10101_v57  ;;  %vm683_vm15 = vcmp.gt.f32.partialorder %v665_v55, 0.0  ;;  %v701_v62 = vmul.f32 %v10399_v29, %v665_v55 }
 0x143   :  { %9159 = vmatprep.mubr.msk.f32.mxu0 %vm10100_vm2, %v10101_v57  ;;  %v614_v2 = vld [vmem:[#allocation2 + $0xf0] ss:$2 sm:$0xff]  ;;  %v648_v4 = vld [vmem:[#allocation2 + $0xf1] ss:$2 sm:$0xff]  ;;  %v10813_v54 = vpack.c.bf16 %v1554_v49, %v1553_v48 }
 0x144   :  { %v782_v1 = vsel %vm755_vm12, %v779_v61, %v781_v56  ;;  %v10687_v5 = vsel %vm1166_vm13, %v1190_v45, %v1192_v58  ;;  %v718_v6 = vsel %vm683_vm15, %v665_v55, %v701_v62  ;;  %v666_v7 = vmax.f32 %v614_v2, %v648_v4  ;;  %v8388_v49 = vld [vmem:[%s12630_s1 + $0x130] sm:$0xff] }
 0x145   :  { %9087 = vmatmul.mubr.msk.f32.gmra.mrb[24].mxu1 %vm548_vm4, %v782_v1  ;;  %v783_v8 = vrot.slane %v718_v6, 1  ;;  %v1194_v34 = vrot.slane %v718_v6, 2 }
 0x146   :  { %9160 = vmatmul.mubr.msk.f32.gmra.mrb[62].mxu0 %vm548_vm4, %v718_v6  ;;  %9089 = vmatprep.mubr.msk.f32.mxu1 %vm10100_vm2, %v10101_v57  ;;  %vm684_vm5 = vcmp.gt.f32.partialorder %v666_v7, 0.0  ;;  %v702_v35 = vmul.f32 %v10399_v29, %v666_v7 }
 0x147   :  { %9162 = vmatprep.mubr.msk.f32.mxu0 %vm10100_vm2, %v10101_v57  ;;  %v784_v52 = vsel %vm755_vm12, %v781_v56, %v783_v8  ;;  %v616_v10 = vld [vmem:[#allocation2 + $0x100] ss:$2 sm:$0x3f]  ;;  %v650_v11 = vld [vmem:[#allocation2 + $0x101] ss:$2 sm:$0x3f]  ;;  %v1195_v12 = vsel %vm1166_vm13, %v1192_v58, %v1194_v34 }
 0x148   :  { %v719_v13 = vsel %vm684_vm5, %v666_v7, %v702_v35  ;;  %v667_v14 = vmax.f32 %v616_v10, %v650_v11 }
 0x149   :  { %9090 = vmatmul.mubr.msk.f32.gmra.mrb[26].mxu1 %vm548_vm4, %v784_v52  ;;  %v785_v15 = vrot.slane %v719_v13, 1  ;;  %v1196_v17 = vrot.slane %v719_v13, 2 }
 0x14a   :  { %9163 = vmatmul.mubr.msk.f32.gmra.mrb[64].mxu0 %vm548_vm4, %v719_v13  ;;  %9092 = vmatprep.mubr.msk.f32.mxu1 %vm10100_vm2, %v10101_v57  ;;  %vm685_vm6 = vcmp.gt.f32.partialorder %v667_v14, 0.0  ;;  %v703_v19 = vmul.f32 %v10399_v29, %v667_v14  ;;  %v8349_v29 = vld [vmem:[%s12635_s6 + $0x20] sm:$0xff] }
 0x14b   :  { %9165 = vmatprep.mubr.msk.f32.mxu0 %vm10100_vm2, %v10101_v57  ;;  %v786_v20 = vsel %vm755_vm12, %v783_v8, %v785_v15  ;;  %v1197_v21 = vsel %vm1166_vm13, %v1194_v34, %v1196_v17 }
 0x14c   :  { %v720_v22 = vsel %vm685_vm6, %v667_v14, %v703_v19 }
 0x14d   :  { %9093 = vmatmul.mubr.msk.f32.gmra.mrb[28].mxu1 %vm548_vm4, %v786_v20  ;;  %v787_v39 = vrot.slane %v720_v22, 1  ;;  %v1198_v44 = vrot.slane %v720_v22, 2 }
 0x14e   :  { %9166 = vmatmul.mubr.msk.f32.gmra.mrb[66].mxu0 %vm548_vm4, %v720_v22  ;;  %9095 = vmatprep.mubr.msk.f32.mxu1 %vm10100_vm2, %v10101_v57 }
 0x14f   :  { %v788_v59 = vsel %vm755_vm12, %v785_v15, %v787_v39  ;;  %v1199_v24 = vsel %vm1166_vm13, %v1196_v17, %v1198_v44 }
 0x151   :  { %9096 = vmatmul.mubr.msk.f32.gmra.mrb[30].mxu1 %vm548_vm4, %v788_v59 }
 0x152   :  { %9098 = vmatprep.mubr.msk.f32.mxu1 %vm10100_vm2, %v10101_v57 }
 0x155   :  { %9099 = vmatmul.mubr.msk.f32.gmra.mrb[32].mxu1 %vm548_vm4, %v787_v39 }
 0x156   :  { %9184 = vmatprep.mubr.msk.f32.mxu1 %vm10100_vm2, %v10101_v57 }
 0x159   :  { %9185 = vmatmul.mubr.msk.f32.vlgmr.msra.gmra.mrb[34].mxu1 %vm548_vm4, %v10478_v25  ;;  %v8350_v25 = vld [vmem:[%s12635_s6 + $0x28] sm:$0xff] }
 0x15a   :  { %9187 = vmatprep.mubr.msk.f32.mxu1 %vm10100_vm2, %v10101_v57 }
 0x15d   :  { %9188 = vmatmul.mubr.msk.f32.gmra.mrb[36].mxu1 %vm548_vm4, %v10496_v50  ;;  %v9645_v50 = vpack.c.bf16 %v8350_v25, %v8349_v29 }
 0x15e   :  { %9190 = vmatprep.mubr.msk.f32.mxu1 %vm10100_vm2, %v10101_v57 }
 0x15f   :  { %9646 = vmatprep.subr.bf16.mxu0 %v9645_v50 }
 0x160   :  { %9648 = vmatpush3.bf16.msra.mxu0 %v9645_v50 }
 0x161   :  { %9191 = vmatmul.mubr.msk.f32.gmra.mrb[38].mxu1 %vm548_vm4, %v10517_v9  ;;  %v8351_v9 = vld [vmem:[%s12635_s6 + $0x30] sm:$0xff] }
 0x162   :  { %9193 = vmatprep.mubr.msk.f32.mxu1 %vm10100_vm2, %v10101_v57 }
 0x165   :  { %9194 = vmatmul.mubr.msk.f32.gmra.mrb[40].mxu1 %vm548_vm4, %v10538_v23  ;;  %v8352_v23 = vld [vmem:[%s12635_s6 + $0x38] sm:$0xff] }
 0x166   :  { %9196 = vmatprep.mubr.msk.f32.mxu1 %vm10100_vm2, %v10101_v57 }
 0x169   :  { %9197 = vmatmul.mubr.msk.f32.gmra.mrb[42].mxu1 %vm548_vm4, %v10558_v43  ;;  %v9649_v43 = vpack.c.bf16 %v8352_v23, %v8351_v9 }
 0x16a   :  { %9199 = vmatprep.mubr.msk.f32.mxu1 %vm10100_vm2, %v10101_v57 }
 0x16b   :  { %9650 = vmatprep.subr.bf16.mxu0 %v9649_v43 }
 0x16c   :  { %9652 = vmatpush3.bf16.msra.mxu0 %v9649_v43 }
 0x16d   :  { %9200 = vmatmul.mubr.msk.f32.gmra.mrb[44].mxu1 %vm548_vm4, %v10575_v3  ;;  %v2126_v3 = vld [vmem:[%s12631_s2] sm:$0x7]  ;;  %9654 = vmatprep.subr.bf16.mxu0 %v10813_v54 }
 0x16e   :  { %9202 = vmatprep.mubr.msk.f32.mxu1 %vm10100_vm2, %v10101_v57  ;;  %9295 = vmatprep.subr.msk.mxu1 %vm205_vm0, %v2126_v3 }
 0x16f   :  { %9296 = vmatpush3.msk.msra.mxu1 %vm205_vm0, %v2126_v3 }
 0x170   :  { %9681 = vmatprep.subr.bf16.mxu1 %v10099_v38 }
 0x171   :  { %9203 = vmatmul.mubr.msk.f32.gmra.mrb[46].mxu1 %vm548_vm4, %v10592_v18 }
 0x172   :  { %9205 = vmatprep.mubr.msk.f32.mxu1 %vm10100_vm2, %v10101_v57 }
 0x175   :  { %9206 = vmatmul.mubr.msk.f32.gmra.mrb[48].mxu1 %vm548_vm4, %v10609_v37 }
 0x176   :  { %9208 = vmatprep.mubr.msk.f32.mxu1 %vm10100_vm2, %v10101_v57 }
 0x179   :  { %9209 = vmatmul.mubr.msk.f32.gmra.mrb[50].mxu1 %vm548_vm4, %v10626_v0 }
 0x17a   :  { %9211 = vmatprep.mubr.msk.f32.mxu1 %vm10100_vm2, %v10101_v57 }
 0x17d   :  { %9212 = vmatmul.mubr.msk.f32.gmra.mrb[52].mxu1 %vm548_vm4, %v10643_v16 }
 0x17e   :  { %9214 = vmatprep.mubr.msk.f32.mxu1 %vm10100_vm2, %v10101_v57 }
 0x181   :  { %9215 = vmatmul.mubr.msk.f32.gmra.mrb[54].mxu1 %vm548_vm4, %v10660_v36 }
 0x182   :  { %9217 = vmatprep.mubr.msk.f32.mxu1 %vm10100_vm2, %v10101_v57 }
 0x185   :  { %9218 = vmatmul.mubr.msk.f32.gmra.mrb[56].mxu1 %vm548_vm4, %v10675_v53 }
 0x186   :  { %9220 = vmatprep.mubr.msk.f32.mxu1 %vm10100_vm2, %v10101_v57 }
 0x189   :  { %9221 = vmatmul.mubr.msk.f32.gmra.mrb[58].mxu1 %vm548_vm4, %v10687_v5 }
 0x18a   :  { %9223 = vmatprep.mubr.msk.f32.mxu1 %vm10100_vm2, %v10101_v57 }
 0x18d   :  { %9224 = vmatmul.mubr.msk.f32.gmra.mrb[60].mxu1 %vm548_vm4, %v1195_v12 }
 0x18e   :  { %9226 = vmatprep.mubr.msk.f32.mxu1 %vm10100_vm2, %v10101_v57 }
 0x191   :  { %9227 = vmatmul.mubr.msk.f32.gmra.mrb[62].mxu1 %vm548_vm4, %v1197_v21 }
 0x192   :  { %9229 = vmatprep.mubr.msk.f32.mxu1 %vm10100_vm2, %v10101_v57 }
 0x195   :  { %9230 = vmatmul.mubr.msk.f32.gmra.mrb[64].mxu1 %vm548_vm4, %v1199_v24 }
 0x196   :  { %9232 = vmatprep.mubr.msk.f32.mxu1 %vm10100_vm2, %v10101_v57 }
 0x199   :  { %9233 = vmatmul.mubr.msk.f32.gmra.mrb[66].mxu1 %vm548_vm4, %v1198_v44 }
 0x1df   :  { %v1073_v18 = vpop.f32.mrb[34].mxu0 }
 0x1e0   :  { %v9119_v37 = vpop.f32.mrb[35].mxu0 }
 0x1e3   :  { %v1078_v0 = vpop.f32.mrb[36].mxu0 }
 0x1e4   :  { %v9122_v16 = vpop.f32.mrb[37].mxu0 }
 0x1e6   :  { %v889_v26 = vpop.f32.mrb[0].mxu1 }
 0x1e7   :  { %v9052_v27 = vpop.f32.mrb[1].mxu1  ;;  %v1083_v28 = vpop.f32.mrb[38].mxu0  ;;  %v10799_v30 = vadd.f32 %v1073_v18, %v889_v26  ;;  %v8384_v26 = vld [vmem:[%s12630_s1 + $0x110] sm:$0xff] }
 0x1e8   :  { %v9125_v31 = vpop.f32.mrb[39].mxu0  ;;  %v8385_v27 = vld [vmem:[%s12630_s1 + $0x118] sm:$0xff]  ;;  %9297 = vmatprep.mubr.msk.f32.mxu1 %vm102_vm1, %v8384_v26 }
 0x1e9   :  { %9298 = vmatmul.mubr.msk.f32.vlgmr.msra.gmra.mrb[68].mxu1 %vm102_vm1, %v8385_v27 }
 0x1ea   :  { %v894_v32 = vpop.f32.mrb[2].mxu1 }
 0x1eb   :  { %v9055_v33 = vpop.f32.mrb[3].mxu1  ;;  %v1088_v36 = vpop.f32.mrb[40].mxu0  ;;  %v10801_v40 = vadd.f32 %v1078_v0, %v894_v32 }
 0x1ec   :  { %v9128_v41 = vpop.f32.mrb[41].mxu0 }
 0x1ed   :  { %v8386_v41 = vld [vmem:[%s12630_s1 + $0x120] sm:$0xff] }
 0x1ee   :  { %9300 = vmatprep.mubr.msk.f32.mxu1 %vm102_vm1, %v8386_v41 }
 0x1ef   :  { %v899_v42 = vpop.f32.mrb[4].mxu1 }
 0x1f0   :  { %v9058_v47 = vpop.f32.mrb[5].mxu1  ;;  %v1093_v61 = vpop.f32.mrb[42].mxu0  ;;  %v10803_v45 = vadd.f32 %v1083_v28, %v899_v42  ;;  %v8387_v42 = vld [vmem:[%s12630_s1 + $0x128] sm:$0xff] }
 0x1f1   :  { %v9131_v46 = vpop.f32.mrb[43].mxu0  ;;  %9301 = vmatmul.mubr.msk.f32.gmra.mrb[70].mxu1 %vm102_vm1, %v8387_v42 }
 0x1f2   :  { %9303 = vmatprep.mubr.msk.f32.mxu1 %vm102_vm1, %v8388_v49  ;;  %v8404_v49 = vld [vmem:[%s12630_s1 + $0x1b0] sm:$0xff] }
 0x1f3   :  { %v904_v60 = vpop.f32.mrb[6].mxu1 }
 0x1f4   :  { %v9061_v63 = vpop.f32.mrb[7].mxu1  ;;  %v1098_v51 = vpop.f32.mrb[44].mxu0  ;;  %v10811_v53 = vadd.f32 %v1088_v36, %v904_v60 }
 0x1f5   :  { %v9134_v55 = vpop.f32.mrb[45].mxu0  ;;  %v8389_v63 = vld [vmem:[%s12630_s1 + $0x138] sm:$0xff] }
 0x1f6   :  { %9304 = vmatmul.mubr.msk.f32.gmra.mrb[72].mxu1 %vm102_vm1, %v8389_v63 }
 0x1f7   :  { %v909_v56 = vpop.f32.mrb[8].mxu1 }
 0x1f8   :  { %v9064_v58 = vpop.f32.mrb[9].mxu1  ;;  %v1103_v62 = vpop.f32.mrb[46].mxu0  ;;  %v10816_v1 = vadd.f32 %v1093_v61, %v909_v56 }
 0x1f9   :  { %v9137_v2 = vpop.f32.mrb[47].mxu0 }
 0x1fa   :  { %v8390_v2 = vld [vmem:[%s12630_s1 + $0x140] sm:$0xff] }
 0x1fb   :  { %v914_v4 = vpop.f32.mrb[10].mxu1  ;;  %9306 = vmatprep.mubr.msk.f32.mxu1 %vm102_vm1, %v8390_v2 }
 0x1fc   :  { %v9067_v5 = vpop.f32.mrb[11].mxu1  ;;  %v1108_v6 = vpop.f32.mrb[48].mxu0  ;;  %v10818_v7 = vadd.f32 %v1098_v51, %v914_v4  ;;  %v8391_v4 = vld [vmem:[%s12630_s1 + $0x148] sm:$0xff] }
 0x1fd   :  { %v9140_v8 = vpop.f32.mrb[49].mxu0  ;;  %9307 = vmatmul.mubr.msk.f32.gmra.mrb[74].mxu1 %vm102_vm1, %v8391_v4  ;;  %v8406_v4 = vld [vmem:[%s12630_s1 + $0x1c0] sm:$0xff] }
 0x1fe   :  { %v8392_v8 = vld [vmem:[%s12630_s1 + $0x150] sm:$0xff] }
 0x1ff   :  { %v919_v34 = vpop.f32.mrb[12].mxu1  ;;  %9309 = vmatprep.mubr.msk.f32.mxu1 %vm102_vm1, %v8392_v8 }
 0x200   :  { %v9070_v35 = vpop.f32.mrb[13].mxu1  ;;  %v1113_v52 = vpop.f32.mrb[50].mxu0  ;;  %v10820_v10 = vadd.f32 %v1103_v62, %v919_v34  ;;  %v8393_v34 = vld [vmem:[%s12630_s1 + $0x158] sm:$0xff] }
 0x201   :  { %v9143_v11 = vpop.f32.mrb[51].mxu0  ;;  %9310 = vmatmul.mubr.msk.f32.gmra.mrb[76].mxu1 %vm102_vm1, %v8393_v34 }
 0x202   :  { %v8394_v11 = vld [vmem:[%s12630_s1 + $0x160] sm:$0xff] }
 0x203   :  { %v924_v12 = vpop.f32.mrb[14].mxu1  ;;  %9312 = vmatprep.mubr.msk.f32.mxu1 %vm102_vm1, %v8394_v11 }
 0x204   :  { %v9073_v13 = vpop.f32.mrb[15].mxu1  ;;  %v1118_v14 = vpop.f32.mrb[52].mxu0  ;;  %v10822_v15 = vadd.f32 %v1108_v6, %v924_v12 }
 0x205   :  { %v9146_v17 = vpop.f32.mrb[53].mxu0  ;;  %v8395_v13 = vld [vmem:[%s12630_s1 + $0x168] sm:$0xff] }
 0x206   :  { %9313 = vmatmul.mubr.msk.f32.gmra.mrb[78].mxu1 %vm102_vm1, %v8395_v13 }
 0x207   :  { %v929_v19 = vpop.f32.mrb[16].mxu1 }
 0x208   :  { %v10824_v20 = vadd.f32 %v1113_v52, %v929_v19  ;;  %v9076_v21 = vpop.f32.mrb[17].mxu1  ;;  %v1123_v22 = vpop.f32.mrb[54].mxu0  ;;  %v8396_v19 = vld [vmem:[%s12630_s1 + $0x170] sm:$0xff] }
 0x209   :  { %v9149_v39 = vpop.f32.mrb[55].mxu0  ;;  %9315 = vmatprep.mubr.msk.f32.mxu1 %vm102_vm1, %v8396_v19  ;;  %v8408_v19 = vld [vmem:[%s12630_s1 + $0x1d0] sm:$0xff] }
 0x20a   :  { %v8397_v39 = vld [vmem:[%s12630_s1 + $0x178] sm:$0xff] }
 0x20b   :  { %v934_v44 = vpop.f32.mrb[18].mxu1  ;;  %9316 = vmatmul.mubr.msk.f32.gmra.mrb[80].mxu1 %vm102_vm1, %v8397_v39 }
 0x20c   :  { %v10826_v59 = vadd.f32 %v1118_v14, %v934_v44  ;;  %v9079_v24 = vpop.f32.mrb[19].mxu1 }
 0x20d   :  { %v1128_v29 = vpop.f32.mrb[56].mxu0 }
 0x20e   :  { %v9152_v25 = vpop.f32.mrb[57].mxu0 }
 0x20f   :  { %v10906_v25 = vstv %s8347_s14 }
 0x210   :  { %v939_v50 = vpop.f32.mrb[20].mxu1 }
 0x211   :  { %v10828_v9 = vadd.f32 %v1123_v22, %v939_v50  ;;  %v9082_v23 = vpop.f32.mrb[21].mxu1  ;;  %v1133_v43 = vpop.f32.mrb[58].mxu0  ;;  %v10896_v22 = vld [vmem:[%s12634_s5] ss:$0 sm:$0xff] }
 0x212   :  { %v9155_v3 = vpop.f32.mrb[59].mxu0 }
 0x214   :  { %v944_v18 = vpop.f32.mrb[22].mxu1 }
 0x215   :  { %v10830_v37 = vadd.f32 %v1128_v29, %v944_v18  ;;  %v9085_v0 = vpop.f32.mrb[23].mxu1  ;;  %v1138_v16 = vpop.f32.mrb[60].mxu0  ;;  %v8398_v29 = vld [vmem:[%s12630_s1 + $0x180] sm:$0xff] }
 0x216   :  { %v9158_v28 = vpop.f32.mrb[61].mxu0  ;;  %9318 = vmatprep.mubr.msk.f32.mxu1 %vm102_vm1, %v8398_v29  ;;  %v8400_v0 = vld [vmem:[%s12630_s1 + $0x190] sm:$0xff] }
 0x217   :  { %v8401_v28 = vld [vmem:[%s12630_s1 + $0x198] sm:$0xff] }
 0x218   :  { %v949_v31 = vpop.f32.mrb[24].mxu1 }
 0x219   :  { %v10840_v32 = vadd.f32 %v1133_v43, %v949_v31  ;;  %v9088_v33 = vpop.f32.mrb[25].mxu1  ;;  %v1143_v36 = vpop.f32.mrb[62].mxu0  ;;  %v8399_v43 = vld [vmem:[%s12630_s1 + $0x188] sm:$0xff] }
 0x21a   :  { %v9161_v47 = vpop.f32.mrb[63].mxu0  ;;  %9319 = vmatmul.mubr.msk.f32.gmra.mrb[82].mxu1 %vm102_vm1, %v8399_v43 }
 0x21b   :  { %9321 = vmatprep.mubr.msk.f32.mxu1 %vm102_vm1, %v8400_v0 }
 0x21c   :  { %v954_v61 = vpop.f32.mrb[26].mxu1 }
 0x21d   :  { %v10850_v46 = vadd.f32 %v1138_v16, %v954_v61  ;;  %v9091_v60 = vpop.f32.mrb[27].mxu1  ;;  %v1148_v48 = vpop.f32.mrb[64].mxu0  ;;  %v8403_v61 = vld [vmem:[%s12630_s1 + $0x1a8] sm:$0xff] }
 0x21e   :  { %v9164_v51 = vpop.f32.mrb[65].mxu0  ;;  %9322 = vmatmul.mubr.msk.f32.gmra.mrb[84].mxu1 %vm102_vm1, %v8401_v28 }
 0x220   :  { %v959_v55 = vpop.f32.mrb[28].mxu1 }
 0x221   :  { %v10860_v56 = vadd.f32 %v1143_v36, %v959_v55  ;;  %v9094_v58 = vpop.f32.mrb[29].mxu1  ;;  %v1153_v62 = vpop.f32.mrb[66].mxu0  ;;  %v8402_v36 = vld [vmem:[%s12630_s1 + $0x1a0] sm:$0xff] }
 0x222   :  { %v9167_v5 = vpop.f32.mrb[67].mxu0  ;;  %9324 = vmatprep.mubr.msk.f32.mxu1 %vm102_vm1, %v8402_v36  ;;  %v8412_v36 = vld [vmem:[%s12630_s1 + $0x1f0] sm:$0xff] }
 0x223   :  { %9325 = vmatmul.mubr.msk.f32.gmra.mrb[86].mxu1 %vm102_vm1, %v8403_v61 }
 0x224   :  { %v964_v6 = vpop.f32.mrb[30].mxu1  ;;  %9327 = vmatprep.mubr.msk.f32.mxu1 %vm102_vm1, %v8404_v49 }
 0x225   :  { %v10876_v35 = vadd.f32 %v1148_v48, %v964_v6  ;;  %v9097_v52 = vpop.f32.mrb[31].mxu1 }
 0x228   :  { %v969_v12 = vpop.f32.mrb[32].mxu1 }
 0x229   :  { %v10887_v14 = vadd.f32 %v1153_v62, %v969_v12  ;;  %v9100_v17 = vpop.f32.mrb[33].mxu1 }
 0x22c   :  { %v1300_v21 = vpop.f32.mrb[34].mxu1 }
 0x22d   :  { %v1384_v44 = vadd.f32 %v1300_v21, %v10799_v30  ;;  %v9186_v24 = vpop.f32.mrb[35].mxu1  ;;  %v10967_v21 = vstv %s8348_s15 }
 0x22f   :  { %v1408_v50 = vadd.f32 %v10896_v22, %v1384_v44 }
 0x230   :  { %v1305_v23 = vpop.f32.mrb[36].mxu1 }
 0x231   :  { %vm1426_vm0 = vcmp.gt.f32.partialorder %v1408_v50, 0.0  ;;  %v1444_v30 = vmul.f32 %v10906_v25, %v1408_v50  ;;  %v1385_v3 = vadd.f32 %v1305_v23, %v10801_v40  ;;  %v9189_v18 = vpop.f32.mrb[37].mxu1 }
 0x233   :  { %v1461_v16 = vsel %vm1426_vm0, %v1408_v50, %v1444_v30  ;;  %v1409_v26 = vadd.f32 %v10896_v22, %v1385_v3  ;;  %v8410_v30 = vld [vmem:[%s12630_s1 + $0x1e0] sm:$0xff] }
 0x234   :  { %1479 = vst.msk [vmem:[#allocation2] sm:$0xff] %vm1478_vm7, %v1461_v16  ;;  %v1310_v27 = vpop.f32.mrb[38].mxu1 }
 0x235   :  { %vm1427_vm8 = vcmp.gt.f32.partialorder %v1409_v26, 0.0  ;;  %v1445_v40 = vmul.f32 %v10906_v25, %v1409_v26  ;;  %v1386_v31 = vadd.f32 %v1310_v27, %v10803_v45  ;;  %v9192_v33 = vpop.f32.mrb[39].mxu1 }
 0x237   :  { %v1462_v41 = vsel %vm1427_vm8, %v1409_v26, %v1445_v40  ;;  %v1410_v42 = vadd.f32 %v10896_v22, %v1386_v31 }
 0x238   :  { %1480 = vst.msk [vmem:[#allocation2 + $0x8] sm:$0xff] %vm1478_vm7, %v1462_v41  ;;  %v1315_v47 = vpop.f32.mrb[40].mxu1 }
 0x239   :  { %vm1428_vm9 = vcmp.gt.f32.partialorder %v1410_v42, 0.0  ;;  %v1446_v45 = vmul.f32 %v10906_v25, %v1410_v42  ;;  %v1387_v60 = vadd.f32 %v1315_v47, %v10811_v53  ;;  %v9195_v48 = vpop.f32.mrb[41].mxu1  ;;  %v8405_v53 = vld [vmem:[%s12630_s1 + $0x1b8] sm:$0xff] }
 0x23a   :  { %9328 = vmatmul.mubr.msk.f32.gmra.mrb[88].mxu1 %vm102_vm1, %v8405_v53 }
 0x23b   :  { %v1463_v63 = vsel %vm1428_vm9, %v1410_v42, %v1446_v45  ;;  %v1411_v51 = vadd.f32 %v10896_v22, %v1387_v60  ;;  %9330 = vmatprep.mubr.msk.f32.mxu1 %vm102_vm1, %v8406_v4  ;;  %v8413_v60 = vld [vmem:[%s12630_s1 + $0x1f8] sm:$0xff] }
 0x23c   :  { %1481 = vst.msk [vmem:[#allocation2 + $0x10] sm:$0xff] %vm1478_vm7, %v1463_v63  ;;  %v1320_v55 = vpop.f32.mrb[42].mxu1 }
 0x23d   :  { %vm1429_vm10 = vcmp.gt.f32.partialorder %v1411_v51, 0.0  ;;  %v1447_v58 = vmul.f32 %v10906_v25, %v1411_v51  ;;  %v1388_v62 = vadd.f32 %v1320_v55, %v10816_v1  ;;  %v9198_v2 = vpop.f32.mrb[43].mxu1  ;;  %v8407_v1 = vld [vmem:[%s12630_s1 + $0x1c8] sm:$0xff]  ;;  %v8414_v55 = vld [vmem:[%s12630_s1 + $0x200] sm:$0xff] }
 0x23e   :  { %9331 = vmatmul.mubr.msk.f32.gmra.mrb[90].mxu1 %vm102_vm1, %v8407_v1 }
 0x23f   :  { %v1464_v5 = vsel %vm1429_vm10, %v1411_v51, %v1447_v58  ;;  %v1412_v6 = vadd.f32 %v10896_v22, %v1388_v62  ;;  %v1497_v8 = vld [vmem:[#allocation2] ss:$2 sm:$0xff]  ;;  %v1506_v34 = vld [vmem:[#allocation2 + $0x1] ss:$2 sm:$0xff]  ;;  %9333 = vmatprep.mubr.msk.f32.mxu1 %vm102_vm1, %v8408_v19 }
 0x240   :  { %1482 = vst.msk [vmem:[#allocation2 + $0x18] sm:$0xff] %vm1478_vm7, %v1464_v5  ;;  %v1325_v52 = vpop.f32.mrb[44].mxu1  ;;  %v1515_v17 = vmax.f32 %v1497_v8, %v1506_v34 }
 0x241   :  { %vm1430_vm11 = vcmp.gt.f32.partialorder %v1412_v6, 0.0  ;;  %v1448_v11 = vmul.f32 %v10906_v25, %v1412_v6  ;;  %v1389_v12 = vadd.f32 %v1325_v52, %v10818_v7  ;;  %v9201_v13 = vpop.f32.mrb[45].mxu1  ;;  %v8409_v7 = vld [vmem:[%s12630_s1 + $0x1d8] sm:$0xff]  ;;  %v8415_v52 = vld [vmem:[%s12630_s1 + $0x208] sm:$0xff] }
 0x242   :  { %v1535_v43 = vmul.f32 %v10967_v21, %v1515_v17  ;;  %vm1525_vm15 = vcmp.gt.f32.partialorder %v1515_v17, 0.0  ;;  %9334 = vmatmul.mubr.msk.f32.gmra.mrb[92].mxu1 %vm102_vm1, %v8409_v7  ;;  %v8416_v13 = vld [vmem:[%s12630_s1 + $0x210] sm:$0xff] }
 0x243   :  { %v1465_v39 = vsel %vm1430_vm11, %v1412_v6, %v1448_v11  ;;  %v1413_v44 = vadd.f32 %v10896_v22, %v1389_v12  ;;  %9336 = vmatprep.mubr.msk.f32.mxu1 %vm102_vm1, %v8410_v30 }
 0x244   :  { %1483 = vst.msk [vmem:[#allocation2 + $0x20] sm:$0xff] %vm1478_vm7, %v1465_v39  ;;  %v1330_v24 = vpop.f32.mrb[46].mxu1  ;;  %v10991_v33 = vsel %vm1525_vm15, %v1515_v17, %v1535_v43 }
 0x245   :  { %vm1431_vm14 = vcmp.gt.f32.partialorder %v1413_v44, 0.0  ;;  %v1449_v29 = vmul.f32 %v10906_v25, %v1413_v44  ;;  %v1390_v50 = vadd.f32 %v1330_v24, %v10820_v10  ;;  %v9204_v23 = vpop.f32.mrb[47].mxu1  ;;  %v8411_v10 = vld [vmem:[%s12630_s1 + $0x1e8] sm:$0xff]  ;;  %v1835_v53 = vrot.slane %v10991_v33, 2  ;;  %v1556_v24 = vld [vmem:[%s12635_s6 + $0x18] sm:$0xff] }
 0x246   :  { %9337 = vmatmul.mubr.msk.f32.gmra.mrb[94].mxu1 %vm102_vm1, %v8411_v10 }
 0x247   :  { %v1466_v3 = vsel %vm1431_vm14, %v1413_v44, %v1449_v29  ;;  %v1414_v18 = vadd.f32 %v10896_v22, %v1390_v50  ;;  %v1498_v0 = vld [vmem:[#allocation2 + $0x10] ss:$2 sm:$0xff]  ;;  %v1507_v16 = vld [vmem:[#allocation2 + $0x11] ss:$2 sm:$0xff]  ;;  %9339 = vmatprep.mubr.msk.f32.mxu1 %vm102_vm1, %v8412_v36 }
 0x248   :  { %1484 = vst.msk [vmem:[#allocation2 + $0x28] sm:$0xff] %vm1478_vm7, %v1466_v3  ;;  %v1335_v26 = vpop.f32.mrb[48].mxu1  ;;  %v1516_v27 = vmax.f32 %v1498_v0, %v1507_v16  ;;  %v1555_v44 = vld [vmem:[%s12635_s6 + $0x10] sm:$0xff]  ;;  %v8417_v29 = vld [vmem:[%s12630_s1 + $0x218] sm:$0xf] }
 0x249   :  { %vm1432_vm5 = vcmp.gt.f32.partialorder %v1414_v18, 0.0  ;;  %v1450_v28 = vmul.f32 %v10906_v25, %v1414_v18  ;;  %v1391_v40 = vadd.f32 %v1335_v26, %v10822_v15  ;;  %v9207_v31 = vpop.f32.mrb[49].mxu1  ;;  %v1571_v15 = vrot.slane %v10991_v33, 1 }
 0x24a   :  { %vm1526_vm6 = vcmp.gt.f32.partialorder %v1516_v27, 0.0  ;;  %v1536_v41 = vmul.f32 %v10967_v21, %v1516_v27  ;;  %9340 = vmatmul.mubr.msk.f32.gmra.mrb[96].mxu1 %vm102_vm1, %v8413_v60  ;;  %v9657_v3 = vpack.c.bf16 %v1556_v24, %v1555_v44 }
 0x24b   :  { %v1467_v42 = vsel %vm1432_vm5, %v1414_v18, %v1450_v28  ;;  %v1415_v47 = vadd.f32 %v10896_v22, %v1391_v40  ;;  %9342 = vmatprep.mubr.msk.f32.mxu1 %vm102_vm1, %v8414_v55  ;;  %v8369_v18 = vld [vmem:[%s12635_s6 + $0x40] sm:$0xff] }
 0x24c   :  { %1485 = vst.msk [vmem:[#allocation2 + $0x30] sm:$0xff] %vm1478_vm7, %v1467_v42  ;;  %v1340_v61 = vpop.f32.mrb[50].mxu1  ;;  %v11000_v45 = vsel %vm1526_vm6, %v1516_v27, %v1536_v41 }
 0x24d   :  { %vm1433_vm0 = vcmp.gt.f32.partialorder %v1415_v47, 0.0  ;;  %v1451_v48 = vmul.f32 %v10906_v25, %v1415_v47  ;;  %v1392_v49 = vadd.f32 %v1340_v61, %v10824_v20  ;;  %v9210_v63 = vpop.f32.mrb[51].mxu1  ;;  %v1572_v51 = vrot.slane %v11000_v45, 1 }
 0x24e   :  { %v1836_v58 = vrot.slane %v11000_v45, 2  ;;  %9343 = vmatmul.mubr.msk.f32.gmra.mrb[98].mxu1 %vm102_vm1, %v8415_v52 }
 0x24f   :  { %v1468_v62 = vsel %vm1433_vm0, %v1415_v47, %v1451_v48  ;;  %v1416_v2 = vadd.f32 %v10896_v22, %v1392_v49  ;;  %v1573_v4 = vsel %vm755_vm12, %v1571_v15, %v1572_v51  ;;  %v1499_v5 = vld [vmem:[#allocation2 + $0x20] ss:$2 sm:$0xff]  ;;  %v1508_v6 = vld [vmem:[#allocation2 + $0x21] ss:$2 sm:$0xff]  ;;  %9345 = vmatprep.mubr.msk.f32.mxu1 %vm102_vm1, %v8416_v13 }
 0x250   :  { %1486 = vst.msk [vmem:[#allocation2 + $0x38] sm:$0xff] %vm1478_vm7, %v1468_v62  ;;  %v1345_v20 = vpop.f32.mrb[52].mxu1  ;;  %9243 = vmatprep.mubr.msk.f32.mxu0 %vm1478_vm7, %v1573_v4  ;;  %v1517_v8 = vmax.f32 %v1499_v5, %v1508_v6  ;;  %v11021_v34 = vsel %vm1166_vm13, %v1835_v53, %v1836_v58 }
 0x251   :  { %vm1434_vm8 = vcmp.gt.f32.partialorder %v1416_v2, 0.0  ;;  %v1452_v1 = vmul.f32 %v10906_v25, %v1416_v2  ;;  %v1393_v11 = vadd.f32 %v1345_v20, %v10826_v59  ;;  %v9213_v12 = vpop.f32.mrb[53].mxu1 }
 0x252   :  { %vm1527_vm9 = vcmp.gt.f32.partialorder %v1517_v8, 0.0  ;;  %v1537_v17 = vmul.f32 %v10967_v21, %v1517_v8  ;;  %9346 = vmatmul.mubr.msk.f32.gmra.mrb[100].mxu1 %vm102_vm1, %v8417_v29 }
 0x253   :  { %v1469_v19 = vsel %vm1434_vm8, %v1416_v2, %v1452_v1  ;;  %v1417_v39 = vadd.f32 %v10896_v22, %v1393_v11  ;;  %9431 = vmatprep.mubr.msk.f32.mxu1 %vm10100_vm2, %v10101_v57 }
 0x254   :  { %1487 = vst.msk [vmem:[#allocation2 + $0x40] sm:$0xff] %vm1478_vm7, %v1469_v19  ;;  %v1350_v59 = vpop.f32.mrb[54].mxu1  ;;  %v11042_v7 = vsel %vm1527_vm9, %v1517_v8, %v1537_v17 }
 0x255   :  { %vm1435_vm10 = vcmp.gt.f32.partialorder %v1417_v39, 0.0  ;;  %v1453_v50 = vmul.f32 %v10906_v25, %v1417_v39  ;;  %v1394_v23 = vadd.f32 %v1350_v59, %v10828_v9  ;;  %v9216_v43 = vpop.f32.mrb[55].mxu1  ;;  %v1574_v30 = vrot.slane %v11042_v7, 1  ;;  %v8370_v9 = vld [vmem:[%s12635_s6 + $0x48] sm:$0xff] }
 0x256   :  { %v1838_v0 = vrot.slane %v11042_v7, 2  ;;  %v11074_v15 = vpack.c.bf16 %v8370_v9, %v8369_v18 }
 0x257   :  { %v1470_v16 = vsel %vm1435_vm10, %v1417_v39, %v1453_v50  ;;  %v1418_v26 = vadd.f32 %v10896_v22, %v1394_v23  ;;  %v1575_v27 = vsel %vm755_vm12, %v1572_v51, %v1574_v30  ;;  %v1500_v10 = vld [vmem:[#allocation2 + $0x30] ss:$2 sm:$0xff]  ;;  %v1509_v28 = vld [vmem:[#allocation2 + $0x31] ss:$2 sm:$0xff] }
 0x258   :  { %1488 = vst.msk [vmem:[#allocation2 + $0x48] sm:$0xff] %vm1478_vm7, %v1470_v16  ;;  %v1355_v40 = vpop.f32.mrb[56].mxu1  ;;  %9244 = vmatmul.mubr.msk.f32.vlgmr.msra.gmra.mrb[68].mxu0 %vm1478_vm7, %v1575_v27  ;;  %v1518_v31 = vmax.f32 %v1500_v10, %v1509_v28  ;;  %v11066_v36 = vsel %vm1166_vm13, %v1836_v58, %v1838_v0 }
 0x259   :  { %vm1436_vm11 = vcmp.gt.f32.partialorder %v1418_v26, 0.0  ;;  %v1454_v41 = vmul.f32 %v10906_v25, %v1418_v26  ;;  %v1395_v42 = vadd.f32 %v1355_v40, %v10830_v37  ;;  %v9219_v47 = vpop.f32.mrb[57].mxu1  ;;  %9656 = vmatpush3.bf16.msra.mxu0 %v10813_v54 }
 0x25a   :  { %vm1528_vm1 = vcmp.gt.f32.partialorder %v1518_v31, 0.0  ;;  %v1538_v61 = vmul.f32 %v10967_v21, %v1518_v31  ;;  %9658 = vmatprep.subr.bf16.mxu0 %v9657_v3 }
 0x25b   :  { %v1471_v60 = vsel %vm1436_vm11, %v1418_v26, %v1454_v41  ;;  %v1419_v48 = vadd.f32 %v10896_v22, %v1395_v42  ;;  %vm1495_vm11 = vcmask 257024  }
 0x25c   :  { %1489 = vst.msk [vmem:[#allocation2 + $0x50] sm:$0xff] %vm1478_vm7, %v1471_v60  ;;  %v1360_v49 = vpop.f32.mrb[58].mxu1  ;;  %v11078_v63 = vsel %vm1528_vm1, %v1518_v31, %v1538_v61 }
 0x25d   :  { %vm1437_vm14 = vcmp.gt.f32.partialorder %v1419_v48, 0.0  ;;  %v1455_v37 = vmul.f32 %v10906_v25, %v1419_v48  ;;  %v1396_v51 = vadd.f32 %v1360_v49, %v10840_v32  ;;  %v9222_v54 = vpop.f32.mrb[59].mxu1  ;;  %v1576_v55 = vrot.slane %v11078_v63, 1  ;;  %9660 = vmatpush3.bf16.msra.mxu0 %v9657_v3 }
 0x25e   :  { %9662 = vmatprep.subr.bf16.mxu0 %v11074_v15 }
 0x25f   :  { %v1472_v53 = vsel %vm1437_vm14, %v1419_v48, %v1455_v37  ;;  %v1420_v58 = vadd.f32 %v10896_v22, %v1396_v51  ;;  %v1577_v62 = vsel %vm755_vm12, %v1574_v30, %v1576_v55  ;;  %v1501_v2 = vld [vmem:[#allocation2 + $0x40] ss:$2 sm:$0xff]  ;;  %v1510_v4 = vld [vmem:[#allocation2 + $0x41] ss:$2 sm:$0xff] }
 0x260   :  { %1490 = vst.msk [vmem:[#allocation2 + $0x58] sm:$0xff] %vm1478_vm7, %v1472_v53  ;;  %v1365_v5 = vpop.f32.mrb[60].mxu1  ;;  %9246 = vmatprep.mubr.msk.f32.mxu0 %vm1478_vm7, %v1577_v62  ;;  %v1519_v6 = vmax.f32 %v1501_v2, %v1510_v4 }
 0x261   :  { %vm1438_vm15 = vcmp.gt.f32.partialorder %v1420_v58, 0.0  ;;  %v1456_v32 = vmul.f32 %v10906_v25, %v1420_v58  ;;  %v1397_v20 = vadd.f32 %v1365_v5, %v10850_v46  ;;  %v9225_v8 = vpop.f32.mrb[61].mxu1 }
 0x262   :  { %vm1529_vm5 = vcmp.gt.f32.partialorder %v1519_v6, 0.0  ;;  %v1539_v52 = vmul.f32 %v10967_v21, %v1519_v6 }
 0x263   :  { %v1473_v1 = vsel %vm1438_vm15, %v1420_v58, %v1456_v32  ;;  %v1421_v11 = vadd.f32 %v10896_v22, %v1397_v20 }
 0x264   :  { %1491 = vst.msk [vmem:[#allocation2 + $0x60] sm:$0xff] %vm1478_vm7, %v1473_v1  ;;  %v1370_v12 = vpop.f32.mrb[62].mxu1  ;;  %v11093_v13 = vsel %vm1529_vm5, %v1519_v6, %v1539_v52  ;;  %v8371_v1 = vld [vmem:[%s12635_s6 + $0x50] sm:$0xff] }
 0x265   :  { %vm1439_vm6 = vcmp.gt.f32.partialorder %v1421_v11, 0.0  ;;  %v1457_v17 = vmul.f32 %v10906_v25, %v1421_v11  ;;  %v1398_v19 = vadd.f32 %v1370_v12, %v10860_v56  ;;  %v9228_v39 = vpop.f32.mrb[63].mxu1  ;;  %v1578_v46 = vrot.slane %v11093_v13, 1 }
 0x267   :  { %v1474_v44 = vsel %vm1439_vm6, %v1421_v11, %v1457_v17  ;;  %v1422_v24 = vadd.f32 %v10896_v22, %v1398_v19  ;;  %v1579_v59 = vsel %vm755_vm12, %v1576_v55, %v1578_v46  ;;  %v1502_v29 = vld [vmem:[#allocation2 + $0x50] ss:$2 sm:$0xff]  ;;  %v1511_v50 = vld [vmem:[#allocation2 + $0x51] ss:$2 sm:$0xff] }
 0x268   :  { %1492 = vst.msk [vmem:[#allocation2 + $0x68] sm:$0xff] %vm1478_vm7, %v1474_v44  ;;  %v1375_v23 = vpop.f32.mrb[64].mxu1  ;;  %9247 = vmatmul.mubr.msk.f32.gmra.mrb[70].mxu0 %vm1478_vm7, %v1579_v59  ;;  %v1520_v43 = vmax.f32 %v1502_v29, %v1511_v50  ;;  %v8372_v11 = vld [vmem:[%s12635_s6 + $0x58] sm:$0xff]  ;;  %v11179_v29 = vstv %s2474_s11 }
 0x269   :  { %vm1440_vm0 = vcmp.gt.f32.partialorder %v1422_v24, 0.0  ;;  %v1458_v30 = vmul.f32 %v10906_v25, %v1422_v24  ;;  %v1399_v56 = vadd.f32 %v1375_v23, %v10876_v35  ;;  %v9231_v3 = vpop.f32.mrb[65].mxu1 }
 0x26a   :  { %vm1530_vm8 = vcmp.gt.f32.partialorder %v1520_v43, 0.0  ;;  %v1540_v18 = vmul.f32 %v10967_v21, %v1520_v43  ;;  %v2717_v3 = vld [vmem:[%s12633_s4 + $0x8] sm:$0xff] }
 0x26b   :  { %v1475_v16 = vsel %vm1440_vm0, %v1422_v24, %v1458_v30  ;;  %v1423_v26 = vadd.f32 %v10896_v22, %v1399_v56  ;;  %v2716_v56 = vld [vmem:[%s12633_s4] sm:$0xff] }
 0x26c   :  { %1493 = vst.msk [vmem:[#allocation2 + $0x70] sm:$0xff] %vm1478_vm7, %v1475_v16  ;;  %v1380_v27 = vpop.f32.mrb[66].mxu1  ;;  %v11107_v10 = vsel %vm1530_vm8, %v1520_v43, %v1540_v18 }
 0x26d   :  { %vm1441_vm9 = vcmp.gt.f32.partialorder %v1423_v26, 0.0  ;;  %v1459_v28 = vmul.f32 %v10906_v25, %v1423_v26  ;;  %v1400_v9 = vadd.f32 %v1380_v27, %v10887_v14  ;;  %v9234_v40 = vpop.f32.mrb[67].mxu1  ;;  %v1580_v35 = vrot.slane %v11107_v10, 1 }
 0x26e   :  { %v1844_v12 = vrot.slane %v11107_v10, 2 }
 0x26f   :  { %v1476_v31 = vsel %vm1441_vm9, %v1423_v26, %v1459_v28  ;;  %v1424_v41 = vadd.f32 %v10896_v22, %v1400_v9  ;;  %v1581_v42 = vsel %vm755_vm12, %v1578_v46, %v1580_v35  ;;  %v1503_v47 = vld [vmem:[#allocation2 + $0x60] ss:$2 sm:$0xff]  ;;  %v1512_v61 = vld [vmem:[#allocation2 + $0x61] ss:$2 sm:$0xff] }
 0x270   :  { %1494 = vst.msk [vmem:[#allocation2 + $0x78] sm:$0xff] %vm1478_vm7, %v1476_v31  ;;  %9249 = vmatprep.mubr.msk.f32.mxu0 %vm1478_vm7, %v1581_v42  ;;  %v1521_v60 = vmax.f32 %v1503_v47, %v1512_v61  ;;  %v11175_v46 = vld [vmem:[%s12632_s3] ss:$0 sm:$0xff]  ;;  %v2718_v31 = vld [vmem:[%s12633_s4 + $0x10] sm:$0xff] }
 0x271   :  { %vm1442_vm10 = vcmp.gt.f32.partialorder %v1424_v41, 0.0  ;;  %v1460_v48 = vmul.f32 %v10906_v25, %v1424_v41 }
 0x272   :  { %vm1531_vm1 = vcmp.gt.f32.partialorder %v1521_v60, 0.0  ;;  %v1541_v14 = vmul.f32 %v10967_v21, %v1521_v60 }
 0x273   :  { %v1477_v49 = vsel %vm1442_vm10, %v1424_v41, %v1460_v48  ;;  %v2719_v41 = vld [vmem:[%s12633_s4 + $0x18] sm:$0xff] }
 0x274   :  { %1496 = vst.msk [vmem:[#allocation2 + $0x80] sm:$0xf] %vm1495_vm11, %v1477_v49  ;;  %v1550_v22 = vsel %vm1531_vm1, %v1521_v60, %v1541_v14  ;;  %v9685_v49 = vpack.c.bf16 %v2719_v41, %v2718_v31 }
 0x275   :  { %v1582_v37 = vrot.slane %v1550_v22, 1  ;;  %v1846_v19 = vrot.slane %v1550_v22, 2 }
 0x277   :  { %v1583_v51 = vsel %vm755_vm12, %v1580_v35, %v1582_v37  ;;  %v1504_v54 = vld [vmem:[#allocation2 + $0x70] ss:$2 sm:$0xff]  ;;  %v1513_v55 = vld [vmem:[#allocation2 + $0x71] ss:$2 sm:$0xff] }
 0x278   :  { %9250 = vmatmul.mubr.msk.f32.gmra.mrb[72].mxu0 %vm1478_vm7, %v1583_v51  ;;  %v1522_v53 = vmax.f32 %v1504_v54, %v1513_v55 }
 0x27a   :  { %vm1532_vm14 = vcmp.gt.f32.partialorder %v1522_v53, 0.0  ;;  %v1542_v58 = vmul.f32 %v10967_v21, %v1522_v53 }
 0x27b   :  { %v1505_v25 = vld [vmem:[#allocation2 + $0x80] ss:$2 sm:$0x3]  ;;  %v1514_v62 = vld [vmem:[#allocation2 + $0x81] ss:$2 sm:$0x3] }
 0x27c   :  { %v1551_v2 = vsel %vm1532_vm14, %v1522_v53, %v1542_v58  ;;  %v1523_v4 = vmax.f32 %v1505_v25, %v1514_v62 }
 0x27d   :  { %v1584_v5 = vrot.slane %v1551_v2, 1 }
 0x27e   :  { %vm1533_vm15 = vcmp.gt.f32.partialorder %v1523_v4, 0.0  ;;  %v1543_v6 = vmul.f32 %v10967_v21, %v1523_v4  ;;  %v9665_v21 = vpack.c.bf16 %v8372_v11, %v8371_v1  ;;  %v2721_v1 = vld [vmem:[%s12633_s4 + $0x28] sm:$0xff] }
 0x27f   :  { %v1585_v32 = vsel %vm755_vm12, %v1582_v37, %v1584_v5 }
 0x280   :  { %9252 = vmatprep.mubr.msk.f32.mxu0 %vm1478_vm7, %v1585_v32  ;;  %v1552_v20 = vsel %vm1533_vm15, %v1523_v4, %v1543_v6  ;;  %v8456_v6 = vld [vmem:[%s12633_s4 + $0x48] sm:$0xff] }
 0x281   :  { %v1586_v8 = vrot.slane %v1552_v20, 1 }
 0x283   :  { %v1587_v52 = vsel %vm755_vm12, %v1584_v5, %v1586_v8  ;;  %v8455_v5 = vld [vmem:[%s12633_s4 + $0x40] sm:$0xff] }
 0x284   :  { %9253 = vmatmul.mubr.msk.f32.gmra.mrb[74].mxu0 %vm1478_vm7, %v1587_v52  ;;  %v2720_v52 = vld [vmem:[%s12633_s4 + $0x20] sm:$0xff] }
 0x285   :  { %9263 = vmatprep.mubr.msk.f32.mxu0 %vm1478_vm7, %v10991_v33  ;;  %v1840_v33 = vrot.slane %v11078_v63, 2 }
 0x288   :  { %9264 = vmatmul.mubr.msk.f32.vlgmr.msra.gmra.mrb[68].mxu0 %vm1478_vm7, %v11000_v45  ;;  %v1842_v45 = vrot.slane %v11093_v13, 2 }
 0x289   :  { %9664 = vmatpush3.bf16.msra.mxu0 %v11074_v15  ;;  %9266 = vmatprep.mubr.msk.f32.mxu0 %vm1478_vm7, %v11042_v7  ;;  %v1841_v15 = vsel %vm1166_vm13, %v1838_v0, %v1840_v33 }
 0x28a   :  { %9666 = vmatprep.subr.bf16.mxu0 %v9665_v21  ;;  %v1843_v17 = vsel %vm1166_vm13, %v1840_v33, %v1842_v45  ;;  %v8457_v33 = vld [vmem:[%s12633_s4 + $0x50] sm:$0xff] }
 0x28c   :  { %9267 = vmatmul.mubr.msk.f32.gmra.mrb[70].mxu0 %vm1478_vm7, %v11078_v63  ;;  %v1848_v63 = vrot.slane %v1551_v2, 2 }
 0x28d   :  { %9269 = vmatprep.mubr.msk.f32.mxu0 %vm1478_vm7, %v11093_v13  ;;  %9668 = vmatpush3.bf16.msra.mxu0 %v9665_v21  ;;  %v1850_v13 = vrot.slane %v1552_v20, 2 }
 0x28e   :  { %9669 = vmatprep.subr.bf16.mxu0 %v10099_v38  ;;  %v1849_v7 = vsel %vm1166_vm13, %v1846_v19, %v1848_v63 }
 0x28f   :  { %v1851_v0 = vsel %vm1166_vm13, %v1848_v63, %v1850_v13  ;;  %v2722_v63 = vld [vmem:[%s12633_s4 + $0x30] sm:$0xff] }
 0x290   :  { %9270 = vmatmul.mubr.msk.f32.gmra.mrb[72].mxu0 %vm1478_vm7, %v11107_v10  ;;  %v9682_v10 = vpack.c.bf16 %v2717_v3, %v2716_v56  ;;  %v8459_v56 = vld [vmem:[%s12633_s4 + $0x60] sm:$0xff]  ;;  %v8460_v3 = vld [vmem:[%s12633_s4 + $0x68] sm:$0xff] }
 0x291   :  { %9272 = vmatprep.mubr.msk.f32.mxu0 %vm1478_vm7, %v1550_v22  ;;  %v9676_v41 = vpack.c.bf16 %v8460_v3, %v8459_v56 }
 0x292   :  { %9683 = vmatpush3.bf16.msra.mxu1 %v9682_v10 }
 0x293   :  { %9684 = vmatprep.subr.bf16.mxu1 %v10099_v38 }
 0x294   :  { %9273 = vmatmul.mubr.msk.f32.gmra.mrb[74].mxu0 %vm1478_vm7, %v1551_v2 }
 0x295   :  { %9283 = vmatprep.mubr.msk.f32.mxu0 %vm1478_vm7, %v11021_v34  ;;  %v1845_v34 = vsel %vm1166_vm13, %v1842_v45, %v1844_v12  ;;  %v8458_v45 = vld [vmem:[%s12633_s4 + $0x58] sm:$0xff] }
 0x296   :  { %9686 = vmatpush3.bf16.msra.mxu1 %v9685_v49  ;;  %v8462_v49 = vld [vmem:[%s12633_s4 + $0x78] sm:$0xff] }
 0x297   :  { %9687 = vmatprep.subr.bf16.mxu1 %v10099_v38 }
 0x298   :  { %9284 = vmatmul.mubr.msk.f32.vlgmr.msra.gmra.mrb[68].mxu0 %vm1478_vm7, %v11066_v36  ;;  %v1847_v36 = vsel %vm1166_vm13, %v1844_v12, %v1846_v19  ;;  %v9670_v19 = vpack.c.bf16 %v8456_v6, %v8455_v5 }
 0x299   :  { %9286 = vmatprep.mubr.msk.f32.mxu0 %vm1478_vm7, %v1841_v15 }
 0x29a   :  { %9671 = vmatpush3.bf16.msra.mxu0 %v9670_v19 }
 0x29b   :  { %9672 = vmatprep.subr.bf16.mxu0 %v10099_v38 }
 0x29c   :  { %9287 = vmatmul.mubr.msk.f32.gmra.mrb[70].mxu0 %vm1478_vm7, %v1843_v17 }
 0x29d   :  { %9289 = vmatprep.mubr.msk.f32.mxu0 %vm1478_vm7, %v1845_v34 }
 0x2a0   :  { %9290 = vmatmul.mubr.msk.f32.gmra.mrb[72].mxu0 %vm1478_vm7, %v1847_v36  ;;  %v2723_v36 = vld [vmem:[%s12633_s4 + $0x38] sm:$0xff] }
 0x2a1   :  { %9292 = vmatprep.mubr.msk.f32.mxu0 %vm1478_vm7, %v1849_v7 }
 0x2a4   :  { %9293 = vmatmul.mubr.msk.f32.gmra.mrb[74].mxu0 %vm1478_vm7, %v1851_v0 }
 0x2a5   :  { %9364 = vmatprep.mubr.msk.f32.mxu0 %vm10100_vm2, %v10101_v57 }
 0x2bc   :  { %v9299_v39 = vpop.f32.mrb[68].mxu1 }
 0x2bd   :  { %v2305_v44 = vpop.f32.mrb[69].mxu1  ;;  %v2311_v24 = vadd.f32 %v9299_v39, %v11175_v46  ;;  %v9688_v39 = vpack.c.bf16 %v2721_v1, %v2720_v52 }
 0x2be   :  { %v2306_v59 = vadd.f32 %v11175_v46, %v2305_v44 }
 0x2bf   :  { %v2511_v50 = vmul.f32 %v11179_v29, %v2311_v24  ;;  %vm2476_vm5 = vcmp.gt.f32.partialorder %v2311_v24, 0.0  ;;  %9689 = vmatpush3.bf16.msra.mxu1 %v9688_v39 }
 0x2c0   :  { %v2510_v23 = vmul.f32 %v11179_v29, %v2306_v59  ;;  %vm2475_vm6 = vcmp.gt.f32.partialorder %v2306_v59, 0.0  ;;  %9690 = vmatprep.subr.bf16.mxu1 %v10099_v38 }
 0x2c1   :  { %v11189_v18 = vsel %vm2476_vm5, %v2311_v24, %v2511_v50  ;;  %v9673_v50 = vpack.c.bf16 %v8458_v45, %v8457_v33 }
 0x2c2   :  { %v11191_v16 = vsel %vm2475_vm6, %v2306_v59, %v2510_v23 }
 0x2c3   :  { %9674 = vmatpush3.bf16.msra.mxu0 %v9673_v50 }
 0x2c4   :  { %v9302_v43 = vpop.f32.mrb[70].mxu1  ;;  %9675 = vmatprep.subr.bf16.mxu0 %v10099_v38 }
 0x2c5   :  { %v2315_v30 = vpop.f32.mrb[71].mxu1  ;;  %v2321_v26 = vadd.f32 %v9302_v43, %v11175_v46 }
 0x2c6   :  { %v2316_v27 = vadd.f32 %v11175_v46, %v2315_v30  ;;  %v9691_v30 = vpack.c.bf16 %v2723_v36, %v2722_v63 }
 0x2c7   :  { %v2513_v28 = vmul.f32 %v11179_v29, %v2321_v26  ;;  %vm2478_vm0 = vcmp.gt.f32.partialorder %v2321_v26, 0.0  ;;  %9677 = vmatpush3.bf16.msra.mxu0 %v9676_v41 }
 0x2c8   :  { %v2512_v9 = vmul.f32 %v11179_v29, %v2316_v27  ;;  %vm2477_vm8 = vcmp.gt.f32.partialorder %v2316_v27, 0.0  ;;  %9692 = vmatpush3.bf16.msra.mxu1 %v9691_v30  ;;  %9678 = vmatprep.subr.bf16.mxu0 %v10099_v38 }
 0x2c9   :  { %v9305_v40 = vpop.f32.mrb[72].mxu1  ;;  %v11203_v42 = vsel %vm2478_vm0, %v2321_v26, %v2513_v28 }
 0x2ca   :  { %v2325_v35 = vpop.f32.mrb[73].mxu1  ;;  %v11205_v47 = vsel %vm2477_vm8, %v2316_v27, %v2512_v9  ;;  %v2331_v61 = vadd.f32 %v9305_v40, %v11175_v46 }
 0x2cb   :  { %v2326_v60 = vadd.f32 %v11175_v46, %v2325_v35 }
 0x2cc   :  { %v2515_v22 = vmul.f32 %v11179_v29, %v2331_v61  ;;  %vm2480_vm9 = vcmp.gt.f32.partialorder %v2331_v61, 0.0 }
 0x2cd   :  { %v2514_v37 = vmul.f32 %v11179_v29, %v2326_v60  ;;  %vm2479_vm10 = vcmp.gt.f32.partialorder %v2326_v60, 0.0 }
 0x2ce   :  { %v11214_v58 = vsel %vm2480_vm9, %v2331_v61, %v2515_v22 }
 0x2cf   :  { %v11216_v25 = vsel %vm2479_vm10, %v2326_v60, %v2514_v37 }
 0x2d0   :  { %v9308_v48 = vpop.f32.mrb[74].mxu1 }
 0x2d1   :  { %v2335_v14 = vpop.f32.mrb[75].mxu1  ;;  %v2341_v54 = vadd.f32 %v9308_v48, %v11175_v46 }
 0x2d2   :  { %v2336_v55 = vadd.f32 %v11175_v46, %v2335_v14  ;;  %v8461_v14 = vld [vmem:[%s12633_s4 + $0x70] sm:$0xff] }
 0x2d3   :  { %vm2482_vm1 = vcmp.gt.f32.partialorder %v2341_v54, 0.0  ;;  %v2517_v32 = vmul.f32 %v11179_v29, %v2341_v54 }
 0x2d4   :  { %v9311_v51 = vpop.f32.mrb[76].mxu1  ;;  %vm2481_vm14 = vcmp.gt.f32.partialorder %v2336_v55, 0.0  ;;  %v2516_v20 = vmul.f32 %v11179_v29, %v2336_v55 }
 0x2d5   :  { %v2345_v53 = vpop.f32.mrb[77].mxu1  ;;  %v2351_v62 = vadd.f32 %v9311_v51, %v11175_v46  ;;  %v11243_v15 = vsel %vm2482_vm1, %v2341_v54, %v2517_v32 }
 0x2d6   :  { %v2346_v2 = vadd.f32 %v11175_v46, %v2345_v53  ;;  %v11245_v12 = vsel %vm2481_vm14, %v2336_v55, %v2516_v20 }
 0x2d7   :  { %vm2484_vm15 = vcmp.gt.f32.partialorder %v2351_v62, 0.0  ;;  %v2519_v11 = vmul.f32 %v11179_v29, %v2351_v62 }
 0x2d8   :  { %vm2483_vm5 = vcmp.gt.f32.partialorder %v2346_v2, 0.0  ;;  %v2518_v21 = vmul.f32 %v11179_v29, %v2346_v2 }
 0x2d9   :  { %v9314_v4 = vpop.f32.mrb[78].mxu1  ;;  %v2553_v13 = vsel %vm2484_vm15, %v2351_v62, %v2519_v11  ;;  %v9679_v62 = vpack.c.bf16 %v8462_v49, %v8461_v14 }
 0x2da   :  { %v2355_v8 = vpop.f32.mrb[79].mxu1  ;;  %v2361_v17 = vadd.f32 %v9314_v4, %v11175_v46  ;;  %v2552_v7 = vsel %vm2483_vm5, %v2346_v2, %v2518_v21  ;;  %2587 = vst.msk [vmem:[#allocation2 + $0x48] sm:$0xff] %vm548_vm4, %v2553_v13 }
 0x2db   :  { %v2356_v0 = vadd.f32 %v11175_v46, %v2355_v8  ;;  %2586 = vst.msk [vmem:[#allocation2 + $0x40] sm:$0xff] %vm548_vm4, %v2552_v7  ;;  %9680 = vmatpush3.bf16.msra.mxu0 %v9679_v62 }
 0x2dc   :  { %vm2486_vm6 = vcmp.gt.f32.partialorder %v2361_v17, 0.0  ;;  %v2521_v24 = vmul.f32 %v11179_v29, %v2361_v17  ;;  %9693 = vmatprep.subr.bf16.mxu0 %v10099_v38 }
 0x2dd   :  { %vm2485_vm0 = vcmp.gt.f32.partialorder %v2356_v0, 0.0  ;;  %v2520_v23 = vmul.f32 %v11179_v29, %v2356_v0 }
 0x2de   :  { %v9317_v34 = vpop.f32.mrb[80].mxu1  ;;  %v2555_v26 = vsel %vm2486_vm6, %v2361_v17, %v2521_v24 }
 0x2df   :  { %v2365_v44 = vpop.f32.mrb[81].mxu1  ;;  %v2371_v59 = vadd.f32 %v9317_v34, %v11175_v46  ;;  %2589 = vst.msk [vmem:[#allocation2 + $0x58] sm:$0xff] %vm548_vm4, %v2555_v26  ;;  %v2554_v28 = vsel %vm2485_vm0, %v2356_v0, %v2520_v23 }
 0x2e0   :  { %v2366_v43 = vadd.f32 %v11175_v46, %v2365_v44  ;;  %2588 = vst.msk [vmem:[#allocation2 + $0x50] sm:$0xff] %vm548_vm4, %v2554_v28 }
 0x2e1   :  { %vm2488_vm8 = vcmp.gt.f32.partialorder %v2371_v59, 0.0  ;;  %v2523_v27 = vmul.f32 %v11179_v29, %v2371_v59 }
 0x2e2   :  { %vm2487_vm9 = vcmp.gt.f32.partialorder %v2366_v43, 0.0  ;;  %v2522_v9 = vmul.f32 %v11179_v29, %v2366_v43 }
 0x2e3   :  { %v2557_v31 = vsel %vm2488_vm8, %v2371_v59, %v2523_v27 }
 0x2e4   :  { %2591 = vst.msk [vmem:[#allocation2 + $0x68] sm:$0xff] %vm548_vm4, %v2557_v31  ;;  %v2556_v60 = vsel %vm2487_vm9, %v2366_v43, %v2522_v9 }
 0x2e5   :  { %2590 = vst.msk [vmem:[#allocation2 + $0x60] sm:$0xff] %vm548_vm4, %v2556_v60 }
 0x2ed   :  { %v9320_v10 = vpop.f32.mrb[82].mxu1 }
 0x2ee   :  { %v2381_v40 = vadd.f32 %v9320_v10, %v11175_v46  ;;  %v2375_v35 = vpop.f32.mrb[83].mxu1 }
 0x2ef   :  { %v2376_v61 = vadd.f32 %v11175_v46, %v2375_v35 }
 0x2f0   :  { %vm2490_vm10 = vcmp.gt.f32.partialorder %v2381_v40, 0.0  ;;  %v2525_v48 = vmul.f32 %v11179_v29, %v2381_v40 }
 0x2f1   :  { %vm2489_vm1 = vcmp.gt.f32.partialorder %v2376_v61, 0.0  ;;  %v2524_v22 = vmul.f32 %v11179_v29, %v2376_v61  ;;  %v9323_v37 = vpop.f32.mrb[84].mxu1 }
 0x2f2   :  { %v2559_v51 = vsel %vm2490_vm10, %v2381_v40, %v2525_v48  ;;  %v2391_v54 = vadd.f32 %v9323_v37, %v11175_v46  ;;  %v2385_v55 = vpop.f32.mrb[85].mxu1 }
 0x2f3   :  { %2593 = vst.msk [vmem:[#allocation2 + $0x78] sm:$0xff] %vm548_vm4, %v2559_v51  ;;  %v2558_v53 = vsel %vm2489_vm1, %v2376_v61, %v2524_v22  ;;  %v2386_v2 = vadd.f32 %v11175_v46, %v2385_v55 }
 0x2f4   :  { %2592 = vst.msk [vmem:[#allocation2 + $0x70] sm:$0xff] %vm548_vm4, %v2558_v53  ;;  %vm2492_vm14 = vcmp.gt.f32.partialorder %v2391_v54, 0.0  ;;  %v2527_v4 = vmul.f32 %v11179_v29, %v2391_v54 }
 0x2f5   :  { %vm2491_vm15 = vcmp.gt.f32.partialorder %v2386_v2, 0.0  ;;  %v2526_v5 = vmul.f32 %v11179_v29, %v2386_v2 }
 0x2f6   :  { %v9326_v6 = vpop.f32.mrb[86].mxu1  ;;  %v2561_v32 = vsel %vm2492_vm14, %v2391_v54, %v2527_v4 }
 0x2f7   :  { %v2401_v20 = vadd.f32 %v9326_v6, %v11175_v46  ;;  %2595 = vst.msk [vmem:[#allocation2 + $0x88] sm:$0xff] %vm548_vm4, %v2561_v32  ;;  %v2560_v8 = vsel %vm2491_vm15, %v2386_v2, %v2526_v5  ;;  %v2395_v52 = vpop.f32.mrb[87].mxu1 }
 0x2f8   :  { %2594 = vst.msk [vmem:[#allocation2 + $0x80] sm:$0xff] %vm548_vm4, %v2560_v8  ;;  %v2396_v11 = vadd.f32 %v11175_v46, %v2395_v52 }
 0x2f9   :  { %vm2494_vm5 = vcmp.gt.f32.partialorder %v2401_v20, 0.0  ;;  %v2529_v1 = vmul.f32 %v11179_v29, %v2401_v20 }
 0x2fa   :  { %vm2493_vm6 = vcmp.gt.f32.partialorder %v2396_v11, 0.0  ;;  %v2528_v45 = vmul.f32 %v11179_v29, %v2396_v11 }
 0x2fb   :  { %v2563_v33 = vsel %vm2494_vm5, %v2401_v20, %v2529_v1 }
 0x2fc   :  { %2597 = vst.msk [vmem:[#allocation2 + $0x98] sm:$0xff] %vm548_vm4, %v2563_v33  ;;  %v2562_v63 = vsel %vm2493_vm6, %v2396_v11, %v2528_v45 }
 0x2fd   :  { %2596 = vst.msk [vmem:[#allocation2 + $0x90] sm:$0xff] %vm548_vm4, %v2562_v63 }
 0x30d   :  { %v9329_v21 = vpop.f32.mrb[88].mxu1 }
 0x30e   :  { %v2411_v17 = vadd.f32 %v9329_v21, %v11175_v46  ;;  %v2405_v19 = vpop.f32.mrb[89].mxu1 }
 0x30f   :  { %v2406_v34 = vadd.f32 %v11175_v46, %v2405_v19 }
 0x310   :  { %vm2496_vm0 = vcmp.gt.f32.partialorder %v2411_v17, 0.0  ;;  %v2531_v36 = vmul.f32 %v11179_v29, %v2411_v17 }
 0x311   :  { %vm2495_vm8 = vcmp.gt.f32.partialorder %v2406_v34, 0.0  ;;  %v2530_v13 = vmul.f32 %v11179_v29, %v2406_v34  ;;  %v9332_v7 = vpop.f32.mrb[90].mxu1 }
 0x312   :  { %v2565_v0 = vsel %vm2496_vm0, %v2411_v17, %v2531_v36  ;;  %v2421_v39 = vadd.f32 %v9332_v7, %v11175_v46  ;;  %v2415_v44 = vpop.f32.mrb[91].mxu1  ;;  %v8381_v36 = vld [vmem:[%s12636_s7] ss:$0 sm:$0xff] }
 0x313   :  { %2599 = vst.msk [vmem:[#allocation2 + $0xa8] sm:$0xff] %vm548_vm4, %v2565_v0  ;;  %v2564_v24 = vsel %vm2495_vm8, %v2406_v34, %v2530_v13  ;;  %v2416_v59 = vadd.f32 %v11175_v46, %v2415_v44  ;;  %v2005_v13 = vstv %s8382_s19  ;;  %s8560_s19 = sld [smem:[#allocation4 + $0x6]] }
 0x314   :  { %2598 = vst.msk [vmem:[#allocation2 + $0xa0] sm:$0xff] %vm548_vm4, %v2564_v24  ;;  %vm2498_vm9 = vcmp.gt.f32.partialorder %v2421_v39, 0.0  ;;  %v2533_v50 = vmul.f32 %v11179_v29, %v2421_v39 }
 0x315   :  { %vm2497_vm10 = vcmp.gt.f32.partialorder %v2416_v59, 0.0  ;;  %v2532_v23 = vmul.f32 %v11179_v29, %v2416_v59  ;;  %v9335_v43 = vpop.f32.mrb[92].mxu1 }
 0x316   :  { %v2567_v30 = vsel %vm2498_vm9, %v2421_v39, %v2533_v50  ;;  %v2431_v56 = vadd.f32 %v9335_v43, %v11175_v46  ;;  %v2425_v3 = vpop.f32.mrb[93].mxu1 }
 0x317   :  { %2601 = vst.msk [vmem:[#allocation2 + $0xb8] sm:$0xff] %vm548_vm4, %v2567_v30  ;;  %v2566_v26 = vsel %vm2497_vm10, %v2416_v59, %v2532_v23  ;;  %v2426_v27 = vadd.f32 %v11175_v46, %v2425_v3 }
 0x318   :  { %2600 = vst.msk [vmem:[#allocation2 + $0xb0] sm:$0xff] %vm548_vm4, %v2566_v26  ;;  %vm2500_vm1 = vcmp.gt.f32.partialorder %v2431_v56, 0.0  ;;  %v2535_v10 = vmul.f32 %v11179_v29, %v2431_v56 }
 0x319   :  { %vm2499_vm14 = vcmp.gt.f32.partialorder %v2426_v27, 0.0  ;;  %v2534_v28 = vmul.f32 %v11179_v29, %v2426_v27  ;;  %v9338_v9 = vpop.f32.mrb[94].mxu1 }
 0x31a   :  { %v2569_v40 = vsel %vm2500_vm1, %v2431_v56, %v2535_v10  ;;  %v2441_v35 = vadd.f32 %v9338_v9, %v11175_v46  ;;  %v2435_v31 = vpop.f32.mrb[95].mxu1 }
 0x31b   :  { %2603 = vst.msk [vmem:[#allocation2 + $0xc8] sm:$0xff] %vm548_vm4, %v2569_v40  ;;  %v2568_v41 = vsel %vm2499_vm14, %v2426_v27, %v2534_v28  ;;  %v2436_v61 = vadd.f32 %v11175_v46, %v2435_v31 }
 0x31c   :  { %2602 = vst.msk [vmem:[#allocation2 + $0xc0] sm:$0xff] %vm548_vm4, %v2568_v41  ;;  %vm2502_vm15 = vcmp.gt.f32.partialorder %v2441_v35, 0.0  ;;  %v2537_v60 = vmul.f32 %v11179_v29, %v2441_v35 }
 0x31d   :  { %vm2501_vm5 = vcmp.gt.f32.partialorder %v2436_v61, 0.0  ;;  %v2536_v48 = vmul.f32 %v11179_v29, %v2436_v61  ;;  %v9341_v14 = vpop.f32.mrb[96].mxu1 }
 0x31e   :  { %v2571_v49 = vsel %vm2502_vm15, %v2441_v35, %v2537_v60  ;;  %v2451_v22 = vadd.f32 %v9341_v14, %v11175_v46  ;;  %v2445_v37 = vpop.f32.mrb[97].mxu1  ;;  %vm2022_vm15 = vcmask 130048  }
 0x31f   :  { %2605 = vst.msk [vmem:[#allocation2 + $0xd8] sm:$0xff] %vm548_vm4, %v2571_v49  ;;  %v2570_v51 = vsel %vm2501_vm5, %v2436_v61, %v2536_v48  ;;  %v2446_v54 = vadd.f32 %v11175_v46, %v2445_v37 }
 0x320   :  { %2604 = vst.msk [vmem:[#allocation2 + $0xd0] sm:$0xff] %vm548_vm4, %v2570_v51  ;;  %vm2504_vm6 = vcmp.gt.f32.partialorder %v2451_v22, 0.0  ;;  %v2539_v55 = vmul.f32 %v11179_v29, %v2451_v22  ;;  %v2048_v51 = vstv %s8383_s21  ;;  %s10067_s21 = scalar_lea.vmem %s8230_s0, 32768 }
 0x321   :  { %vm2503_vm0 = vcmp.gt.f32.partialorder %v2446_v54, 0.0  ;;  %v2538_v53 = vmul.f32 %v11179_v29, %v2446_v54  ;;  %v9344_v62 = vpop.f32.mrb[98].mxu1  ;;  %p10068_p13 = scmp.ne.s32.totalorder %s8230_s0, %s10067_s21  ;;  %p10073_p1 = scmp.lt.s32.totalorder %s10067_s21, %s10067_s21 }
 0x322   :  { %v2573_v2 = vsel %vm2504_vm6, %v2451_v22, %v2539_v55  ;;  %v2461_v4 = vadd.f32 %v9344_v62, %v11175_v46  ;;  %v2455_v5 = vpop.f32.mrb[99].mxu1 }
 0x323   :  { %2607 = vst.msk [vmem:[#allocation2 + $0xe8] sm:$0xff] %vm548_vm4, %v2573_v2  ;;  %v2572_v6 = vsel %vm2503_vm0, %v2446_v54, %v2538_v53  ;;  %v2456_v32 = vadd.f32 %v11175_v46, %v2455_v5  ;;  %p10074_p2 = por %p10073_p1, %p10072_p0 }
 0x324   :  { %2606 = vst.msk [vmem:[#allocation2 + $0xe0] sm:$0xff] %vm548_vm4, %v2572_v6  ;;  %vm2506_vm8 = vcmp.gt.f32.partialorder %v2461_v4, 0.0  ;;  %v2541_v20 = vmul.f32 %v11179_v29, %v2461_v4 }
 0x325   :  { %vm2505_vm9 = vcmp.gt.f32.partialorder %v2456_v32, 0.0  ;;  %v2540_v8 = vmul.f32 %v11179_v29, %v2456_v32  ;;  %v9347_v52 = vpop.f32.mrb[100].mxu1  ;;  %p10075_p3 = pnand %p10074_p2, %p10068_p13 }
 0x326   :  { %v2575_v1 = vsel %vm2506_vm8, %v2461_v4, %v2541_v20  ;;  %v2471_v11 = vadd.f32 %v9347_v52, %v11175_v46  ;;  %v2465_v21 = vpop.f32.mrb[101].mxu1 }
 0x327   :  { %2609 = vst.msk [vmem:[#allocation2 + $0xf8] sm:$0xff] %vm548_vm4, %v2575_v1  ;;  %v2574_v33 = vsel %vm2505_vm9, %v2456_v32, %v2540_v8  ;;  %v2466_v45 = vadd.f32 %v11175_v46, %v2465_v21 }
 0x328   :  { %2608 = vst.msk [vmem:[#allocation2 + $0xf0] sm:$0xff] %vm548_vm4, %v2574_v33  ;;  %vm2508_vm10 = vcmp.gt.f32.partialorder %v2471_v11, 0.0  ;;  %v2543_v17 = vmul.f32 %v11179_v29, %v2471_v11  ;;  %v11367_v33 = vstv %s8454_s22 }
 0x329   :  { %vm2507_vm1 = vcmp.gt.f32.partialorder %v2466_v45, 0.0  ;;  %v2542_v19 = vmul.f32 %v11179_v29, %v2466_v45 }
 0x32a   :  { %v2577_v34 = vsel %vm2508_vm10, %v2471_v11, %v2543_v17 }
 0x32b   :  { %2611 = vst.msk [vmem:[#allocation2 + $0x108] sm:$0xf] %vm582_vm3, %v2577_v34  ;;  %v2576_v63 = vsel %vm2507_vm1, %v2466_v45, %v2542_v19  ;;  %v2616_v45 = vld [vmem:[#allocation2 + $0x40] ss:$2 sm:$0xff] }
 0x32c   :  { %2610 = vst.msk [vmem:[#allocation2 + $0x100] sm:$0xff] %vm548_vm4, %v2576_v63 }
 0x36b   :  { %v9285_v46 = vpop.f32.mrb[68].mxu0 }
 0x36c   :  { %v1989_v7 = vadd.f32 %v9285_v46, %v8381_v36  ;;  %v1934_v0 = vpop.f32.mrb[69].mxu0  ;;  %v2633_v46 = vld [vmem:[#allocation2 + $0x41] ss:$2 sm:$0xff] }
 0x36d   :  { %v1988_v39 = vadd.f32 %v8381_v36, %v1934_v0 }
 0x36e   :  { %vm1998_vm14 = vcmp.gt.f32.partialorder %v1989_v7, 0.0  ;;  %v2007_v44 = vmul.f32 %v2005_v13, %v1989_v7 }
 0x36f   :  { %vm1997_vm5 = vcmp.gt.f32.partialorder %v1988_v39, 0.0  ;;  %v2006_v29 = vmul.f32 %v2005_v13, %v1988_v39  ;;  %v9288_v24 = vpop.f32.mrb[70].mxu0 }
 0x370   :  { %v2015_v59 = vsel %vm1998_vm14, %v1989_v7, %v2007_v44  ;;  %v1991_v50 = vadd.f32 %v9288_v24, %v8381_v36  ;;  %v1944_v23 = vpop.f32.mrb[71].mxu0  ;;  %v2650_v24 = vmax.f32 %v2616_v45, %v2633_v46  ;;  %v8503_v45 = vld [vmem:[%s12633_s4 + $0xb0] sm:$0xff] }
 0x371   :  { %2024 = vst.msk [vmem:[#allocation2 + $0x8] sm:$0xff] %vm2022_vm15, %v2015_v59  ;;  %v2014_v43 = vsel %vm1997_vm5, %v1988_v39, %v2006_v29  ;;  %v1990_v30 = vadd.f32 %v8381_v36, %v1944_v23  ;;  %v8497_v39 = vld [vmem:[%s12633_s4 + $0x80] sm:$0xff] }
 0x372   :  { %2023 = vst.msk [vmem:[#allocation2] sm:$0xff] %vm2022_vm15, %v2014_v43  ;;  %vm2000_vm3 = vcmp.gt.f32.partialorder %v1991_v50, 0.0  ;;  %v2009_v56 = vmul.f32 %v2005_v13, %v1991_v50 }
 0x373   :  { %vm1999_vm6 = vcmp.gt.f32.partialorder %v1990_v30, 0.0  ;;  %v2008_v3 = vmul.f32 %v2005_v13, %v1990_v30  ;;  %v9291_v26 = vpop.f32.mrb[72].mxu0 }
 0x374   :  { %v2017_v27 = vsel %vm2000_vm3, %v1991_v50, %v2009_v56  ;;  %v1993_v10 = vadd.f32 %v9291_v26, %v8381_v36  ;;  %v1954_v28 = vpop.f32.mrb[73].mxu0 }
 0x375   :  { %2026 = vst.msk [vmem:[#allocation2 + $0x18] sm:$0xff] %vm2022_vm15, %v2017_v27  ;;  %v2016_v9 = vsel %vm1999_vm6, %v1990_v30, %v2008_v3  ;;  %v1992_v40 = vadd.f32 %v8381_v36, %v1954_v28  ;;  %v2617_v3 = vld [vmem:[#allocation2 + $0x50] ss:$2 sm:$0xff]  ;;  %v2634_v28 = vld [vmem:[#allocation2 + $0x51] ss:$2 sm:$0xff] }
 0x376   :  { %2025 = vst.msk [vmem:[#allocation2 + $0x10] sm:$0xff] %vm2022_vm15, %v2016_v9  ;;  %vm2002_vm0 = vcmp.gt.f32.partialorder %v1993_v10, 0.0  ;;  %v2011_v35 = vmul.f32 %v2005_v13, %v1993_v10 }
 0x377   :  { %vm2001_vm8 = vcmp.gt.f32.partialorder %v1992_v40, 0.0  ;;  %v2010_v31 = vmul.f32 %v2005_v13, %v1992_v40  ;;  %v9294_v41 = vpop.f32.mrb[74].mxu0 }
 0x378   :  { %v2019_v61 = vsel %vm2002_vm0, %v1993_v10, %v2011_v35  ;;  %v1995_v60 = vadd.f32 %v9294_v41, %v8381_v36  ;;  %v1964_v48 = vpop.f32.mrb[75].mxu0  ;;  %v2686_v35 = vmul.f32 %v11367_v33, %v2650_v24 }
 0x379   :  { %2028 = vst.msk [vmem:[#allocation2 + $0x28] sm:$0xff] %vm2022_vm15, %v2019_v61  ;;  %v2018_v14 = vsel %vm2001_vm8, %v1992_v40, %v2010_v31  ;;  %v1994_v49 = vadd.f32 %v8381_v36, %v1964_v48  ;;  %v2031_v22 = vld [vmem:[#allocation2] ss:$2 sm:$0xff]  ;;  %v2035_v37 = vld [vmem:[#allocation2 + $0x1] ss:$2 sm:$0xff]  ;;  %v8500_v48 = vld [vmem:[%s12633_s4 + $0x98] sm:$0xff] }
 0x37a   :  { %2027 = vst.msk [vmem:[#allocation2 + $0x20] sm:$0xff] %vm2022_vm15, %v2018_v14  ;;  %vm2004_vm9 = vcmp.gt.f32.partialorder %v1995_v60, 0.0  ;;  %v2013_v54 = vmul.f32 %v2005_v13, %v1995_v60  ;;  %v2039_v55 = vmax.f32 %v2031_v22, %v2035_v37  ;;  %v2651_v37 = vmax.f32 %v2617_v3, %v2634_v28 }
 0x37b   :  { %2578 = vst.msk [vmem:[#allocation2] sm:$0xff] %vm548_vm4, %v11191_v16  ;;  %2579 = vst.msk [vmem:[#allocation2 + $0x8] sm:$0xff] %vm548_vm4, %v11189_v18  ;;  %vm2003_vm10 = vcmp.gt.f32.partialorder %v1994_v49, 0.0  ;;  %v2012_v53 = vmul.f32 %v2005_v13, %v1994_v49 }
 0x37c   :  { %v2021_v62 = vsel %vm2004_vm9, %v1995_v60, %v2013_v54  ;;  %vm2044_vm1 = vcmp.gt.f32.partialorder %v2039_v55, 0.0  ;;  %v2049_v2 = vmul.f32 %v2048_v51, %v2039_v55  ;;  %v8499_v60 = vld [vmem:[%s12633_s4 + $0x90] sm:$0xff]  ;;  %vm2668_vm9 = vcmp.gt.f32.partialorder %v2650_v24, 0.0  ;;  %v2618_v54 = vld [vmem:[#allocation2 + $0x60] ss:$2 sm:$0xff] }
 0x37d   :  { %2030 = vst.msk [vmem:[#allocation2 + $0x38] sm:$0xff] %vm2022_vm15, %v2021_v62  ;;  %v2020_v4 = vsel %vm2003_vm10, %v1994_v49, %v2012_v53  ;;  %v2032_v5 = vld [vmem:[#allocation2 + $0x10] ss:$2 sm:$0xff]  ;;  %v2036_v6 = vld [vmem:[#allocation2 + $0x11] ss:$2 sm:$0xff]  ;;  %v9697_v62 = vpack.c.bf16 %v8500_v48, %v8499_v60 }
 0x37e   :  { %2029 = vst.msk [vmem:[#allocation2 + $0x30] sm:$0xff] %vm2022_vm15, %v2020_v4  ;;  %v2053_v32 = vsel %vm2044_vm1, %v2039_v55, %v2049_v2  ;;  %v2040_v20 = vmax.f32 %v2032_v5, %v2036_v6  ;;  %v2635_v55 = vld [vmem:[#allocation2 + $0x61] ss:$2 sm:$0xff]  ;;  %v11412_v5 = vsel %vm2668_vm9, %v2650_v24, %v2686_v35  ;;  %vm2669_vm1 = vcmp.gt.f32.partialorder %v2651_v37, 0.0 }
 0x37f   :  { %2580 = vst.msk [vmem:[#allocation2 + $0x10] sm:$0xff] %vm548_vm4, %v11205_v47  ;;  %2581 = vst.msk [vmem:[#allocation2 + $0x18] sm:$0xff] %vm548_vm4, %v11203_v42  ;;  %2057 = vxpose.xlu0.b32.start [1/4] (short) (narrow) %v2053_v32, 16  ;;  %v8501_v6 = vld [vmem:[%s12633_s4 + $0xa0] sm:$0xff]  ;;  %v8502_v32 = vld [vmem:[%s12633_s4 + $0xa8] sm:$0xff] }
 0x380   :  { %vm2045_vm14 = vcmp.gt.f32.partialorder %v2040_v20, 0.0  ;;  %v2050_v18 = vmul.f32 %v2048_v51, %v2040_v20 }
 0x381   :  { %v2033_v16 = vld [vmem:[#allocation2 + $0x20] ss:$2 sm:$0xff]  ;;  %v2037_v8 = vld [vmem:[#allocation2 + $0x21] ss:$2 sm:$0xff] }
 0x382   :  { %v2612_v52 = vld [vmem:[#allocation2] ss:$2 sm:$0xff]  ;;  %v2054_v1 = vsel %vm2045_vm14, %v2040_v20, %v2050_v18  ;;  %v2041_v11 = vmax.f32 %v2033_v16, %v2037_v8  ;;  %2582 = vst.msk [vmem:[#allocation2 + $0x20] sm:$0xff] %vm548_vm4, %v11216_v25  ;;  %2583 = vst.msk [vmem:[#allocation2 + $0x28] sm:$0xff] %vm548_vm4, %v11214_v58  ;;  %v2629_v21 = vld [vmem:[#allocation2 + $0x1] ss:$2 sm:$0xff]  ;;  %v2687_v16 = vmul.f32 %v11367_v33, %v2651_v37 }
 0x383   :  { %2058 = vxpose.xlu0.b32.cont [2/4] (short) (narrow) %v2054_v1, 16  ;;  %v2646_v47 = vmax.f32 %v2612_v52, %v2629_v21  ;;  %v2652_v8 = vmax.f32 %v2618_v54, %v2635_v55  ;;  %v2619_v52 = vld [vmem:[#allocation2 + $0x70] ss:$2 sm:$0xff]  ;;  %v2636_v1 = vld [vmem:[#allocation2 + $0x71] ss:$2 sm:$0xff]  ;;  %v9700_v21 = vpack.c.bf16 %v8502_v32, %v8501_v6 }
 0x384   :  { %vm2046_vm5 = vcmp.gt.f32.partialorder %v2041_v11, 0.0  ;;  %v2051_v42 = vmul.f32 %v2048_v51, %v2041_v11  ;;  %v2642_v54 = vld [vmem:[#allocation2 + $0xd1] ss:$2 sm:$0xff] }
 0x385   :  { %vm2664_vm3 = vcmp.gt.f32.partialorder %v2646_v47, 0.0  ;;  %v2682_v17 = vmul.f32 %v11367_v33, %v2646_v47  ;;  %v2034_v19 = vld [vmem:[#allocation2 + $0x30] ss:$2 sm:$0xff]  ;;  %v2038_v34 = vld [vmem:[#allocation2 + $0x31] ss:$2 sm:$0xff]  ;;  %vm2670_vm14 = vcmp.gt.f32.partialorder %v2652_v8, 0.0 }
 0x386   :  { %v2055_v63 = vsel %vm2046_vm5, %v2041_v11, %v2051_v42  ;;  %v2042_v36 = vmax.f32 %v2034_v19, %v2038_v34  ;;  %2584 = vst.msk [vmem:[#allocation2 + $0x30] sm:$0xff] %vm548_vm4, %v11245_v12  ;;  %2585 = vst.msk [vmem:[#allocation2 + $0x38] sm:$0xff] %vm548_vm4, %v11243_v15  ;;  %v2613_v58 = vld [vmem:[#allocation2 + $0x10] ss:$2 sm:$0xff]  ;;  %v2630_v25 = vld [vmem:[#allocation2 + $0x11] ss:$2 sm:$0xff]  ;;  %v11446_v19 = vsel %vm2669_vm1, %v2651_v37, %v2687_v16 }
 0x387   :  { %2059 = vxpose.xlu0.b32.cont [3/4] (short) (narrow) %v2055_v63, 16  ;;  %v2699_v13 = vsel %vm2664_vm3, %v2646_v47, %v2682_v17  ;;  %v2647_v7 = vmax.f32 %v2613_v58, %v2630_v25  ;;  %v8498_v12 = vld [vmem:[%s12633_s4 + $0x88] sm:$0xff]  ;;  %v2756_v42 = vrot.slane %v11412_v5, 1  ;;  %v8504_v17 = vld [vmem:[%s12633_s4 + $0xb8] sm:$0xff]  ;;  %v2688_v34 = vmul.f32 %v11367_v33, %v2652_v8 }
 0x388   :  { %9432 = vmatmul.mubr.msk.f32.vlgmr.msra.gmra.mrb[102].mxu1 %vm548_vm4, %v2699_v13  ;;  %vm2047_vm6 = vcmp.gt.f32.partialorder %v2042_v36, 0.0  ;;  %v2052_v0 = vmul.f32 %v2048_v51, %v2042_v36  ;;  %v2749_v23 = vrot.slane %v2699_v13, 1  ;;  %v3158_v43 = vrot.slane %v2699_v13, 2  ;;  %v2637_v58 = vld [vmem:[#allocation2 + $0x81] ss:$2 sm:$0xff] }
 0x389   :  { %9434 = vmatprep.mubr.msk.f32.mxu1 %vm10100_vm2, %v10101_v57  ;;  %vm2665_vm0 = vcmp.gt.f32.partialorder %v2647_v7, 0.0  ;;  %v2683_v15 = vmul.f32 %v11367_v33, %v2647_v7  ;;  %v2614_v44 = vld [vmem:[#allocation2 + $0x20] ss:$2 sm:$0xff]  ;;  %v2631_v29 = vld [vmem:[#allocation2 + $0x21] ss:$2 sm:$0xff]  ;;  %v9694_v56 = vpack.c.bf16 %v8498_v12, %v8497_v39  ;;  %v2653_v63 = vmax.f32 %v2619_v52, %v2636_v1 }
 0x38a   :  { %v2056_v59 = vsel %vm2047_vm6, %v2042_v36, %v2052_v0  ;;  %v2648_v50 = vmax.f32 %v2614_v44, %v2631_v29  ;;  %v2620_v36 = vld [vmem:[#allocation2 + $0x80] ss:$2 sm:$0xff]  ;;  %v9703_v25 = vpack.c.bf16 %v8504_v17, %v8503_v45  ;;  %v2758_v13 = vrot.slane %v11446_v19, 1  ;;  %v2621_v12 = vld [vmem:[#allocation2 + $0x90] ss:$2 sm:$0xff] }
 0x38b   :  { %2060 = vxpose.xlu0.b32.end [4/4] (short) (narrow) %v2056_v59, 16  ;;  %v2700_v30 = vsel %vm2665_vm0, %v2647_v7, %v2683_v15  ;;  %v11459_v7 = vsel %vm2670_vm14, %v2652_v8, %v2688_v34  ;;  %v2689_v0 = vmul.f32 %v11367_v33, %v2653_v63  ;;  %v2654_v39 = vmax.f32 %v2620_v36, %v2637_v58  ;;  %v2638_v15 = vld [vmem:[#allocation2 + $0x91] ss:$2 sm:$0xff]  ;;  %v2643_v16 = vld [vmem:[#allocation2 + $0xe1] ss:$2 sm:$0xff] }
 0x38c   :  { %v2750_v26 = vrot.slane %v2700_v30, 1  ;;  %9435 = vmatmul.mubr.msk.f32.gmra.mrb[104].mxu1 %vm548_vm4, %v2700_v30  ;;  %v3159_v27 = vrot.slane %v2700_v30, 2  ;;  %vm2666_vm8 = vcmp.gt.f32.partialorder %v2648_v50, 0.0  ;;  %v2684_v10 = vmul.f32 %v11367_v33, %v2648_v50  ;;  %v2644_v45 = vld [vmem:[#allocation2 + $0xf1] ss:$2 sm:$0xff] }
 0x38d   :  { %9437 = vmatprep.mubr.msk.f32.mxu1 %vm10100_vm2, %v10101_v57  ;;  %v2615_v9 = vld [vmem:[#allocation2 + $0x30] ss:$2 sm:$0xff]  ;;  %v2632_v40 = vld [vmem:[#allocation2 + $0x31] ss:$2 sm:$0xff]  ;;  %vm2671_vm5 = vcmp.gt.f32.partialorder %v2653_v63, 0.0  ;;  %v2760_v44 = vrot.slane %v11459_v7, 1  ;;  %v2690_v24 = vmul.f32 %v11367_v33, %v2654_v39  ;;  %v2655_v59 = vmax.f32 %v2621_v12, %v2638_v15 }
 0x38e   :  { %v2751_v31 = vsel %vm755_vm12, %v2749_v23, %v2750_v26  ;;  %v2701_v41 = vsel %vm2666_vm8, %v2648_v50, %v2684_v10  ;;  %v2649_v61 = vmax.f32 %v2615_v9, %v2632_v40  ;;  %v11397_v14 = vsel %vm1166_vm13, %v3158_v43, %v3159_v27  ;;  %v2622_v50 = vld [vmem:[#allocation2 + $0xa0] ss:$2 sm:$0xff]  ;;  %v2639_v23 = vld [vmem:[#allocation2 + $0xa1] ss:$2 sm:$0xff]  ;;  %v2640_v10 = vld [vmem:[#allocation2 + $0xb1] ss:$2 sm:$0xff] }
 0x38f   :  { %9365 = vmatmul.mubr.msk.f32.vlgmr.msra.gmra.mrb[76].mxu0 %vm548_vm4, %v2751_v31  ;;  %v2752_v49 = vrot.slane %v2701_v41, 1  ;;  %v3161_v22 = vrot.slane %v2701_v41, 2  ;;  %v11471_v29 = vsel %vm2671_vm5, %v2653_v63, %v2689_v0  ;;  %vm2672_vm3 = vcmp.gt.f32.partialorder %v2654_v39, 0.0 }
 0x390   :  { %9695 = vmatpush3.bf16.msra.mxu0 %v9694_v56  ;;  %9438 = vmatmul.mubr.msk.f32.gmra.mrb[106].mxu1 %vm548_vm4, %v2701_v41  ;;  %vm2667_vm10 = vcmp.gt.f32.partialorder %v2649_v61, 0.0  ;;  %v2685_v51 = vmul.f32 %v11367_v33, %v2649_v61  ;;  %v2761_v43 = vsel %vm755_vm12, %v2758_v13, %v2760_v44  ;;  %v2762_v30 = vrot.slane %v11471_v29, 1  ;;  %v2624_v41 = vld [vmem:[#allocation2 + $0xc0] ss:$2 sm:$0xff] }
 0x391   :  { %9367 = vmatprep.mubr.msk.f32.mxu0 %vm10100_vm2, %v10101_v57  ;;  %v2753_v53 = vsel %vm755_vm12, %v2750_v26, %v2752_v49  ;;  %9440 = vmatprep.mubr.msk.f32.mxu1 %vm10100_vm2, %v10101_v57  ;;  %v11408_v2 = vsel %vm1166_vm13, %v3159_v27, %v3161_v22  ;;  %v11483_v56 = vsel %vm2672_vm3, %v2654_v39, %v2690_v24  ;;  %vm2673_vm6 = vcmp.gt.f32.partialorder %v2655_v59, 0.0  ;;  %v2623_v27 = vld [vmem:[#allocation2 + $0xb0] ss:$2 sm:$0xff] }
 0x392   :  { %v11410_v4 = vsel %vm2667_vm10, %v2649_v61, %v2685_v51  ;;  %9696 = vmatprep.subr.bf16.mxu0 %v10099_v38  ;;  %v2691_v3 = vmul.f32 %v11367_v33, %v2655_v59  ;;  %v2656_v26 = vmax.f32 %v2622_v50, %v2639_v23  ;;  %v2763_v28 = vsel %vm755_vm12, %v2760_v44, %v2762_v30  ;;  %v2641_v61 = vld [vmem:[#allocation2 + $0xc1] ss:$2 sm:$0xff]  ;;  %v2625_v51 = vld [vmem:[#allocation2 + $0xd0] ss:$2 sm:$0xff] }
 0x393   :  { %9368 = vmatmul.mubr.msk.f32.gmra.mrb[78].mxu0 %vm548_vm4, %v2753_v53  ;;  %v2754_v20 = vrot.slane %v11410_v4, 1  ;;  %v3163_v18 = vrot.slane %v11410_v4, 2  ;;  %v2764_v9 = vrot.slane %v11483_v56, 1  ;;  %v2657_v31 = vmax.f32 %v2623_v27, %v2640_v10 }
 0x394   :  { %9441 = vmatmul.mubr.msk.f32.gmra.mrb[108].mxu1 %vm548_vm4, %v11410_v4  ;;  %9370 = vmatprep.mubr.msk.f32.mxu0 %vm10100_vm2, %v10101_v57  ;;  %v11495_v40 = vsel %vm2673_vm6, %v2655_v59, %v2691_v3  ;;  %v2692_v35 = vmul.f32 %v11367_v33, %v2656_v26  ;;  %vm2674_vm0 = vcmp.gt.f32.partialorder %v2656_v26, 0.0  ;;  %v2658_v37 = vmax.f32 %v2624_v41, %v2641_v61 }
 0x395   :  { %v2755_v11 = vsel %vm755_vm12, %v2752_v49, %v2754_v20  ;;  %9443 = vmatprep.mubr.msk.f32.mxu1 %vm10100_vm2, %v10101_v57  ;;  %9698 = vmatpush3.bf16.msra.mxu0 %v9697_v62  ;;  %v11435_v47 = vsel %vm1166_vm13, %v3161_v22, %v3163_v18  ;;  %v2757_v46 = vsel %vm755_vm12, %v2754_v20, %v2756_v42  ;;  %v2766_v48 = vrot.slane %v11495_v40, 1  ;;  %v2626_v20 = vld [vmem:[#allocation2 + $0xe0] ss:$2 sm:$0xff] }
 0x396   :  { %9699 = vmatprep.subr.bf16.mxu0 %v10099_v38  ;;  %v2765_v60 = vsel %vm755_vm12, %v2762_v30, %v2764_v9  ;;  %v11507_v49 = vsel %vm2674_vm0, %v2656_v26, %v2692_v35  ;;  %v2693_v22 = vmul.f32 %v11367_v33, %v2657_v31  ;;  %vm2675_vm8 = vcmp.gt.f32.partialorder %v2657_v31, 0.0 }
 0x397   :  { %9371 = vmatmul.mubr.msk.f32.gmra.mrb[80].mxu0 %vm548_vm4, %v2755_v11  ;;  %v2767_v55 = vsel %vm755_vm12, %v2764_v9, %v2766_v48  ;;  %v2768_v53 = vrot.slane %v11507_v49, 1  ;;  %v2694_v6 = vmul.f32 %v11367_v33, %v2658_v37  ;;  %v2659_v32 = vmax.f32 %v2625_v51, %v2642_v54  ;;  %v8525_v54 = vld [vmem:[%s12635_s6 + $0x20] sm:$0xff] }
 0x398   :  { %9444 = vmatmul.mubr.msk.f32.gmra.mrb[110].mxu1 %vm548_vm4, %v11412_v5  ;;  %9373 = vmatprep.mubr.msk.f32.mxu0 %vm10100_vm2, %v10101_v57  ;;  %v11519_v62 = vsel %vm2675_vm8, %v2657_v31, %v2693_v22  ;;  %vm2676_vm9 = vcmp.gt.f32.partialorder %v2658_v37, 0.0  ;;  %v3165_v26 = vrot.slane %v11412_v5, 2  ;;  %v3167_v27 = vrot.slane %v11446_v19, 2 }
 0x399   :  { %9446 = vmatprep.mubr.msk.f32.mxu1 %vm10100_vm2, %v10101_v57  ;;  %9701 = vmatpush3.bf16.msra.mxu0 %v9700_v21  ;;  %v2769_v8 = vsel %vm755_vm12, %v2766_v48, %v2768_v53  ;;  %v2770_v52 = vrot.slane %v11519_v62, 1  ;;  %v11531_v1 = vsel %vm2676_vm9, %v2658_v37, %v2694_v6  ;;  %v2695_v11 = vmul.f32 %v11367_v33, %v2659_v32  ;;  %v8528_v6 = vld [vmem:[%s12635_s6 + $0x38] sm:$0xff] }
 0x39a   :  { %9702 = vmatprep.subr.bf16.mxu0 %v10099_v38  ;;  %v2759_v38 = vsel %vm755_vm12, %v2756_v42, %v2758_v13  ;;  %v2660_v21 = vmax.f32 %v2626_v20, %v2643_v16  ;;  %vm2677_vm10 = vcmp.gt.f32.partialorder %v2659_v32, 0.0  ;;  %v2627_v42 = vld [vmem:[#allocation2 + $0xf0] ss:$2 sm:$0xff]  ;;  %v2772_v34 = vrot.slane %v11531_v1, 1 }
 0x39b   :  { %9374 = vmatmul.mubr.msk.f32.gmra.mrb[82].mxu0 %vm548_vm4, %v2757_v46  ;;  %v2771_v17 = vsel %vm755_vm12, %v2768_v53, %v2770_v52  ;;  %v11543_v63 = vsel %vm2677_vm10, %v2659_v32, %v2695_v11  ;;  %v2661_v58 = vmax.f32 %v2627_v42, %v2644_v45  ;;  %v2645_v46 = vld [vmem:[#allocation2 + $0x101] ss:$2 sm:$0x3f]  ;;  %v3168_v5 = vsel %vm1166_vm13, %v3165_v26, %v3167_v27 }
 0x39c   :  { %9447 = vmatmul.mubr.msk.f32.gmra.mrb[112].mxu1 %vm548_vm4, %v11446_v19  ;;  %9376 = vmatprep.mubr.msk.f32.mxu0 %vm10100_vm2, %v10101_v57  ;;  %vm2678_vm1 = vcmp.gt.f32.partialorder %v2660_v21, 0.0  ;;  %v2696_v36 = vmul.f32 %v11367_v33, %v2660_v21  ;;  %v2773_v13 = vsel %vm755_vm12, %v2770_v52, %v2772_v34  ;;  %v2774_v0 = vrot.slane %v11543_v63, 1 }
 0x39d   :  { %9449 = vmatprep.mubr.msk.f32.mxu1 %vm10100_vm2, %v10101_v57  ;;  %9704 = vmatpush3.bf16.msra.mxu0 %v9703_v25  ;;  %v2628_v25 = vld [vmem:[#allocation2 + $0x100] ss:$2 sm:$0x3f]  ;;  %v2697_v12 = vmul.f32 %v11367_v33, %v2661_v58  ;;  %vm2679_vm14 = vcmp.gt.f32.partialorder %v2661_v58, 0.0  ;;  %v3177_v10 = vrot.slane %v11507_v49, 2  ;;  %v3183_v31 = vrot.slane %v11543_v63, 2 }
 0x39e   :  { %v11555_v39 = vsel %vm2678_vm1, %v2660_v21, %v2696_v36  ;;  %v2662_v15 = vmax.f32 %v2628_v25, %v2645_v46 }
 0x39f   :  { %9377 = vmatmul.mubr.msk.f32.gmra.mrb[84].mxu0 %vm548_vm4, %v2759_v38  ;;  %v2775_v38 = vsel %vm755_vm12, %v2772_v34, %v2774_v0  ;;  %v2776_v44 = vrot.slane %v11555_v39, 1  ;;  %v11567_v24 = vsel %vm2679_vm14, %v2661_v58, %v2697_v12  ;;  %v3185_v61 = vrot.slane %v11555_v39, 2 }
 0x3a0   :  { %9450 = vmatmul.mubr.msk.f32.gmra.mrb[114].mxu1 %vm548_vm4, %v11459_v7  ;;  %9379 = vmatprep.mubr.msk.f32.mxu0 %vm10100_vm2, %v10101_v57  ;;  %v2698_v59 = vmul.f32 %v11367_v33, %v2662_v15  ;;  %vm2680_vm5 = vcmp.gt.f32.partialorder %v2662_v15, 0.0  ;;  %v2778_v23 = vrot.slane %v11567_v24, 1  ;;  %v3187_v48 = vrot.slane %v11567_v24, 2 }
 0x3a1   :  { %9452 = vmatprep.mubr.msk.f32.mxu1 %vm10100_vm2, %v10101_v57  ;;  %v2777_v50 = vsel %vm755_vm12, %v2774_v0, %v2776_v44 }
 0x3a2   :  { %v2779_v33 = vsel %vm755_vm12, %v2776_v44, %v2778_v23  ;;  %v3188_v37 = vsel %vm1166_vm13, %v3185_v61, %v3187_v48 }
 0x3a3   :  { %9380 = vmatmul.mubr.msk.f32.gmra.mrb[86].mxu0 %vm548_vm4, %v2761_v43  ;;  %v11579_v43 = vsel %vm2680_vm5, %v2662_v15, %v2698_v59 }
 0x3a4   :  { %9453 = vmatmul.mubr.msk.f32.gmra.mrb[116].mxu1 %vm548_vm4, %v11471_v29  ;;  %9382 = vmatprep.mubr.msk.f32.mxu0 %vm10100_vm2, %v10101_v57  ;;  %v2780_v30 = vrot.slane %v11579_v43, 1  ;;  %v3189_v22 = vrot.slane %v11579_v43, 2 }
 0x3a5   :  { %9455 = vmatprep.mubr.msk.f32.mxu1 %vm10100_vm2, %v10101_v57 }
 0x3a6   :  { %v2781_v3 = vsel %vm755_vm12, %v2778_v23, %v2780_v30  ;;  %v3190_v51 = vsel %vm1166_vm13, %v3187_v48, %v3189_v22  ;;  %v3543_v23 = vld [vmem:[%s12635_s6 + $0x8] sm:$0xff] }
 0x3a7   :  { %9383 = vmatmul.mubr.msk.f32.gmra.mrb[88].mxu0 %vm548_vm4, %v2763_v28  ;;  %v3179_v28 = vrot.slane %v11519_v62, 2 }
 0x3a8   :  { %9456 = vmatmul.mubr.msk.f32.gmra.mrb[118].mxu1 %vm548_vm4, %v11483_v56  ;;  %9385 = vmatprep.mubr.msk.f32.mxu0 %vm10100_vm2, %v10101_v57 }
 0x3a9   :  { %9458 = vmatprep.mubr.msk.f32.mxu1 %vm10100_vm2, %v10101_v57  ;;  %v3180_v35 = vsel %vm1166_vm13, %v3177_v10, %v3179_v28 }
 0x3ab   :  { %9386 = vmatmul.mubr.msk.f32.gmra.mrb[90].mxu0 %vm548_vm4, %v2765_v60 }
 0x3ac   :  { %9459 = vmatmul.mubr.msk.f32.gmra.mrb[120].mxu1 %vm548_vm4, %v11495_v40  ;;  %9388 = vmatprep.mubr.msk.f32.mxu0 %vm10100_vm2, %v10101_v57 }
 0x3ad   :  { %9461 = vmatprep.mubr.msk.f32.mxu1 %vm10100_vm2, %v10101_v57 }
 0x3af   :  { %9389 = vmatmul.mubr.msk.f32.gmra.mrb[92].mxu0 %vm548_vm4, %v2767_v55  ;;  %v8526_v55 = vld [vmem:[%s12635_s6 + $0x28] sm:$0xff] }
 0x3b0   :  { %9462 = vmatmul.mubr.msk.f32.gmra.mrb[122].mxu1 %vm548_vm4, %v11507_v49  ;;  %9391 = vmatprep.mubr.msk.f32.mxu0 %vm10100_vm2, %v10101_v57  ;;  %v3186_v49 = vsel %vm1166_vm13, %v3183_v31, %v3185_v61  ;;  %v9705_v53 = vpack.c.bf16 %v8526_v55, %v8525_v54 }
 0x3b1   :  { %9464 = vmatprep.mubr.msk.f32.mxu1 %vm10100_vm2, %v10101_v57 }
 0x3b2   :  { %9985 = vmatprep.subr.bf16.mxu1 %v9705_v53  ;;  %9706 = vmatprep.subr.bf16.mxu0 %v9705_v53 }
 0x3b3   :  { %9392 = vmatmul.mubr.msk.f32.gmra.mrb[94].mxu0 %vm548_vm4, %v2769_v8  ;;  %9987 = vmatpush3.bf16.msra.mxu1 %v9705_v53 }
 0x3b4   :  { %9465 = vmatmul.mubr.msk.f32.gmra.mrb[124].mxu1 %vm548_vm4, %v11519_v62  ;;  %9394 = vmatprep.mubr.msk.f32.mxu0 %vm10100_vm2, %v10101_v57  ;;  %v8527_v62 = vld [vmem:[%s12635_s6 + $0x30] sm:$0xff] }
 0x3b5   :  { %9467 = vmatprep.mubr.msk.f32.mxu1 %vm10100_vm2, %v10101_v57  ;;  %v9709_v32 = vpack.c.bf16 %v8528_v6, %v8527_v62 }
 0x3b7   :  { %9395 = vmatmul.mubr.msk.f32.gmra.mrb[96].mxu0 %vm548_vm4, %v2771_v17  ;;  %9986 = vmatprep.subr.bf16.mxu1 %v9709_v32 }
 0x3b8   :  { %9468 = vmatmul.mubr.msk.f32.gmra.mrb[126].mxu1 %vm548_vm4, %v11531_v1  ;;  %9397 = vmatprep.mubr.msk.f32.mxu0 %vm10100_vm2, %v10101_v57 }
 0x3b9   :  { %9470 = vmatprep.mubr.msk.f32.mxu1 %vm10100_vm2, %v10101_v57  ;;  %9988 = vmatpush3.bf16.msra.mxu1 %v9709_v32 }
 0x3bb   :  { %9398 = vmatmul.mubr.msk.f32.gmra.mrb[98].mxu0 %vm548_vm4, %v2773_v13 }
 0x3bc   :  { %9471 = vmatmul.mubr.msk.f32.gmra.mrb[128].mxu1 %vm548_vm4, %v11543_v63  ;;  %9400 = vmatprep.mubr.msk.f32.mxu0 %vm10100_vm2, %v10101_v57 }
 0x3bd   :  { %9473 = vmatprep.mubr.msk.f32.mxu1 %vm10100_vm2, %v10101_v57 }
 0x3bf   :  { %9401 = vmatmul.mubr.msk.f32.gmra.mrb[100].mxu0 %vm548_vm4, %v2775_v38 }
 0x3c0   :  { %9474 = vmatmul.mubr.msk.f32.gmra.mrb[130].mxu1 %vm548_vm4, %v11555_v39  ;;  %9403 = vmatprep.mubr.msk.f32.mxu0 %vm10100_vm2, %v10101_v57 }
 0x3c1   :  { %9476 = vmatprep.mubr.msk.f32.mxu1 %vm10100_vm2, %v10101_v57 }
 0x3c3   :  { %9404 = vmatmul.mubr.msk.f32.gmra.mrb[102].mxu0 %vm548_vm4, %v2777_v50  ;;  %v3542_v50 = vld [vmem:[%s12635_s6] sm:$0xff] }
 0x3c4   :  { %9477 = vmatmul.mubr.msk.f32.gmra.mrb[132].mxu1 %vm548_vm4, %v11567_v24  ;;  %9406 = vmatprep.mubr.msk.f32.mxu0 %vm10100_vm2, %v10101_v57 }
 0x3c5   :  { %9479 = vmatprep.mubr.msk.f32.mxu1 %vm10100_vm2, %v10101_v57 }
 0x3c7   :  { %9407 = vmatmul.mubr.msk.f32.gmra.mrb[104].mxu0 %vm548_vm4, %v2779_v33 }
 0x3c8   :  { %9480 = vmatmul.mubr.msk.f32.gmra.mrb[134].mxu1 %vm548_vm4, %v11579_v43  ;;  %9409 = vmatprep.mubr.msk.f32.mxu0 %vm10100_vm2, %v10101_v57 }
 0x3cb   :  { %9410 = vmatmul.mubr.msk.f32.gmra.mrb[106].mxu0 %vm548_vm4, %v2781_v3  ;;  %v11709_v3 = vpack.c.bf16 %v3543_v23, %v3542_v50 }
 0x3cc   :  { %9412 = vmatprep.mubr.msk.f32.mxu0 %vm10100_vm2, %v10101_v57 }
 0x3cd   :  { %9714 = vmatprep.subr.bf16.mxu1 %v11709_v3 }
 0x3cf   :  { %9413 = vmatmul.mubr.msk.f32.gmra.mrb[108].mxu0 %vm548_vm4, %v2780_v30 }
 0x3d0   :  { %9498 = vmatprep.mubr.msk.f32.mxu0 %vm10100_vm2, %v10101_v57 }
 0x3d3   :  { %9499 = vmatmul.mubr.msk.f32.vlgmr.msra.gmra.mrb[110].mxu0 %vm548_vm4, %v11397_v14  ;;  %v3166_v14 = vsel %vm1166_vm13, %v3163_v18, %v3165_v26  ;;  %v3173_v18 = vrot.slane %v11483_v56, 2 }
 0x3d4   :  { %9501 = vmatprep.mubr.msk.f32.mxu0 %vm10100_vm2, %v10101_v57  ;;  %9708 = vmatpush3.bf16.msra.mxu0 %v9705_v53 }
 0x3d5   :  { %9710 = vmatprep.subr.bf16.mxu0 %v9709_v32 }
 0x3d7   :  { %9502 = vmatmul.mubr.msk.f32.gmra.mrb[112].mxu0 %vm548_vm4, %v11408_v2  ;;  %v3169_v2 = vrot.slane %v11459_v7, 2  ;;  %v3175_v7 = vrot.slane %v11495_v40, 2  ;;  %v3181_v40 = vrot.slane %v11531_v1, 2 }
 0x3d8   :  { %9504 = vmatprep.mubr.msk.f32.mxu0 %vm10100_vm2, %v10101_v57  ;;  %9712 = vmatpush3.bf16.msra.mxu0 %v9709_v32 }
 0x3d9   :  { %v3170_v4 = vsel %vm1166_vm13, %v3167_v27, %v3169_v2  ;;  %v3176_v56 = vsel %vm1166_vm13, %v3173_v18, %v3175_v7  ;;  %v3178_v9 = vsel %vm1166_vm13, %v3175_v7, %v3177_v10  ;;  %v3182_v41 = vsel %vm1166_vm13, %v3179_v28, %v3181_v40 }
 0x3da   :  { %v3184_v60 = vsel %vm1166_vm13, %v3181_v40, %v3183_v31 }
 0x3db   :  { %9505 = vmatmul.mubr.msk.f32.gmra.mrb[114].mxu0 %vm548_vm4, %v11435_v47  ;;  %v3171_v47 = vrot.slane %v11471_v29, 2 }
 0x3dc   :  { %9507 = vmatprep.mubr.msk.f32.mxu0 %vm10100_vm2, %v10101_v57 }
 0x3dd   :  { %v3172_v19 = vsel %vm1166_vm13, %v3169_v2, %v3171_v47  ;;  %v3174_v29 = vsel %vm1166_vm13, %v3171_v47, %v3173_v18 }
 0x3df   :  { %9508 = vmatmul.mubr.msk.f32.gmra.mrb[116].mxu0 %vm548_vm4, %v3166_v14 }
 0x3e0   :  { %9510 = vmatprep.mubr.msk.f32.mxu0 %vm10100_vm2, %v10101_v57 }
 0x3e3   :  { %9511 = vmatmul.mubr.msk.f32.gmra.mrb[118].mxu0 %vm548_vm4, %v3168_v5 }
 0x3e4   :  { %9513 = vmatprep.mubr.msk.f32.mxu0 %vm10100_vm2, %v10101_v57 }
 0x3e7   :  { %9514 = vmatmul.mubr.msk.f32.gmra.mrb[120].mxu0 %vm548_vm4, %v3170_v4 }
 0x3e8   :  { %9516 = vmatprep.mubr.msk.f32.mxu0 %vm10100_vm2, %v10101_v57 }
 0x3eb   :  { %9517 = vmatmul.mubr.msk.f32.gmra.mrb[122].mxu0 %vm548_vm4, %v3172_v19 }
 0x3ec   :  { %9519 = vmatprep.mubr.msk.f32.mxu0 %vm10100_vm2, %v10101_v57 }
 0x3ef   :  { %9520 = vmatmul.mubr.msk.f32.gmra.mrb[124].mxu0 %vm548_vm4, %v3174_v29 }
 0x3f0   :  { %9522 = vmatprep.mubr.msk.f32.mxu0 %vm10100_vm2, %v10101_v57 }
 0x3f3   :  { %9523 = vmatmul.mubr.msk.f32.gmra.mrb[126].mxu0 %vm548_vm4, %v3176_v56 }
 0x3f4   :  { %9525 = vmatprep.mubr.msk.f32.mxu0 %vm10100_vm2, %v10101_v57 }
 0x3f7   :  { %9526 = vmatmul.mubr.msk.f32.gmra.mrb[128].mxu0 %vm548_vm4, %v3178_v9 }
 0x3f8   :  { %9528 = vmatprep.mubr.msk.f32.mxu0 %vm10100_vm2, %v10101_v57 }
 0x3fb   :  { %9529 = vmatmul.mubr.msk.f32.gmra.mrb[130].mxu0 %vm548_vm4, %v3180_v35 }
 0x3fc   :  { %9531 = vmatprep.mubr.msk.f32.mxu0 %vm10100_vm2, %v10101_v57 }
 0x3ff   :  { %9532 = vmatmul.mubr.msk.f32.gmra.mrb[132].mxu0 %vm548_vm4, %v3182_v41 }
 0x400   :  { %9534 = vmatprep.mubr.msk.f32.mxu0 %vm10100_vm2, %v10101_v57 }
 0x403   :  { %9535 = vmatmul.mubr.msk.f32.gmra.mrb[134].mxu0 %vm548_vm4, %v3184_v60 }
 0x404   :  { %9537 = vmatprep.mubr.msk.f32.mxu0 %vm10100_vm2, %v10101_v57 }
 0x407   :  { %9538 = vmatmul.mubr.msk.f32.gmra.mrb[136].mxu0 %vm548_vm4, %v3186_v49 }
 0x408   :  { %9540 = vmatprep.mubr.msk.f32.mxu0 %vm10100_vm2, %v10101_v57 }
 0x40b   :  { %9541 = vmatmul.mubr.msk.f32.gmra.mrb[138].mxu0 %vm548_vm4, %v3188_v37 }
 0x40c   :  { %9543 = vmatprep.mubr.msk.f32.mxu0 %vm10100_vm2, %v10101_v57 }
 0x40f   :  { %9544 = vmatmul.mubr.msk.f32.gmra.mrb[140].mxu0 %vm548_vm4, %v3190_v51 }
 0x410   :  { %9546 = vmatprep.mubr.msk.f32.mxu0 %vm10100_vm2, %v10101_v57 }
 0x413   :  { %9547 = vmatmul.mubr.msk.f32.gmra.mrb[142].mxu0 %vm548_vm4, %v3189_v22 }
 0x45b   :  { %v3066_v20 = vpop.f32.mrb[102].mxu1 }
 0x45c   :  { %v9433_v16 = vpop.f32.mrb[103].mxu1 }
 0x45f   :  { %v3071_v8 = vpop.f32.mrb[104].mxu1 }
 0x460   :  { %v9436_v52 = vpop.f32.mrb[105].mxu1 }
 0x462   :  { %v2882_v1 = vpop.f32.mrb[76].mxu0 }
 0x463   :  { %v11693_v11 = vadd.f32 %v3066_v20, %v2882_v1  ;;  %v9366_v21 = vpop.f32.mrb[77].mxu0  ;;  %v3076_v42 = vpop.f32.mrb[106].mxu1 }
 0x464   :  { %v9439_v45 = vpop.f32.mrb[107].mxu1 }
 0x466   :  { %v2887_v17 = vpop.f32.mrb[78].mxu0 }
 0x467   :  { %v11695_v34 = vadd.f32 %v3071_v8, %v2887_v17  ;;  %v9369_v63 = vpop.f32.mrb[79].mxu0  ;;  %v3081_v36 = vpop.f32.mrb[108].mxu1 }
 0x468   :  { %v9442_v58 = vpop.f32.mrb[109].mxu1 }
 0x46a   :  { %v2892_v25 = vpop.f32.mrb[80].mxu0 }
 0x46b   :  { %v11697_v46 = vadd.f32 %v3076_v42, %v2892_v25  ;;  %v9372_v13 = vpop.f32.mrb[81].mxu0  ;;  %v3086_v0 = vpop.f32.mrb[110].mxu1 }
 0x46c   :  { %v9445_v39 = vpop.f32.mrb[111].mxu1 }
 0x46e   :  { %v2897_v12 = vpop.f32.mrb[82].mxu0 }
 0x46f   :  { %v11699_v15 = vadd.f32 %v3081_v36, %v2897_v12  ;;  %v9375_v38 = vpop.f32.mrb[83].mxu0  ;;  %v3091_v44 = vpop.f32.mrb[112].mxu1 }
 0x470   :  { %v9448_v24 = vpop.f32.mrb[113].mxu1 }
 0x472   :  { %v2902_v59 = vpop.f32.mrb[84].mxu0 }
 0x473   :  { %v11707_v43 = vadd.f32 %v3086_v0, %v2902_v59  ;;  %v9378_v33 = vpop.f32.mrb[85].mxu0  ;;  %v3096_v30 = vpop.f32.mrb[114].mxu1 }
 0x474   :  { %v9451_v26 = vpop.f32.mrb[115].mxu1 }
 0x476   :  { %v2907_v27 = vpop.f32.mrb[86].mxu0 }
 0x477   :  { %v11712_v14 = vadd.f32 %v3091_v44, %v2907_v27  ;;  %v9381_v2 = vpop.f32.mrb[87].mxu0  ;;  %v3101_v5 = vpop.f32.mrb[116].mxu1  ;;  %v11739_v27 = vld [vmem:[%s12634_s5] ss:$0 sm:$0xff]  ;;  %s8524_s5 = sld [smem:[#allocation4 + $0x3]] }
 0x478   :  { %v9454_v47 = vpop.f32.mrb[117].mxu1 }
 0x479   :  { %v11742_v47 = vstv %s8523_s27 }
 0x47a   :  { %v2912_v4 = vpop.f32.mrb[88].mxu0 }
 0x47b   :  { %v11714_v18 = vadd.f32 %v3096_v30, %v2912_v4  ;;  %v9384_v19 = vpop.f32.mrb[89].mxu0  ;;  %v3106_v7 = vpop.f32.mrb[118].mxu1 }
 0x47c   :  { %v9457_v29 = vpop.f32.mrb[119].mxu1 }
 0x47e   :  { %v2917_v10 = vpop.f32.mrb[90].mxu0 }
 0x47f   :  { %v11716_v56 = vadd.f32 %v3101_v5, %v2917_v10  ;;  %v9387_v28 = vpop.f32.mrb[91].mxu0  ;;  %v3111_v9 = vpop.f32.mrb[120].mxu1 }
 0x480   :  { %v9460_v40 = vpop.f32.mrb[121].mxu1 }
 0x482   :  { %v2922_v35 = vpop.f32.mrb[92].mxu0 }
 0x483   :  { %v11718_v31 = vadd.f32 %v3106_v7, %v2922_v35  ;;  %v9390_v41 = vpop.f32.mrb[93].mxu0  ;;  %v3116_v61 = vpop.f32.mrb[122].mxu1 }
 0x484   :  { %v9463_v60 = vpop.f32.mrb[123].mxu1 }
 0x486   :  { %v2927_v48 = vpop.f32.mrb[94].mxu0 }
 0x487   :  { %v11720_v49 = vadd.f32 %v3111_v9, %v2927_v48  ;;  %v9393_v22 = vpop.f32.mrb[95].mxu0  ;;  %v3121_v37 = vpop.f32.mrb[124].mxu1 }
 0x488   :  { %v9466_v51 = vpop.f32.mrb[125].mxu1 }
 0x48a   :  { %v2932_v54 = vpop.f32.mrb[96].mxu0 }
 0x48b   :  { %v11722_v55 = vadd.f32 %v3116_v61, %v2932_v54  ;;  %v9396_v53 = vpop.f32.mrb[97].mxu0  ;;  %v3126_v62 = vpop.f32.mrb[126].mxu1 }
 0x48c   :  { %v9469_v6 = vpop.f32.mrb[127].mxu1 }
 0x48e   :  { %v2937_v32 = vpop.f32.mrb[98].mxu0 }
 0x48f   :  { %v11724_v20 = vadd.f32 %v3121_v37, %v2937_v32  ;;  %v9399_v16 = vpop.f32.mrb[99].mxu0  ;;  %v3131_v8 = vpop.f32.mrb[128].mxu1 }
 0x490   :  { %v9472_v52 = vpop.f32.mrb[129].mxu1 }
 0x492   :  { %v2942_v1 = vpop.f32.mrb[100].mxu0 }
 0x493   :  { %v11726_v21 = vadd.f32 %v3126_v62, %v2942_v1  ;;  %v9402_v42 = vpop.f32.mrb[101].mxu0  ;;  %v3136_v45 = vpop.f32.mrb[130].mxu1 }
 0x494   :  { %v9475_v17 = vpop.f32.mrb[131].mxu1 }
 0x496   :  { %v2947_v63 = vpop.f32.mrb[102].mxu0 }
 0x497   :  { %v11728_v36 = vadd.f32 %v3131_v8, %v2947_v63  ;;  %v9405_v58 = vpop.f32.mrb[103].mxu0  ;;  %v3141_v25 = vpop.f32.mrb[132].mxu1  ;;  %v11763_v63 = vstv %s8524_s5 }
 0x498   :  { %v9478_v13 = vpop.f32.mrb[133].mxu1 }
 0x49a   :  { %v2952_v0 = vpop.f32.mrb[104].mxu0 }
 0x49b   :  { %v11730_v39 = vadd.f32 %v3136_v45, %v2952_v0  ;;  %v9408_v12 = vpop.f32.mrb[105].mxu0  ;;  %v3146_v38 = vpop.f32.mrb[134].mxu1 }
 0x49c   :  { %v9481_v44 = vpop.f32.mrb[135].mxu1 }
 0x49e   :  { %v2957_v24 = vpop.f32.mrb[106].mxu0 }
 0x49f   :  { %v11732_v59 = vadd.f32 %v3141_v25, %v2957_v24  ;;  %v9411_v50 = vpop.f32.mrb[107].mxu0 }
 0x4a2   :  { %v2962_v23 = vpop.f32.mrb[108].mxu0 }
 0x4a3   :  { %v11734_v33 = vadd.f32 %v3146_v38, %v2962_v23  ;;  %v9414_v30 = vpop.f32.mrb[109].mxu0 }
 0x4a6   :  { %v3291_v26 = vpop.f32.mrb[110].mxu0 }
 0x4a7   :  { %v3375_v2 = vadd.f32 %v3291_v26, %v11693_v11  ;;  %v9500_v5 = vpop.f32.mrb[111].mxu0 }
 0x4a9   :  { %v3399_v4 = vadd.f32 %v11739_v27, %v3375_v2 }
 0x4aa   :  { %v3296_v19 = vpop.f32.mrb[112].mxu0 }
 0x4ab   :  { %vm3417_vm2 = vcmp.gt.f32.partialorder %v3399_v4, 0.0  ;;  %v3435_v7 = vmul.f32 %v11742_v47, %v3399_v4  ;;  %v3376_v29 = vadd.f32 %v3296_v19, %v11695_v34  ;;  %v9503_v10 = vpop.f32.mrb[113].mxu0 }
 0x4ad   :  { %v3452_v28 = vsel %vm3417_vm2, %v3399_v4, %v3435_v7  ;;  %v3400_v9 = vadd.f32 %v11739_v27, %v3376_v29 }
 0x4ae   :  { %3469 = vst.msk [vmem:[#allocation2] sm:$0xff] %vm1478_vm7, %v3452_v28  ;;  %v3301_v40 = vpop.f32.mrb[114].mxu0 }
 0x4af   :  { %vm3418_vm4 = vcmp.gt.f32.partialorder %v3400_v9, 0.0  ;;  %v3436_v11 = vmul.f32 %v11742_v47, %v3400_v9  ;;  %v3377_v35 = vadd.f32 %v3301_v40, %v11697_v46  ;;  %v9506_v41 = vpop.f32.mrb[115].mxu0 }
 0x4b1   :  { %v3453_v61 = vsel %vm3418_vm4, %v3400_v9, %v3436_v11  ;;  %v3401_v60 = vadd.f32 %v11739_v27, %v3377_v35 }
 0x4b2   :  { %3470 = vst.msk [vmem:[#allocation2 + $0x8] sm:$0xff] %vm1478_vm7, %v3453_v61  ;;  %v3306_v48 = vpop.f32.mrb[116].mxu0 }
 0x4b3   :  { %vm3419_vm3 = vcmp.gt.f32.partialorder %v3401_v60, 0.0  ;;  %v3437_v34 = vmul.f32 %v11742_v47, %v3401_v60  ;;  %v3378_v22 = vadd.f32 %v3306_v48, %v11699_v15  ;;  %v9509_v37 = vpop.f32.mrb[117].mxu0 }
 0x4b5   :  { %v3454_v51 = vsel %vm3419_vm3, %v3401_v60, %v3437_v34  ;;  %v3402_v54 = vadd.f32 %v11739_v27, %v3378_v22 }
 0x4b6   :  { %3471 = vst.msk [vmem:[#allocation2 + $0x10] sm:$0xff] %vm1478_vm7, %v3454_v51  ;;  %v3311_v46 = vpop.f32.mrb[118].mxu0 }
 0x4b7   :  { %vm3420_vm6 = vcmp.gt.f32.partialorder %v3402_v54, 0.0  ;;  %v3438_v53 = vmul.f32 %v11742_v47, %v3402_v54  ;;  %v3379_v62 = vadd.f32 %v3311_v46, %v11707_v43  ;;  %v9512_v6 = vpop.f32.mrb[119].mxu0 }
 0x4b9   :  { %v3455_v32 = vsel %vm3420_vm6, %v3402_v54, %v3438_v53  ;;  %v3403_v16 = vadd.f32 %v11739_v27, %v3379_v62  ;;  %v3486_v8 = vld [vmem:[#allocation2] ss:$2 sm:$0xff]  ;;  %v3495_v52 = vld [vmem:[#allocation2 + $0x1] ss:$2 sm:$0xff] }
 0x4ba   :  { %3472 = vst.msk [vmem:[#allocation2 + $0x18] sm:$0xff] %vm1478_vm7, %v3455_v32  ;;  %v3316_v15 = vpop.f32.mrb[120].mxu0  ;;  %v3504_v17 = vmax.f32 %v3486_v8, %v3495_v52 }
 0x4bb   :  { %vm3421_vm0 = vcmp.gt.f32.partialorder %v3403_v16, 0.0  ;;  %v3439_v1 = vmul.f32 %v11742_v47, %v3403_v16  ;;  %v3380_v42 = vadd.f32 %v3316_v15, %v11712_v14  ;;  %v9515_v45 = vpop.f32.mrb[121].mxu0 }
 0x4bc   :  { %v3524_v38 = vmul.f32 %v11763_v63, %v3504_v17  ;;  %vm3514_vm9 = vcmp.gt.f32.partialorder %v3504_v17, 0.0 }
 0x4bd   :  { %v3456_v58 = vsel %vm3421_vm0, %v3403_v16, %v3439_v1  ;;  %v3404_v43 = vadd.f32 %v11739_v27, %v3380_v42 }
 0x4be   :  { %3473 = vst.msk [vmem:[#allocation2 + $0x20] sm:$0xff] %vm1478_vm7, %v3456_v58  ;;  %v3321_v25 = vpop.f32.mrb[122].mxu0 }
 0x4bf   :  { %vm3422_vm8 = vcmp.gt.f32.partialorder %v3404_v43, 0.0  ;;  %v3440_v13 = vmul.f32 %v11742_v47, %v3404_v43  ;;  %v3381_v0 = vadd.f32 %v3321_v25, %v11714_v18  ;;  %v9518_v12 = vpop.f32.mrb[123].mxu0  ;;  %v11774_v18 = vsel %vm3514_vm9, %v3504_v17, %v3524_v38 }
 0x4c0   :  { %v3559_v28 = vrot.slane %v11774_v18, 1  ;;  %v3822_v35 = vrot.slane %v11774_v18, 2 }
 0x4c1   :  { %v3457_v14 = vsel %vm3422_vm8, %v3404_v43, %v3440_v13  ;;  %v3405_v44 = vadd.f32 %v11739_v27, %v3381_v0  ;;  %v3487_v24 = vld [vmem:[#allocation2 + $0x10] ss:$2 sm:$0xff]  ;;  %v3496_v50 = vld [vmem:[#allocation2 + $0x11] ss:$2 sm:$0xff] }
 0x4c2   :  { %3474 = vst.msk [vmem:[#allocation2 + $0x28] sm:$0xff] %vm1478_vm7, %v3457_v14  ;;  %v3326_v23 = vpop.f32.mrb[124].mxu0  ;;  %v3505_v30 = vmax.f32 %v3487_v24, %v3496_v50 }
 0x4c3   :  { %vm3423_vm10 = vcmp.gt.f32.partialorder %v3405_v44, 0.0  ;;  %v3441_v26 = vmul.f32 %v11742_v47, %v3405_v44  ;;  %v3382_v2 = vadd.f32 %v3326_v23, %v11716_v56  ;;  %v9521_v5 = vpop.f32.mrb[125].mxu0 }
 0x4c4   :  { %vm3515_vm1 = vcmp.gt.f32.partialorder %v3505_v30, 0.0  ;;  %v3525_v4 = vmul.f32 %v11763_v63, %v3505_v30 }
 0x4c5   :  { %v3458_v19 = vsel %vm3423_vm10, %v3405_v44, %v3441_v26  ;;  %v3406_v7 = vadd.f32 %v11739_v27, %v3382_v2 }
 0x4c6   :  { %3475 = vst.msk [vmem:[#allocation2 + $0x30] sm:$0xff] %vm1478_vm7, %v3458_v19  ;;  %v3331_v29 = vpop.f32.mrb[126].mxu0  ;;  %v11779_v10 = vsel %vm3515_vm1, %v3505_v30, %v3525_v4 }
 0x4c7   :  { %vm3424_vm14 = vcmp.gt.f32.partialorder %v3406_v7, 0.0  ;;  %v3442_v9 = vmul.f32 %v11742_v47, %v3406_v7  ;;  %v3383_v56 = vadd.f32 %v3331_v29, %v11718_v31  ;;  %v9524_v40 = vpop.f32.mrb[127].mxu0  ;;  %v3560_v11 = vrot.slane %v11779_v10, 1 }
 0x4c8   :  { %v3823_v41 = vrot.slane %v11779_v10, 2 }
 0x4c9   :  { %v3459_v61 = vsel %vm3424_vm14, %v3406_v7, %v3442_v9  ;;  %v3407_v60 = vadd.f32 %v11739_v27, %v3383_v56  ;;  %v3561_v48 = vsel %vm755_vm12, %v3559_v28, %v3560_v11  ;;  %v3488_v34 = vld [vmem:[#allocation2 + $0x20] ss:$2 sm:$0xff]  ;;  %v3497_v22 = vld [vmem:[#allocation2 + $0x21] ss:$2 sm:$0xff] }
 0x4ca   :  { %3476 = vst.msk [vmem:[#allocation2 + $0x38] sm:$0xff] %vm1478_vm7, %v3459_v61  ;;  %v3336_v37 = vpop.f32.mrb[128].mxu0  ;;  %9557 = vmatprep.mubr.msk.f32.mxu0 %vm1478_vm7, %v3561_v48  ;;  %v3506_v31 = vmax.f32 %v3488_v34, %v3497_v22  ;;  %v11792_v51 = vsel %vm1166_vm13, %v3822_v35, %v3823_v41 }
 0x4cb   :  { %vm3425_vm5 = vcmp.gt.f32.partialorder %v3407_v60, 0.0  ;;  %v3443_v54 = vmul.f32 %v11742_v47, %v3407_v60  ;;  %v3384_v46 = vadd.f32 %v3336_v37, %v11720_v49  ;;  %v9527_v53 = vpop.f32.mrb[129].mxu0 }
 0x4cc   :  { %vm3516_vm2 = vcmp.gt.f32.partialorder %v3506_v31, 0.0  ;;  %v3526_v62 = vmul.f32 %v11763_v63, %v3506_v31 }
 0x4cd   :  { %v3460_v6 = vsel %vm3425_vm5, %v3407_v60, %v3443_v54  ;;  %v3408_v32 = vadd.f32 %v11739_v27, %v3384_v46 }
 0x4ce   :  { %3477 = vst.msk [vmem:[#allocation2 + $0x40] sm:$0xff] %vm1478_vm7, %v3460_v6  ;;  %v3341_v16 = vpop.f32.mrb[130].mxu0  ;;  %v11799_v8 = vsel %vm3516_vm2, %v3506_v31, %v3526_v62 }
 0x4cf   :  { %vm3426_vm4 = vcmp.gt.f32.partialorder %v3408_v32, 0.0  ;;  %v3444_v52 = vmul.f32 %v11742_v47, %v3408_v32  ;;  %v3385_v15 = vadd.f32 %v3341_v16, %v11722_v55  ;;  %v9530_v1 = vpop.f32.mrb[131].mxu0  ;;  %v3562_v49 = vrot.slane %v11799_v8, 1 }
 0x4d0   :  { %v3825_v42 = vrot.slane %v11799_v8, 2 }
 0x4d1   :  { %v3461_v45 = vsel %vm3426_vm4, %v3408_v32, %v3444_v52  ;;  %v3409_v17 = vadd.f32 %v11739_v27, %v3385_v15  ;;  %v3563_v58 = vsel %vm755_vm12, %v3560_v11, %v3562_v49  ;;  %v3489_v43 = vld [vmem:[#allocation2 + $0x30] ss:$2 sm:$0xff]  ;;  %v3498_v25 = vld [vmem:[#allocation2 + $0x31] ss:$2 sm:$0xff] }
 0x4d2   :  { %3478 = vst.msk [vmem:[#allocation2 + $0x48] sm:$0xff] %vm1478_vm7, %v3461_v45  ;;  %v3346_v13 = vpop.f32.mrb[132].mxu0  ;;  %9558 = vmatmul.mubr.msk.f32.vlgmr.msra.gmra.mrb[144].mxu0 %vm1478_vm7, %v3563_v58  ;;  %v3507_v0 = vmax.f32 %v3489_v43, %v3498_v25  ;;  %v11812_v55 = vsel %vm1166_vm13, %v3823_v41, %v3825_v42 }
 0x4d3   :  { %vm3427_vm3 = vcmp.gt.f32.partialorder %v3409_v17, 0.0  ;;  %v3445_v12 = vmul.f32 %v11742_v47, %v3409_v17  ;;  %v3386_v38 = vadd.f32 %v3346_v13, %v11724_v20  ;;  %v9533_v14 = vpop.f32.mrb[133].mxu0 }
 0x4d4   :  { %vm3517_vm6 = vcmp.gt.f32.partialorder %v3507_v0, 0.0  ;;  %v3527_v44 = vmul.f32 %v11763_v63, %v3507_v0 }
 0x4d5   :  { %v3462_v24 = vsel %vm3427_vm3, %v3409_v17, %v3445_v12  ;;  %v3410_v50 = vadd.f32 %v11739_v27, %v3386_v38 }
 0x4d6   :  { %3479 = vst.msk [vmem:[#allocation2 + $0x50] sm:$0xff] %vm1478_vm7, %v3462_v24  ;;  %v3351_v23 = vpop.f32.mrb[134].mxu0  ;;  %v11819_v30 = vsel %vm3517_vm6, %v3507_v0, %v3527_v44 }
 0x4d7   :  { %vm3428_vm0 = vcmp.gt.f32.partialorder %v3410_v50, 0.0  ;;  %v3446_v26 = vmul.f32 %v11742_v47, %v3410_v50  ;;  %v3387_v2 = vadd.f32 %v3351_v23, %v11726_v21  ;;  %v9536_v5 = vpop.f32.mrb[135].mxu0  ;;  %v3564_v20 = vrot.slane %v11819_v30, 1  ;;  %v3545_v23 = vld [vmem:[%s12635_s6 + $0x18] sm:$0xff] }
 0x4d9   :  { %v3463_v4 = vsel %vm3428_vm0, %v3410_v50, %v3446_v26  ;;  %v3411_v19 = vadd.f32 %v11739_v27, %v3387_v2  ;;  %v3565_v7 = vsel %vm755_vm12, %v3562_v49, %v3564_v20  ;;  %v3490_v29 = vld [vmem:[#allocation2 + $0x40] ss:$2 sm:$0xff]  ;;  %v3499_v28 = vld [vmem:[#allocation2 + $0x41] ss:$2 sm:$0xff] }
 0x4da   :  { %3480 = vst.msk [vmem:[#allocation2 + $0x58] sm:$0xff] %vm1478_vm7, %v3463_v4  ;;  %v3356_v9 = vpop.f32.mrb[136].mxu0  ;;  %9560 = vmatprep.mubr.msk.f32.mxu0 %vm1478_vm7, %v3565_v7  ;;  %v3508_v56 = vmax.f32 %v3490_v29, %v3499_v28  ;;  %v8546_v7 = vld [vmem:[%s12635_s6 + $0x48] sm:$0xff] }
 0x4db   :  { %vm3429_vm8 = vcmp.gt.f32.partialorder %v3411_v19, 0.0  ;;  %v3447_v40 = vmul.f32 %v11742_v47, %v3411_v19  ;;  %v3388_v21 = vadd.f32 %v3356_v9, %v11728_v36  ;;  %v9539_v11 = vpop.f32.mrb[137].mxu0 }
 0x4dc   :  { %vm3518_vm9 = vcmp.gt.f32.partialorder %v3508_v56, 0.0  ;;  %v3528_v35 = vmul.f32 %v11763_v63, %v3508_v56 }
 0x4dd   :  { %v3464_v41 = vsel %vm3429_vm8, %v3411_v19, %v3447_v40  ;;  %v3412_v61 = vadd.f32 %v11739_v27, %v3388_v21 }
 0x4de   :  { %3481 = vst.msk [vmem:[#allocation2 + $0x60] sm:$0xff] %vm1478_vm7, %v3464_v41  ;;  %v3361_v60 = vpop.f32.mrb[138].mxu0  ;;  %v11833_v48 = vsel %vm3518_vm9, %v3508_v56, %v3528_v35 }
 0x4df   :  { %vm3430_vm10 = vcmp.gt.f32.partialorder %v3412_v61, 0.0  ;;  %v3448_v34 = vmul.f32 %v11742_v47, %v3412_v61  ;;  %v3389_v22 = vadd.f32 %v3361_v60, %v11730_v39  ;;  %v9542_v37 = vpop.f32.mrb[139].mxu0  ;;  %v3566_v36 = vrot.slane %v11833_v48, 1 }
 0x4e0   :  { %v8548_v37 = vld [vmem:[%s12635_s6 + $0x58] sm:$0xff] }
 0x4e1   :  { %v3465_v31 = vsel %vm3430_vm10, %v3412_v61, %v3448_v34  ;;  %v3413_v54 = vadd.f32 %v11739_v27, %v3389_v22  ;;  %v3567_v46 = vsel %vm755_vm12, %v3564_v20, %v3566_v36  ;;  %v3491_v53 = vld [vmem:[#allocation2 + $0x50] ss:$2 sm:$0xff]  ;;  %v3500_v62 = vld [vmem:[#allocation2 + $0x51] ss:$2 sm:$0xff] }
 0x4e2   :  { %3482 = vst.msk [vmem:[#allocation2 + $0x68] sm:$0xff] %vm1478_vm7, %v3465_v31  ;;  %v3366_v6 = vpop.f32.mrb[140].mxu0  ;;  %9561 = vmatmul.mubr.msk.f32.gmra.mrb[146].mxu0 %vm1478_vm7, %v3567_v46  ;;  %v3509_v32 = vmax.f32 %v3491_v53, %v3500_v62  ;;  %v8547_v22 = vld [vmem:[%s12635_s6 + $0x50] sm:$0xff]  ;;  %v4086_v53 = vld [vmem:[#allocation8 + $0x18] sm:$0xff] }
 0x4e3   :  { %vm3431_vm1 = vcmp.gt.f32.partialorder %v3413_v54, 0.0  ;;  %v3449_v16 = vmul.f32 %v11742_v47, %v3413_v54  ;;  %v3390_v39 = vadd.f32 %v3366_v6, %v11732_v59  ;;  %v9545_v52 = vpop.f32.mrb[141].mxu0  ;;  %4223 = vmatprep.mubr.f32.mxu0 %v10101_v57  ;;  %v4102_v62 = vld [vmem:[#allocation8 + $0x218] sm:$0xff]  ;;  %v4085_v6 = vld [vmem:[#allocation8 + $0x10] sm:$0xff] }
 0x4e4   :  { %vm3519_vm14 = vcmp.gt.f32.partialorder %v3509_v32, 0.0  ;;  %v3529_v15 = vmul.f32 %v11763_v63, %v3509_v32  ;;  %v4084_v52 = vld [vmem:[#allocation8 + $0x8] sm:$0xff] }
 0x4e5   :  { %v3466_v1 = vsel %vm3431_vm1, %v3413_v54, %v3449_v16  ;;  %v3414_v49 = vadd.f32 %v11739_v27, %v3390_v39  ;;  %v9737_v16 = vpack.c.bf16 %v4102_v62, %v4086_v53  ;;  %v4101_v39 = vld [vmem:[#allocation8 + $0x210] sm:$0xff] }
 0x4e6   :  { %3483 = vst.msk [vmem:[#allocation2 + $0x70] sm:$0xff] %vm1478_vm7, %v3466_v1  ;;  %v3371_v45 = vpop.f32.mrb[142].mxu0  ;;  %v11848_v17 = vsel %vm3519_vm14, %v3509_v32, %v3529_v15  ;;  %v2073_v32 = vpop.trf.xlu0  ;;  %v4100_v15 = vld [vmem:[#allocation8 + $0x208] sm:$0xff]  ;;  %v9739_v1 = vpack.c.bf16 %v4101_v39, %v4085_v6 }
 0x4e7   :  { %vm3432_vm5 = vcmp.gt.f32.partialorder %v3414_v49, 0.0  ;;  %v3450_v58 = vmul.f32 %v11742_v47, %v3414_v49  ;;  %v3391_v43 = vadd.f32 %v3371_v45, %v11734_v33  ;;  %v9548_v59 = vpop.f32.mrb[143].mxu0  ;;  %v3568_v25 = vrot.slane %v11848_v17, 1  ;;  %2089 = vst.msk [vmem:[#allocation3] sm:$0xff] %vm1478_vm7, %v2073_v32  ;;  %v4083_v45 = vld [vmem:[#allocation8] sm:$0xff] }
 0x4e8   :  { %v3831_v31 = vrot.slane %v11848_v17, 2  ;;  %v4134_v59 = vld [vmem:[#allocation8 + $0x618] sm:$0xff] }
 0x4e9   :  { %v3467_v13 = vsel %vm3432_vm5, %v3414_v49, %v3450_v58  ;;  %v3415_v0 = vadd.f32 %v11739_v27, %v3391_v43  ;;  %v3569_v12 = vsel %vm755_vm12, %v3566_v36, %v3568_v25  ;;  %v3492_v38 = vld [vmem:[#allocation2 + $0x60] ss:$2 sm:$0xff]  ;;  %v3501_v14 = vld [vmem:[#allocation2 + $0x61] ss:$2 sm:$0xff]  ;;  %v3544_v27 = vld [vmem:[%s12635_s6 + $0x10] sm:$0xff]  ;;  %v9729_v49 = vpack.c.bf16 %v4100_v15, %v4084_v52 }
 0x4ea   :  { %3484 = vst.msk [vmem:[#allocation2 + $0x78] sm:$0xff] %vm1478_vm7, %v3467_v13  ;;  %9563 = vmatprep.mubr.msk.f32.mxu1 %vm1478_vm7, %v3569_v12  ;;  %v3510_v44 = vmax.f32 %v3492_v38, %v3501_v14  ;;  %v9717_v5 = vpack.c.bf16 %v3545_v23, %v3544_v27  ;;  %v4118_v58 = vld [vmem:[#allocation8 + $0x418] sm:$0xff]  ;;  %v4133_v13 = vld [vmem:[#allocation8 + $0x610] sm:$0xff]  ;;  %v2074_v12 = vpop.trf.xlu0  ;;  %v4116_v14 = vld [vmem:[#allocation8 + $0x408] sm:$0xff] }
 0x4eb   :  { %vm3433_vm2 = vcmp.gt.f32.partialorder %v3415_v0, 0.0  ;;  %v3451_v24 = vmul.f32 %v11742_v47, %v3415_v0  ;;  %v8545_v47 = vld [vmem:[%s12635_s6 + $0x40] sm:$0xff]  ;;  %9730 = vmatprep.subr.bf16.mxu0 %v9729_v49  ;;  %2090 = vst.msk [vmem:[#allocation3 + $0x8] sm:$0xff] %vm1478_vm7, %v2074_v12  ;;  %v4088_v27 = vld [vmem:[#allocation8 + $0x28] sm:$0xff]  ;;  %s8558_s6 = sld [smem:[#allocation4 + $0x4]] }
 0x4ec   :  { %vm3520_vm4 = vcmp.gt.f32.partialorder %v3510_v44, 0.0  ;;  %v3530_v33 = vmul.f32 %v11763_v63, %v3510_v44  ;;  %v9721_v9 = vpack.c.bf16 %v8546_v7, %v8545_v47  ;;  %v4104_v23 = vld [vmem:[#allocation8 + $0x228] sm:$0xff]  ;;  %v4106_v47 = vld [vmem:[#allocation8 + $0x238] sm:$0xff] }
 0x4ed   :  { %v3468_v50 = vsel %vm3433_vm2, %v3415_v0, %v3451_v24  ;;  %v9741_v0 = vpack.c.bf16 %v4134_v59, %v4118_v58  ;;  %v4115_v24 = vld [vmem:[#allocation8 + $0x400] sm:$0xff] }
 0x4ee   :  { %3485 = vst.msk [vmem:[#allocation2 + $0x80] sm:$0xf] %vm1495_vm11, %v3468_v50  ;;  %v3539_v26 = vsel %vm3520_vm4, %v3510_v44, %v3530_v33  ;;  %v4132_v44 = vld [vmem:[#allocation8 + $0x608] sm:$0xff]  ;;  %v4131_v50 = vld [vmem:[#allocation8 + $0x600] sm:$0xff] }
 0x4ef   :  { %v3570_v2 = vrot.slane %v3539_v26, 1  ;;  %v3833_v46 = vrot.slane %v3539_v26, 2  ;;  %v9733_v33 = vpack.c.bf16 %v4132_v44, %v4116_v14 }
 0x4f1   :  { %v3571_v20 = vsel %vm755_vm12, %v3568_v25, %v3570_v2  ;;  %v3493_v4 = vld [vmem:[#allocation2 + $0x70] ss:$2 sm:$0xff]  ;;  %v3502_v19 = vld [vmem:[#allocation2 + $0x71] ss:$2 sm:$0xff]  ;;  %v4117_v25 = vld [vmem:[#allocation8 + $0x410] sm:$0xff] }
 0x4f2   :  { %9564 = vmatmul.mubr.msk.f32.vlgmr.msra.gmra.mrb[136].mxu1 %vm1478_vm7, %v3571_v20  ;;  %v3511_v29 = vmax.f32 %v3493_v4, %v3502_v19  ;;  %v9743_v38 = vpack.c.bf16 %v4133_v13, %v4117_v25  ;;  %v11925_v4 = vld [vmem:[#allocation3] sm:$0xff]  ;;  %v11929_v19 = vld [vmem:[#allocation3 + $0x8] sm:$0xff] }
 0x4f3   :  { %9716 = vmatpush3.bf16.msra.mxu1 %v11709_v3 }
 0x4f4   :  { %vm3521_vm11 = vcmp.gt.f32.partialorder %v3511_v29, 0.0  ;;  %v3531_v28 = vmul.f32 %v11763_v63, %v3511_v29  ;;  %9718 = vmatprep.subr.bf16.mxu1 %v9717_v5 }
 0x4f5   :  { %v3494_v56 = vld [vmem:[#allocation2 + $0x80] ss:$2 sm:$0x3]  ;;  %v3503_v40 = vld [vmem:[#allocation2 + $0x81] ss:$2 sm:$0x3] }
 0x4f6   :  { %v3540_v21 = vsel %vm3521_vm11, %v3511_v29, %v3531_v28  ;;  %v3512_v11 = vmax.f32 %v3494_v56, %v3503_v40  ;;  %v8557_v40 = vld [vmem:[%s12636_s7] ss:$0 sm:$0xff]  ;;  %s11945_s7 = sld [smem:[#allocation4 + $0x5]] }
 0x4f7   :  { %v3572_v35 = vrot.slane %v3540_v21, 1  ;;  %9720 = vmatpush3.bf16.msra.mxu1 %v9717_v5  ;;  %v4090_v5 = vld [vmem:[#allocation8 + $0x38] sm:$0xff] }
 0x4f8   :  { %vm3522_vm3 = vcmp.gt.f32.partialorder %v3512_v11, 0.0  ;;  %v3532_v41 = vmul.f32 %v11763_v63, %v3512_v11  ;;  %9722 = vmatprep.subr.bf16.mxu1 %v9721_v9  ;;  %v9725_v63 = vpack.c.bf16 %v8548_v37, %v8547_v22  ;;  %v9753_v20 = vpack.c.bf16 %v4106_v47, %v4090_v5 }
 0x4f9   :  { %v3573_v61 = vsel %vm755_vm12, %v3570_v2, %v3572_v35  ;;  %v9745_v2 = vpack.c.bf16 %v4104_v23, %v4088_v27 }
 0x4fa   :  { %9566 = vmatprep.mubr.msk.f32.mxu1 %vm1478_vm7, %v3573_v61  ;;  %v3541_v3 = vsel %vm3522_vm3, %v3512_v11, %v3532_v41 }
 0x4fb   :  { %v3574_v60 = vrot.slane %v3541_v3, 1 }
 0x4fd   :  { %v3575_v34 = vsel %vm755_vm12, %v3572_v35, %v3574_v60  ;;  %v3992_v35 = vstv %s8558_s6 }
 0x4fe   :  { %9567 = vmatmul.mubr.msk.f32.gmra.mrb[138].mxu1 %vm1478_vm7, %v3575_v34 }
 0x4ff   :  { %9577 = vmatprep.mubr.msk.f32.mxu1 %vm1478_vm7, %v11774_v18  ;;  %v3827_v18 = vrot.slane %v11819_v30, 2 }
 0x501   :  { %v3828_v36 = vsel %vm1166_vm13, %v3825_v42, %v3827_v18 }
 0x502   :  { %9578 = vmatmul.mubr.msk.f32.vlgmr.msra.gmra.mrb[140].mxu1 %vm1478_vm7, %v11779_v10  ;;  %v3829_v10 = vrot.slane %v11833_v48, 2 }
 0x503   :  { %9724 = vmatpush3.bf16.msra.mxu1 %v9721_v9  ;;  %9580 = vmatprep.mubr.msk.f32.mxu1 %vm1478_vm7, %v11799_v8 }
 0x504   :  { %9726 = vmatprep.subr.bf16.mxu1 %v9725_v63  ;;  %v3830_v54 = vsel %vm1166_vm13, %v3827_v18, %v3829_v10 }
 0x506   :  { %9581 = vmatmul.mubr.msk.f32.gmra.mrb[142].mxu1 %vm1478_vm7, %v11819_v30  ;;  %v3835_v30 = vrot.slane %v3540_v21, 2 }
 0x507   :  { %9583 = vmatprep.mubr.msk.f32.mxu1 %vm1478_vm7, %v11833_v48  ;;  %9728 = vmatpush3.bf16.msra.mxu1 %v9725_v63  ;;  %v3837_v48 = vrot.slane %v3541_v3, 2 }
 0x508   :  { %v3836_v8 = vsel %vm1166_vm13, %v3833_v46, %v3835_v30  ;;  %9738 = vmatprep.subr.bf16.mxu1 %v9737_v16 }
 0x509   :  { %v3838_v42 = vsel %vm1166_vm13, %v3835_v30, %v3837_v48 }
 0x50a   :  { %9584 = vmatmul.mubr.msk.f32.gmra.mrb[136].mxu1 %vm1478_vm7, %v11848_v17  ;;  %v4099_v17 = vld [vmem:[#allocation8 + $0x200] sm:$0xff] }
 0x50b   :  { %9586 = vmatprep.mubr.msk.f32.mxu1 %vm1478_vm7, %v3539_v26  ;;  %v9731_v43 = vpack.c.bf16 %v4099_v17, %v4083_v45  ;;  %v9735_v26 = vpack.c.bf16 %v4131_v50, %v4115_v24 }
 0x50d   :  { %9732 = vmatpush1.bf16.msra.mxu0 %v9731_v43  ;;  %v4034_v43 = vstv %s11945_s7 }
 0x50e   :  { %9587 = vmatmul.mubr.msk.f32.gmra.mrb[138].mxu1 %vm1478_vm7, %v3540_v21  ;;  %9734 = vmatprep.subr.bf16.mxu0 %v9733_v33 }
 0x50f   :  { %9597 = vmatprep.mubr.msk.f32.mxu1 %vm1478_vm7, %v11792_v51  ;;  %v3832_v51 = vsel %vm1166_vm13, %v3829_v10, %v3831_v31 }
 0x511   :  { %9736 = vmatpush1.bf16.msra.mxu0 %v9735_v26 }
 0x512   :  { %9598 = vmatmul.mubr.msk.f32.vlgmr.msra.gmra.mrb[140].mxu1 %vm1478_vm7, %v11812_v55  ;;  %v3834_v55 = vsel %vm1166_vm13, %v3831_v31, %v3833_v46  ;;  %9746 = vmatprep.subr.bf16.mxu0 %v9745_v2 }
 0x513   :  { %9600 = vmatprep.mubr.msk.f32.mxu1 %vm1478_vm7, %v3828_v36  ;;  %9740 = vmatpush1.bf16.msra.mxu1 %v9739_v1 }
 0x514   :  { %9742 = vmatprep.subr.bf16.mxu1 %v9741_v0  ;;  %8561 = vmatmul.mubr.msk.f32.vlgmr.msra.gmra.mrb[148].mxu0 %vm1478_vm7, %v11925_v4 }
 0x515   :  { %4229 = vmatprep.mubr.f32.mxu0 %v10101_v57 }
 0x516   :  { %9601 = vmatmul.mubr.msk.f32.gmra.mrb[142].mxu1 %vm1478_vm7, %v3830_v54 }
 0x517   :  { %9603 = vmatprep.mubr.msk.f32.mxu1 %vm1478_vm7, %v3832_v51  ;;  %9744 = vmatpush1.bf16.msra.mxu1 %v9743_v38 }
 0x518   :  { %9754 = vmatprep.subr.bf16.mxu1 %v9753_v20  ;;  %8562 = vmatmul.mubr.msk.f32.gmra.mrb[150].mxu0 %vm1478_vm7, %v11929_v19 }
 0x519   :  { %4235 = vmatprep.mubr.f32.mxu0 %v10101_v57 }
 0x51a   :  { %9604 = vmatmul.mubr.msk.f32.gmra.mrb[136].mxu1 %vm1478_vm7, %v3834_v55 }
 0x51b   :  { %9606 = vmatprep.mubr.msk.f32.mxu1 %vm1478_vm7, %v3836_v8 }
 0x51e   :  { %9607 = vmatmul.mubr.msk.f32.gmra.mrb[138].mxu1 %vm1478_vm7, %v3838_v42 }
 0x51f   :  { %4312 = vmatprep.mubr.f32.mxu1 %v10101_v57 }
 0x522   :  { %8565 = vmatmul.mubr.msk.f32.vlgmr.msra.gmra.mrb[144].mxu1 %vm1478_vm7, %v11925_v4 }
 0x523   :  { %4318 = vmatprep.mubr.f32.mxu1 %v10101_v57 }
 0x526   :  { %8566 = vmatmul.mubr.msk.f32.gmra.mrb[146].mxu1 %vm1478_vm7, %v11929_v19 }
 0x527   :  { %4324 = vmatprep.mubr.f32.mxu1 %v10101_v57 }
 0x5a5   :  { %v9559_v7 = vpop.f32.mrb[144].mxu0 }
 0x5a6   :  { %v3658_v29 = vpop.f32.mrb[145].mxu0 }
 0x5b5   :  { %v9562_v28 = vpop.f32.mrb[146].mxu0 }
 0x5b6   :  { %v3668_v9 = vpop.f32.mrb[147].mxu0 }
 0x5e5   :  { %v9599_v56 = vpop.f32.mrb[140].mxu1 }
 0x5e6   :  { %v9989_v21 = vadd.f32 %v9599_v56, %v9559_v7  ;;  %v3921_v11 = vpop.f32.mrb[141].mxu1 }
 0x5e7   :  { %v9990_v41 = vadd.f32 %v3921_v11, %v3658_v29  ;;  %v4087_v29 = vld [vmem:[#allocation8 + $0x20] sm:$0xff] }
 0x5e8   :  { %v3976_v61 = vadd.f32 %v9989_v21, %v8557_v40 }
 0x5e9   :  { %v3975_v3 = vadd.f32 %v9990_v41, %v8557_v40  ;;  %v9602_v60 = vpop.f32.mrb[142].mxu1  ;;  %v4136_v41 = vld [vmem:[#allocation8 + $0x628] sm:$0xff] }
 0x5ea   :  { %vm3985_vm12 = vcmp.gt.f32.partialorder %v3976_v61, 0.0  ;;  %v3994_v34 = vmul.f32 %v3992_v35, %v3976_v61  ;;  %v9991_v22 = vadd.f32 %v9602_v60, %v9562_v28  ;;  %v3931_v37 = vpop.f32.mrb[143].mxu1  ;;  %v4103_v28 = vld [vmem:[#allocation8 + $0x220] sm:$0xff]  ;;  %v4138_v60 = vld [vmem:[#allocation8 + $0x638] sm:$0xff] }
 0x5eb   :  { %vm3984_vm13 = vcmp.gt.f32.partialorder %v3975_v3, 0.0  ;;  %v3993_v63 = vmul.f32 %v3992_v35, %v3975_v3  ;;  %v9992_v18 = vadd.f32 %v3931_v37, %v3668_v9  ;;  %v4089_v9 = vld [vmem:[#allocation8 + $0x30] sm:$0xff]  ;;  %v9747_v56 = vpack.c.bf16 %v4103_v28, %v4087_v29 }
 0x5ec   :  { %v4002_v10 = vsel %vm3985_vm12, %v3976_v61, %v3994_v34  ;;  %v3978_v36 = vadd.f32 %v9991_v22, %v8557_v40  ;;  %v4122_v61 = vld [vmem:[#allocation8 + $0x438] sm:$0xff]  ;;  %v4119_v34 = vld [vmem:[#allocation8 + $0x420] sm:$0xff] }
 0x5ed   :  { %4010 = vst.msk [vmem:[#allocation2 + $0x8] sm:$0xff] %vm2022_vm15, %v4002_v10  ;;  %v4001_v31 = vsel %vm3984_vm13, %v3975_v3, %v3993_v63  ;;  %v3977_v54 = vadd.f32 %v9992_v18, %v8557_v40  ;;  %v9605_v46 = vpop.f32.mrb[136].mxu1  ;;  %9748 = vmatpush1.bf16.msra.mxu0 %v9747_v56  ;;  %v4135_v22 = vld [vmem:[#allocation8 + $0x620] sm:$0xff]  ;;  %v9757_v37 = vpack.c.bf16 %v4138_v60, %v4122_v61  ;;  %v4121_v18 = vld [vmem:[#allocation8 + $0x430] sm:$0xff]  ;;  %v5145_v61 = vld [vmem:[#allocation8 + $0x288] sm:$0xff] }
 0x5ee   :  { %4009 = vst.msk [vmem:[#allocation2] sm:$0xff] %vm2022_vm15, %v4001_v31  ;;  %vm3987_vm6 = vcmp.gt.f32.partialorder %v3978_v36, 0.0  ;;  %v3996_v51 = vmul.f32 %v3992_v35, %v3978_v36  ;;  %v3980_v30 = vadd.f32 %v9605_v46, %v8557_v40  ;;  %v3941_v55 = vpop.f32.mrb[137].mxu1  ;;  %v9751_v63 = vpack.c.bf16 %v4135_v22, %v4119_v34  ;;  %v4137_v10 = vld [vmem:[#allocation8 + $0x630] sm:$0xff]  ;;  %v4092_v31 = vld [vmem:[#allocation8 + $0x48] sm:$0xff]  ;;  %v4094_v46 = vld [vmem:[#allocation8 + $0x58] sm:$0xff] }
 0x5ef   :  { %vm3986_vm0 = vcmp.gt.f32.partialorder %v3977_v54, 0.0  ;;  %v3995_v48 = vmul.f32 %v3992_v35, %v3977_v54  ;;  %v3979_v8 = vadd.f32 %v8557_v40, %v3941_v55  ;;  %v4143_v56 = vld [vmem:[#allocation8 + $0x660] sm:$0xff]  ;;  %v5147_v60 = vld [vmem:[#allocation8 + $0x298] sm:$0xff] }
 0x5f0   :  { %v4004_v42 = vsel %vm3987_vm6, %v3978_v36, %v3996_v51  ;;  %vm3989_vm8 = vcmp.gt.f32.partialorder %v3980_v30, 0.0  ;;  %v3998_v53 = vmul.f32 %v3992_v35, %v3980_v30  ;;  %v9759_v36 = vpack.c.bf16 %v4137_v10, %v4121_v18  ;;  %v5128_v18 = vld [vmem:[#allocation8 + $0x80] sm:$0xff] }
 0x5f1   :  { %4012 = vst.msk [vmem:[#allocation2 + $0x18] sm:$0xff] %vm2022_vm15, %v4004_v42  ;;  %v4003_v62 = vsel %vm3986_vm0, %v3977_v54, %v3995_v48  ;;  %vm3988_vm9 = vcmp.gt.f32.partialorder %v3979_v8, 0.0  ;;  %v3997_v6 = vmul.f32 %v3992_v35, %v3979_v8  ;;  %v9608_v32 = vpop.f32.mrb[138].mxu1  ;;  %v4108_v54 = vld [vmem:[#allocation8 + $0x248] sm:$0xff]  ;;  %v5144_v10 = vld [vmem:[#allocation8 + $0x280] sm:$0xff] }
 0x5f2   :  { %4011 = vst.msk [vmem:[#allocation2 + $0x10] sm:$0xff] %vm2022_vm15, %v4003_v62  ;;  %v4006_v16 = vsel %vm3989_vm8, %v3980_v30, %v3998_v53  ;;  %v3982_v39 = vadd.f32 %v9608_v32, %v8557_v40  ;;  %v3951_v52 = vpop.f32.mrb[139].mxu1  ;;  %v9761_v51 = vpack.c.bf16 %v4108_v54, %v4092_v31  ;;  %v4110_v30 = vld [vmem:[#allocation8 + $0x258] sm:$0xff]  ;;  %v4091_v53 = vld [vmem:[#allocation8 + $0x40] sm:$0xff]  ;;  %v4109_v32 = vld [vmem:[#allocation8 + $0x250] sm:$0xff] }
 0x5f3   :  { %4014 = vst.msk [vmem:[#allocation2 + $0x28] sm:$0xff] %vm2022_vm15, %v4006_v16  ;;  %v4005_v15 = vsel %vm3988_vm9, %v3979_v8, %v3997_v6  ;;  %v3981_v1 = vadd.f32 %v8557_v40, %v3951_v52  ;;  %v4105_v40 = vld [vmem:[#allocation8 + $0x230] sm:$0xff]  ;;  %v9769_v55 = vpack.c.bf16 %v4110_v30, %v4094_v46  ;;  %v4107_v62 = vld [vmem:[#allocation8 + $0x240] sm:$0xff]  ;;  %v4140_v52 = vld [vmem:[#allocation8 + $0x648] sm:$0xff] }
 0x5f4   :  { %4013 = vst.msk [vmem:[#allocation2 + $0x20] sm:$0xff] %vm2022_vm15, %v4005_v15  ;;  %vm3991_vm10 = vcmp.gt.f32.partialorder %v3982_v39, 0.0  ;;  %v4000_v49 = vmul.f32 %v3992_v35, %v3982_v39  ;;  %v9755_v21 = vpack.c.bf16 %v4105_v40, %v4089_v9  ;;  %v4093_v6 = vld [vmem:[#allocation8 + $0x50] sm:$0xff]  ;;  %v4126_v15 = vld [vmem:[#allocation8 + $0x458] sm:$0xff]  ;;  %v4127_v9 = vld [vmem:[#allocation8 + $0x460] sm:$0xff] }
 0x5f5   :  { %vm3990_vm1 = vcmp.gt.f32.partialorder %v3981_v1, 0.0  ;;  %v3999_v45 = vmul.f32 %v3992_v35, %v3981_v1  ;;  %v4017_v17 = vld [vmem:[#allocation2] ss:$2 sm:$0xff]  ;;  %v4021_v58 = vld [vmem:[#allocation2 + $0x1] ss:$2 sm:$0xff]  ;;  %v4120_v35 = vld [vmem:[#allocation8 + $0x428] sm:$0xff]  ;;  %v9783_v34 = vpack.c.bf16 %v4143_v56, %v4127_v9 }
 0x5f6   :  { %v4008_v59 = vsel %vm3991_vm10, %v3982_v39, %v4000_v49  ;;  %v4025_v25 = vmax.f32 %v4017_v17, %v4021_v58  ;;  %9756 = vmatpush1.bf16.msra.mxu1 %v9755_v21  ;;  %v9749_v3 = vpack.c.bf16 %v4136_v41, %v4120_v35  ;;  %v4124_v39 = vld [vmem:[#allocation8 + $0x448] sm:$0xff]  ;;  %v9763_v49 = vpack.c.bf16 %v4107_v62, %v4091_v53  ;;  %v4123_v17 = vld [vmem:[#allocation8 + $0x440] sm:$0xff]  ;;  %v4145_v35 = vld [vmem:[#allocation8 + $0x670] sm:$0xff] }
 0x5f7   :  { %4016 = vst.msk [vmem:[#allocation2 + $0x38] sm:$0xff] %vm2022_vm15, %v4008_v59  ;;  %v4007_v13 = vsel %vm3990_vm1, %v3981_v1, %v3999_v45  ;;  %9758 = vmatprep.subr.bf16.mxu1 %v9757_v37  ;;  %v4142_v1 = vld [vmem:[#allocation8 + $0x658] sm:$0xff]  ;;  %v9771_v45 = vpack.c.bf16 %v4109_v32, %v4093_v6  ;;  %v4139_v58 = vld [vmem:[#allocation8 + $0x640] sm:$0xff]  ;;  %v5129_v41 = vld [vmem:[#allocation8 + $0x88] sm:$0xff] }
 0x5f8   :  { %4015 = vst.msk [vmem:[#allocation2 + $0x30] sm:$0xff] %vm2022_vm15, %v4007_v13  ;;  %vm4030_vm14 = vcmp.gt.f32.partialorder %v4025_v25, 0.0  ;;  %v4035_v0 = vmul.f32 %v4034_v43, %v4025_v25  ;;  %9750 = vmatprep.subr.bf16.mxu0 %v9749_v3  ;;  %v9773_v59 = vpack.c.bf16 %v4142_v1, %v4126_v15  ;;  %v4141_v13 = vld [vmem:[#allocation8 + $0x650] sm:$0xff]  ;;  %v5131_v3 = vld [vmem:[#allocation8 + $0x98] sm:$0xff]  ;;  %v9793_v37 = vpack.c.bf16 %v5145_v61, %v5129_v41  ;;  %v5161_v54 = vld [vmem:[#allocation8 + $0x488] sm:$0xff] }
 0x5f9   :  { %v4018_v12 = vld [vmem:[#allocation2 + $0x10] ss:$2 sm:$0xff]  ;;  %v4022_v38 = vld [vmem:[#allocation2 + $0x11] ss:$2 sm:$0xff]  ;;  %9752 = vmatpush1.bf16.msra.mxu0 %v9751_v63  ;;  %v9801_v63 = vpack.c.bf16 %v5147_v60, %v5131_v3  ;;  %v5146_v31 = vld [vmem:[#allocation8 + $0x290] sm:$0xff] }
 0x5fa   :  { %v4039_v14 = vsel %vm4030_vm14, %v4025_v25, %v4035_v0  ;;  %v4026_v44 = vmax.f32 %v4018_v12, %v4022_v38  ;;  %9760 = vmatpush1.bf16.msra.mxu1 %v9759_v36  ;;  %9762 = vmatprep.subr.bf16.mxu0 %v9761_v51  ;;  %v4125_v25 = vld [vmem:[#allocation8 + $0x450] sm:$0xff]  ;;  %v4096_v0 = vld [vmem:[#allocation8 + $0x68] sm:$0xff]  ;;  %v4098_v38 = vld [vmem:[#allocation8 + $0x78] sm:$0xff] }
 0x5fb   :  { %4043 = vxpose.xlu1.b32.start [1/4] (short) (narrow) %v4039_v14, 16  ;;  %v4019_v24 = vld [vmem:[#allocation2 + $0x20] ss:$2 sm:$0xff]  ;;  %v4023_v33 = vld [vmem:[#allocation2 + $0x21] ss:$2 sm:$0xff]  ;;  %9770 = vmatprep.subr.bf16.mxu1 %v9769_v55  ;;  %v4112_v12 = vld [vmem:[#allocation8 + $0x268] sm:$0xff]  ;;  %v9795_v55 = vpack.c.bf16 %v5144_v10, %v5128_v18 }
 0x5fc   :  { %vm4031_vm5 = vcmp.gt.f32.partialorder %v4026_v44, 0.0  ;;  %v4036_v50 = vmul.f32 %v4034_v43, %v4026_v44  ;;  %v4027_v27 = vmax.f32 %v4019_v24, %v4023_v33  ;;  %v4114_v14 = vld [vmem:[#allocation8 + $0x278] sm:$0xff]  ;;  %v9775_v24 = vpack.c.bf16 %v4141_v13, %v4125_v25  ;;  %v5130_v36 = vld [vmem:[#allocation8 + $0x90] sm:$0xff]  ;;  %v5177_v46 = vld [vmem:[#allocation8 + $0x688] sm:$0xff] }
 0x5fd   :  { %v9777_v33 = vpack.c.bf16 %v4112_v12, %v4096_v0  ;;  %v5163_v51 = vld [vmem:[#allocation8 + $0x498] sm:$0xff]  ;;  %v5176_v53 = vld [vmem:[#allocation8 + $0x680] sm:$0xff]  ;;  %v9797_v62 = vpack.c.bf16 %v5177_v46, %v5161_v54  ;;  %v5162_v32 = vld [vmem:[#allocation8 + $0x490] sm:$0xff]  ;;  %v4225_v54 = vpop.f32.mrb[148].mxu0  ;;  %v4314_v46 = vpop.f32.mrb[144].mxu1 }
 0x5fe   :  { %v4040_v23 = vsel %vm4031_vm5, %v4026_v44, %v4036_v50  ;;  %v4037_v26 = vmul.f32 %v4034_v43, %v4027_v27  ;;  %vm4032_vm2 = vcmp.gt.f32.partialorder %v4027_v27, 0.0  ;;  %v9767_v44 = vpack.c.bf16 %v4139_v58, %v4123_v17  ;;  %v5179_v30 = vld [vmem:[#allocation8 + $0x698] sm:$0xff]  ;;  %v5149_v15 = vld [vmem:[#allocation8 + $0x2a8] sm:$0xff]  ;;  %v5148_v25 = vld [vmem:[#allocation8 + $0x2a0] sm:$0xff] }
 0x5ff   :  { %4044 = vxpose.xlu1.b32.cont [2/4] (short) (narrow) %v4040_v23, 16  ;;  %v4020_v2 = vld [vmem:[#allocation2 + $0x30] ss:$2 sm:$0xff]  ;;  %v4024_v5 = vld [vmem:[#allocation2 + $0x31] ss:$2 sm:$0xff]  ;;  %v9785_v50 = vpack.c.bf16 %v4114_v14, %v4098_v38  ;;  %v9805_v6 = vpack.c.bf16 %v5179_v30, %v5163_v51  ;;  %v5135_v1 = vld [vmem:[#allocation8 + $0xb8] sm:$0xff] }
 0x600   :  { %v4028_v47 = vmax.f32 %v4020_v2, %v4024_v5  ;;  %v4041_v20 = vsel %vm4032_vm2, %v4027_v27, %v4037_v26  ;;  %v4095_v27 = vld [vmem:[#allocation8 + $0x60] sm:$0xff]  ;;  %v4097_v26 = vld [vmem:[#allocation8 + $0x70] sm:$0xff]  ;;  %v4128_v5 = vld [vmem:[#allocation8 + $0x468] sm:$0xff]  ;;  %vm4871_vm4 = vcmp.gt.f32.partialorder %v4225_v54, 0.0  ;;  %vm4873_vm11 = vcmp.gt.f32.partialorder %v4314_v46, 0.0 }
 0x601   :  { %v4111_v23 = vld [vmem:[#allocation8 + $0x260] sm:$0xff]  ;;  %v4113_v2 = vld [vmem:[#allocation8 + $0x270] sm:$0xff]  ;;  %v5165_v12 = vld [vmem:[#allocation8 + $0x4a8] sm:$0xff] }
 0x602   :  { %v4038_v7 = vmul.f32 %v4034_v43, %v4028_v47  ;;  %vm4033_vm15 = vcmp.gt.f32.partialorder %v4028_v47, 0.0  ;;  %v9765_v43 = vpack.c.bf16 %v4140_v52, %v4124_v39  ;;  %v9779_v29 = vpack.c.bf16 %v4111_v23, %v4095_v27  ;;  %v5178_v39 = vld [vmem:[#allocation8 + $0x690] sm:$0xff]  ;;  %v5133_v52 = vld [vmem:[#allocation8 + $0xa8] sm:$0xff]  ;;  %v5167_v14 = vld [vmem:[#allocation8 + $0x4b8] sm:$0xff] }
 0x603   :  { %4045 = vxpose.xlu1.b32.cont [3/4] (short) (narrow) %v4041_v20, 16  ;;  %v4130_v20 = vld [vmem:[#allocation8 + $0x478] sm:$0xff]  ;;  %v9787_v28 = vpack.c.bf16 %v4113_v2, %v4097_v26  ;;  %v9807_v17 = vpack.c.bf16 %v5178_v39, %v5162_v32  ;;  %v9809_v58 = vpack.c.bf16 %v5149_v15, %v5133_v52  ;;  %v5134_v13 = vld [vmem:[#allocation8 + $0xb0] sm:$0xff]  ;;  %v5181_v38 = vld [vmem:[#allocation8 + $0x6a8] sm:$0xff]  ;;  %v4227_v39 = vpop.f32.mrb[149].mxu0  ;;  %v4316_v52 = vpop.f32.mrb[145].mxu1  ;;  %v12075_v15 = vstv %s8560_s19 }
 0x604   :  { %v4042_v11 = vsel %vm4033_vm15, %v4028_v47, %v4038_v7  ;;  %v4144_v47 = vld [vmem:[#allocation8 + $0x668] sm:$0xff]  ;;  %v4146_v7 = vld [vmem:[#allocation8 + $0x678] sm:$0xff]  ;;  %v5150_v0 = vld [vmem:[#allocation8 + $0x2b0] sm:$0xff]  ;;  %v9813_v23 = vpack.c.bf16 %v5181_v38, %v5165_v12  ;;  %vm4872_vm3 = vcmp.gt.f32.partialorder %v4227_v39, 0.0  ;;  %vm4874_vm12 = vcmp.gt.f32.partialorder %v4316_v52, 0.0 }
 0x605   :  { %v9781_v40 = vpack.c.bf16 %v4144_v47, %v4128_v5  ;;  %v9789_v21 = vpack.c.bf16 %v4146_v7, %v4130_v20  ;;  %v5180_v27 = vld [vmem:[#allocation8 + $0x6a0] sm:$0xff]  ;;  %v5166_v2 = vld [vmem:[#allocation8 + $0x4b0] sm:$0xff]  ;;  %v5137_v47 = vld [vmem:[#allocation8 + $0xc8] sm:$0xff] }
 0x606   :  { %v5182_v5 = vld [vmem:[#allocation8 + $0x6b0] sm:$0xff]  ;;  %v5153_v20 = vld [vmem:[#allocation8 + $0x2c8] sm:$0xff]  ;;  %v5139_v7 = vld [vmem:[#allocation8 + $0xd8] sm:$0xff] }
 0x607   :  { %4046 = vxpose.xlu1.b32.end [4/4] (short) (narrow) %v4042_v11, 16  ;;  %v4129_v11 = vld [vmem:[#allocation8 + $0x470] sm:$0xff]  ;;  %v9823_v9 = vpack.c.bf16 %v5182_v5, %v5166_v2  ;;  %v9825_v56 = vpack.c.bf16 %v5153_v20, %v5137_v47  ;;  %v5169_v61 = vld [vmem:[#allocation8 + $0x4c8] sm:$0xff]  ;;  %v5171_v60 = vld [vmem:[#allocation8 + $0x4d8] sm:$0xff] }
 0x608   :  { %v9791_v22 = vpack.c.bf16 %v4145_v35, %v4129_v11  ;;  %v5152_v11 = vld [vmem:[#allocation8 + $0x2c0] sm:$0xff]  ;;  %v5138_v35 = vld [vmem:[#allocation8 + $0xd0] sm:$0xff]  ;;  %v5185_v3 = vld [vmem:[#allocation8 + $0x6c8] sm:$0xff] }
 0x609   :  { %v5154_v41 = vld [vmem:[#allocation8 + $0x2d0] sm:$0xff]  ;;  %v5157_v51 = vld [vmem:[#allocation8 + $0x2e8] sm:$0xff]  ;;  %v5143_v30 = vld [vmem:[#allocation8 + $0xf8] sm:$0xff] }
 0x60a   :  { %v9835_v18 = vpack.c.bf16 %v5154_v41, %v5138_v35  ;;  %v5170_v10 = vld [vmem:[#allocation8 + $0x4d0] sm:$0xff]  ;;  %v5156_v5 = vld [vmem:[#allocation8 + $0x2e0] sm:$0xff] }
 0x60b   :  { %v5142_v47 = vld [vmem:[#allocation8 + $0xf0] sm:$0xff] }
 0x60c   :  { %v5158_v20 = vld [vmem:[#allocation8 + $0x2f0] sm:$0xff] }
 0x67b   :  { %v4059_v48 = vpop.trf.xlu1 }
 0x67c   :  { %4076 = vst.msk [vmem:[#allocation3 + $0x10] sm:$0xff] %vm1478_vm7, %v4059_v48  ;;  %v9803_v48 = vpack.c.bf16 %v5146_v31, %v5130_v36  ;;  %v5186_v36 = vld [vmem:[#allocation8 + $0x6d0] sm:$0xff]  ;;  %v5141_v31 = vld [vmem:[#allocation8 + $0xe8] sm:$0xff] }
 0x67f   :  { %v4060_v8 = vpop.trf.xlu1 }
 0x680   :  { %4077 = vst.msk [vmem:[#allocation3 + $0x18] sm:$0xff] %vm1478_vm7, %v4060_v8  ;;  %v5160_v8 = vld [vmem:[#allocation8 + $0x480] sm:$0xff] }
 0x683   :  { %v11957_v42 = vld [vmem:[#allocation3 + $0x10] sm:$0xff] }
 0x684   :  { %8563 = vmatmul.mubr.msk.f32.gmra.mrb[152].mxu0 %vm1478_vm7, %v11957_v42  ;;  %8567 = vmatmul.mubr.msk.f32.gmra.mrb[148].mxu1 %vm1478_vm7, %v11957_v42 }
 0x685   :  { %4241 = vmatprep.mubr.f32.mxu0 %v10101_v57  ;;  %4330 = vmatprep.mubr.f32.mxu1 %v10101_v57 }
 0x687   :  { %v11965_v16 = vld [vmem:[#allocation3 + $0x18] sm:$0xff] }
 0x688   :  { %8564 = vmatmul.mubr.msk.f32.gmra.mrb[154].mxu0 %vm1478_vm7, %v11965_v16  ;;  %8568 = vmatmul.mubr.msk.f32.gmra.mrb[150].mxu1 %vm1478_vm7, %v11965_v16 }
 0x689   :  { %4401 = vmatprep.mubr.f32.mxu0 %v10101_v57  ;;  %4490 = vmatprep.mubr.f32.mxu1 %v10101_v57 }
 0x68c   :  { %8569 = vmatmul.mubr.msk.f32.vlgmr.msra.gmra.mrb[156].mxu0 %vm1478_vm7, %v11925_v4  ;;  %8573 = vmatmul.mubr.msk.f32.vlgmr.msra.gmra.mrb[152].mxu1 %vm1478_vm7, %v11925_v4 }
 0x68d   :  { %9764 = vmatpush1.bf16.msra.mxu0 %v9763_v49  ;;  %9772 = vmatpush1.bf16.msra.mxu1 %v9771_v45  ;;  %v5151_v49 = vld [vmem:[#allocation8 + $0x2b8] sm:$0xff]  ;;  %v9799_v45 = vpack.c.bf16 %v5176_v53, %v5160_v8 }
 0x68e   :  { %4407 = vmatprep.mubr.f32.mxu0 %v10101_v57  ;;  %4496 = vmatprep.mubr.f32.mxu1 %v10101_v57 }
 0x68f   :  { %9766 = vmatprep.subr.bf16.mxu0 %v9765_v43  ;;  %9774 = vmatprep.subr.bf16.mxu1 %v9773_v59  ;;  %v9817_v43 = vpack.c.bf16 %v5151_v49, %v5135_v1  ;;  %v5132_v59 = vld [vmem:[#allocation8 + $0xa0] sm:$0xff]  ;;  %v4231_v1 = vpop.f32.mrb[150].mxu0  ;;  %v4320_v49 = vpop.f32.mrb[146].mxu1 }
 0x690   :  { %8570 = vmatmul.mubr.msk.f32.gmra.mrb[158].mxu0 %vm1478_vm7, %v11929_v19  ;;  %8574 = vmatmul.mubr.msk.f32.gmra.mrb[154].mxu1 %vm1478_vm7, %v11929_v19  ;;  %vm4887_vm13 = vcmp.gt.f32.partialorder %v4231_v1, 0.0  ;;  %vm4889_vm6 = vcmp.gt.f32.partialorder %v4320_v49, 0.0 }
 0x691   :  { %4413 = vmatprep.mubr.f32.mxu0 %v10101_v57  ;;  %4502 = vmatprep.mubr.f32.mxu1 %v10101_v57 }
 0x692   :  { %9768 = vmatpush1.bf16.msra.mxu0 %v9767_v44  ;;  %9776 = vmatpush1.bf16.msra.mxu1 %v9775_v24  ;;  %v5183_v44 = vld [vmem:[#allocation8 + $0x6b8] sm:$0xff]  ;;  %v9811_v24 = vpack.c.bf16 %v5148_v25, %v5132_v59  ;;  %v4952_v59 = vmul.f32 %v12075_v15, %v4231_v1  ;;  %v4954_v25 = vmul.f32 %v12075_v15, %v4320_v49 }
 0x693   :  { %9778 = vmatprep.subr.bf16.mxu0 %v9777_v33  ;;  %9786 = vmatprep.subr.bf16.mxu1 %v9785_v50  ;;  %v9819_v33 = vpack.c.bf16 %v5150_v0, %v5134_v13  ;;  %v5164_v50 = vld [vmem:[#allocation8 + $0x4a0] sm:$0xff]  ;;  %v9821_v26 = vpack.c.bf16 %v5183_v44, %v5167_v14  ;;  %v4233_v13 = vpop.f32.mrb[151].mxu0  ;;  %v4322_v0 = vpop.f32.mrb[147].mxu1 }
 0x694   :  { %8571 = vmatmul.mubr.msk.f32.gmra.mrb[160].mxu0 %vm1478_vm7, %v11957_v42  ;;  %8575 = vmatmul.mubr.msk.f32.gmra.mrb[156].mxu1 %vm1478_vm7, %v11957_v42  ;;  %vm4888_vm0 = vcmp.gt.f32.partialorder %v4233_v13, 0.0  ;;  %vm4890_vm8 = vcmp.gt.f32.partialorder %v4322_v0, 0.0 }
 0x695   :  { %4419 = vmatprep.mubr.f32.mxu0 %v10101_v57  ;;  %4508 = vmatprep.mubr.f32.mxu1 %v10101_v57 }
 0x698   :  { %8572 = vmatmul.mubr.msk.f32.gmra.mrb[162].mxu0 %vm1478_vm7, %v11965_v16  ;;  %8576 = vmatmul.mubr.msk.f32.gmra.mrb[158].mxu1 %vm1478_vm7, %v11965_v16 }
 0x699   :  { %4579 = vmatprep.mubr.f32.mxu0 %v10101_v57  ;;  %4668 = vmatprep.mubr.f32.mxu1 %v10101_v57 }
 0x69c   :  { %8577 = vmatmul.mubr.msk.f32.vlgmr.msra.gmra.mrb[164].mxu0 %vm1478_vm7, %v11925_v4  ;;  %8581 = vmatmul.mubr.msk.f32.vlgmr.msra.gmra.mrb[160].mxu1 %vm1478_vm7, %v11925_v4 }
 0x69d   :  { %9780 = vmatpush1.bf16.msra.mxu0 %v9779_v29  ;;  %9788 = vmatpush1.bf16.msra.mxu1 %v9787_v28  ;;  %v5155_v29 = vld [vmem:[#allocation8 + $0x2d8] sm:$0xff]  ;;  %v9815_v28 = vpack.c.bf16 %v5180_v27, %v5164_v50  ;;  %v4953_v50 = vmul.f32 %v12075_v15, %v4233_v13  ;;  %v4955_v27 = vmul.f32 %v12075_v15, %v4322_v0 }
 0x69e   :  { %4585 = vmatprep.mubr.f32.mxu0 %v10101_v57  ;;  %4674 = vmatprep.mubr.f32.mxu1 %v10101_v57 }
 0x69f   :  { %9782 = vmatprep.subr.bf16.mxu0 %v9781_v40  ;;  %9790 = vmatprep.subr.bf16.mxu1 %v9789_v21  ;;  %v9833_v40 = vpack.c.bf16 %v5155_v29, %v5139_v7  ;;  %v5136_v21 = vld [vmem:[#allocation8 + $0xc0] sm:$0xff]  ;;  %v5019_v2 = vsel %vm4890_vm8, %v4322_v0, %v4955_v27  ;;  %v5173_v7 = vld [vmem:[#allocation8 + $0x4e8] sm:$0xff] }
 0x6a0   :  { %8578 = vmatmul.mubr.msk.f32.gmra.mrb[166].mxu0 %vm1478_vm7, %v11929_v19  ;;  %8582 = vmatmul.mubr.msk.f32.gmra.mrb[162].mxu1 %vm1478_vm7, %v11929_v19  ;;  %5083 = vst [vmem:[#allocation9 + $0x218] sm:$0xff] %v5019_v2  ;;  %v5189_v29 = vld [vmem:[#allocation8 + $0x6e8] sm:$0xff] }
 0x6a1   :  { %4591 = vmatprep.mubr.f32.mxu0 %v10101_v57  ;;  %4680 = vmatprep.mubr.f32.mxu1 %v10101_v57  ;;  %v9845_v35 = vpack.c.bf16 %v5189_v29, %v5173_v7  ;;  %v6169_v7 = vld [vmem:[#allocation8 + $0x148] sm:$0xff]  ;;  %v12158_v29 = vld [vmem:[#allocation3] sm:$0xff] }
 0x6a2   :  { %9784 = vmatpush1.bf16.msra.mxu0 %v9783_v34  ;;  %9792 = vmatpush1.bf16.msra.mxu1 %v9791_v22  ;;  %v5187_v34 = vld [vmem:[#allocation8 + $0x6d8] sm:$0xff]  ;;  %v5168_v22 = vld [vmem:[#allocation8 + $0x4c0] sm:$0xff] }
 0x6a3   :  { %9794 = vmatprep.subr.bf16.mxu0 %v9793_v37  ;;  %9802 = vmatprep.subr.bf16.mxu1 %v9801_v63  ;;  %v5184_v37 = vld [vmem:[#allocation8 + $0x6c0] sm:$0xff]  ;;  %v9827_v63 = vpack.c.bf16 %v5152_v11, %v5136_v21  ;;  %v9837_v8 = vpack.c.bf16 %v5187_v34, %v5171_v60  ;;  %v6161_v60 = vld [vmem:[#allocation8 + $0x108] sm:$0xff] }
 0x6a4   :  { %8579 = vmatmul.mubr.msk.f32.gmra.mrb[168].mxu0 %vm1478_vm7, %v11957_v42  ;;  %8583 = vmatmul.mubr.msk.f32.gmra.mrb[164].mxu1 %vm1478_vm7, %v11957_v42  ;;  %v9831_v53 = vpack.c.bf16 %v5184_v37, %v5168_v22  ;;  %v5172_v21 = vld [vmem:[#allocation8 + $0x4e0] sm:$0xff]  ;;  %v6177_v34 = vld [vmem:[#allocation8 + $0x308] sm:$0xff]  ;;  %v6163_v22 = vld [vmem:[#allocation8 + $0x118] sm:$0xff] }
 0x6a5   :  { %4597 = vmatprep.mubr.f32.mxu0 %v10101_v57  ;;  %4686 = vmatprep.mubr.f32.mxu1 %v10101_v57  ;;  %v5188_v11 = vld [vmem:[#allocation8 + $0x6e0] sm:$0xff]  ;;  %v6179_v37 = vld [vmem:[#allocation8 + $0x318] sm:$0xff] }
 0x6a8   :  { %8580 = vmatmul.mubr.msk.f32.gmra.mrb[170].mxu0 %vm1478_vm7, %v11965_v16  ;;  %8584 = vmatmul.mubr.msk.f32.gmra.mrb[166].mxu1 %vm1478_vm7, %v11965_v16 }
 0x6a9   :  { %4757 = vmatprep.mubr.f32.mxu0 %v10101_v57  ;;  %4846 = vmatprep.mubr.f32.mxu1 %v10101_v57 }
 0x6ac   :  { %8585 = vmatmul.mubr.msk.f32.vlgmr.msra.gmra.mrb[172].mxu0 %vm1478_vm7, %v11925_v4  ;;  %8589 = vmatmul.mubr.msk.f32.vlgmr.msra.gmra.mrb[168].mxu1 %vm1478_vm7, %v11925_v4 }
 0x6ad   :  { %9796 = vmatpush1.bf16.msra.mxu0 %v9795_v55  ;;  %9804 = vmatpush1.bf16.msra.mxu1 %v9803_v48  ;;  %v5159_v55 = vld [vmem:[#allocation8 + $0x2f8] sm:$0xff]  ;;  %v9829_v48 = vpack.c.bf16 %v5185_v3, %v5169_v61  ;;  %v5174_v61 = vld [vmem:[#allocation8 + $0x4f0] sm:$0xff] }
 0x6ae   :  { %4763 = vmatprep.mubr.f32.mxu0 %v10101_v57  ;;  %4852 = vmatprep.mubr.f32.mxu1 %v10101_v57  ;;  %v9849_v32 = vpack.c.bf16 %v5159_v55, %v5143_v30  ;;  %v5190_v3 = vld [vmem:[#allocation8 + $0x6f0] sm:$0xff]  ;;  %v6193_v30 = vld [vmem:[#allocation8 + $0x508] sm:$0xff] }
 0x6af   :  { %9798 = vmatprep.subr.bf16.mxu0 %v9797_v62  ;;  %9806 = vmatprep.subr.bf16.mxu1 %v9805_v6  ;;  %v9839_v62 = vpack.c.bf16 %v5186_v36, %v5170_v10  ;;  %v9841_v6 = vpack.c.bf16 %v5157_v51, %v5141_v31  ;;  %v9857_v10 = vpack.c.bf16 %v6177_v34, %v6161_v60  ;;  %v6160_v31 = vld [vmem:[#allocation8 + $0x100] sm:$0xff]  ;;  %v6178_v51 = vld [vmem:[#allocation8 + $0x310] sm:$0xff]  ;;  %v6209_v55 = vld [vmem:[#allocation8 + $0x708] sm:$0xff] }
 0x6b0   :  { %8586 = vmatmul.mubr.msk.f32.gmra.mrb[174].mxu0 %vm1478_vm7, %v11929_v19  ;;  %8590 = vmatmul.mubr.msk.f32.gmra.mrb[170].mxu1 %vm1478_vm7, %v11929_v19  ;;  %v9865_v36 = vpack.c.bf16 %v6179_v37, %v6163_v22  ;;  %v6170_v60 = vld [vmem:[#allocation8 + $0x150] sm:$0xff]  ;;  %v6201_v22 = vld [vmem:[#allocation8 + $0x548] sm:$0xff] }
 0x6b1   :  { %4769 = vmatprep.mubr.f32.mxu0 %v10101_v57  ;;  %4858 = vmatprep.mubr.f32.mxu1 %v10101_v57  ;;  %v6186_v34 = vld [vmem:[#allocation8 + $0x350] sm:$0xff]  ;;  %v6217_v37 = vld [vmem:[#allocation8 + $0x748] sm:$0xff] }
 0x6b2   :  { %9800 = vmatpush1.bf16.msra.mxu0 %v9799_v45  ;;  %9808 = vmatpush1.bf16.msra.mxu1 %v9807_v17  ;;  %v4936_v45 = vmul.f32 %v12075_v15, %v4225_v54  ;;  %v4938_v17 = vmul.f32 %v12075_v15, %v4314_v46 }
 0x6b3   :  { %9810 = vmatprep.subr.bf16.mxu0 %v9809_v58  ;;  %9818 = vmatprep.subr.bf16.mxu1 %v9817_v43  ;;  %v4937_v58 = vmul.f32 %v12075_v15, %v4227_v39  ;;  %v4939_v43 = vmul.f32 %v12075_v15, %v4316_v52 }
 0x6b4   :  { %8587 = vmatmul.mubr.msk.f32.gmra.mrb[176].mxu0 %vm1478_vm7, %v11957_v42  ;;  %8591 = vmatmul.mubr.msk.f32.gmra.mrb[172].mxu1 %vm1478_vm7, %v11957_v42  ;;  %v5000_v12 = vsel %vm4871_vm4, %v4225_v54, %v4936_v45  ;;  %v5002_v38 = vsel %vm4873_vm11, %v4314_v46, %v4938_v17  ;;  %v6176_v54 = vld [vmem:[#allocation8 + $0x300] sm:$0xff]  ;;  %v6162_v46 = vld [vmem:[#allocation8 + $0x110] sm:$0xff]  ;;  %v6165_v45 = vld [vmem:[#allocation8 + $0x128] sm:$0xff] }
 0x6b5   :  { %4775 = vmatprep.mubr.f32.mxu0 %v10101_v57  ;;  %4864 = vmatprep.mubr.f32.mxu1 %v10101_v57  ;;  %v5001_v14 = vsel %vm4872_vm3, %v4227_v39, %v4937_v58  ;;  %5064 = vst [vmem:[#allocation9] sm:$0xff] %v5000_v12  ;;  %5066 = vst [vmem:[#allocation9 + $0x10] sm:$0xff] %v5002_v38  ;;  %v5003_v44 = vsel %vm4874_vm12, %v4316_v52, %v4939_v43  ;;  %v6181_v17 = vld [vmem:[#allocation8 + $0x328] sm:$0xff]  ;;  %v6167_v58 = vld [vmem:[#allocation8 + $0x138] sm:$0xff] }
 0x6b6   :  { %5065 = vst [vmem:[#allocation9 + $0x8] sm:$0xff] %v5001_v14  ;;  %5067 = vst [vmem:[#allocation9 + $0x18] sm:$0xff] %v5003_v44  ;;  %v9861_v39 = vpack.c.bf16 %v6209_v55, %v6193_v30  ;;  %v6183_v43 = vld [vmem:[#allocation8 + $0x338] sm:$0xff]  ;;  %v6166_v12 = vld [vmem:[#allocation8 + $0x130] sm:$0xff] }
 0x6b7   :  { %v9881_v0 = vpack.c.bf16 %v6183_v43, %v6167_v58  ;;  %v6182_v38 = vld [vmem:[#allocation8 + $0x330] sm:$0xff]  ;;  %v6197_v14 = vld [vmem:[#allocation8 + $0x528] sm:$0xff] }
 0x6b8   :  { %8588 = vmatmul.mubr.msk.f32.gmra.mrb[178].mxu0 %vm1478_vm7, %v11965_v16  ;;  %8592 = vmatmul.mubr.msk.f32.gmra.mrb[174].mxu1 %vm1478_vm7, %v11965_v16  ;;  %v6213_v44 = vld [vmem:[#allocation8 + $0x728] sm:$0xff]  ;;  %v9883_v27 = vpack.c.bf16 %v6182_v38, %v6166_v12  ;;  %v6202_v30 = vld [vmem:[#allocation8 + $0x550] sm:$0xff] }
 0x6b9   :  { %5256 = vmatprep.mubr.f32.mxu0 %v10101_v57  ;;  %5345 = vmatprep.mubr.f32.mxu1 %v10101_v57  ;;  %v9877_v2 = vpack.c.bf16 %v6213_v44, %v6197_v14  ;;  %v6218_v55 = vld [vmem:[#allocation8 + $0x750] sm:$0xff]  ;;  %v6205_v58 = vld [vmem:[#allocation8 + $0x568] sm:$0xff] }
 0x6ba   :  { %v6221_v43 = vld [vmem:[#allocation8 + $0x768] sm:$0xff]  ;;  %v6206_v38 = vld [vmem:[#allocation8 + $0x570] sm:$0xff] }
 0x6bb   :  { %v6222_v14 = vld [vmem:[#allocation8 + $0x770] sm:$0xff]  ;;  %v7193_v44 = vld [vmem:[#allocation8 + $0x188] sm:$0xff] }
 0x6bc   :  { %8593 = vmatmul.mubr.msk.f32.vlgmr.msra.gmra.mrb[180].mxu0 %vm1478_vm7, %v11925_v4  ;;  %8597 = vmatmul.mubr.msk.f32.vlgmr.msra.gmra.mrb[176].mxu1 %vm1478_vm7, %v11925_v4 }
 0x6bd   :  { %9812 = vmatpush1.bf16.msra.mxu0 %v9811_v24  ;;  %9820 = vmatpush1.bf16.msra.mxu1 %v9819_v33  ;;  %v5016_v24 = vsel %vm4887_vm13, %v4231_v1, %v4952_v59  ;;  %v5018_v33 = vsel %vm4889_vm6, %v4320_v49, %v4954_v25  ;;  %v6194_v1 = vld [vmem:[#allocation8 + $0x510] sm:$0xff] }
 0x6be   :  { %5262 = vmatprep.mubr.f32.mxu0 %v10101_v57  ;;  %5351 = vmatprep.mubr.f32.mxu1 %v10101_v57  ;;  %5080 = vst [vmem:[#allocation9 + $0x200] sm:$0xff] %v5016_v24  ;;  %5082 = vst [vmem:[#allocation9 + $0x210] sm:$0xff] %v5018_v33  ;;  %v6210_v49 = vld [vmem:[#allocation8 + $0x710] sm:$0xff]  ;;  %v6199_v24 = vld [vmem:[#allocation8 + $0x538] sm:$0xff] }
 0x6bf   :  { %9814 = vmatprep.subr.bf16.mxu0 %v9813_v23  ;;  %9822 = vmatprep.subr.bf16.mxu1 %v9821_v26  ;;  %v5140_v23 = vld [vmem:[#allocation8 + $0xe0] sm:$0xff]  ;;  %v5017_v26 = vsel %vm4888_vm0, %v4233_v13, %v4953_v50  ;;  %v9871_v25 = vpack.c.bf16 %v6210_v49, %v6194_v1  ;;  %v9873_v13 = vpack.c.bf16 %v6181_v17, %v6165_v45  ;;  %v6215_v33 = vld [vmem:[#allocation8 + $0x738] sm:$0xff]  ;;  %v6174_v45 = vld [vmem:[#allocation8 + $0x170] sm:$0xff] }
 0x6c0   :  { %8594 = vmatmul.mubr.msk.f32.gmra.mrb[182].mxu0 %vm1478_vm7, %v11929_v19  ;;  %8598 = vmatmul.mubr.msk.f32.gmra.mrb[178].mxu1 %vm1478_vm7, %v11929_v19  ;;  %5081 = vst [vmem:[#allocation9 + $0x208] sm:$0xff] %v5017_v26  ;;  %v6212_v26 = vld [vmem:[#allocation8 + $0x720] sm:$0xff]  ;;  %v6190_v17 = vld [vmem:[#allocation8 + $0x370] sm:$0xff] }
 0x6c1   :  { %5268 = vmatprep.mubr.f32.mxu0 %v10101_v57  ;;  %5357 = vmatprep.mubr.f32.mxu1 %v10101_v57  ;;  %v6172_v1 = vld [vmem:[#allocation8 + $0x160] sm:$0xff] }
 0x6c2   :  { %9816 = vmatpush1.bf16.msra.mxu0 %v9815_v28  ;;  %9824 = vmatpush1.bf16.msra.mxu1 %v9823_v9  ;;  %v5175_v28 = vld [vmem:[#allocation8 + $0x4f8] sm:$0xff]  ;;  %v6188_v49 = vld [vmem:[#allocation8 + $0x360] sm:$0xff] }
 0x6c3   :  { %9826 = vmatprep.subr.bf16.mxu0 %v9825_v56  ;;  %9834 = vmatprep.subr.bf16.mxu1 %v9833_v40  ;;  %v5191_v9 = vld [vmem:[#allocation8 + $0x6f8] sm:$0xff]  ;;  %v9843_v56 = vpack.c.bf16 %v5156_v5, %v5140_v23  ;;  %v9851_v40 = vpack.c.bf16 %v5158_v20, %v5142_v47  ;;  %v6196_v23 = vld [vmem:[#allocation8 + $0x520] sm:$0xff]  ;;  %v9885_v5 = vpack.c.bf16 %v6215_v33, %v6199_v24  ;;  %v6198_v47 = vld [vmem:[#allocation8 + $0x530] sm:$0xff] }
 0x6c4   :  { %8595 = vmatmul.mubr.msk.f32.gmra.mrb[184].mxu0 %vm1478_vm7, %v11957_v42  ;;  %8599 = vmatmul.mubr.msk.f32.gmra.mrb[180].mxu1 %vm1478_vm7, %v11957_v42  ;;  %v9853_v41 = vpack.c.bf16 %v5191_v9, %v5175_v28  ;;  %v6214_v20 = vld [vmem:[#allocation8 + $0x730] sm:$0xff]  ;;  %v6185_v28 = vld [vmem:[#allocation8 + $0x348] sm:$0xff]  ;;  %v6171_v9 = vld [vmem:[#allocation8 + $0x158] sm:$0xff] }
 0x6c5   :  { %5274 = vmatprep.mubr.f32.mxu0 %v10101_v57  ;;  %5363 = vmatprep.mubr.f32.mxu1 %v10101_v57  ;;  %v7195_v24 = vld [vmem:[#allocation8 + $0x198] sm:$0xff] }
 0x6c6   :  { %v7211_v33 = vld [vmem:[#allocation8 + $0x398] sm:$0xff] }
 0x6c8   :  { %8596 = vmatmul.mubr.msk.f32.gmra.mrb[186].mxu0 %vm1478_vm7, %v11965_v16  ;;  %8600 = vmatmul.mubr.msk.f32.gmra.mrb[182].mxu1 %vm1478_vm7, %v11965_v16 }
 0x6c9   :  { %5434 = vmatprep.mubr.f32.mxu0 %v10101_v57  ;;  %5523 = vmatprep.mubr.f32.mxu1 %v10101_v57 }
 0x6cc   :  { %8601 = vmatmul.mubr.msk.f32.vlgmr.msra.gmra.mrb[188].mxu0 %vm1478_vm7, %v11925_v4  ;;  %8605 = vmatmul.mubr.msk.f32.vlgmr.msra.gmra.mrb[184].mxu1 %vm1478_vm7, %v11925_v4 }
 0x6cd   :  { %9828 = vmatpush1.bf16.msra.mxu0 %v9827_v63  ;;  %9836 = vmatpush1.bf16.msra.mxu1 %v9835_v18  ;;  %v9847_v63 = vpack.c.bf16 %v5188_v11, %v5172_v21  ;;  %v9855_v18 = vpack.c.bf16 %v5190_v3, %v5174_v61  ;;  %v9887_v21 = vpack.c.bf16 %v6214_v20, %v6198_v47  ;;  %v6168_v61 = vld [vmem:[#allocation8 + $0x140] sm:$0xff]  ;;  %v7194_v20 = vld [vmem:[#allocation8 + $0x190] sm:$0xff] }
 0x6ce   :  { %5440 = vmatprep.mubr.f32.mxu0 %v10101_v57  ;;  %5529 = vmatprep.mubr.f32.mxu1 %v10101_v57  ;;  %v9889_v11 = vpack.c.bf16 %v6185_v28, %v6169_v7  ;;  %v6184_v3 = vld [vmem:[#allocation8 + $0x340] sm:$0xff]  ;;  %v7210_v7 = vld [vmem:[#allocation8 + $0x390] sm:$0xff]  ;;  %v7225_v28 = vld [vmem:[#allocation8 + $0x588] sm:$0xff] }
 0x6cf   :  { %9830 = vmatprep.subr.bf16.mxu0 %v9829_v48  ;;  %9838 = vmatprep.subr.bf16.mxu1 %v9837_v8  ;;  %v6195_v48 = vld [vmem:[#allocation8 + $0x518] sm:$0xff]  ;;  %v7208_v47 = vld [vmem:[#allocation8 + $0x380] sm:$0xff] }
 0x6d0   :  { %8602 = vmatmul.mubr.msk.f32.gmra.mrb[190].mxu0 %vm1478_vm7, %v11929_v19  ;;  %8606 = vmatmul.mubr.msk.f32.gmra.mrb[186].mxu1 %vm1478_vm7, %v11929_v19  ;;  %v6211_v8 = vld [vmem:[#allocation8 + $0x718] sm:$0xff] }
 0x6d1   :  { %5446 = vmatprep.mubr.f32.mxu0 %v10101_v57  ;;  %5535 = vmatprep.mubr.f32.mxu1 %v10101_v57  ;;  %v9869_v52 = vpack.c.bf16 %v6211_v8, %v6195_v48  ;;  %v6173_v48 = vld [vmem:[#allocation8 + $0x168] sm:$0xff] }
 0x6d2   :  { %9832 = vmatpush1.bf16.msra.mxu0 %v9831_v53  ;;  %9840 = vmatpush1.bf16.msra.mxu1 %v9839_v62  ;;  %v9859_v53 = vpack.c.bf16 %v6176_v54, %v6160_v31  ;;  %v9867_v62 = vpack.c.bf16 %v6178_v51, %v6162_v46  ;;  %v6200_v31 = vld [vmem:[#allocation8 + $0x540] sm:$0xff]  ;;  %v9893_v46 = vpack.c.bf16 %v6217_v37, %v6201_v22  ;;  %v6189_v8 = vld [vmem:[#allocation8 + $0x368] sm:$0xff]  ;;  %v7226_v22 = vld [vmem:[#allocation8 + $0x590] sm:$0xff] }
 0x6d3   :  { %9842 = vmatprep.subr.bf16.mxu0 %v9841_v6  ;;  %9850 = vmatprep.subr.bf16.mxu1 %v9849_v32  ;;  %v6192_v6 = vld [vmem:[#allocation8 + $0x500] sm:$0xff]  ;;  %v7242_v37 = vld [vmem:[#allocation8 + $0x790] sm:$0xff] }
 0x6d4   :  { %8603 = vmatmul.mubr.msk.f32.gmra.mrb[192].mxu0 %vm1478_vm7, %v11957_v42  ;;  %8607 = vmatmul.mubr.msk.f32.gmra.mrb[188].mxu1 %vm1478_vm7, %v11957_v42  ;;  %v6208_v32 = vld [vmem:[#allocation8 + $0x700] sm:$0xff] }
 0x6d5   :  { %5452 = vmatprep.mubr.f32.mxu0 %v10101_v57  ;;  %5541 = vmatprep.mubr.f32.mxu1 %v10101_v57  ;;  %v9863_v59 = vpack.c.bf16 %v6208_v32, %v6192_v6  ;;  %v6216_v54 = vld [vmem:[#allocation8 + $0x740] sm:$0xff]  ;;  %v9903_v32 = vpack.c.bf16 %v6218_v55, %v6202_v30 }
 0x6d6   :  { %v9895_v6 = vpack.c.bf16 %v6216_v54, %v6200_v31  ;;  %v9935_v54 = vpack.c.bf16 %v7242_v37, %v7226_v22  ;;  %v7196_v30 = vld [vmem:[#allocation8 + $0x1a0] sm:$0xff] }
 0x6d7   :  { %v7212_v55 = vld [vmem:[#allocation8 + $0x3a0] sm:$0xff] }
 0x6d8   :  { %8604 = vmatmul.mubr.msk.f32.gmra.mrb[194].mxu0 %vm1478_vm7, %v11965_v16  ;;  %8608 = vmatmul.mubr.msk.f32.gmra.mrb[190].mxu1 %vm1478_vm7, %v11965_v16  ;;  %v7204_v22 = vld [vmem:[#allocation8 + $0x1e0] sm:$0xff] }
 0x6d9   :  { %5612 = vmatprep.mubr.f32.mxu0 %v10101_v57  ;;  %5701 = vmatprep.mubr.f32.mxu1 %v10101_v57  ;;  %v7220_v37 = vld [vmem:[#allocation8 + $0x3e0] sm:$0xff] }
 0x6dc   :  { %8609 = vmatmul.mubr.msk.f32.vlgmr.msra.gmra.mrb[196].mxu0 %vm1478_vm7, %v11925_v4  ;;  %8613 = vmatmul.mubr.msk.f32.vlgmr.msra.gmra.mrb[192].mxu1 %vm1478_vm7, %v11925_v4 }
 0x6dd   :  { %9844 = vmatpush1.bf16.msra.mxu0 %v9843_v56  ;;  %9852 = vmatpush1.bf16.msra.mxu1 %v9851_v40  ;;  %v6187_v56 = vld [vmem:[#allocation8 + $0x358] sm:$0xff]  ;;  %v9879_v40 = vpack.c.bf16 %v6212_v26, %v6196_v23  ;;  %v9929_v26 = vpack.c.bf16 %v7211_v33, %v7195_v24  ;;  %v7233_v24 = vld [vmem:[#allocation8 + $0x5c8] sm:$0xff] }
 0x6de   :  { %5618 = vmatprep.mubr.f32.mxu0 %v10101_v57  ;;  %5707 = vmatprep.mubr.f32.mxu1 %v10101_v57  ;;  %v7249_v33 = vld [vmem:[#allocation8 + $0x7c8] sm:$0xff] }
 0x6df   :  { %9846 = vmatprep.subr.bf16.mxu0 %v9845_v35  ;;  %9854 = vmatprep.subr.bf16.mxu1 %v9853_v41  ;;  %v9897_v35 = vpack.c.bf16 %v6187_v56, %v6171_v9  ;;  %v12166_v41 = vld [vmem:[#allocation3 + $0x8] sm:$0xff]  ;;  %v12230_v9 = vld [vmem:[#allocation3 + $0x18] sm:$0xff] }
 0x6e0   :  { %8610 = vmatmul.mubr.msk.f32.gmra.mrb[198].mxu0 %vm1478_vm7, %v11929_v19  ;;  %8614 = vmatmul.mubr.msk.f32.gmra.mrb[194].mxu1 %vm1478_vm7, %v11929_v19  ;;  %v7241_v56 = vld [vmem:[#allocation8 + $0x788] sm:$0xff] }
 0x6e1   :  { %5624 = vmatprep.mubr.f32.mxu0 %v10101_v57  ;;  %5713 = vmatprep.mubr.f32.mxu1 %v10101_v57 }
 0x6e2   :  { %9848 = vmatpush1.bf16.msra.mxu0 %v9847_v63  ;;  %9856 = vmatpush1.bf16.msra.mxu1 %v9855_v18  ;;  %v6203_v63 = vld [vmem:[#allocation8 + $0x558] sm:$0xff] }
 0x6e3   :  { %9858 = vmatprep.subr.bf16.mxu0 %v9857_v10  ;;  %9866 = vmatprep.subr.bf16.mxu1 %v9865_v36  ;;  %v6219_v18 = vld [vmem:[#allocation8 + $0x758] sm:$0xff]  ;;  %v9891_v10 = vpack.c.bf16 %v6184_v3, %v6168_v61  ;;  %v9899_v36 = vpack.c.bf16 %v6186_v34, %v6170_v60  ;;  %v7224_v61 = vld [vmem:[#allocation8 + $0x580] sm:$0xff]  ;;  %v9925_v60 = vpack.c.bf16 %v7241_v56, %v7225_v28  ;;  %v7234_v28 = vld [vmem:[#allocation8 + $0x5d0] sm:$0xff] }
 0x6e4   :  { %8611 = vmatmul.mubr.msk.f32.gmra.mrb[200].mxu0 %vm1478_vm7, %v11957_v42  ;;  %8615 = vmatmul.mubr.msk.f32.gmra.mrb[196].mxu1 %vm1478_vm7, %v11957_v42  ;;  %v9901_v51 = vpack.c.bf16 %v6219_v18, %v6203_v63  ;;  %v7240_v3 = vld [vmem:[#allocation8 + $0x780] sm:$0xff]  ;;  %v7197_v63 = vld [vmem:[#allocation8 + $0x1a8] sm:$0xff]  ;;  %v7250_v56 = vld [vmem:[#allocation8 + $0x7d0] sm:$0xff] }
 0x6e5   :  { %5630 = vmatprep.mubr.f32.mxu0 %v10101_v57  ;;  %5719 = vmatprep.mubr.f32.mxu1 %v10101_v57  ;;  %v7213_v18 = vld [vmem:[#allocation8 + $0x3a8] sm:$0xff]  ;;  %v9927_v31 = vpack.c.bf16 %v7240_v3, %v7224_v61  ;;  %v9967_v3 = vpack.c.bf16 %v7250_v56, %v7234_v28 }
 0x6e8   :  { %8612 = vmatmul.mubr.msk.f32.gmra.mrb[202].mxu0 %vm1478_vm7, %v11965_v16  ;;  %8616 = vmatmul.mubr.msk.f32.gmra.mrb[198].mxu1 %vm1478_vm7, %v11965_v16 }
 0x6e9   :  { %5790 = vmatprep.mubr.f32.mxu0 %v10101_v57  ;;  %5879 = vmatprep.mubr.f32.mxu1 %v10101_v57 }
 0x6ec   :  { %8617 = vmatmul.mubr.msk.f32.vlgmr.msra.gmra.mrb[204].mxu0 %vm1478_vm7, %v11925_v4  ;;  %8621 = vmatmul.mubr.msk.f32.vlgmr.msra.gmra.mrb[200].mxu1 %vm1478_vm7, %v11925_v4  ;;  %v6164_v4 = vld [vmem:[#allocation8 + $0x120] sm:$0xff] }
 0x6ed   :  { %9860 = vmatpush1.bf16.msra.mxu0 %v9859_v53  ;;  %9868 = vmatpush1.bf16.msra.mxu1 %v9867_v62  ;;  %v6175_v53 = vld [vmem:[#allocation8 + $0x178] sm:$0xff] }
 0x6ee   :  { %5796 = vmatprep.mubr.f32.mxu0 %v10101_v57  ;;  %5885 = vmatprep.mubr.f32.mxu1 %v10101_v57  ;;  %v6191_v62 = vld [vmem:[#allocation8 + $0x378] sm:$0xff] }
 0x6ef   :  { %9862 = vmatprep.subr.bf16.mxu0 %v9861_v39  ;;  %9870 = vmatprep.subr.bf16.mxu1 %v9869_v52  ;;  %v9905_v39 = vpack.c.bf16 %v6189_v8, %v6173_v48  ;;  %v9913_v52 = vpack.c.bf16 %v6191_v62, %v6175_v53  ;;  %v7198_v48 = vld [vmem:[#allocation8 + $0x1b0] sm:$0xff]  ;;  %v7229_v53 = vld [vmem:[#allocation8 + $0x5a8] sm:$0xff] }
 0x6f0   :  { %8618 = vmatmul.mubr.msk.f32.gmra.mrb[206].mxu0 %vm1478_vm7, %v11929_v19  ;;  %8622 = vmatmul.mubr.msk.f32.gmra.mrb[202].mxu1 %vm1478_vm7, %v11929_v19  ;;  %v6180_v19 = vld [vmem:[#allocation8 + $0x320] sm:$0xff]  ;;  %v7214_v8 = vld [vmem:[#allocation8 + $0x3b0] sm:$0xff]  ;;  %v7245_v62 = vld [vmem:[#allocation8 + $0x7a8] sm:$0xff] }
 0x6f1   :  { %5802 = vmatprep.mubr.f32.mxu0 %v10101_v57  ;;  %5891 = vmatprep.mubr.f32.mxu1 %v10101_v57  ;;  %v9875_v50 = vpack.c.bf16 %v6180_v19, %v6164_v4  ;;  %v6220_v4 = vld [vmem:[#allocation8 + $0x760] sm:$0xff]  ;;  %v9909_v19 = vpack.c.bf16 %v6221_v43, %v6205_v58  ;;  %v7230_v58 = vld [vmem:[#allocation8 + $0x5b0] sm:$0xff] }
 0x6f2   :  { %9864 = vmatpush1.bf16.msra.mxu0 %v9863_v59  ;;  %9872 = vmatpush1.bf16.msra.mxu1 %v9871_v25  ;;  %v6207_v59 = vld [vmem:[#allocation8 + $0x578] sm:$0xff]  ;;  %v7246_v43 = vld [vmem:[#allocation8 + $0x7b0] sm:$0xff] }
 0x6f3   :  { %9874 = vmatprep.subr.bf16.mxu0 %v9873_v13  ;;  %9882 = vmatprep.subr.bf16.mxu1 %v9881_v0  ;;  %v6223_v25 = vld [vmem:[#allocation8 + $0x778] sm:$0xff]  ;;  %v9915_v13 = vpack.c.bf16 %v6190_v17, %v6174_v45  ;;  %v6204_v0 = vld [vmem:[#allocation8 + $0x560] sm:$0xff]  ;;  %v9941_v45 = vpack.c.bf16 %v7245_v62, %v7229_v53 }
 0x6f4   :  { %8619 = vmatmul.mubr.msk.f32.gmra.mrb[208].mxu0 %vm1478_vm7, %v11957_v42  ;;  %8623 = vmatmul.mubr.msk.f32.gmra.mrb[204].mxu1 %vm1478_vm7, %v11957_v42  ;;  %v9917_v12 = vpack.c.bf16 %v6223_v25, %v6207_v59  ;;  %v7201_v59 = vld [vmem:[#allocation8 + $0x1c8] sm:$0xff] }
 0x6f5   :  { %5808 = vmatprep.mubr.f32.mxu0 %v10101_v57  ;;  %5897 = vmatprep.mubr.f32.mxu1 %v10101_v57  ;;  %v7217_v25 = vld [vmem:[#allocation8 + $0x3c8] sm:$0xff] }
 0x6f8   :  { %8620 = vmatmul.mubr.msk.f32.gmra.mrb[210].mxu0 %vm1478_vm7, %v11965_v16  ;;  %8624 = vmatmul.mubr.msk.f32.gmra.mrb[206].mxu1 %vm1478_vm7, %v11965_v16 }
 0x6f9   :  { %6288 = vmatprep.mubr.f32.mxu0 %v10101_v57  ;;  %6377 = vmatprep.mubr.f32.mxu1 %v10101_v57 }
 0x6fc   :  { %8625 = vmatmul.mubr.msk.f32.vlgmr.msra.gmra.mrb[212].mxu0 %vm1478_vm7, %v12158_v29  ;;  %8629 = vmatmul.mubr.msk.f32.vlgmr.msra.gmra.mrb[208].mxu1 %vm1478_vm7, %v12158_v29 }
 0x6fd   :  { %9876 = vmatpush1.bf16.msra.mxu0 %v9875_v50  ;;  %9884 = vmatpush1.bf16.msra.mxu1 %v9883_v27  ;;  %v9911_v50 = vpack.c.bf16 %v6220_v4, %v6204_v0  ;;  %v9919_v27 = vpack.c.bf16 %v6222_v14, %v6206_v38  ;;  %v9951_v4 = vpack.c.bf16 %v7246_v43, %v7230_v58  ;;  %v7200_v38 = vld [vmem:[#allocation8 + $0x1c0] sm:$0xff] }
 0x6fe   :  { %6294 = vmatprep.mubr.f32.mxu0 %v10101_v57  ;;  %6383 = vmatprep.mubr.f32.mxu1 %v10101_v57  ;;  %v7216_v14 = vld [vmem:[#allocation8 + $0x3c0] sm:$0xff] }
 0x6ff   :  { %9878 = vmatprep.subr.bf16.mxu0 %v9877_v2  ;;  %9886 = vmatprep.subr.bf16.mxu1 %v9885_v5  ;;  %v12222_v2 = vld [vmem:[#allocation3 + $0x10] sm:$0xff]  ;;  %v7192_v5 = vld [vmem:[#allocation8 + $0x180] sm:$0xff] }
 0x700   :  { %8626 = vmatmul.mubr.msk.f32.gmra.mrb[214].mxu0 %vm1478_vm7, %v12166_v41  ;;  %8630 = vmatmul.mubr.msk.f32.gmra.mrb[210].mxu1 %vm1478_vm7, %v12166_v41 }
 0x701   :  { %6300 = vmatprep.mubr.f32.mxu0 %v10101_v57  ;;  %6389 = vmatprep.mubr.f32.mxu1 %v10101_v57 }
 0x702   :  { %9880 = vmatpush1.bf16.msra.mxu0 %v9879_v40  ;;  %9888 = vmatpush1.bf16.msra.mxu1 %v9887_v21  ;;  %v7227_v40 = vld [vmem:[#allocation8 + $0x598] sm:$0xff] }
 0x703   :  { %9890 = vmatprep.subr.bf16.mxu0 %v9889_v11  ;;  %9898 = vmatprep.subr.bf16.mxu1 %v9897_v35  ;;  %v7243_v21 = vld [vmem:[#allocation8 + $0x798] sm:$0xff]  ;;  %v9923_v11 = vpack.c.bf16 %v7208_v47, %v7192_v5  ;;  %v9931_v35 = vpack.c.bf16 %v7210_v7, %v7194_v20  ;;  %v7232_v5 = vld [vmem:[#allocation8 + $0x5c0] sm:$0xff]  ;;  %v9957_v20 = vpack.c.bf16 %v7249_v33, %v7233_v24 }
 0x704   :  { %8627 = vmatmul.mubr.msk.f32.gmra.mrb[216].mxu0 %vm1478_vm7, %v11957_v42  ;;  %8631 = vmatmul.mubr.msk.f32.gmra.mrb[212].mxu1 %vm1478_vm7, %v11957_v42  ;;  %v9933_v34 = vpack.c.bf16 %v7243_v21, %v7227_v40  ;;  %v7248_v47 = vld [vmem:[#allocation8 + $0x7c0] sm:$0xff]  ;;  %v7205_v40 = vld [vmem:[#allocation8 + $0x1e8] sm:$0xff] }
 0x705   :  { %6306 = vmatprep.mubr.f32.mxu0 %v10101_v57  ;;  %6395 = vmatprep.mubr.f32.mxu1 %v10101_v57  ;;  %v7221_v21 = vld [vmem:[#allocation8 + $0x3e8] sm:$0xff]  ;;  %v9959_v61 = vpack.c.bf16 %v7248_v47, %v7232_v5 }
 0x708   :  { %8628 = vmatmul.mubr.msk.f32.gmra.mrb[218].mxu0 %vm1478_vm7, %v11965_v16  ;;  %8632 = vmatmul.mubr.msk.f32.gmra.mrb[214].mxu1 %vm1478_vm7, %v11965_v16 }
 0x709   :  { %6466 = vmatprep.mubr.f32.mxu0 %v10101_v57  ;;  %6555 = vmatprep.mubr.f32.mxu1 %v10101_v57 }
 0x70c   :  { %8633 = vmatmul.mubr.msk.f32.vlgmr.msra.gmra.mrb[220].mxu0 %vm1478_vm7, %v12158_v29  ;;  %8637 = vmatmul.mubr.msk.f32.vlgmr.msra.gmra.mrb[216].mxu1 %vm1478_vm7, %v12158_v29 }
 0x70d   :  { %9892 = vmatpush1.bf16.msra.mxu0 %v9891_v10  ;;  %9900 = vmatpush1.bf16.msra.mxu1 %v9899_v36  ;;  %v7199_v10 = vld [vmem:[#allocation8 + $0x1b8] sm:$0xff] }
 0x70e   :  { %6472 = vmatprep.mubr.f32.mxu0 %v10101_v57  ;;  %6561 = vmatprep.mubr.f32.mxu1 %v10101_v57  ;;  %v7215_v36 = vld [vmem:[#allocation8 + $0x3b8] sm:$0xff] }
 0x70f   :  { %9894 = vmatprep.subr.bf16.mxu0 %v9893_v46  ;;  %9902 = vmatprep.subr.bf16.mxu1 %v9901_v51  ;;  %v9937_v46 = vpack.c.bf16 %v7213_v18, %v7197_v63  ;;  %v9945_v51 = vpack.c.bf16 %v7215_v36, %v7199_v10  ;;  %v7206_v63 = vld [vmem:[#allocation8 + $0x1f0] sm:$0xff]  ;;  %v12304_v10 = vld [vmem:[#allocation8 + $0x5e8] sm:$0xff] }
 0x710   :  { %8634 = vmatmul.mubr.msk.f32.gmra.mrb[222].mxu0 %vm1478_vm7, %v12166_v41  ;;  %8638 = vmatmul.mubr.msk.f32.gmra.mrb[218].mxu1 %vm1478_vm7, %v12166_v41  ;;  %v7222_v18 = vld [vmem:[#allocation8 + $0x3f0] sm:$0xff] }
 0x711   :  { %6478 = vmatprep.mubr.f32.mxu0 %v10101_v57  ;;  %6567 = vmatprep.mubr.f32.mxu1 %v10101_v57 }
 0x712   :  { %9896 = vmatpush1.bf16.msra.mxu0 %v9895_v6  ;;  %9904 = vmatpush1.bf16.msra.mxu1 %v9903_v32  ;;  %v7231_v6 = vld [vmem:[#allocation8 + $0x5b8] sm:$0xff] }
 0x713   :  { %9906 = vmatprep.subr.bf16.mxu0 %v9905_v39  ;;  %9914 = vmatprep.subr.bf16.mxu1 %v9913_v52  ;;  %v7247_v32 = vld [vmem:[#allocation8 + $0x7b8] sm:$0xff]  ;;  %v9939_v39 = vpack.c.bf16 %v7212_v55, %v7196_v30  ;;  %v9947_v52 = vpack.c.bf16 %v7214_v8, %v7198_v48 }
 0x714   :  { %8635 = vmatmul.mubr.msk.f32.gmra.mrb[224].mxu0 %vm1478_vm7, %v11957_v42  ;;  %8639 = vmatmul.mubr.msk.f32.gmra.mrb[220].mxu1 %vm1478_vm7, %v11957_v42  ;;  %v9907_v42 = vpack.c.bf16 %v6188_v49, %v6172_v1  ;;  %v7228_v1 = vld [vmem:[#allocation8 + $0x5a0] sm:$0xff]  ;;  %v9949_v17 = vpack.c.bf16 %v7247_v32, %v7231_v6  ;;  %v7239_v30 = vld [vmem:[#allocation8 + $0x5f8] sm:$0xff] }
 0x715   :  { %6484 = vmatprep.mubr.f32.mxu0 %v10101_v57  ;;  %6573 = vmatprep.mubr.f32.mxu1 %v10101_v57  ;;  %v7244_v49 = vld [vmem:[#allocation8 + $0x7a0] sm:$0xff]  ;;  %v7255_v55 = vld [vmem:[#allocation8 + $0x7f8] sm:$0xff] }
 0x716   :  { %v9943_v0 = vpack.c.bf16 %v7244_v49, %v7228_v1  ;;  %v12312_v6 = vld [vmem:[#allocation8 + $0x5e0] sm:$0xff] }
 0x717   :  { %v12314_v32 = vld [vmem:[#allocation8 + $0x7e0] sm:$0xff] }
 0x718   :  { %8636 = vmatmul.mubr.msk.f32.gmra.mrb[226].mxu0 %vm1478_vm7, %v11965_v16  ;;  %8640 = vmatmul.mubr.msk.f32.gmra.mrb[222].mxu1 %vm1478_vm7, %v11965_v16  ;;  %v7209_v16 = vld [vmem:[#allocation8 + $0x388] sm:$0xff] }
 0x719   :  { %6644 = vmatprep.mubr.f32.mxu0 %v10101_v57  ;;  %6733 = vmatprep.mubr.f32.mxu1 %v10101_v57  ;;  %v9921_v23 = vpack.c.bf16 %v7209_v16, %v7193_v44  ;;  %v7202_v44 = vld [vmem:[#allocation8 + $0x1d0] sm:$0xff] }
 0x71a   :  { %v7218_v16 = vld [vmem:[#allocation8 + $0x3d0] sm:$0xff] }
 0x71c   :  { %8641 = vmatmul.mubr.msk.f32.vlgmr.msra.gmra.mrb[228].mxu0 %vm1478_vm7, %v12158_v29  ;;  %8645 = vmatmul.mubr.msk.f32.vlgmr.msra.gmra.mrb[224].mxu1 %vm1478_vm7, %v12158_v29 }
 0x71d   :  { %9908 = vmatpush1.bf16.msra.mxu0 %v9907_v42  ;;  %9916 = vmatpush1.bf16.msra.mxu1 %v9915_v13  ;;  %v7203_v42 = vld [vmem:[#allocation8 + $0x1d8] sm:$0xff] }
 0x71e   :  { %6650 = vmatprep.mubr.f32.mxu0 %v10101_v57  ;;  %6739 = vmatprep.mubr.f32.mxu1 %v10101_v57  ;;  %v7219_v13 = vld [vmem:[#allocation8 + $0x3d8] sm:$0xff] }
 0x71f   :  { %9910 = vmatprep.subr.bf16.mxu0 %v9909_v19  ;;  %9918 = vmatprep.subr.bf16.mxu1 %v9917_v12  ;;  %v9953_v19 = vpack.c.bf16 %v7217_v25, %v7201_v59  ;;  %v9961_v12 = vpack.c.bf16 %v7219_v13, %v7203_v42  ;;  %v9981_v25 = vpack.c.bf16 %v7255_v55, %v7239_v30  ;;  %v7238_v13 = vld [vmem:[#allocation8 + $0x5f0] sm:$0xff] }
 0x720   :  { %8642 = vmatmul.mubr.msk.f32.gmra.mrb[230].mxu0 %vm1478_vm7, %v12166_v41  ;;  %8646 = vmatmul.mubr.msk.f32.gmra.mrb[226].mxu1 %vm1478_vm7, %v12166_v41  ;;  %v9975_v42 = vpack.c.bf16 %v12314_v32, %v12312_v6 }
 0x721   :  { %6656 = vmatprep.mubr.f32.mxu0 %v10101_v57  ;;  %6745 = vmatprep.mubr.f32.mxu1 %v10101_v57 }
 0x722   :  { %9912 = vmatpush1.bf16.msra.mxu0 %v9911_v50  ;;  %9920 = vmatpush1.bf16.msra.mxu1 %v9919_v27  ;;  %v7235_v50 = vld [vmem:[#allocation8 + $0x5d8] sm:$0xff] }
 0x723   :  { %9922 = vmatprep.subr.bf16.mxu0 %v9921_v23  ;;  %9930 = vmatprep.subr.bf16.mxu1 %v9929_v26  ;;  %v7251_v27 = vld [vmem:[#allocation8 + $0x7d8] sm:$0xff]  ;;  %v9955_v23 = vpack.c.bf16 %v7216_v14, %v7200_v38  ;;  %v9963_v26 = vpack.c.bf16 %v7218_v16, %v7202_v44 }
 0x724   :  { %8643 = vmatmul.mubr.msk.f32.gmra.mrb[232].mxu0 %vm1478_vm7, %v12222_v2  ;;  %8647 = vmatmul.mubr.msk.f32.gmra.mrb[228].mxu1 %vm1478_vm7, %v12222_v2  ;;  %v9965_v7 = vpack.c.bf16 %v7251_v27, %v7235_v50 }
 0x725   :  { %6662 = vmatprep.mubr.f32.mxu0 %v10101_v57  ;;  %6751 = vmatprep.mubr.f32.mxu1 %v10101_v57 }
 0x728   :  { %8644 = vmatmul.mubr.msk.f32.gmra.mrb[234].mxu0 %vm1478_vm7, %v12230_v9  ;;  %8648 = vmatmul.mubr.msk.f32.gmra.mrb[230].mxu1 %vm1478_vm7, %v12230_v9 }
 0x729   :  { %6822 = vmatprep.mubr.f32.mxu0 %v10101_v57  ;;  %6911 = vmatprep.mubr.f32.mxu1 %v10101_v57 }
 0x72c   :  { %8649 = vmatmul.mubr.msk.f32.vlgmr.msra.gmra.mrb[236].mxu0 %vm1478_vm7, %v12158_v29  ;;  %8653 = vmatmul.mubr.msk.f32.vlgmr.msra.gmra.mrb[232].mxu1 %vm1478_vm7, %v12158_v29 }
 0x72d   :  { %9924 = vmatpush1.bf16.msra.mxu0 %v9923_v11  ;;  %9932 = vmatpush1.bf16.msra.mxu1 %v9931_v35  ;;  %v7207_v11 = vld [vmem:[#allocation8 + $0x1f8] sm:$0xff] }
 0x72e   :  { %6828 = vmatprep.mubr.f32.mxu0 %v10101_v57  ;;  %6917 = vmatprep.mubr.f32.mxu1 %v10101_v57  ;;  %v7223_v35 = vld [vmem:[#allocation8 + $0x3f8] sm:$0xff] }
 0x72f   :  { %9926 = vmatprep.subr.bf16.mxu0 %v9925_v60  ;;  %9934 = vmatprep.subr.bf16.mxu1 %v9933_v34  ;;  %v9969_v60 = vpack.c.bf16 %v7221_v21, %v7205_v40  ;;  %v9977_v34 = vpack.c.bf16 %v7223_v35, %v7207_v11 }
 0x730   :  { %8650 = vmatmul.mubr.msk.f32.gmra.mrb[238].mxu0 %vm1478_vm7, %v12166_v41  ;;  %8654 = vmatmul.mubr.msk.f32.gmra.mrb[234].mxu1 %vm1478_vm7, %v12166_v41 }
 0x731   :  { %6834 = vmatprep.mubr.f32.mxu0 %v10101_v57  ;;  %6923 = vmatprep.mubr.f32.mxu1 %v10101_v57 }
 0x732   :  { %9928 = vmatpush1.bf16.msra.mxu0 %v9927_v31  ;;  %9936 = vmatpush1.bf16.msra.mxu1 %v9935_v54  ;;  %v9971_v54 = vpack.c.bf16 %v7220_v37, %v7204_v22 }
 0x733   :  { %9938 = vmatprep.subr.bf16.mxu0 %v9937_v46  ;;  %9946 = vmatprep.subr.bf16.mxu1 %v9945_v51  ;;  %v9979_v46 = vpack.c.bf16 %v7222_v18, %v7206_v63  ;;  %v7253_v51 = vld [vmem:[#allocation8 + $0x7e8] sm:$0xff] }
 0x734   :  { %8651 = vmatmul.mubr.msk.f32.gmra.mrb[240].mxu0 %vm1478_vm7, %v12222_v2  ;;  %8655 = vmatmul.mubr.msk.f32.gmra.mrb[236].mxu1 %vm1478_vm7, %v12222_v2 }
 0x735   :  { %6840 = vmatprep.mubr.f32.mxu0 %v10101_v57  ;;  %6929 = vmatprep.mubr.f32.mxu1 %v10101_v57 }
 0x738   :  { %8652 = vmatmul.mubr.msk.f32.gmra.mrb[242].mxu0 %vm1478_vm7, %v12230_v9  ;;  %8656 = vmatmul.mubr.msk.f32.gmra.mrb[238].mxu1 %vm1478_vm7, %v12230_v9 }
 0x739   :  { %7320 = vmatprep.mubr.f32.mxu0 %v10101_v57  ;;  %7409 = vmatprep.mubr.f32.mxu1 %v10101_v57 }
 0x73c   :  { %8657 = vmatmul.mubr.msk.f32.vlgmr.msra.gmra.mrb[244].mxu0 %vm1478_vm7, %v12158_v29  ;;  %8661 = vmatmul.mubr.msk.f32.vlgmr.msra.gmra.mrb[240].mxu1 %vm1478_vm7, %v12158_v29 }
 0x73d   :  { %9940 = vmatpush1.bf16.msra.mxu0 %v9939_v39  ;;  %9948 = vmatpush1.bf16.msra.mxu1 %v9947_v52 }
 0x73e   :  { %7326 = vmatprep.mubr.f32.mxu0 %v10101_v57  ;;  %7415 = vmatprep.mubr.f32.mxu1 %v10101_v57 }
 0x73f   :  { %9942 = vmatprep.subr.bf16.mxu0 %v9941_v45  ;;  %9950 = vmatprep.subr.bf16.mxu1 %v9949_v17  ;;  %v9973_v45 = vpack.c.bf16 %v7253_v51, %v12304_v10 }
 0x740   :  { %8658 = vmatmul.mubr.msk.f32.gmra.mrb[246].mxu0 %vm1478_vm7, %v12166_v41  ;;  %8662 = vmatmul.mubr.msk.f32.gmra.mrb[242].mxu1 %vm1478_vm7, %v12166_v41 }
 0x741   :  { %7332 = vmatprep.mubr.f32.mxu0 %v10101_v57  ;;  %7421 = vmatprep.mubr.f32.mxu1 %v10101_v57 }
 0x742   :  { %9944 = vmatpush1.bf16.msra.mxu0 %v9943_v0  ;;  %9952 = vmatpush1.bf16.msra.mxu1 %v9951_v4  ;;  %v7254_v0 = vld [vmem:[#allocation8 + $0x7f0] sm:$0xff] }
 0x743   :  { %9954 = vmatprep.subr.bf16.mxu0 %v9953_v19  ;;  %9962 = vmatprep.subr.bf16.mxu1 %v9961_v12  ;;  %v9983_v33 = vpack.c.bf16 %v7254_v0, %v7238_v13 }
 0x744   :  { %8659 = vmatmul.mubr.msk.f32.gmra.mrb[248].mxu0 %vm1478_vm7, %v12222_v2  ;;  %8663 = vmatmul.mubr.msk.f32.gmra.mrb[244].mxu1 %vm1478_vm7, %v12222_v2 }
 0x745   :  { %7338 = vmatprep.mubr.f32.mxu0 %v10101_v57  ;;  %7427 = vmatprep.mubr.f32.mxu1 %v10101_v57 }
 0x748   :  { %8660 = vmatmul.mubr.msk.f32.gmra.mrb[250].mxu0 %vm1478_vm7, %v12230_v9  ;;  %8664 = vmatmul.mubr.msk.f32.gmra.mrb[246].mxu1 %vm1478_vm7, %v12230_v9 }
 0x749   :  { %7498 = vmatprep.mubr.f32.mxu0 %v10101_v57  ;;  %7587 = vmatprep.mubr.f32.mxu1 %v10101_v57 }
 0x74c   :  { %8665 = vmatmul.mubr.msk.f32.vlgmr.msra.gmra.mrb[252].mxu0 %vm1478_vm7, %v12158_v29  ;;  %8669 = vmatmul.mubr.msk.f32.vlgmr.msra.gmra.mrb[248].mxu1 %vm1478_vm7, %v12158_v29 }
 0x74d   :  { %9956 = vmatpush1.bf16.msra.mxu0 %v9955_v23  ;;  %9964 = vmatpush1.bf16.msra.mxu1 %v9963_v26 }
 0x74e   :  { %7504 = vmatprep.mubr.f32.mxu0 %v10101_v57  ;;  %7593 = vmatprep.mubr.f32.mxu1 %v10101_v57 }
 0x74f   :  { %9958 = vmatprep.subr.bf16.mxu0 %v9957_v20  ;;  %9966 = vmatprep.subr.bf16.mxu1 %v9965_v7 }
 0x750   :  { %8666 = vmatmul.mubr.msk.f32.gmra.mrb[254].mxu0 %vm1478_vm7, %v12166_v41  ;;  %8670 = vmatmul.mubr.msk.f32.gmra.mrb[250].mxu1 %vm1478_vm7, %v12166_v41 }
 0x751   :  { %7510 = vmatprep.mubr.f32.mxu0 %v10101_v57  ;;  %7599 = vmatprep.mubr.f32.mxu1 %v10101_v57 }
 0x752   :  { %9960 = vmatpush1.bf16.msra.mxu0 %v9959_v61  ;;  %9968 = vmatpush1.bf16.msra.mxu1 %v9967_v3 }
 0x753   :  { %9970 = vmatprep.subr.bf16.mxu0 %v9969_v60  ;;  %9978 = vmatprep.subr.bf16.mxu1 %v9977_v34 }
 0x754   :  { %8667 = vmatmul.mubr.msk.f32.gmra.mrb[0].mxu0 %vm1478_vm7, %v12222_v2  ;;  %8671 = vmatmul.mubr.msk.f32.gmra.mrb[252].mxu1 %vm1478_vm7, %v12222_v2 }
 0x755   :  { %7516 = vmatprep.mubr.f32.mxu0 %v10101_v57  ;;  %7605 = vmatprep.mubr.f32.mxu1 %v10101_v57 }
 0x757   :  { %v4237_v36 = vpop.f32.mrb[152].mxu0  ;;  %v4326_v31 = vpop.f32.mrb[148].mxu1 }
 0x758   :  { %vm4903_vm9 = vcmp.gt.f32.partialorder %v4237_v36, 0.0  ;;  %v4968_v48 = vmul.f32 %v12075_v15, %v4237_v36  ;;  %vm4905_vm10 = vcmp.gt.f32.partialorder %v4326_v31, 0.0  ;;  %v4970_v8 = vmul.f32 %v12075_v15, %v4326_v31  ;;  %v4239_v53 = vpop.f32.mrb[153].mxu0  ;;  %v4328_v62 = vpop.f32.mrb[149].mxu1  ;;  %8668 = vmatmul.mubr.msk.f32.gmra.mrb[2].mxu0 %vm1478_vm7, %v12230_v9  ;;  %8672 = vmatmul.mubr.msk.f32.gmra.mrb[254].mxu1 %vm1478_vm7, %v12230_v9 }
 0x759   :  { %vm4904_vm1 = vcmp.gt.f32.partialorder %v4239_v53, 0.0  ;;  %v4969_v39 = vmul.f32 %v12075_v15, %v4239_v53  ;;  %vm4906_vm14 = vcmp.gt.f32.partialorder %v4328_v62, 0.0  ;;  %v4971_v52 = vmul.f32 %v12075_v15, %v4328_v62  ;;  %7676 = vmatprep.mubr.f32.mxu0 %v10101_v57  ;;  %7765 = vmatprep.mubr.f32.mxu1 %v10101_v57 }
 0x75a   :  { %v5032_v1 = vsel %vm4903_vm9, %v4237_v36, %v4968_v48  ;;  %v5034_v49 = vsel %vm4905_vm10, %v4326_v31, %v4970_v8 }
 0x75b   :  { %5096 = vst [vmem:[#allocation9 + $0x400] sm:$0xff] %v5032_v1  ;;  %5098 = vst [vmem:[#allocation9 + $0x410] sm:$0xff] %v5034_v49  ;;  %v5033_v17 = vsel %vm4904_vm1, %v4239_v53, %v4969_v39  ;;  %v5035_v58 = vsel %vm4906_vm14, %v4328_v62, %v4971_v52  ;;  %v4243_v43 = vpop.f32.mrb[154].mxu0  ;;  %v4332_v59 = vpop.f32.mrb[150].mxu1 }
 0x75c   :  { %5097 = vst [vmem:[#allocation9 + $0x408] sm:$0xff] %v5033_v17  ;;  %5099 = vst [vmem:[#allocation9 + $0x418] sm:$0xff] %v5035_v58  ;;  %vm4919_vm5 = vcmp.gt.f32.partialorder %v4243_v43, 0.0  ;;  %v4984_v4 = vmul.f32 %v12075_v15, %v4243_v43  ;;  %vm4921_vm2 = vcmp.gt.f32.partialorder %v4332_v59, 0.0  ;;  %v4986_v19 = vmul.f32 %v12075_v15, %v4332_v59  ;;  %v4245_v12 = vpop.f32.mrb[155].mxu0  ;;  %v4334_v38 = vpop.f32.mrb[151].mxu1  ;;  %8673 = vmatmul.mubr.msk.f32.vlgmr.msra.gmra.mrb[4].mxu0 %vm1478_vm7, %v12158_v29 }
 0x75d   :  { %8677 = vmatmul.mubr.msk.f32.vlgmr.msra.gmra.mrb[0].mxu1 %vm1478_vm7, %v12158_v29  ;;  %vm4920_vm15 = vcmp.gt.f32.partialorder %v4245_v12, 0.0  ;;  %v4985_v14 = vmul.f32 %v12075_v15, %v4245_v12  ;;  %vm4922_vm4 = vcmp.gt.f32.partialorder %v4334_v38, 0.0  ;;  %v4987_v44 = vmul.f32 %v12075_v15, %v4334_v38  ;;  %9972 = vmatpush1.bf16.msra.mxu0 %v9971_v54 }
 0x75e   :  { %9980 = vmatpush1.bf16.msra.mxu1 %v9979_v46  ;;  %v5048_v16 = vsel %vm4919_vm5, %v4243_v43, %v4984_v4  ;;  %v5050_v24 = vsel %vm4921_vm2, %v4332_v59, %v4986_v19  ;;  %7682 = vmatprep.mubr.f32.mxu0 %v10101_v57 }
 0x75f   :  { %7771 = vmatprep.mubr.f32.mxu1 %v10101_v57  ;;  %5112 = vst [vmem:[#allocation9 + $0x600] sm:$0xff] %v5048_v16  ;;  %5114 = vst [vmem:[#allocation9 + $0x610] sm:$0xff] %v5050_v24  ;;  %v5049_v50 = vsel %vm4920_vm15, %v4245_v12, %v4985_v14  ;;  %v5051_v27 = vsel %vm4922_vm4, %v4334_v38, %v4987_v44  ;;  %v4403_v23 = vpop.f32.mrb[156].mxu0  ;;  %v4492_v26 = vpop.f32.mrb[152].mxu1  ;;  %9974 = vmatprep.subr.bf16.mxu0 %v9973_v45 }
 0x760   :  { %9982 = vmatprep.subr.bf16.mxu1 %v9981_v25  ;;  %5113 = vst [vmem:[#allocation9 + $0x608] sm:$0xff] %v5049_v50  ;;  %5115 = vst [vmem:[#allocation9 + $0x618] sm:$0xff] %v5051_v27  ;;  %vm4875_vm11 = vcmp.gt.f32.partialorder %v4403_v23, 0.0  ;;  %v4940_v5 = vmul.f32 %v12075_v15, %v4403_v23  ;;  %vm4877_vm3 = vcmp.gt.f32.partialorder %v4492_v26, 0.0  ;;  %v4942_v47 = vmul.f32 %v12075_v15, %v4492_v26  ;;  %v4405_v20 = vpop.f32.mrb[157].mxu0  ;;  %v4494_v7 = vpop.f32.mrb[153].mxu1 }
 0x761   :  { %8674 = vmatmul.mubr.msk.f32.gmra.mrb[6].mxu0 %vm1478_vm7, %v12166_v41  ;;  %8678 = vmatmul.mubr.msk.f32.gmra.mrb[2].mxu1 %vm1478_vm7, %v12166_v41  ;;  %vm4876_vm12 = vcmp.gt.f32.partialorder %v4405_v20, 0.0  ;;  %v4941_v28 = vmul.f32 %v12075_v15, %v4405_v20  ;;  %vm4878_vm13 = vcmp.gt.f32.partialorder %v4494_v7, 0.0  ;;  %v4943_v56 = vmul.f32 %v12075_v15, %v4494_v7 }
 0x762   :  { %7688 = vmatprep.mubr.f32.mxu0 %v10101_v57  ;;  %7777 = vmatprep.mubr.f32.mxu1 %v10101_v57  ;;  %v5004_v40 = vsel %vm4875_vm11, %v4403_v23, %v4940_v5  ;;  %v5006_v21 = vsel %vm4877_vm3, %v4492_v26, %v4942_v47 }
 0x763   :  { %9976 = vmatpush1.bf16.msra.mxu0 %v9975_v42  ;;  %9984 = vmatpush1.bf16.msra.mxu1 %v9983_v33  ;;  %5068 = vst [vmem:[#allocation9 + $0x20] sm:$0xff] %v5004_v40  ;;  %5070 = vst [vmem:[#allocation9 + $0x30] sm:$0xff] %v5006_v21  ;;  %v5005_v11 = vsel %vm4876_vm12, %v4405_v20, %v4941_v28  ;;  %v5007_v35 = vsel %vm4878_vm13, %v4494_v7, %v4943_v56  ;;  %v4409_v61 = vpop.f32.mrb[158].mxu0  ;;  %v4498_v3 = vpop.f32.mrb[154].mxu1 }
 0x764   :  { %5069 = vst [vmem:[#allocation9 + $0x28] sm:$0xff] %v5005_v11  ;;  %5071 = vst [vmem:[#allocation9 + $0x38] sm:$0xff] %v5007_v35  ;;  %vm4891_vm6 = vcmp.gt.f32.partialorder %v4409_v61, 0.0  ;;  %v4956_v60 = vmul.f32 %v12075_v15, %v4409_v61  ;;  %vm4893_vm0 = vcmp.gt.f32.partialorder %v4498_v3, 0.0  ;;  %v4958_v34 = vmul.f32 %v12075_v15, %v4498_v3  ;;  %v4411_v22 = vpop.f32.mrb[159].mxu0  ;;  %v4500_v37 = vpop.f32.mrb[155].mxu1 }
 0x765   :  { %8675 = vmatmul.mubr.msk.f32.gmra.mrb[8].mxu0 %vm1478_vm7, %v12222_v2  ;;  %8679 = vmatmul.mubr.msk.f32.gmra.mrb[4].mxu1 %vm1478_vm7, %v12222_v2  ;;  %vm4892_vm8 = vcmp.gt.f32.partialorder %v4411_v22, 0.0  ;;  %v4957_v63 = vmul.f32 %v12075_v15, %v4411_v22  ;;  %vm4894_vm9 = vcmp.gt.f32.partialorder %v4500_v37, 0.0  ;;  %v4959_v18 = vmul.f32 %v12075_v15, %v4500_v37 }
 0x766   :  { %7694 = vmatprep.mubr.f32.mxu0 %v10101_v57  ;;  %7783 = vmatprep.mubr.f32.mxu1 %v10101_v57  ;;  %v5020_v10 = vsel %vm4891_vm6, %v4409_v61, %v4956_v60  ;;  %v5022_v36 = vsel %vm4893_vm0, %v4498_v3, %v4958_v34 }
 0x767   :  { %5084 = vst [vmem:[#allocation9 + $0x220] sm:$0xff] %v5020_v10  ;;  %5086 = vst [vmem:[#allocation9 + $0x230] sm:$0xff] %v5022_v36  ;;  %v5021_v31 = vsel %vm4892_vm8, %v4411_v22, %v4957_v63  ;;  %v5023_v54 = vsel %vm4894_vm9, %v4500_v37, %v4959_v18  ;;  %v4415_v46 = vpop.f32.mrb[160].mxu0  ;;  %v4504_v51 = vpop.f32.mrb[156].mxu1 }
 0x768   :  { %5085 = vst [vmem:[#allocation9 + $0x228] sm:$0xff] %v5021_v31  ;;  %5087 = vst [vmem:[#allocation9 + $0x238] sm:$0xff] %v5023_v54  ;;  %vm4907_vm10 = vcmp.gt.f32.partialorder %v4415_v46, 0.0  ;;  %v4972_v30 = vmul.f32 %v12075_v15, %v4415_v46  ;;  %vm4909_vm1 = vcmp.gt.f32.partialorder %v4504_v51, 0.0  ;;  %v4974_v55 = vmul.f32 %v12075_v15, %v4504_v51  ;;  %v4417_v48 = vpop.f32.mrb[161].mxu0  ;;  %v4506_v8 = vpop.f32.mrb[157].mxu1 }
 0x769   :  { %8676 = vmatmul.mubr.msk.f32.gmra.mrb[10].mxu0 %vm1478_vm7, %v12230_v9  ;;  %8680 = vmatmul.mubr.msk.f32.gmra.mrb[6].mxu1 %vm1478_vm7, %v12230_v9  ;;  %vm4908_vm14 = vcmp.gt.f32.partialorder %v4417_v48, 0.0  ;;  %v4973_v53 = vmul.f32 %v12075_v15, %v4417_v48  ;;  %vm4910_vm5 = vcmp.gt.f32.partialorder %v4506_v8, 0.0  ;;  %v4975_v62 = vmul.f32 %v12075_v15, %v4506_v8 }
 0x76a   :  { %7854 = vmatprep.mubr.f32.mxu0 %v10101_v57  ;;  %7943 = vmatprep.mubr.f32.mxu1 %v10101_v57  ;;  %v5036_v6 = vsel %vm4907_vm10, %v4415_v46, %v4972_v30  ;;  %v5038_v32 = vsel %vm4909_vm1, %v4504_v51, %v4974_v55 }
 0x76b   :  { %5100 = vst [vmem:[#allocation9 + $0x420] sm:$0xff] %v5036_v6  ;;  %5102 = vst [vmem:[#allocation9 + $0x430] sm:$0xff] %v5038_v32  ;;  %v5037_v39 = vsel %vm4908_vm14, %v4417_v48, %v4973_v53  ;;  %v5039_v52 = vsel %vm4910_vm5, %v4506_v8, %v4975_v62  ;;  %v4421_v1 = vpop.f32.mrb[162].mxu0  ;;  %v4510_v49 = vpop.f32.mrb[158].mxu1 }
 0x76c   :  { %5101 = vst [vmem:[#allocation9 + $0x428] sm:$0xff] %v5037_v39  ;;  %5103 = vst [vmem:[#allocation9 + $0x438] sm:$0xff] %v5039_v52  ;;  %vm4923_vm2 = vcmp.gt.f32.partialorder %v4421_v1, 0.0  ;;  %v4988_v45 = vmul.f32 %v12075_v15, %v4421_v1  ;;  %vm4925_vm15 = vcmp.gt.f32.partialorder %v4510_v49, 0.0  ;;  %v4990_v17 = vmul.f32 %v12075_v15, %v4510_v49  ;;  %v4423_v58 = vpop.f32.mrb[163].mxu0  ;;  %v4512_v43 = vpop.f32.mrb[159].mxu1 }
 0x76d   :  { %8681 = vmatmul.mubr.msk.f32.vlgmr.msra.gmra.mrb[12].mxu0 %vm1478_vm7, %v12158_v29  ;;  %8685 = vmatmul.mubr.msk.f32.vlgmr.msra.gmra.mrb[8].mxu1 %vm1478_vm7, %v12158_v29  ;;  %vm4924_vm4 = vcmp.gt.f32.partialorder %v4423_v58, 0.0  ;;  %v4989_v59 = vmul.f32 %v12075_v15, %v4423_v58  ;;  %vm4926_vm11 = vcmp.gt.f32.partialorder %v4512_v43, 0.0  ;;  %v4991_v25 = vmul.f32 %v12075_v15, %v4512_v43 }
 0x76e   :  { %7860 = vmatprep.mubr.f32.mxu0 %v10101_v57  ;;  %7949 = vmatprep.mubr.f32.mxu1 %v10101_v57  ;;  %v5052_v42 = vsel %vm4923_vm2, %v4421_v1, %v4988_v45  ;;  %v5054_v13 = vsel %vm4925_vm15, %v4510_v49, %v4990_v17 }
 0x76f   :  { %5116 = vst [vmem:[#allocation9 + $0x620] sm:$0xff] %v5052_v42  ;;  %5118 = vst [vmem:[#allocation9 + $0x630] sm:$0xff] %v5054_v13  ;;  %v5053_v0 = vsel %vm4924_vm4, %v4423_v58, %v4989_v59  ;;  %v5055_v4 = vsel %vm4926_vm11, %v4512_v43, %v4991_v25  ;;  %v4581_v19 = vpop.f32.mrb[164].mxu0  ;;  %v4670_v12 = vpop.f32.mrb[160].mxu1 }
 0x770   :  { %5117 = vst [vmem:[#allocation9 + $0x628] sm:$0xff] %v5053_v0  ;;  %5119 = vst [vmem:[#allocation9 + $0x638] sm:$0xff] %v5055_v4  ;;  %vm4879_vm3 = vcmp.gt.f32.partialorder %v4581_v19, 0.0  ;;  %v4944_v29 = vmul.f32 %v12075_v15, %v4581_v19  ;;  %vm4881_vm12 = vcmp.gt.f32.partialorder %v4670_v12, 0.0  ;;  %v4946_v38 = vmul.f32 %v12075_v15, %v4670_v12  ;;  %v4583_v14 = vpop.f32.mrb[165].mxu0  ;;  %v4672_v44 = vpop.f32.mrb[161].mxu1 }
 0x771   :  { %8682 = vmatmul.mubr.msk.f32.gmra.mrb[14].mxu0 %vm1478_vm7, %v12166_v41  ;;  %8686 = vmatmul.mubr.msk.f32.gmra.mrb[10].mxu1 %vm1478_vm7, %v12166_v41  ;;  %vm4880_vm13 = vcmp.gt.f32.partialorder %v4583_v14, 0.0  ;;  %v4945_v16 = vmul.f32 %v12075_v15, %v4583_v14  ;;  %vm4882_vm6 = vcmp.gt.f32.partialorder %v4672_v44, 0.0  ;;  %v4947_v24 = vmul.f32 %v12075_v15, %v4672_v44 }
 0x772   :  { %7866 = vmatprep.mubr.f32.mxu0 %v10101_v57  ;;  %7955 = vmatprep.mubr.f32.mxu1 %v10101_v57  ;;  %v5008_v33 = vsel %vm4879_vm3, %v4581_v19, %v4944_v29  ;;  %v5010_v50 = vsel %vm4881_vm12, %v4670_v12, %v4946_v38 }
 0x773   :  { %5072 = vst [vmem:[#allocation9 + $0x40] sm:$0xff] %v5008_v33  ;;  %5074 = vst [vmem:[#allocation9 + $0x50] sm:$0xff] %v5010_v50  ;;  %v5009_v27 = vsel %vm4880_vm13, %v4583_v14, %v4945_v16  ;;  %v5011_v23 = vsel %vm4882_vm6, %v4672_v44, %v4947_v24  ;;  %v4587_v26 = vpop.f32.mrb[166].mxu0  ;;  %v4676_v5 = vpop.f32.mrb[162].mxu1 }
 0x774   :  { %5073 = vst [vmem:[#allocation9 + $0x48] sm:$0xff] %v5009_v27  ;;  %5075 = vst [vmem:[#allocation9 + $0x58] sm:$0xff] %v5011_v23  ;;  %vm4895_vm0 = vcmp.gt.f32.partialorder %v4587_v26, 0.0  ;;  %v4960_v41 = vmul.f32 %v12075_v15, %v4587_v26  ;;  %vm4897_vm8 = vcmp.gt.f32.partialorder %v4676_v5, 0.0  ;;  %v4962_v47 = vmul.f32 %v12075_v15, %v4676_v5  ;;  %v4589_v20 = vpop.f32.mrb[167].mxu0  ;;  %v4678_v7 = vpop.f32.mrb[163].mxu1 }
 0x775   :  { %8683 = vmatmul.mubr.msk.f32.gmra.mrb[16].mxu0 %vm1478_vm7, %v12222_v2  ;;  %8687 = vmatmul.mubr.msk.f32.gmra.mrb[12].mxu1 %vm1478_vm7, %v12222_v2  ;;  %vm4896_vm9 = vcmp.gt.f32.partialorder %v4589_v20, 0.0  ;;  %v4961_v28 = vmul.f32 %v12075_v15, %v4589_v20  ;;  %vm4898_vm10 = vcmp.gt.f32.partialorder %v4678_v7, 0.0  ;;  %v4963_v56 = vmul.f32 %v12075_v15, %v4678_v7 }
 0x776   :  { %7872 = vmatprep.mubr.f32.mxu0 %v10101_v57  ;;  %7961 = vmatprep.mubr.f32.mxu1 %v10101_v57  ;;  %v5024_v40 = vsel %vm4895_vm0, %v4587_v26, %v4960_v41  ;;  %v5026_v21 = vsel %vm4897_vm8, %v4676_v5, %v4962_v47 }
 0x777   :  { %5088 = vst [vmem:[#allocation9 + $0x240] sm:$0xff] %v5024_v40  ;;  %5090 = vst [vmem:[#allocation9 + $0x250] sm:$0xff] %v5026_v21  ;;  %v5025_v11 = vsel %vm4896_vm9, %v4589_v20, %v4961_v28  ;;  %v5027_v35 = vsel %vm4898_vm10, %v4678_v7, %v4963_v56  ;;  %v4593_v61 = vpop.f32.mrb[168].mxu0  ;;  %v4682_v3 = vpop.f32.mrb[164].mxu1 }
 0x778   :  { %5089 = vst [vmem:[#allocation9 + $0x248] sm:$0xff] %v5025_v11  ;;  %5091 = vst [vmem:[#allocation9 + $0x258] sm:$0xff] %v5027_v35  ;;  %vm4911_vm1 = vcmp.gt.f32.partialorder %v4593_v61, 0.0  ;;  %v4976_v2 = vmul.f32 %v12075_v15, %v4593_v61  ;;  %vm4913_vm14 = vcmp.gt.f32.partialorder %v4682_v3, 0.0  ;;  %v4978_v60 = vmul.f32 %v12075_v15, %v4682_v3  ;;  %v4595_v34 = vpop.f32.mrb[169].mxu0  ;;  %v4684_v22 = vpop.f32.mrb[165].mxu1 }
 0x779   :  { %8684 = vmatmul.mubr.msk.f32.gmra.mrb[18].mxu0 %vm1478_vm7, %v12230_v9  ;;  %8688 = vmatmul.mubr.msk.f32.gmra.mrb[14].mxu1 %vm1478_vm7, %v12230_v9  ;;  %vm4912_vm5 = vcmp.gt.f32.partialorder %v4595_v34, 0.0  ;;  %v4977_v57 = vmul.f32 %v12075_v15, %v4595_v34  ;;  %vm4914_vm2 = vcmp.gt.f32.partialorder %v4684_v22, 0.0  ;;  %v4979_v37 = vmul.f32 %v12075_v15, %v4684_v22 }
 0x77a   :  { %v5040_v63 = vsel %vm4911_vm1, %v4593_v61, %v4976_v2  ;;  %v5042_v18 = vsel %vm4913_vm14, %v4682_v3, %v4978_v60 }
 0x77b   :  { %5104 = vst [vmem:[#allocation9 + $0x440] sm:$0xff] %v5040_v63  ;;  %5106 = vst [vmem:[#allocation9 + $0x450] sm:$0xff] %v5042_v18  ;;  %v5041_v10 = vsel %vm4912_vm5, %v4595_v34, %v4977_v57  ;;  %v5043_v36 = vsel %vm4914_vm2, %v4684_v22, %v4979_v37  ;;  %v4599_v31 = vpop.f32.mrb[170].mxu0  ;;  %v4688_v54 = vpop.f32.mrb[166].mxu1 }
 0x77c   :  { %5105 = vst [vmem:[#allocation9 + $0x448] sm:$0xff] %v5041_v10  ;;  %5107 = vst [vmem:[#allocation9 + $0x458] sm:$0xff] %v5043_v36  ;;  %vm4927_vm15 = vcmp.gt.f32.partialorder %v4599_v31, 0.0  ;;  %v4992_v46 = vmul.f32 %v12075_v15, %v4599_v31  ;;  %vm4929_vm7 = vcmp.gt.f32.partialorder %v4688_v54, 0.0  ;;  %v4994_v9 = vmul.f32 %v12075_v15, %v4688_v54  ;;  %v4601_v51 = vpop.f32.mrb[171].mxu0  ;;  %v4690_v30 = vpop.f32.mrb[167].mxu1 }
 0x77d   :  { %vm4928_vm4 = vcmp.gt.f32.partialorder %v4601_v51, 0.0  ;;  %v4993_v55 = vmul.f32 %v12075_v15, %v4601_v51  ;;  %vm4930_vm11 = vcmp.gt.f32.partialorder %v4690_v30, 0.0  ;;  %v4995_v48 = vmul.f32 %v12075_v15, %v4690_v30 }
 0x77e   :  { %v5056_v8 = vsel %vm4927_vm15, %v4599_v31, %v4992_v46  ;;  %v5058_v53 = vsel %vm4929_vm7, %v4688_v54, %v4994_v9 }
 0x77f   :  { %5120 = vst [vmem:[#allocation9 + $0x640] sm:$0xff] %v5056_v8  ;;  %5122 = vst [vmem:[#allocation9 + $0x650] sm:$0xff] %v5058_v53  ;;  %v5057_v62 = vsel %vm4928_vm4, %v4601_v51, %v4993_v55  ;;  %v5059_v6 = vsel %vm4930_vm11, %v4690_v30, %v4995_v48  ;;  %v4759_v32 = vpop.f32.mrb[172].mxu0  ;;  %v4848_v39 = vpop.f32.mrb[168].mxu1 }
 0x780   :  { %5121 = vst [vmem:[#allocation9 + $0x648] sm:$0xff] %v5057_v62  ;;  %5123 = vst [vmem:[#allocation9 + $0x658] sm:$0xff] %v5059_v6  ;;  %vm4883_vm3 = vcmp.gt.f32.partialorder %v4759_v32, 0.0  ;;  %v4948_v52 = vmul.f32 %v12075_v15, %v4759_v32  ;;  %vm4885_vm12 = vcmp.gt.f32.partialorder %v4848_v39, 0.0  ;;  %v4950_v1 = vmul.f32 %v12075_v15, %v4848_v39  ;;  %v4761_v49 = vpop.f32.mrb[173].mxu0  ;;  %v4850_v45 = vpop.f32.mrb[169].mxu1 }
 0x781   :  { %vm4884_vm13 = vcmp.gt.f32.partialorder %v4761_v49, 0.0  ;;  %v4949_v17 = vmul.f32 %v12075_v15, %v4761_v49  ;;  %vm4886_vm6 = vcmp.gt.f32.partialorder %v4850_v45, 0.0  ;;  %v4951_v58 = vmul.f32 %v12075_v15, %v4850_v45 }
 0x782   :  { %v5012_v43 = vsel %vm4883_vm3, %v4759_v32, %v4948_v52  ;;  %v5014_v59 = vsel %vm4885_vm12, %v4848_v39, %v4950_v1 }
 0x783   :  { %5076 = vst [vmem:[#allocation9 + $0x60] sm:$0xff] %v5012_v43  ;;  %5078 = vst [vmem:[#allocation9 + $0x70] sm:$0xff] %v5014_v59  ;;  %v5013_v25 = vsel %vm4884_vm13, %v4761_v49, %v4949_v17  ;;  %v5015_v42 = vsel %vm4886_vm6, %v4850_v45, %v4951_v58  ;;  %v4765_v13 = vpop.f32.mrb[174].mxu0  ;;  %v4854_v0 = vpop.f32.mrb[170].mxu1 }
 0x784   :  { %5077 = vst [vmem:[#allocation9 + $0x68] sm:$0xff] %v5013_v25  ;;  %5079 = vst [vmem:[#allocation9 + $0x78] sm:$0xff] %v5015_v42  ;;  %vm4899_vm0 = vcmp.gt.f32.partialorder %v4765_v13, 0.0  ;;  %v4964_v4 = vmul.f32 %v12075_v15, %v4765_v13  ;;  %vm4901_vm8 = vcmp.gt.f32.partialorder %v4854_v0, 0.0  ;;  %v4966_v19 = vmul.f32 %v12075_v15, %v4854_v0  ;;  %v4767_v12 = vpop.f32.mrb[175].mxu0  ;;  %v4856_v29 = vpop.f32.mrb[171].mxu1 }
 0x785   :  { %vm4900_vm9 = vcmp.gt.f32.partialorder %v4767_v12, 0.0  ;;  %v4965_v38 = vmul.f32 %v12075_v15, %v4767_v12  ;;  %vm4902_vm10 = vcmp.gt.f32.partialorder %v4856_v29, 0.0  ;;  %v4967_v14 = vmul.f32 %v12075_v15, %v4856_v29 }
 0x786   :  { %v5028_v44 = vsel %vm4899_vm0, %v4765_v13, %v4964_v4  ;;  %v5030_v16 = vsel %vm4901_vm8, %v4854_v0, %v4966_v19 }
 0x787   :  { %5092 = vst [vmem:[#allocation9 + $0x260] sm:$0xff] %v5028_v44  ;;  %5094 = vst [vmem:[#allocation9 + $0x270] sm:$0xff] %v5030_v16  ;;  %v5029_v24 = vsel %vm4900_vm9, %v4767_v12, %v4965_v38  ;;  %v5031_v33 = vsel %vm4902_vm10, %v4856_v29, %v4967_v14  ;;  %v4771_v50 = vpop.f32.mrb[176].mxu0  ;;  %v4860_v27 = vpop.f32.mrb[172].mxu1 }
 0x788   :  { %5093 = vst [vmem:[#allocation9 + $0x268] sm:$0xff] %v5029_v24  ;;  %5095 = vst [vmem:[#allocation9 + $0x278] sm:$0xff] %v5031_v33  ;;  %vm4915_vm1 = vcmp.gt.f32.partialorder %v4771_v50, 0.0  ;;  %v4980_v23 = vmul.f32 %v12075_v15, %v4771_v50  ;;  %vm4917_vm14 = vcmp.gt.f32.partialorder %v4860_v27, 0.0  ;;  %v4982_v26 = vmul.f32 %v12075_v15, %v4860_v27  ;;  %v4773_v5 = vpop.f32.mrb[177].mxu0  ;;  %v4862_v41 = vpop.f32.mrb[173].mxu1 }
 0x789   :  { %vm4916_vm5 = vcmp.gt.f32.partialorder %v4773_v5, 0.0  ;;  %v4981_v47 = vmul.f32 %v12075_v15, %v4773_v5  ;;  %vm4918_vm2 = vcmp.gt.f32.partialorder %v4862_v41, 0.0  ;;  %v4983_v20 = vmul.f32 %v12075_v15, %v4862_v41 }
 0x78a   :  { %v5044_v7 = vsel %vm4915_vm1, %v4771_v50, %v4980_v23  ;;  %v5046_v28 = vsel %vm4917_vm14, %v4860_v27, %v4982_v26 }
 0x78b   :  { %5108 = vst [vmem:[#allocation9 + $0x460] sm:$0xff] %v5044_v7  ;;  %5110 = vst [vmem:[#allocation9 + $0x470] sm:$0xff] %v5046_v28  ;;  %v5045_v56 = vsel %vm4916_vm5, %v4773_v5, %v4981_v47  ;;  %v5047_v40 = vsel %vm4918_vm2, %v4862_v41, %v4983_v20  ;;  %v4777_v21 = vpop.f32.mrb[178].mxu0  ;;  %v4866_v11 = vpop.f32.mrb[174].mxu1 }
 0x78c   :  { %5109 = vst [vmem:[#allocation9 + $0x468] sm:$0xff] %v5045_v56  ;;  %5111 = vst [vmem:[#allocation9 + $0x478] sm:$0xff] %v5047_v40  ;;  %vm4931_vm15 = vcmp.gt.f32.partialorder %v4777_v21, 0.0  ;;  %v4996_v35 = vmul.f32 %v12075_v15, %v4777_v21  ;;  %vm4933_vm7 = vcmp.gt.f32.partialorder %v4866_v11, 0.0  ;;  %v4998_v61 = vmul.f32 %v12075_v15, %v4866_v11  ;;  %v4779_v3 = vpop.f32.mrb[179].mxu0  ;;  %v4868_v2 = vpop.f32.mrb[175].mxu1 }
 0x78d   :  { %vm4932_vm4 = vcmp.gt.f32.partialorder %v4779_v3, 0.0  ;;  %v4997_v60 = vmul.f32 %v12075_v15, %v4779_v3  ;;  %vm4934_vm11 = vcmp.gt.f32.partialorder %v4868_v2, 0.0  ;;  %v4999_v34 = vmul.f32 %v12075_v15, %v4868_v2 }
 0x78e   :  { %v5060_v22 = vsel %vm4931_vm15, %v4777_v21, %v4996_v35  ;;  %v5062_v57 = vsel %vm4933_vm7, %v4866_v11, %v4998_v61 }
 0x78f   :  { %5124 = vst [vmem:[#allocation9 + $0x660] sm:$0xff] %v5060_v22  ;;  %5126 = vst [vmem:[#allocation9 + $0x670] sm:$0xff] %v5062_v57  ;;  %v5061_v37 = vsel %vm4932_vm4, %v4779_v3, %v4997_v60  ;;  %v5063_v63 = vsel %vm4934_vm11, %v4868_v2, %v4999_v34  ;;  %v5258_v18 = vpop.f32.mrb[180].mxu0  ;;  %v5347_v10 = vpop.f32.mrb[176].mxu1 }
 0x790   :  { %5125 = vst [vmem:[#allocation9 + $0x668] sm:$0xff] %v5061_v37  ;;  %5127 = vst [vmem:[#allocation9 + $0x678] sm:$0xff] %v5063_v63  ;;  %vm5904_vm3 = vcmp.gt.f32.partialorder %v5258_v18, 0.0  ;;  %v5968_v36 = vmul.f32 %v5258_v18, %v12075_v15  ;;  %vm5906_vm12 = vcmp.gt.f32.partialorder %v5347_v10, 0.0  ;;  %v5970_v31 = vmul.f32 %v5347_v10, %v12075_v15  ;;  %v5260_v54 = vpop.f32.mrb[181].mxu0  ;;  %v5349_v46 = vpop.f32.mrb[177].mxu1 }
 0x791   :  { %vm5905_vm13 = vcmp.gt.f32.partialorder %v5260_v54, 0.0  ;;  %v5969_v9 = vmul.f32 %v5260_v54, %v12075_v15  ;;  %vm5907_vm6 = vcmp.gt.f32.partialorder %v5349_v46, 0.0  ;;  %v5971_v51 = vmul.f32 %v5349_v46, %v12075_v15 }
 0x792   :  { %v6032_v30 = vsel %vm5904_vm3, %v5258_v18, %v5968_v36  ;;  %v6034_v55 = vsel %vm5906_vm12, %v5347_v10, %v5970_v31 }
 0x793   :  { %6096 = vst [vmem:[#allocation9 + $0x80] sm:$0xff] %v6032_v30  ;;  %6098 = vst [vmem:[#allocation9 + $0x90] sm:$0xff] %v6034_v55  ;;  %v6033_v48 = vsel %vm5905_vm13, %v5260_v54, %v5969_v9  ;;  %v6035_v8 = vsel %vm5907_vm6, %v5349_v46, %v5971_v51  ;;  %v5264_v53 = vpop.f32.mrb[182].mxu0  ;;  %v5353_v62 = vpop.f32.mrb[178].mxu1 }
 0x794   :  { %6097 = vst [vmem:[#allocation9 + $0x88] sm:$0xff] %v6033_v48  ;;  %6099 = vst [vmem:[#allocation9 + $0x98] sm:$0xff] %v6035_v8  ;;  %vm5920_vm0 = vcmp.gt.f32.partialorder %v5264_v53, 0.0  ;;  %v5984_v6 = vmul.f32 %v5264_v53, %v12075_v15  ;;  %vm5922_vm8 = vcmp.gt.f32.partialorder %v5353_v62, 0.0  ;;  %v5986_v32 = vmul.f32 %v5353_v62, %v12075_v15  ;;  %v5266_v39 = vpop.f32.mrb[183].mxu0  ;;  %v5355_v52 = vpop.f32.mrb[179].mxu1 }
 0x795   :  { %vm5921_vm9 = vcmp.gt.f32.partialorder %v5266_v39, 0.0  ;;  %v5985_v1 = vmul.f32 %v5266_v39, %v12075_v15  ;;  %vm5923_vm10 = vcmp.gt.f32.partialorder %v5355_v52, 0.0  ;;  %v5987_v49 = vmul.f32 %v5355_v52, %v12075_v15 }
 0x796   :  { %v6048_v45 = vsel %vm5920_vm0, %v5264_v53, %v5984_v6  ;;  %v6050_v17 = vsel %vm5922_vm8, %v5353_v62, %v5986_v32 }
 0x797   :  { %6112 = vst [vmem:[#allocation9 + $0x280] sm:$0xff] %v6048_v45  ;;  %6114 = vst [vmem:[#allocation9 + $0x290] sm:$0xff] %v6050_v17  ;;  %v6049_v58 = vsel %vm5921_vm9, %v5266_v39, %v5985_v1  ;;  %v6051_v43 = vsel %vm5923_vm10, %v5355_v52, %v5987_v49  ;;  %v5270_v59 = vpop.f32.mrb[184].mxu0  ;;  %v5359_v25 = vpop.f32.mrb[180].mxu1 }
 0x798   :  { %6113 = vst [vmem:[#allocation9 + $0x288] sm:$0xff] %v6049_v58  ;;  %6115 = vst [vmem:[#allocation9 + $0x298] sm:$0xff] %v6051_v43  ;;  %vm5936_vm1 = vcmp.gt.f32.partialorder %v5270_v59, 0.0  ;;  %v6000_v42 = vmul.f32 %v5270_v59, %v12075_v15  ;;  %vm5938_vm14 = vcmp.gt.f32.partialorder %v5359_v25, 0.0  ;;  %v6002_v13 = vmul.f32 %v5359_v25, %v12075_v15  ;;  %v5272_v0 = vpop.f32.mrb[185].mxu0  ;;  %v5361_v4 = vpop.f32.mrb[181].mxu1 }
 0x799   :  { %vm5937_vm5 = vcmp.gt.f32.partialorder %v5272_v0, 0.0  ;;  %v6001_v19 = vmul.f32 %v5272_v0, %v12075_v15  ;;  %vm5939_vm2 = vcmp.gt.f32.partialorder %v5361_v4, 0.0  ;;  %v6003_v12 = vmul.f32 %v5361_v4, %v12075_v15 }
 0x79a   :  { %v6064_v29 = vsel %vm5936_vm1, %v5270_v59, %v6000_v42  ;;  %v6066_v38 = vsel %vm5938_vm14, %v5359_v25, %v6002_v13 }
 0x79b   :  { %6128 = vst [vmem:[#allocation9 + $0x480] sm:$0xff] %v6064_v29  ;;  %6130 = vst [vmem:[#allocation9 + $0x490] sm:$0xff] %v6066_v38  ;;  %v6065_v14 = vsel %vm5937_vm5, %v5272_v0, %v6001_v19  ;;  %v6067_v44 = vsel %vm5939_vm2, %v5361_v4, %v6003_v12  ;;  %v5276_v16 = vpop.f32.mrb[186].mxu0  ;;  %v5365_v24 = vpop.f32.mrb[182].mxu1 }
 0x79c   :  { %6129 = vst [vmem:[#allocation9 + $0x488] sm:$0xff] %v6065_v14  ;;  %6131 = vst [vmem:[#allocation9 + $0x498] sm:$0xff] %v6067_v44  ;;  %vm5952_vm15 = vcmp.gt.f32.partialorder %v5276_v16, 0.0  ;;  %v6016_v33 = vmul.f32 %v5276_v16, %v12075_v15  ;;  %vm5954_vm7 = vcmp.gt.f32.partialorder %v5365_v24, 0.0  ;;  %v6018_v50 = vmul.f32 %v5365_v24, %v12075_v15  ;;  %v5278_v27 = vpop.f32.mrb[187].mxu0  ;;  %v5367_v23 = vpop.f32.mrb[183].mxu1 }
 0x79d   :  { %vm5953_vm4 = vcmp.gt.f32.partialorder %v5278_v27, 0.0  ;;  %v6017_v26 = vmul.f32 %v5278_v27, %v12075_v15  ;;  %vm5955_vm11 = vcmp.gt.f32.partialorder %v5367_v23, 0.0  ;;  %v6019_v5 = vmul.f32 %v5367_v23, %v12075_v15 }
 0x79e   :  { %v6080_v41 = vsel %vm5952_vm15, %v5276_v16, %v6016_v33  ;;  %v6082_v47 = vsel %vm5954_vm7, %v5365_v24, %v6018_v50 }
 0x79f   :  { %6144 = vst [vmem:[#allocation9 + $0x680] sm:$0xff] %v6080_v41  ;;  %6146 = vst [vmem:[#allocation9 + $0x690] sm:$0xff] %v6082_v47  ;;  %v6081_v20 = vsel %vm5953_vm4, %v5278_v27, %v6017_v26  ;;  %v6083_v7 = vsel %vm5955_vm11, %v5367_v23, %v6019_v5  ;;  %v5436_v28 = vpop.f32.mrb[188].mxu0  ;;  %v5525_v56 = vpop.f32.mrb[184].mxu1 }
 0x7a0   :  { %6145 = vst [vmem:[#allocation9 + $0x688] sm:$0xff] %v6081_v20  ;;  %6147 = vst [vmem:[#allocation9 + $0x698] sm:$0xff] %v6083_v7  ;;  %vm5908_vm3 = vcmp.gt.f32.partialorder %v5436_v28, 0.0  ;;  %v5972_v40 = vmul.f32 %v5436_v28, %v12075_v15  ;;  %vm5910_vm12 = vcmp.gt.f32.partialorder %v5525_v56, 0.0  ;;  %v5974_v21 = vmul.f32 %v5525_v56, %v12075_v15  ;;  %v5438_v11 = vpop.f32.mrb[189].mxu0  ;;  %v5527_v35 = vpop.f32.mrb[185].mxu1 }
 0x7a1   :  { %vm5909_vm13 = vcmp.gt.f32.partialorder %v5438_v11, 0.0  ;;  %v5973_v61 = vmul.f32 %v5438_v11, %v12075_v15  ;;  %vm5911_vm6 = vcmp.gt.f32.partialorder %v5527_v35, 0.0  ;;  %v5975_v3 = vmul.f32 %v5527_v35, %v12075_v15 }
 0x7a2   :  { %v6036_v2 = vsel %vm5908_vm3, %v5436_v28, %v5972_v40  ;;  %v6038_v60 = vsel %vm5910_vm12, %v5525_v56, %v5974_v21 }
 0x7a3   :  { %6100 = vst [vmem:[#allocation9 + $0xa0] sm:$0xff] %v6036_v2  ;;  %6102 = vst [vmem:[#allocation9 + $0xb0] sm:$0xff] %v6038_v60  ;;  %v6037_v34 = vsel %vm5909_vm13, %v5438_v11, %v5973_v61  ;;  %v6039_v22 = vsel %vm5911_vm6, %v5527_v35, %v5975_v3  ;;  %v5442_v57 = vpop.f32.mrb[190].mxu0  ;;  %v5531_v37 = vpop.f32.mrb[186].mxu1 }
 0x7a4   :  { %6101 = vst [vmem:[#allocation9 + $0xa8] sm:$0xff] %v6037_v34  ;;  %6103 = vst [vmem:[#allocation9 + $0xb8] sm:$0xff] %v6039_v22  ;;  %vm5924_vm0 = vcmp.gt.f32.partialorder %v5442_v57, 0.0  ;;  %v5988_v63 = vmul.f32 %v5442_v57, %v12075_v15  ;;  %vm5926_vm8 = vcmp.gt.f32.partialorder %v5531_v37, 0.0  ;;  %v5990_v18 = vmul.f32 %v5531_v37, %v12075_v15  ;;  %v5444_v10 = vpop.f32.mrb[191].mxu0  ;;  %v5533_v36 = vpop.f32.mrb[187].mxu1 }
 0x7a5   :  { %vm5925_vm9 = vcmp.gt.f32.partialorder %v5444_v10, 0.0  ;;  %v5989_v31 = vmul.f32 %v5444_v10, %v12075_v15  ;;  %vm5927_vm10 = vcmp.gt.f32.partialorder %v5533_v36, 0.0  ;;  %v5991_v54 = vmul.f32 %v5533_v36, %v12075_v15 }
 0x7a6   :  { %v6052_v46 = vsel %vm5924_vm0, %v5442_v57, %v5988_v63  ;;  %v6054_v9 = vsel %vm5926_vm8, %v5531_v37, %v5990_v18 }
 0x7a7   :  { %6116 = vst [vmem:[#allocation9 + $0x2a0] sm:$0xff] %v6052_v46  ;;  %6118 = vst [vmem:[#allocation9 + $0x2b0] sm:$0xff] %v6054_v9  ;;  %v6053_v51 = vsel %vm5925_vm9, %v5444_v10, %v5989_v31  ;;  %v6055_v30 = vsel %vm5927_vm10, %v5533_v36, %v5991_v54  ;;  %v5448_v55 = vpop.f32.mrb[192].mxu0  ;;  %v5537_v48 = vpop.f32.mrb[188].mxu1 }
 0x7a8   :  { %6117 = vst [vmem:[#allocation9 + $0x2a8] sm:$0xff] %v6053_v51  ;;  %6119 = vst [vmem:[#allocation9 + $0x2b8] sm:$0xff] %v6055_v30  ;;  %vm5940_vm1 = vcmp.gt.f32.partialorder %v5448_v55, 0.0  ;;  %v6004_v8 = vmul.f32 %v5448_v55, %v12075_v15  ;;  %vm5942_vm14 = vcmp.gt.f32.partialorder %v5537_v48, 0.0  ;;  %v6006_v53 = vmul.f32 %v5537_v48, %v12075_v15  ;;  %v5450_v62 = vpop.f32.mrb[193].mxu0  ;;  %v5539_v6 = vpop.f32.mrb[189].mxu1 }
 0x7a9   :  { %vm5941_vm5 = vcmp.gt.f32.partialorder %v5450_v62, 0.0  ;;  %v6005_v32 = vmul.f32 %v5450_v62, %v12075_v15  ;;  %vm5943_vm2 = vcmp.gt.f32.partialorder %v5539_v6, 0.0  ;;  %v6007_v39 = vmul.f32 %v5539_v6, %v12075_v15 }
 0x7aa   :  { %v6068_v52 = vsel %vm5940_vm1, %v5448_v55, %v6004_v8  ;;  %v6070_v1 = vsel %vm5942_vm14, %v5537_v48, %v6006_v53 }
 0x7ab   :  { %6132 = vst [vmem:[#allocation9 + $0x4a0] sm:$0xff] %v6068_v52  ;;  %6134 = vst [vmem:[#allocation9 + $0x4b0] sm:$0xff] %v6070_v1  ;;  %v6069_v49 = vsel %vm5941_vm5, %v5450_v62, %v6005_v32  ;;  %v6071_v45 = vsel %vm5943_vm2, %v5539_v6, %v6007_v39  ;;  %v5454_v17 = vpop.f32.mrb[194].mxu0  ;;  %v5543_v58 = vpop.f32.mrb[190].mxu1 }
 0x7ac   :  { %6133 = vst [vmem:[#allocation9 + $0x4a8] sm:$0xff] %v6069_v49  ;;  %6135 = vst [vmem:[#allocation9 + $0x4b8] sm:$0xff] %v6071_v45  ;;  %vm5956_vm15 = vcmp.gt.f32.partialorder %v5454_v17, 0.0  ;;  %v6020_v43 = vmul.f32 %v5454_v17, %v12075_v15  ;;  %vm5958_vm7 = vcmp.gt.f32.partialorder %v5543_v58, 0.0  ;;  %v6022_v59 = vmul.f32 %v5543_v58, %v12075_v15  ;;  %v5456_v25 = vpop.f32.mrb[195].mxu0  ;;  %v5545_v42 = vpop.f32.mrb[191].mxu1 }
 0x7ad   :  { %vm5957_vm4 = vcmp.gt.f32.partialorder %v5456_v25, 0.0  ;;  %v6021_v13 = vmul.f32 %v5456_v25, %v12075_v15  ;;  %vm5959_vm11 = vcmp.gt.f32.partialorder %v5545_v42, 0.0  ;;  %v6023_v0 = vmul.f32 %v5545_v42, %v12075_v15 }
 0x7ae   :  { %v6084_v4 = vsel %vm5956_vm15, %v5454_v17, %v6020_v43  ;;  %v6086_v19 = vsel %vm5958_vm7, %v5543_v58, %v6022_v59 }
 0x7af   :  { %6148 = vst [vmem:[#allocation9 + $0x6a0] sm:$0xff] %v6084_v4  ;;  %6150 = vst [vmem:[#allocation9 + $0x6b0] sm:$0xff] %v6086_v19  ;;  %v6085_v12 = vsel %vm5957_vm4, %v5456_v25, %v6021_v13  ;;  %v6087_v29 = vsel %vm5959_vm11, %v5545_v42, %v6023_v0  ;;  %v5614_v38 = vpop.f32.mrb[196].mxu0  ;;  %v5703_v14 = vpop.f32.mrb[192].mxu1 }
 0x7b0   :  { %6149 = vst [vmem:[#allocation9 + $0x6a8] sm:$0xff] %v6085_v12  ;;  %6151 = vst [vmem:[#allocation9 + $0x6b8] sm:$0xff] %v6087_v29  ;;  %vm5912_vm3 = vcmp.gt.f32.partialorder %v5614_v38, 0.0  ;;  %v5976_v44 = vmul.f32 %v5614_v38, %v12075_v15  ;;  %vm5914_vm12 = vcmp.gt.f32.partialorder %v5703_v14, 0.0  ;;  %v5978_v16 = vmul.f32 %v5703_v14, %v12075_v15  ;;  %v5616_v24 = vpop.f32.mrb[197].mxu0  ;;  %v5705_v33 = vpop.f32.mrb[193].mxu1 }
 0x7b1   :  { %vm5913_vm13 = vcmp.gt.f32.partialorder %v5616_v24, 0.0  ;;  %v5977_v50 = vmul.f32 %v5616_v24, %v12075_v15  ;;  %vm5915_vm6 = vcmp.gt.f32.partialorder %v5705_v33, 0.0  ;;  %v5979_v27 = vmul.f32 %v5705_v33, %v12075_v15 }
 0x7b2   :  { %v6040_v23 = vsel %vm5912_vm3, %v5614_v38, %v5976_v44  ;;  %v6042_v26 = vsel %vm5914_vm12, %v5703_v14, %v5978_v16 }
 0x7b3   :  { %6104 = vst [vmem:[#allocation9 + $0xc0] sm:$0xff] %v6040_v23  ;;  %6106 = vst [vmem:[#allocation9 + $0xd0] sm:$0xff] %v6042_v26  ;;  %v6041_v5 = vsel %vm5913_vm13, %v5616_v24, %v5977_v50  ;;  %v6043_v41 = vsel %vm5915_vm6, %v5705_v33, %v5979_v27  ;;  %v5620_v47 = vpop.f32.mrb[198].mxu0  ;;  %v5709_v20 = vpop.f32.mrb[194].mxu1 }
 0x7b4   :  { %6105 = vst [vmem:[#allocation9 + $0xc8] sm:$0xff] %v6041_v5  ;;  %6107 = vst [vmem:[#allocation9 + $0xd8] sm:$0xff] %v6043_v41  ;;  %vm5928_vm0 = vcmp.gt.f32.partialorder %v5620_v47, 0.0  ;;  %v5992_v7 = vmul.f32 %v5620_v47, %v12075_v15  ;;  %vm5930_vm8 = vcmp.gt.f32.partialorder %v5709_v20, 0.0  ;;  %v5994_v28 = vmul.f32 %v5709_v20, %v12075_v15  ;;  %v5622_v56 = vpop.f32.mrb[199].mxu0  ;;  %v5711_v40 = vpop.f32.mrb[195].mxu1 }
 0x7b5   :  { %vm5929_vm9 = vcmp.gt.f32.partialorder %v5622_v56, 0.0  ;;  %v5993_v21 = vmul.f32 %v5622_v56, %v12075_v15  ;;  %vm5931_vm10 = vcmp.gt.f32.partialorder %v5711_v40, 0.0  ;;  %v5995_v11 = vmul.f32 %v5711_v40, %v12075_v15 }
 0x7b6   :  { %v6056_v35 = vsel %vm5928_vm0, %v5620_v47, %v5992_v7  ;;  %v6058_v61 = vsel %vm5930_vm8, %v5709_v20, %v5994_v28 }
 0x7b7   :  { %6120 = vst [vmem:[#allocation9 + $0x2c0] sm:$0xff] %v6056_v35  ;;  %6122 = vst [vmem:[#allocation9 + $0x2d0] sm:$0xff] %v6058_v61  ;;  %v6057_v3 = vsel %vm5929_vm9, %v5622_v56, %v5993_v21  ;;  %v6059_v2 = vsel %vm5931_vm10, %v5711_v40, %v5995_v11  ;;  %v5626_v60 = vpop.f32.mrb[200].mxu0  ;;  %v5715_v34 = vpop.f32.mrb[196].mxu1 }
 0x7b8   :  { %6121 = vst [vmem:[#allocation9 + $0x2c8] sm:$0xff] %v6057_v3  ;;  %6123 = vst [vmem:[#allocation9 + $0x2d8] sm:$0xff] %v6059_v2  ;;  %vm5944_vm1 = vcmp.gt.f32.partialorder %v5626_v60, 0.0  ;;  %v6008_v22 = vmul.f32 %v5626_v60, %v12075_v15  ;;  %vm5946_vm14 = vcmp.gt.f32.partialorder %v5715_v34, 0.0  ;;  %v6010_v57 = vmul.f32 %v5715_v34, %v12075_v15  ;;  %v5628_v37 = vpop.f32.mrb[201].mxu0  ;;  %v5717_v63 = vpop.f32.mrb[197].mxu1 }
 0x7b9   :  { %vm5945_vm5 = vcmp.gt.f32.partialorder %v5628_v37, 0.0  ;;  %v6009_v18 = vmul.f32 %v5628_v37, %v12075_v15  ;;  %vm5947_vm2 = vcmp.gt.f32.partialorder %v5717_v63, 0.0  ;;  %v6011_v10 = vmul.f32 %v5717_v63, %v12075_v15 }
 0x7ba   :  { %v6072_v36 = vsel %vm5944_vm1, %v5626_v60, %v6008_v22  ;;  %v6074_v31 = vsel %vm5946_vm14, %v5715_v34, %v6010_v57 }
 0x7bb   :  { %6136 = vst [vmem:[#allocation9 + $0x4c0] sm:$0xff] %v6072_v36  ;;  %6138 = vst [vmem:[#allocation9 + $0x4d0] sm:$0xff] %v6074_v31  ;;  %v6073_v54 = vsel %vm5945_vm5, %v5628_v37, %v6009_v18  ;;  %v6075_v46 = vsel %vm5947_vm2, %v5717_v63, %v6011_v10  ;;  %v5632_v9 = vpop.f32.mrb[202].mxu0  ;;  %v5721_v51 = vpop.f32.mrb[198].mxu1 }
 0x7bc   :  { %6137 = vst [vmem:[#allocation9 + $0x4c8] sm:$0xff] %v6073_v54  ;;  %6139 = vst [vmem:[#allocation9 + $0x4d8] sm:$0xff] %v6075_v46  ;;  %vm5960_vm15 = vcmp.gt.f32.partialorder %v5632_v9, 0.0  ;;  %v6024_v30 = vmul.f32 %v5632_v9, %v12075_v15  ;;  %vm5962_vm7 = vcmp.gt.f32.partialorder %v5721_v51, 0.0  ;;  %v6026_v55 = vmul.f32 %v5721_v51, %v12075_v15  ;;  %v5634_v48 = vpop.f32.mrb[203].mxu0  ;;  %v5723_v8 = vpop.f32.mrb[199].mxu1 }
 0x7bd   :  { %vm5961_vm4 = vcmp.gt.f32.partialorder %v5634_v48, 0.0  ;;  %v6025_v53 = vmul.f32 %v5634_v48, %v12075_v15  ;;  %vm5963_vm11 = vcmp.gt.f32.partialorder %v5723_v8, 0.0  ;;  %v6027_v62 = vmul.f32 %v5723_v8, %v12075_v15 }
 0x7be   :  { %v6088_v6 = vsel %vm5960_vm15, %v5632_v9, %v6024_v30  ;;  %v6090_v32 = vsel %vm5962_vm7, %v5721_v51, %v6026_v55 }
 0x7bf   :  { %6152 = vst [vmem:[#allocation9 + $0x6c0] sm:$0xff] %v6088_v6  ;;  %6154 = vst [vmem:[#allocation9 + $0x6d0] sm:$0xff] %v6090_v32  ;;  %v6089_v39 = vsel %vm5961_vm4, %v5634_v48, %v6025_v53  ;;  %v6091_v52 = vsel %vm5963_vm11, %v5723_v8, %v6027_v62  ;;  %v5792_v1 = vpop.f32.mrb[204].mxu0  ;;  %v5881_v49 = vpop.f32.mrb[200].mxu1 }
 0x7c0   :  { %6153 = vst [vmem:[#allocation9 + $0x6c8] sm:$0xff] %v6089_v39  ;;  %6155 = vst [vmem:[#allocation9 + $0x6d8] sm:$0xff] %v6091_v52  ;;  %vm5916_vm3 = vcmp.gt.f32.partialorder %v5792_v1, 0.0  ;;  %v5980_v45 = vmul.f32 %v5792_v1, %v12075_v15  ;;  %vm5918_vm12 = vcmp.gt.f32.partialorder %v5881_v49, 0.0  ;;  %v5982_v17 = vmul.f32 %v5881_v49, %v12075_v15  ;;  %v5794_v58 = vpop.f32.mrb[205].mxu0  ;;  %v5883_v43 = vpop.f32.mrb[201].mxu1 }
 0x7c1   :  { %vm5917_vm13 = vcmp.gt.f32.partialorder %v5794_v58, 0.0  ;;  %v5981_v59 = vmul.f32 %v5794_v58, %v12075_v15  ;;  %vm5919_vm6 = vcmp.gt.f32.partialorder %v5883_v43, 0.0  ;;  %v5983_v25 = vmul.f32 %v5883_v43, %v12075_v15 }
 0x7c2   :  { %v6044_v42 = vsel %vm5916_vm3, %v5792_v1, %v5980_v45  ;;  %v6046_v13 = vsel %vm5918_vm12, %v5881_v49, %v5982_v17 }
 0x7c3   :  { %6108 = vst [vmem:[#allocation9 + $0xe0] sm:$0xff] %v6044_v42  ;;  %6110 = vst [vmem:[#allocation9 + $0xf0] sm:$0xff] %v6046_v13  ;;  %v6045_v0 = vsel %vm5917_vm13, %v5794_v58, %v5981_v59  ;;  %v6047_v4 = vsel %vm5919_vm6, %v5883_v43, %v5983_v25  ;;  %v5798_v19 = vpop.f32.mrb[206].mxu0  ;;  %v5887_v12 = vpop.f32.mrb[202].mxu1 }
 0x7c4   :  { %6109 = vst [vmem:[#allocation9 + $0xe8] sm:$0xff] %v6045_v0  ;;  %6111 = vst [vmem:[#allocation9 + $0xf8] sm:$0xff] %v6047_v4  ;;  %vm5932_vm0 = vcmp.gt.f32.partialorder %v5798_v19, 0.0  ;;  %v5996_v29 = vmul.f32 %v5798_v19, %v12075_v15  ;;  %vm5934_vm8 = vcmp.gt.f32.partialorder %v5887_v12, 0.0  ;;  %v5998_v38 = vmul.f32 %v5887_v12, %v12075_v15  ;;  %v5800_v14 = vpop.f32.mrb[207].mxu0  ;;  %v5889_v44 = vpop.f32.mrb[203].mxu1 }
 0x7c5   :  { %vm5933_vm9 = vcmp.gt.f32.partialorder %v5800_v14, 0.0  ;;  %v5997_v16 = vmul.f32 %v5800_v14, %v12075_v15  ;;  %vm5935_vm10 = vcmp.gt.f32.partialorder %v5889_v44, 0.0  ;;  %v5999_v24 = vmul.f32 %v5889_v44, %v12075_v15 }
 0x7c6   :  { %v6060_v33 = vsel %vm5932_vm0, %v5798_v19, %v5996_v29  ;;  %v6062_v50 = vsel %vm5934_vm8, %v5887_v12, %v5998_v38 }
 0x7c7   :  { %6124 = vst [vmem:[#allocation9 + $0x2e0] sm:$0xff] %v6060_v33  ;;  %6126 = vst [vmem:[#allocation9 + $0x2f0] sm:$0xff] %v6062_v50  ;;  %v6061_v27 = vsel %vm5933_vm9, %v5800_v14, %v5997_v16  ;;  %v6063_v23 = vsel %vm5935_vm10, %v5889_v44, %v5999_v24  ;;  %v5804_v26 = vpop.f32.mrb[208].mxu0  ;;  %v5893_v5 = vpop.f32.mrb[204].mxu1 }
 0x7c8   :  { %6125 = vst [vmem:[#allocation9 + $0x2e8] sm:$0xff] %v6061_v27  ;;  %6127 = vst [vmem:[#allocation9 + $0x2f8] sm:$0xff] %v6063_v23  ;;  %vm5948_vm1 = vcmp.gt.f32.partialorder %v5804_v26, 0.0  ;;  %v6012_v41 = vmul.f32 %v5804_v26, %v12075_v15  ;;  %vm5950_vm14 = vcmp.gt.f32.partialorder %v5893_v5, 0.0  ;;  %v6014_v47 = vmul.f32 %v5893_v5, %v12075_v15  ;;  %v5806_v20 = vpop.f32.mrb[209].mxu0  ;;  %v5895_v7 = vpop.f32.mrb[205].mxu1 }
 0x7c9   :  { %vm5949_vm5 = vcmp.gt.f32.partialorder %v5806_v20, 0.0  ;;  %v6013_v28 = vmul.f32 %v5806_v20, %v12075_v15  ;;  %vm5951_vm2 = vcmp.gt.f32.partialorder %v5895_v7, 0.0  ;;  %v6015_v56 = vmul.f32 %v5895_v7, %v12075_v15 }
 0x7ca   :  { %v6076_v40 = vsel %vm5948_vm1, %v5804_v26, %v6012_v41  ;;  %v6078_v21 = vsel %vm5950_vm14, %v5893_v5, %v6014_v47 }
 0x7cb   :  { %6140 = vst [vmem:[#allocation9 + $0x4e0] sm:$0xff] %v6076_v40  ;;  %6142 = vst [vmem:[#allocation9 + $0x4f0] sm:$0xff] %v6078_v21  ;;  %v6077_v11 = vsel %vm5949_vm5, %v5806_v20, %v6013_v28  ;;  %v6079_v35 = vsel %vm5951_vm2, %v5895_v7, %v6015_v56  ;;  %v5810_v61 = vpop.f32.mrb[210].mxu0  ;;  %v5899_v3 = vpop.f32.mrb[206].mxu1 }
 0x7cc   :  { %6141 = vst [vmem:[#allocation9 + $0x4e8] sm:$0xff] %v6077_v11  ;;  %6143 = vst [vmem:[#allocation9 + $0x4f8] sm:$0xff] %v6079_v35  ;;  %vm5964_vm15 = vcmp.gt.f32.partialorder %v5810_v61, 0.0  ;;  %v6028_v2 = vmul.f32 %v5810_v61, %v12075_v15  ;;  %vm5966_vm7 = vcmp.gt.f32.partialorder %v5899_v3, 0.0  ;;  %v6030_v60 = vmul.f32 %v5899_v3, %v12075_v15  ;;  %v5812_v34 = vpop.f32.mrb[211].mxu0  ;;  %v5901_v22 = vpop.f32.mrb[207].mxu1 }
 0x7cd   :  { %vm5965_vm4 = vcmp.gt.f32.partialorder %v5812_v34, 0.0  ;;  %v6029_v57 = vmul.f32 %v5812_v34, %v12075_v15  ;;  %vm5967_vm11 = vcmp.gt.f32.partialorder %v5901_v22, 0.0  ;;  %v6031_v37 = vmul.f32 %v5901_v22, %v12075_v15 }
 0x7ce   :  { %v6092_v63 = vsel %vm5964_vm15, %v5810_v61, %v6028_v2  ;;  %v6094_v18 = vsel %vm5966_vm7, %v5899_v3, %v6030_v60 }
 0x7cf   :  { %6156 = vst [vmem:[#allocation9 + $0x6e0] sm:$0xff] %v6092_v63  ;;  %6158 = vst [vmem:[#allocation9 + $0x6f0] sm:$0xff] %v6094_v18  ;;  %v6093_v10 = vsel %vm5965_vm4, %v5812_v34, %v6029_v57  ;;  %v6095_v36 = vsel %vm5967_vm11, %v5901_v22, %v6031_v37  ;;  %v6290_v31 = vpop.f32.mrb[212].mxu0  ;;  %v6379_v54 = vpop.f32.mrb[208].mxu1 }
 0x7d0   :  { %6157 = vst [vmem:[#allocation9 + $0x6e8] sm:$0xff] %v6093_v10  ;;  %6159 = vst [vmem:[#allocation9 + $0x6f8] sm:$0xff] %v6095_v36  ;;  %vm6936_vm3 = vcmp.gt.f32.partialorder %v6290_v31, 0.0  ;;  %v7000_v46 = vmul.f32 %v6290_v31, %v12075_v15  ;;  %vm6938_vm12 = vcmp.gt.f32.partialorder %v6379_v54, 0.0  ;;  %v7002_v9 = vmul.f32 %v6379_v54, %v12075_v15  ;;  %v6292_v51 = vpop.f32.mrb[213].mxu0  ;;  %v6381_v30 = vpop.f32.mrb[209].mxu1 }
 0x7d1   :  { %vm6937_vm13 = vcmp.gt.f32.partialorder %v6292_v51, 0.0  ;;  %v7001_v55 = vmul.f32 %v6292_v51, %v12075_v15  ;;  %vm6939_vm6 = vcmp.gt.f32.partialorder %v6381_v30, 0.0  ;;  %v7003_v48 = vmul.f32 %v6381_v30, %v12075_v15 }
 0x7d2   :  { %v7064_v8 = vsel %vm6936_vm3, %v6290_v31, %v7000_v46  ;;  %v7066_v53 = vsel %vm6938_vm12, %v6379_v54, %v7002_v9 }
 0x7d3   :  { %7128 = vst [vmem:[#allocation9 + $0x100] sm:$0xff] %v7064_v8  ;;  %7130 = vst [vmem:[#allocation9 + $0x110] sm:$0xff] %v7066_v53  ;;  %v7065_v62 = vsel %vm6937_vm13, %v6292_v51, %v7001_v55  ;;  %v7067_v6 = vsel %vm6939_vm6, %v6381_v30, %v7003_v48  ;;  %v6296_v32 = vpop.f32.mrb[214].mxu0  ;;  %v6385_v39 = vpop.f32.mrb[210].mxu1 }
 0x7d4   :  { %7129 = vst [vmem:[#allocation9 + $0x108] sm:$0xff] %v7065_v62  ;;  %7131 = vst [vmem:[#allocation9 + $0x118] sm:$0xff] %v7067_v6  ;;  %vm6952_vm0 = vcmp.gt.f32.partialorder %v6296_v32, 0.0  ;;  %v7016_v52 = vmul.f32 %v6296_v32, %v12075_v15  ;;  %vm6954_vm8 = vcmp.gt.f32.partialorder %v6385_v39, 0.0  ;;  %v7018_v1 = vmul.f32 %v6385_v39, %v12075_v15  ;;  %v6298_v49 = vpop.f32.mrb[215].mxu0  ;;  %v6387_v45 = vpop.f32.mrb[211].mxu1 }
 0x7d5   :  { %vm6953_vm9 = vcmp.gt.f32.partialorder %v6298_v49, 0.0  ;;  %v7017_v17 = vmul.f32 %v6298_v49, %v12075_v15  ;;  %vm6955_vm10 = vcmp.gt.f32.partialorder %v6387_v45, 0.0  ;;  %v7019_v58 = vmul.f32 %v6387_v45, %v12075_v15 }
 0x7d6   :  { %v7080_v43 = vsel %vm6952_vm0, %v6296_v32, %v7016_v52  ;;  %v7082_v59 = vsel %vm6954_vm8, %v6385_v39, %v7018_v1 }
 0x7d7   :  { %7144 = vst [vmem:[#allocation9 + $0x300] sm:$0xff] %v7080_v43  ;;  %7146 = vst [vmem:[#allocation9 + $0x310] sm:$0xff] %v7082_v59  ;;  %v7081_v25 = vsel %vm6953_vm9, %v6298_v49, %v7017_v17  ;;  %v7083_v42 = vsel %vm6955_vm10, %v6387_v45, %v7019_v58  ;;  %v6302_v13 = vpop.f32.mrb[216].mxu0  ;;  %v6391_v0 = vpop.f32.mrb[212].mxu1 }
 0x7d8   :  { %7145 = vst [vmem:[#allocation9 + $0x308] sm:$0xff] %v7081_v25  ;;  %7147 = vst [vmem:[#allocation9 + $0x318] sm:$0xff] %v7083_v42  ;;  %vm6968_vm1 = vcmp.gt.f32.partialorder %v6302_v13, 0.0  ;;  %v7032_v4 = vmul.f32 %v6302_v13, %v12075_v15  ;;  %vm6970_vm14 = vcmp.gt.f32.partialorder %v6391_v0, 0.0  ;;  %v7034_v19 = vmul.f32 %v6391_v0, %v12075_v15  ;;  %v6304_v12 = vpop.f32.mrb[217].mxu0  ;;  %v6393_v29 = vpop.f32.mrb[213].mxu1 }
 0x7d9   :  { %vm6969_vm5 = vcmp.gt.f32.partialorder %v6304_v12, 0.0  ;;  %v7033_v38 = vmul.f32 %v6304_v12, %v12075_v15  ;;  %vm6971_vm2 = vcmp.gt.f32.partialorder %v6393_v29, 0.0  ;;  %v7035_v14 = vmul.f32 %v6393_v29, %v12075_v15 }
 0x7da   :  { %v7096_v44 = vsel %vm6968_vm1, %v6302_v13, %v7032_v4  ;;  %v7098_v16 = vsel %vm6970_vm14, %v6391_v0, %v7034_v19 }
 0x7db   :  { %7160 = vst [vmem:[#allocation9 + $0x500] sm:$0xff] %v7096_v44  ;;  %7162 = vst [vmem:[#allocation9 + $0x510] sm:$0xff] %v7098_v16  ;;  %v7097_v24 = vsel %vm6969_vm5, %v6304_v12, %v7033_v38  ;;  %v7099_v33 = vsel %vm6971_vm2, %v6393_v29, %v7035_v14  ;;  %v6308_v50 = vpop.f32.mrb[218].mxu0  ;;  %v6397_v27 = vpop.f32.mrb[214].mxu1 }
 0x7dc   :  { %7161 = vst [vmem:[#allocation9 + $0x508] sm:$0xff] %v7097_v24  ;;  %7163 = vst [vmem:[#allocation9 + $0x518] sm:$0xff] %v7099_v33  ;;  %vm6984_vm15 = vcmp.gt.f32.partialorder %v6308_v50, 0.0  ;;  %v7048_v23 = vmul.f32 %v6308_v50, %v12075_v15  ;;  %vm6986_vm7 = vcmp.gt.f32.partialorder %v6397_v27, 0.0  ;;  %v7050_v26 = vmul.f32 %v6397_v27, %v12075_v15  ;;  %v6310_v5 = vpop.f32.mrb[219].mxu0  ;;  %v6399_v41 = vpop.f32.mrb[215].mxu1 }
 0x7dd   :  { %vm6985_vm4 = vcmp.gt.f32.partialorder %v6310_v5, 0.0  ;;  %v7049_v47 = vmul.f32 %v6310_v5, %v12075_v15  ;;  %vm6987_vm11 = vcmp.gt.f32.partialorder %v6399_v41, 0.0  ;;  %v7051_v20 = vmul.f32 %v6399_v41, %v12075_v15 }
 0x7de   :  { %v7112_v7 = vsel %vm6984_vm15, %v6308_v50, %v7048_v23  ;;  %v7114_v28 = vsel %vm6986_vm7, %v6397_v27, %v7050_v26 }
 0x7df   :  { %7176 = vst [vmem:[#allocation9 + $0x700] sm:$0xff] %v7112_v7  ;;  %7178 = vst [vmem:[#allocation9 + $0x710] sm:$0xff] %v7114_v28  ;;  %v7113_v56 = vsel %vm6985_vm4, %v6310_v5, %v7049_v47  ;;  %v7115_v40 = vsel %vm6987_vm11, %v6399_v41, %v7051_v20  ;;  %v6468_v21 = vpop.f32.mrb[220].mxu0  ;;  %v6557_v11 = vpop.f32.mrb[216].mxu1 }
 0x7e0   :  { %7177 = vst [vmem:[#allocation9 + $0x708] sm:$0xff] %v7113_v56  ;;  %7179 = vst [vmem:[#allocation9 + $0x718] sm:$0xff] %v7115_v40  ;;  %vm6940_vm3 = vcmp.gt.f32.partialorder %v6468_v21, 0.0  ;;  %v7004_v35 = vmul.f32 %v6468_v21, %v12075_v15  ;;  %vm6942_vm12 = vcmp.gt.f32.partialorder %v6557_v11, 0.0  ;;  %v7006_v61 = vmul.f32 %v6557_v11, %v12075_v15  ;;  %v6470_v3 = vpop.f32.mrb[221].mxu0  ;;  %v6559_v2 = vpop.f32.mrb[217].mxu1 }
 0x7e1   :  { %vm6941_vm13 = vcmp.gt.f32.partialorder %v6470_v3, 0.0  ;;  %v7005_v60 = vmul.f32 %v6470_v3, %v12075_v15  ;;  %vm6943_vm6 = vcmp.gt.f32.partialorder %v6559_v2, 0.0  ;;  %v7007_v34 = vmul.f32 %v6559_v2, %v12075_v15 }
 0x7e2   :  { %v7068_v22 = vsel %vm6940_vm3, %v6468_v21, %v7004_v35  ;;  %v7070_v57 = vsel %vm6942_vm12, %v6557_v11, %v7006_v61 }
 0x7e3   :  { %7132 = vst [vmem:[#allocation9 + $0x120] sm:$0xff] %v7068_v22  ;;  %7134 = vst [vmem:[#allocation9 + $0x130] sm:$0xff] %v7070_v57  ;;  %v7069_v37 = vsel %vm6941_vm13, %v6470_v3, %v7005_v60  ;;  %v7071_v63 = vsel %vm6943_vm6, %v6559_v2, %v7007_v34  ;;  %v6474_v18 = vpop.f32.mrb[222].mxu0  ;;  %v6563_v10 = vpop.f32.mrb[218].mxu1 }
 0x7e4   :  { %7133 = vst [vmem:[#allocation9 + $0x128] sm:$0xff] %v7069_v37  ;;  %7135 = vst [vmem:[#allocation9 + $0x138] sm:$0xff] %v7071_v63  ;;  %vm6956_vm0 = vcmp.gt.f32.partialorder %v6474_v18, 0.0  ;;  %v7020_v36 = vmul.f32 %v6474_v18, %v12075_v15  ;;  %vm6958_vm8 = vcmp.gt.f32.partialorder %v6563_v10, 0.0  ;;  %v7022_v31 = vmul.f32 %v6563_v10, %v12075_v15  ;;  %v6476_v54 = vpop.f32.mrb[223].mxu0  ;;  %v6565_v46 = vpop.f32.mrb[219].mxu1 }
 0x7e5   :  { %vm6957_vm9 = vcmp.gt.f32.partialorder %v6476_v54, 0.0  ;;  %v7021_v9 = vmul.f32 %v6476_v54, %v12075_v15  ;;  %vm6959_vm10 = vcmp.gt.f32.partialorder %v6565_v46, 0.0  ;;  %v7023_v51 = vmul.f32 %v6565_v46, %v12075_v15 }
 0x7e6   :  { %v7084_v30 = vsel %vm6956_vm0, %v6474_v18, %v7020_v36  ;;  %v7086_v55 = vsel %vm6958_vm8, %v6563_v10, %v7022_v31 }
 0x7e7   :  { %7148 = vst [vmem:[#allocation9 + $0x320] sm:$0xff] %v7084_v30  ;;  %7150 = vst [vmem:[#allocation9 + $0x330] sm:$0xff] %v7086_v55  ;;  %v7085_v48 = vsel %vm6957_vm9, %v6476_v54, %v7021_v9  ;;  %v7087_v8 = vsel %vm6959_vm10, %v6565_v46, %v7023_v51  ;;  %v6480_v53 = vpop.f32.mrb[224].mxu0  ;;  %v6569_v62 = vpop.f32.mrb[220].mxu1 }
 0x7e8   :  { %7149 = vst [vmem:[#allocation9 + $0x328] sm:$0xff] %v7085_v48  ;;  %7151 = vst [vmem:[#allocation9 + $0x338] sm:$0xff] %v7087_v8  ;;  %vm6972_vm1 = vcmp.gt.f32.partialorder %v6480_v53, 0.0  ;;  %v7036_v6 = vmul.f32 %v6480_v53, %v12075_v15  ;;  %vm6974_vm14 = vcmp.gt.f32.partialorder %v6569_v62, 0.0  ;;  %v7038_v32 = vmul.f32 %v6569_v62, %v12075_v15  ;;  %v6482_v39 = vpop.f32.mrb[225].mxu0  ;;  %v6571_v52 = vpop.f32.mrb[221].mxu1 }
 0x7e9   :  { %vm6973_vm5 = vcmp.gt.f32.partialorder %v6482_v39, 0.0  ;;  %v7037_v1 = vmul.f32 %v6482_v39, %v12075_v15  ;;  %vm6975_vm2 = vcmp.gt.f32.partialorder %v6571_v52, 0.0  ;;  %v7039_v49 = vmul.f32 %v6571_v52, %v12075_v15 }
 0x7ea   :  { %v7100_v45 = vsel %vm6972_vm1, %v6480_v53, %v7036_v6  ;;  %v7102_v17 = vsel %vm6974_vm14, %v6569_v62, %v7038_v32 }
 0x7eb   :  { %7164 = vst [vmem:[#allocation9 + $0x520] sm:$0xff] %v7100_v45  ;;  %7166 = vst [vmem:[#allocation9 + $0x530] sm:$0xff] %v7102_v17  ;;  %v7101_v58 = vsel %vm6973_vm5, %v6482_v39, %v7037_v1  ;;  %v7103_v43 = vsel %vm6975_vm2, %v6571_v52, %v7039_v49  ;;  %v6486_v59 = vpop.f32.mrb[226].mxu0  ;;  %v6575_v25 = vpop.f32.mrb[222].mxu1 }
 0x7ec   :  { %7165 = vst [vmem:[#allocation9 + $0x528] sm:$0xff] %v7101_v58  ;;  %7167 = vst [vmem:[#allocation9 + $0x538] sm:$0xff] %v7103_v43  ;;  %vm6988_vm15 = vcmp.gt.f32.partialorder %v6486_v59, 0.0  ;;  %v7052_v42 = vmul.f32 %v6486_v59, %v12075_v15  ;;  %vm6990_vm7 = vcmp.gt.f32.partialorder %v6575_v25, 0.0  ;;  %v7054_v13 = vmul.f32 %v6575_v25, %v12075_v15  ;;  %v6488_v0 = vpop.f32.mrb[227].mxu0  ;;  %v6577_v4 = vpop.f32.mrb[223].mxu1 }
 0x7ed   :  { %vm6989_vm4 = vcmp.gt.f32.partialorder %v6488_v0, 0.0  ;;  %v7053_v19 = vmul.f32 %v6488_v0, %v12075_v15  ;;  %vm6991_vm11 = vcmp.gt.f32.partialorder %v6577_v4, 0.0  ;;  %v7055_v12 = vmul.f32 %v6577_v4, %v12075_v15 }
 0x7ee   :  { %v7116_v29 = vsel %vm6988_vm15, %v6486_v59, %v7052_v42  ;;  %v7118_v38 = vsel %vm6990_vm7, %v6575_v25, %v7054_v13 }
 0x7ef   :  { %7180 = vst [vmem:[#allocation9 + $0x720] sm:$0xff] %v7116_v29  ;;  %7182 = vst [vmem:[#allocation9 + $0x730] sm:$0xff] %v7118_v38  ;;  %v7117_v14 = vsel %vm6989_vm4, %v6488_v0, %v7053_v19  ;;  %v7119_v44 = vsel %vm6991_vm11, %v6577_v4, %v7055_v12  ;;  %v6646_v16 = vpop.f32.mrb[228].mxu0  ;;  %v6735_v24 = vpop.f32.mrb[224].mxu1 }
 0x7f0   :  { %7181 = vst [vmem:[#allocation9 + $0x728] sm:$0xff] %v7117_v14  ;;  %7183 = vst [vmem:[#allocation9 + $0x738] sm:$0xff] %v7119_v44  ;;  %vm6944_vm3 = vcmp.gt.f32.partialorder %v6646_v16, 0.0  ;;  %v7008_v33 = vmul.f32 %v6646_v16, %v12075_v15  ;;  %vm6946_vm12 = vcmp.gt.f32.partialorder %v6735_v24, 0.0  ;;  %v7010_v50 = vmul.f32 %v6735_v24, %v12075_v15  ;;  %v6648_v27 = vpop.f32.mrb[229].mxu0  ;;  %v6737_v23 = vpop.f32.mrb[225].mxu1 }
 0x7f1   :  { %vm6945_vm13 = vcmp.gt.f32.partialorder %v6648_v27, 0.0  ;;  %v7009_v26 = vmul.f32 %v6648_v27, %v12075_v15  ;;  %vm6947_vm6 = vcmp.gt.f32.partialorder %v6737_v23, 0.0  ;;  %v7011_v5 = vmul.f32 %v6737_v23, %v12075_v15 }
 0x7f2   :  { %v7072_v41 = vsel %vm6944_vm3, %v6646_v16, %v7008_v33  ;;  %v7074_v47 = vsel %vm6946_vm12, %v6735_v24, %v7010_v50 }
 0x7f3   :  { %7136 = vst [vmem:[#allocation9 + $0x140] sm:$0xff] %v7072_v41  ;;  %7138 = vst [vmem:[#allocation9 + $0x150] sm:$0xff] %v7074_v47  ;;  %v7073_v20 = vsel %vm6945_vm13, %v6648_v27, %v7009_v26  ;;  %v7075_v7 = vsel %vm6947_vm6, %v6737_v23, %v7011_v5  ;;  %v6652_v28 = vpop.f32.mrb[230].mxu0  ;;  %v6741_v56 = vpop.f32.mrb[226].mxu1 }
 0x7f4   :  { %7137 = vst [vmem:[#allocation9 + $0x148] sm:$0xff] %v7073_v20  ;;  %7139 = vst [vmem:[#allocation9 + $0x158] sm:$0xff] %v7075_v7  ;;  %vm6960_vm0 = vcmp.gt.f32.partialorder %v6652_v28, 0.0  ;;  %v7024_v40 = vmul.f32 %v6652_v28, %v12075_v15  ;;  %vm6962_vm8 = vcmp.gt.f32.partialorder %v6741_v56, 0.0  ;;  %v7026_v21 = vmul.f32 %v6741_v56, %v12075_v15  ;;  %v6654_v11 = vpop.f32.mrb[231].mxu0  ;;  %v6743_v35 = vpop.f32.mrb[227].mxu1 }
 0x7f5   :  { %vm6961_vm9 = vcmp.gt.f32.partialorder %v6654_v11, 0.0  ;;  %v7025_v61 = vmul.f32 %v6654_v11, %v12075_v15  ;;  %vm6963_vm10 = vcmp.gt.f32.partialorder %v6743_v35, 0.0  ;;  %v7027_v3 = vmul.f32 %v6743_v35, %v12075_v15 }
 0x7f6   :  { %v7088_v2 = vsel %vm6960_vm0, %v6652_v28, %v7024_v40  ;;  %v7090_v60 = vsel %vm6962_vm8, %v6741_v56, %v7026_v21 }
 0x7f7   :  { %7152 = vst [vmem:[#allocation9 + $0x340] sm:$0xff] %v7088_v2  ;;  %7154 = vst [vmem:[#allocation9 + $0x350] sm:$0xff] %v7090_v60  ;;  %v7089_v34 = vsel %vm6961_vm9, %v6654_v11, %v7025_v61  ;;  %v7091_v22 = vsel %vm6963_vm10, %v6743_v35, %v7027_v3  ;;  %v6658_v57 = vpop.f32.mrb[232].mxu0  ;;  %v6747_v37 = vpop.f32.mrb[228].mxu1 }
 0x7f8   :  { %7153 = vst [vmem:[#allocation9 + $0x348] sm:$0xff] %v7089_v34  ;;  %7155 = vst [vmem:[#allocation9 + $0x358] sm:$0xff] %v7091_v22  ;;  %vm6976_vm1 = vcmp.gt.f32.partialorder %v6658_v57, 0.0  ;;  %v7040_v63 = vmul.f32 %v6658_v57, %v12075_v15  ;;  %vm6978_vm14 = vcmp.gt.f32.partialorder %v6747_v37, 0.0  ;;  %v7042_v18 = vmul.f32 %v6747_v37, %v12075_v15  ;;  %v6660_v10 = vpop.f32.mrb[233].mxu0  ;;  %v6749_v36 = vpop.f32.mrb[229].mxu1 }
 0x7f9   :  { %vm6977_vm5 = vcmp.gt.f32.partialorder %v6660_v10, 0.0  ;;  %v7041_v31 = vmul.f32 %v6660_v10, %v12075_v15  ;;  %vm6979_vm2 = vcmp.gt.f32.partialorder %v6749_v36, 0.0  ;;  %v7043_v54 = vmul.f32 %v6749_v36, %v12075_v15 }
 0x7fa   :  { %v7104_v46 = vsel %vm6976_vm1, %v6658_v57, %v7040_v63  ;;  %v7106_v9 = vsel %vm6978_vm14, %v6747_v37, %v7042_v18 }
 0x7fb   :  { %7168 = vst [vmem:[#allocation9 + $0x540] sm:$0xff] %v7104_v46  ;;  %7170 = vst [vmem:[#allocation9 + $0x550] sm:$0xff] %v7106_v9  ;;  %v7105_v51 = vsel %vm6977_vm5, %v6660_v10, %v7041_v31  ;;  %v7107_v30 = vsel %vm6979_vm2, %v6749_v36, %v7043_v54  ;;  %v6664_v55 = vpop.f32.mrb[234].mxu0  ;;  %v6753_v48 = vpop.f32.mrb[230].mxu1 }
 0x7fc   :  { %7169 = vst [vmem:[#allocation9 + $0x548] sm:$0xff] %v7105_v51  ;;  %7171 = vst [vmem:[#allocation9 + $0x558] sm:$0xff] %v7107_v30  ;;  %vm6992_vm15 = vcmp.gt.f32.partialorder %v6664_v55, 0.0  ;;  %v7056_v8 = vmul.f32 %v6664_v55, %v12075_v15  ;;  %vm6994_vm7 = vcmp.gt.f32.partialorder %v6753_v48, 0.0  ;;  %v7058_v53 = vmul.f32 %v6753_v48, %v12075_v15  ;;  %v6666_v62 = vpop.f32.mrb[235].mxu0  ;;  %v6755_v6 = vpop.f32.mrb[231].mxu1 }
 0x7fd   :  { %vm6993_vm4 = vcmp.gt.f32.partialorder %v6666_v62, 0.0  ;;  %v7057_v32 = vmul.f32 %v6666_v62, %v12075_v15  ;;  %vm6995_vm11 = vcmp.gt.f32.partialorder %v6755_v6, 0.0  ;;  %v7059_v39 = vmul.f32 %v6755_v6, %v12075_v15 }
 0x7fe   :  { %v7120_v52 = vsel %vm6992_vm15, %v6664_v55, %v7056_v8  ;;  %v7122_v1 = vsel %vm6994_vm7, %v6753_v48, %v7058_v53 }
 0x7ff   :  { %7184 = vst [vmem:[#allocation9 + $0x740] sm:$0xff] %v7120_v52  ;;  %7186 = vst [vmem:[#allocation9 + $0x750] sm:$0xff] %v7122_v1  ;;  %v7121_v49 = vsel %vm6993_vm4, %v6666_v62, %v7057_v32  ;;  %v7123_v45 = vsel %vm6995_vm11, %v6755_v6, %v7059_v39  ;;  %v6824_v17 = vpop.f32.mrb[236].mxu0  ;;  %v6913_v58 = vpop.f32.mrb[232].mxu1 }
 0x800   :  { %7185 = vst [vmem:[#allocation9 + $0x748] sm:$0xff] %v7121_v49  ;;  %7187 = vst [vmem:[#allocation9 + $0x758] sm:$0xff] %v7123_v45  ;;  %vm6948_vm3 = vcmp.gt.f32.partialorder %v6824_v17, 0.0  ;;  %v7012_v43 = vmul.f32 %v6824_v17, %v12075_v15  ;;  %vm6950_vm12 = vcmp.gt.f32.partialorder %v6913_v58, 0.0  ;;  %v7014_v59 = vmul.f32 %v6913_v58, %v12075_v15  ;;  %v6826_v25 = vpop.f32.mrb[237].mxu0  ;;  %v6915_v42 = vpop.f32.mrb[233].mxu1 }
 0x801   :  { %vm6949_vm13 = vcmp.gt.f32.partialorder %v6826_v25, 0.0  ;;  %v7013_v13 = vmul.f32 %v6826_v25, %v12075_v15  ;;  %vm6951_vm6 = vcmp.gt.f32.partialorder %v6915_v42, 0.0  ;;  %v7015_v0 = vmul.f32 %v6915_v42, %v12075_v15 }
 0x802   :  { %v7076_v4 = vsel %vm6948_vm3, %v6824_v17, %v7012_v43  ;;  %v7078_v19 = vsel %vm6950_vm12, %v6913_v58, %v7014_v59 }
 0x803   :  { %7140 = vst [vmem:[#allocation9 + $0x160] sm:$0xff] %v7076_v4  ;;  %7142 = vst [vmem:[#allocation9 + $0x170] sm:$0xff] %v7078_v19  ;;  %v7077_v12 = vsel %vm6949_vm13, %v6826_v25, %v7013_v13  ;;  %v7079_v29 = vsel %vm6951_vm6, %v6915_v42, %v7015_v0  ;;  %v6830_v38 = vpop.f32.mrb[238].mxu0  ;;  %v6919_v14 = vpop.f32.mrb[234].mxu1 }
 0x804   :  { %7141 = vst [vmem:[#allocation9 + $0x168] sm:$0xff] %v7077_v12  ;;  %7143 = vst [vmem:[#allocation9 + $0x178] sm:$0xff] %v7079_v29  ;;  %vm6964_vm0 = vcmp.gt.f32.partialorder %v6830_v38, 0.0  ;;  %v7028_v44 = vmul.f32 %v6830_v38, %v12075_v15  ;;  %vm6966_vm8 = vcmp.gt.f32.partialorder %v6919_v14, 0.0  ;;  %v7030_v16 = vmul.f32 %v6919_v14, %v12075_v15  ;;  %v6832_v24 = vpop.f32.mrb[239].mxu0  ;;  %v6921_v33 = vpop.f32.mrb[235].mxu1 }
 0x805   :  { %vm6965_vm9 = vcmp.gt.f32.partialorder %v6832_v24, 0.0  ;;  %v7029_v50 = vmul.f32 %v6832_v24, %v12075_v15  ;;  %vm6967_vm10 = vcmp.gt.f32.partialorder %v6921_v33, 0.0  ;;  %v7031_v27 = vmul.f32 %v6921_v33, %v12075_v15 }
 0x806   :  { %v7092_v23 = vsel %vm6964_vm0, %v6830_v38, %v7028_v44  ;;  %v7094_v26 = vsel %vm6966_vm8, %v6919_v14, %v7030_v16 }
 0x807   :  { %7156 = vst [vmem:[#allocation9 + $0x360] sm:$0xff] %v7092_v23  ;;  %7158 = vst [vmem:[#allocation9 + $0x370] sm:$0xff] %v7094_v26  ;;  %v7093_v5 = vsel %vm6965_vm9, %v6832_v24, %v7029_v50  ;;  %v7095_v41 = vsel %vm6967_vm10, %v6921_v33, %v7031_v27  ;;  %v6836_v47 = vpop.f32.mrb[240].mxu0  ;;  %v6925_v20 = vpop.f32.mrb[236].mxu1 }
 0x808   :  { %7157 = vst [vmem:[#allocation9 + $0x368] sm:$0xff] %v7093_v5  ;;  %7159 = vst [vmem:[#allocation9 + $0x378] sm:$0xff] %v7095_v41  ;;  %vm6980_vm1 = vcmp.gt.f32.partialorder %v6836_v47, 0.0  ;;  %v7044_v7 = vmul.f32 %v6836_v47, %v12075_v15  ;;  %vm6982_vm14 = vcmp.gt.f32.partialorder %v6925_v20, 0.0  ;;  %v7046_v28 = vmul.f32 %v6925_v20, %v12075_v15  ;;  %v6838_v56 = vpop.f32.mrb[241].mxu0  ;;  %v6927_v40 = vpop.f32.mrb[237].mxu1 }
 0x809   :  { %vm6981_vm5 = vcmp.gt.f32.partialorder %v6838_v56, 0.0  ;;  %v7045_v21 = vmul.f32 %v6838_v56, %v12075_v15  ;;  %vm6983_vm2 = vcmp.gt.f32.partialorder %v6927_v40, 0.0  ;;  %v7047_v11 = vmul.f32 %v6927_v40, %v12075_v15 }
 0x80a   :  { %v7108_v35 = vsel %vm6980_vm1, %v6836_v47, %v7044_v7  ;;  %v7110_v61 = vsel %vm6982_vm14, %v6925_v20, %v7046_v28 }
 0x80b   :  { %7172 = vst [vmem:[#allocation9 + $0x560] sm:$0xff] %v7108_v35  ;;  %7174 = vst [vmem:[#allocation9 + $0x570] sm:$0xff] %v7110_v61  ;;  %v7109_v3 = vsel %vm6981_vm5, %v6838_v56, %v7045_v21  ;;  %v7111_v2 = vsel %vm6983_vm2, %v6927_v40, %v7047_v11  ;;  %v6842_v60 = vpop.f32.mrb[242].mxu0  ;;  %v6931_v34 = vpop.f32.mrb[238].mxu1 }
 0x80c   :  { %7173 = vst [vmem:[#allocation9 + $0x568] sm:$0xff] %v7109_v3  ;;  %7175 = vst [vmem:[#allocation9 + $0x578] sm:$0xff] %v7111_v2  ;;  %vm6996_vm15 = vcmp.gt.f32.partialorder %v6842_v60, 0.0  ;;  %v7060_v22 = vmul.f32 %v6842_v60, %v12075_v15  ;;  %vm6998_vm7 = vcmp.gt.f32.partialorder %v6931_v34, 0.0  ;;  %v7062_v57 = vmul.f32 %v6931_v34, %v12075_v15  ;;  %v6844_v37 = vpop.f32.mrb[243].mxu0  ;;  %v6933_v63 = vpop.f32.mrb[239].mxu1 }
 0x80d   :  { %vm6997_vm4 = vcmp.gt.f32.partialorder %v6844_v37, 0.0  ;;  %v7061_v18 = vmul.f32 %v6844_v37, %v12075_v15  ;;  %vm6999_vm11 = vcmp.gt.f32.partialorder %v6933_v63, 0.0  ;;  %v7063_v10 = vmul.f32 %v6933_v63, %v12075_v15 }
 0x80e   :  { %v7124_v36 = vsel %vm6996_vm15, %v6842_v60, %v7060_v22  ;;  %v7126_v31 = vsel %vm6998_vm7, %v6931_v34, %v7062_v57 }
 0x80f   :  { %7188 = vst [vmem:[#allocation9 + $0x760] sm:$0xff] %v7124_v36  ;;  %7190 = vst [vmem:[#allocation9 + $0x770] sm:$0xff] %v7126_v31  ;;  %v7125_v54 = vsel %vm6997_vm4, %v6844_v37, %v7061_v18  ;;  %v7127_v46 = vsel %vm6999_vm11, %v6933_v63, %v7063_v10  ;;  %v7322_v9 = vpop.f32.mrb[244].mxu0  ;;  %v7411_v51 = vpop.f32.mrb[240].mxu1 }
 0x810   :  { %7189 = vst [vmem:[#allocation9 + $0x768] sm:$0xff] %v7125_v54  ;;  %7191 = vst [vmem:[#allocation9 + $0x778] sm:$0xff] %v7127_v46  ;;  %vm7968_vm3 = vcmp.gt.f32.partialorder %v7322_v9, 0.0  ;;  %v8032_v30 = vmul.f32 %v7322_v9, %v12075_v15  ;;  %vm7970_vm12 = vcmp.gt.f32.partialorder %v7411_v51, 0.0  ;;  %v8034_v55 = vmul.f32 %v7411_v51, %v12075_v15  ;;  %v7324_v48 = vpop.f32.mrb[245].mxu0  ;;  %v7413_v8 = vpop.f32.mrb[241].mxu1 }
 0x811   :  { %vm7969_vm13 = vcmp.gt.f32.partialorder %v7324_v48, 0.0  ;;  %v8033_v53 = vmul.f32 %v7324_v48, %v12075_v15  ;;  %vm7971_vm6 = vcmp.gt.f32.partialorder %v7413_v8, 0.0  ;;  %v8035_v62 = vmul.f32 %v7413_v8, %v12075_v15 }
 0x812   :  { %v8096_v6 = vsel %vm7968_vm3, %v7322_v9, %v8032_v30  ;;  %v8098_v32 = vsel %vm7970_vm12, %v7411_v51, %v8034_v55 }
 0x813   :  { %8160 = vst [vmem:[#allocation9 + $0x180] sm:$0xff] %v8096_v6  ;;  %8162 = vst [vmem:[#allocation9 + $0x190] sm:$0xff] %v8098_v32  ;;  %v8097_v39 = vsel %vm7969_vm13, %v7324_v48, %v8033_v53  ;;  %v8099_v52 = vsel %vm7971_vm6, %v7413_v8, %v8035_v62  ;;  %v7328_v1 = vpop.f32.mrb[246].mxu0  ;;  %v7417_v49 = vpop.f32.mrb[242].mxu1 }
 0x814   :  { %8161 = vst [vmem:[#allocation9 + $0x188] sm:$0xff] %v8097_v39  ;;  %8163 = vst [vmem:[#allocation9 + $0x198] sm:$0xff] %v8099_v52  ;;  %vm7984_vm0 = vcmp.gt.f32.partialorder %v7328_v1, 0.0  ;;  %v8048_v45 = vmul.f32 %v7328_v1, %v12075_v15  ;;  %vm7986_vm8 = vcmp.gt.f32.partialorder %v7417_v49, 0.0  ;;  %v8050_v17 = vmul.f32 %v7417_v49, %v12075_v15  ;;  %v7330_v58 = vpop.f32.mrb[247].mxu0  ;;  %v7419_v43 = vpop.f32.mrb[243].mxu1 }
 0x815   :  { %vm7985_vm9 = vcmp.gt.f32.partialorder %v7330_v58, 0.0  ;;  %v8049_v59 = vmul.f32 %v7330_v58, %v12075_v15  ;;  %vm7987_vm10 = vcmp.gt.f32.partialorder %v7419_v43, 0.0  ;;  %v8051_v25 = vmul.f32 %v7419_v43, %v12075_v15 }
 0x816   :  { %v8112_v42 = vsel %vm7984_vm0, %v7328_v1, %v8048_v45  ;;  %v8114_v13 = vsel %vm7986_vm8, %v7417_v49, %v8050_v17 }
 0x817   :  { %8176 = vst [vmem:[#allocation9 + $0x380] sm:$0xff] %v8112_v42  ;;  %8178 = vst [vmem:[#allocation9 + $0x390] sm:$0xff] %v8114_v13  ;;  %v8113_v0 = vsel %vm7985_vm9, %v7330_v58, %v8049_v59  ;;  %v8115_v4 = vsel %vm7987_vm10, %v7419_v43, %v8051_v25  ;;  %v7334_v19 = vpop.f32.mrb[248].mxu0  ;;  %v7423_v12 = vpop.f32.mrb[244].mxu1 }
 0x818   :  { %8177 = vst [vmem:[#allocation9 + $0x388] sm:$0xff] %v8113_v0  ;;  %8179 = vst [vmem:[#allocation9 + $0x398] sm:$0xff] %v8115_v4  ;;  %vm8000_vm1 = vcmp.gt.f32.partialorder %v7334_v19, 0.0  ;;  %v8064_v29 = vmul.f32 %v7334_v19, %v12075_v15  ;;  %vm8002_vm14 = vcmp.gt.f32.partialorder %v7423_v12, 0.0  ;;  %v8066_v38 = vmul.f32 %v7423_v12, %v12075_v15  ;;  %v7336_v14 = vpop.f32.mrb[249].mxu0  ;;  %v7425_v44 = vpop.f32.mrb[245].mxu1 }
 0x819   :  { %vm8001_vm5 = vcmp.gt.f32.partialorder %v7336_v14, 0.0  ;;  %v8065_v16 = vmul.f32 %v7336_v14, %v12075_v15  ;;  %vm8003_vm2 = vcmp.gt.f32.partialorder %v7425_v44, 0.0  ;;  %v8067_v24 = vmul.f32 %v7425_v44, %v12075_v15 }
 0x81a   :  { %v8128_v33 = vsel %vm8000_vm1, %v7334_v19, %v8064_v29  ;;  %v8130_v50 = vsel %vm8002_vm14, %v7423_v12, %v8066_v38 }
 0x81b   :  { %8192 = vst [vmem:[#allocation9 + $0x580] sm:$0xff] %v8128_v33  ;;  %8194 = vst [vmem:[#allocation9 + $0x590] sm:$0xff] %v8130_v50  ;;  %v8129_v27 = vsel %vm8001_vm5, %v7336_v14, %v8065_v16  ;;  %v8131_v23 = vsel %vm8003_vm2, %v7425_v44, %v8067_v24  ;;  %v7340_v26 = vpop.f32.mrb[250].mxu0  ;;  %v7429_v5 = vpop.f32.mrb[246].mxu1 }
 0x81c   :  { %8193 = vst [vmem:[#allocation9 + $0x588] sm:$0xff] %v8129_v27  ;;  %8195 = vst [vmem:[#allocation9 + $0x598] sm:$0xff] %v8131_v23  ;;  %vm8016_vm15 = vcmp.gt.f32.partialorder %v7340_v26, 0.0  ;;  %v8080_v41 = vmul.f32 %v7340_v26, %v12075_v15  ;;  %vm8018_vm7 = vcmp.gt.f32.partialorder %v7429_v5, 0.0  ;;  %v8082_v47 = vmul.f32 %v7429_v5, %v12075_v15  ;;  %v7342_v20 = vpop.f32.mrb[251].mxu0  ;;  %v7431_v7 = vpop.f32.mrb[247].mxu1 }
 0x81d   :  { %vm8017_vm4 = vcmp.gt.f32.partialorder %v7342_v20, 0.0  ;;  %v8081_v28 = vmul.f32 %v7342_v20, %v12075_v15  ;;  %vm8019_vm11 = vcmp.gt.f32.partialorder %v7431_v7, 0.0  ;;  %v8083_v56 = vmul.f32 %v7431_v7, %v12075_v15 }
 0x81e   :  { %v8144_v40 = vsel %vm8016_vm15, %v7340_v26, %v8080_v41  ;;  %v8146_v21 = vsel %vm8018_vm7, %v7429_v5, %v8082_v47 }
 0x81f   :  { %8208 = vst [vmem:[#allocation9 + $0x780] sm:$0xff] %v8144_v40  ;;  %8210 = vst [vmem:[#allocation9 + $0x790] sm:$0xff] %v8146_v21  ;;  %v8145_v11 = vsel %vm8017_vm4, %v7342_v20, %v8081_v28  ;;  %v8147_v35 = vsel %vm8019_vm11, %v7431_v7, %v8083_v56  ;;  %v7500_v61 = vpop.f32.mrb[252].mxu0  ;;  %v7589_v3 = vpop.f32.mrb[248].mxu1 }
 0x820   :  { %8209 = vst [vmem:[#allocation9 + $0x788] sm:$0xff] %v8145_v11  ;;  %8211 = vst [vmem:[#allocation9 + $0x798] sm:$0xff] %v8147_v35  ;;  %vm7972_vm3 = vcmp.gt.f32.partialorder %v7500_v61, 0.0  ;;  %v8036_v2 = vmul.f32 %v7500_v61, %v12075_v15  ;;  %vm7974_vm12 = vcmp.gt.f32.partialorder %v7589_v3, 0.0  ;;  %v8038_v60 = vmul.f32 %v7589_v3, %v12075_v15  ;;  %v7502_v34 = vpop.f32.mrb[253].mxu0  ;;  %v7591_v22 = vpop.f32.mrb[249].mxu1 }
 0x821   :  { %vm7973_vm13 = vcmp.gt.f32.partialorder %v7502_v34, 0.0  ;;  %v8037_v57 = vmul.f32 %v7502_v34, %v12075_v15  ;;  %vm7975_vm6 = vcmp.gt.f32.partialorder %v7591_v22, 0.0  ;;  %v8039_v37 = vmul.f32 %v7591_v22, %v12075_v15 }
 0x822   :  { %v8100_v63 = vsel %vm7972_vm3, %v7500_v61, %v8036_v2  ;;  %v8102_v18 = vsel %vm7974_vm12, %v7589_v3, %v8038_v60 }
 0x823   :  { %8164 = vst [vmem:[#allocation9 + $0x1a0] sm:$0xff] %v8100_v63  ;;  %8166 = vst [vmem:[#allocation9 + $0x1b0] sm:$0xff] %v8102_v18  ;;  %v8101_v10 = vsel %vm7973_vm13, %v7502_v34, %v8037_v57  ;;  %v8103_v36 = vsel %vm7975_vm6, %v7591_v22, %v8039_v37  ;;  %v7506_v31 = vpop.f32.mrb[254].mxu0  ;;  %v7595_v54 = vpop.f32.mrb[250].mxu1 }
 0x824   :  { %8165 = vst [vmem:[#allocation9 + $0x1a8] sm:$0xff] %v8101_v10  ;;  %8167 = vst [vmem:[#allocation9 + $0x1b8] sm:$0xff] %v8103_v36  ;;  %vm7988_vm0 = vcmp.gt.f32.partialorder %v7506_v31, 0.0  ;;  %v8052_v46 = vmul.f32 %v7506_v31, %v12075_v15  ;;  %vm7990_vm8 = vcmp.gt.f32.partialorder %v7595_v54, 0.0  ;;  %v8054_v9 = vmul.f32 %v7595_v54, %v12075_v15  ;;  %v7508_v51 = vpop.f32.mrb[255].mxu0  ;;  %v7597_v30 = vpop.f32.mrb[251].mxu1 }
 0x825   :  { %vm7989_vm9 = vcmp.gt.f32.partialorder %v7508_v51, 0.0  ;;  %v8053_v55 = vmul.f32 %v7508_v51, %v12075_v15  ;;  %vm7991_vm10 = vcmp.gt.f32.partialorder %v7597_v30, 0.0  ;;  %v8055_v48 = vmul.f32 %v7597_v30, %v12075_v15 }
 0x826   :  { %v8116_v8 = vsel %vm7988_vm0, %v7506_v31, %v8052_v46  ;;  %v8118_v53 = vsel %vm7990_vm8, %v7595_v54, %v8054_v9 }
 0x827   :  { %8180 = vst [vmem:[#allocation9 + $0x3a0] sm:$0xff] %v8116_v8  ;;  %8182 = vst [vmem:[#allocation9 + $0x3b0] sm:$0xff] %v8118_v53  ;;  %v8117_v62 = vsel %vm7989_vm9, %v7508_v51, %v8053_v55  ;;  %v8119_v6 = vsel %vm7991_vm10, %v7597_v30, %v8055_v48  ;;  %v7512_v32 = vpop.f32.mrb[0].mxu0  ;;  %v7601_v39 = vpop.f32.mrb[252].mxu1 }
 0x828   :  { %8181 = vst [vmem:[#allocation9 + $0x3a8] sm:$0xff] %v8117_v62  ;;  %8183 = vst [vmem:[#allocation9 + $0x3b8] sm:$0xff] %v8119_v6  ;;  %vm8004_vm1 = vcmp.gt.f32.partialorder %v7512_v32, 0.0  ;;  %v8068_v52 = vmul.f32 %v7512_v32, %v12075_v15  ;;  %vm8006_vm14 = vcmp.gt.f32.partialorder %v7601_v39, 0.0  ;;  %v8070_v1 = vmul.f32 %v7601_v39, %v12075_v15  ;;  %v7514_v49 = vpop.f32.mrb[1].mxu0  ;;  %v7603_v45 = vpop.f32.mrb[253].mxu1 }
 0x829   :  { %vm8005_vm5 = vcmp.gt.f32.partialorder %v7514_v49, 0.0  ;;  %v8069_v17 = vmul.f32 %v7514_v49, %v12075_v15  ;;  %vm8007_vm2 = vcmp.gt.f32.partialorder %v7603_v45, 0.0  ;;  %v8071_v58 = vmul.f32 %v7603_v45, %v12075_v15 }
 0x82a   :  { %v8132_v43 = vsel %vm8004_vm1, %v7512_v32, %v8068_v52  ;;  %v8134_v59 = vsel %vm8006_vm14, %v7601_v39, %v8070_v1 }
 0x82b   :  { %8196 = vst [vmem:[#allocation9 + $0x5a0] sm:$0xff] %v8132_v43  ;;  %8198 = vst [vmem:[#allocation9 + $0x5b0] sm:$0xff] %v8134_v59  ;;  %v8133_v25 = vsel %vm8005_vm5, %v7514_v49, %v8069_v17  ;;  %v8135_v42 = vsel %vm8007_vm2, %v7603_v45, %v8071_v58  ;;  %v7518_v13 = vpop.f32.mrb[2].mxu0  ;;  %v7607_v0 = vpop.f32.mrb[254].mxu1 }
 0x82c   :  { %8197 = vst [vmem:[#allocation9 + $0x5a8] sm:$0xff] %v8133_v25  ;;  %8199 = vst [vmem:[#allocation9 + $0x5b8] sm:$0xff] %v8135_v42  ;;  %vm8020_vm15 = vcmp.gt.f32.partialorder %v7518_v13, 0.0  ;;  %v8084_v4 = vmul.f32 %v7518_v13, %v12075_v15  ;;  %vm8022_vm7 = vcmp.gt.f32.partialorder %v7607_v0, 0.0  ;;  %v8086_v19 = vmul.f32 %v7607_v0, %v12075_v15  ;;  %v7520_v12 = vpop.f32.mrb[3].mxu0  ;;  %v7609_v29 = vpop.f32.mrb[255].mxu1 }
 0x82d   :  { %vm8021_vm4 = vcmp.gt.f32.partialorder %v7520_v12, 0.0  ;;  %v8085_v38 = vmul.f32 %v7520_v12, %v12075_v15  ;;  %vm8023_vm11 = vcmp.gt.f32.partialorder %v7609_v29, 0.0  ;;  %v8087_v14 = vmul.f32 %v7609_v29, %v12075_v15 }
 0x82e   :  { %v8148_v44 = vsel %vm8020_vm15, %v7518_v13, %v8084_v4  ;;  %v8150_v16 = vsel %vm8022_vm7, %v7607_v0, %v8086_v19 }
 0x82f   :  { %8212 = vst [vmem:[#allocation9 + $0x7a0] sm:$0xff] %v8148_v44  ;;  %8214 = vst [vmem:[#allocation9 + $0x7b0] sm:$0xff] %v8150_v16  ;;  %v8149_v24 = vsel %vm8021_vm4, %v7520_v12, %v8085_v38  ;;  %v8151_v33 = vsel %vm8023_vm11, %v7609_v29, %v8087_v14  ;;  %v7678_v50 = vpop.f32.mrb[4].mxu0 }
 0x830   :  { %v7767_v27 = vpop.f32.mrb[0].mxu1  ;;  %8213 = vst [vmem:[#allocation9 + $0x7a8] sm:$0xff] %v8149_v24  ;;  %8215 = vst [vmem:[#allocation9 + $0x7b8] sm:$0xff] %v8151_v33  ;;  %vm7976_vm3 = vcmp.gt.f32.partialorder %v7678_v50, 0.0  ;;  %v8040_v23 = vmul.f32 %v7678_v50, %v12075_v15  ;;  %v7680_v5 = vpop.f32.mrb[5].mxu0 }
 0x831   :  { %vm7978_vm12 = vcmp.gt.f32.partialorder %v7767_v27, 0.0  ;;  %v8042_v26 = vmul.f32 %v7767_v27, %v12075_v15  ;;  %v7769_v41 = vpop.f32.mrb[1].mxu1  ;;  %vm7977_vm13 = vcmp.gt.f32.partialorder %v7680_v5, 0.0  ;;  %v8041_v47 = vmul.f32 %v7680_v5, %v12075_v15 }
 0x832   :  { %vm7979_vm6 = vcmp.gt.f32.partialorder %v7769_v41, 0.0  ;;  %v8043_v20 = vmul.f32 %v7769_v41, %v12075_v15  ;;  %v8104_v7 = vsel %vm7976_vm3, %v7678_v50, %v8040_v23 }
 0x833   :  { %v8106_v28 = vsel %vm7978_vm12, %v7767_v27, %v8042_v26  ;;  %8168 = vst [vmem:[#allocation9 + $0x1c0] sm:$0xff] %v8104_v7  ;;  %v8105_v56 = vsel %vm7977_vm13, %v7680_v5, %v8041_v47 }
 0x834   :  { %8170 = vst [vmem:[#allocation9 + $0x1d0] sm:$0xff] %v8106_v28  ;;  %v8107_v40 = vsel %vm7979_vm6, %v7769_v41, %v8043_v20  ;;  %v7684_v21 = vpop.f32.mrb[6].mxu0  ;;  %v7773_v11 = vpop.f32.mrb[2].mxu1  ;;  %8169 = vst [vmem:[#allocation9 + $0x1c8] sm:$0xff] %v8105_v56 }
 0x835   :  { %8171 = vst [vmem:[#allocation9 + $0x1d8] sm:$0xff] %v8107_v40  ;;  %vm7992_vm0 = vcmp.gt.f32.partialorder %v7684_v21, 0.0  ;;  %v8056_v35 = vmul.f32 %v7684_v21, %v12075_v15  ;;  %vm7994_vm8 = vcmp.gt.f32.partialorder %v7773_v11, 0.0  ;;  %v8058_v61 = vmul.f32 %v7773_v11, %v12075_v15  ;;  %v7686_v3 = vpop.f32.mrb[7].mxu0  ;;  %v7775_v2 = vpop.f32.mrb[3].mxu1 }
 0x836   :  { %vm7993_vm9 = vcmp.gt.f32.partialorder %v7686_v3, 0.0  ;;  %v8057_v60 = vmul.f32 %v7686_v3, %v12075_v15  ;;  %vm7995_vm10 = vcmp.gt.f32.partialorder %v7775_v2, 0.0  ;;  %v8059_v34 = vmul.f32 %v7775_v2, %v12075_v15 }
 0x837   :  { %v8120_v22 = vsel %vm7992_vm0, %v7684_v21, %v8056_v35  ;;  %v8122_v57 = vsel %vm7994_vm8, %v7773_v11, %v8058_v61 }
 0x838   :  { %8184 = vst [vmem:[#allocation9 + $0x3c0] sm:$0xff] %v8120_v22  ;;  %8186 = vst [vmem:[#allocation9 + $0x3d0] sm:$0xff] %v8122_v57  ;;  %v8121_v37 = vsel %vm7993_vm9, %v7686_v3, %v8057_v60  ;;  %v8123_v63 = vsel %vm7995_vm10, %v7775_v2, %v8059_v34  ;;  %v7690_v18 = vpop.f32.mrb[8].mxu0  ;;  %v7779_v10 = vpop.f32.mrb[4].mxu1 }
 0x839   :  { %8185 = vst [vmem:[#allocation9 + $0x3c8] sm:$0xff] %v8121_v37  ;;  %8187 = vst [vmem:[#allocation9 + $0x3d8] sm:$0xff] %v8123_v63  ;;  %vm8008_vm1 = vcmp.gt.f32.partialorder %v7690_v18, 0.0  ;;  %v8072_v36 = vmul.f32 %v7690_v18, %v12075_v15  ;;  %vm8010_vm14 = vcmp.gt.f32.partialorder %v7779_v10, 0.0  ;;  %v8074_v31 = vmul.f32 %v7779_v10, %v12075_v15  ;;  %v7692_v54 = vpop.f32.mrb[9].mxu0  ;;  %v7781_v46 = vpop.f32.mrb[5].mxu1 }
 0x83a   :  { %vm8009_vm5 = vcmp.gt.f32.partialorder %v7692_v54, 0.0  ;;  %v8073_v9 = vmul.f32 %v7692_v54, %v12075_v15  ;;  %vm8011_vm2 = vcmp.gt.f32.partialorder %v7781_v46, 0.0  ;;  %v8075_v51 = vmul.f32 %v7781_v46, %v12075_v15 }
 0x83b   :  { %v8136_v30 = vsel %vm8008_vm1, %v7690_v18, %v8072_v36  ;;  %v8138_v55 = vsel %vm8010_vm14, %v7779_v10, %v8074_v31 }
 0x83c   :  { %8200 = vst [vmem:[#allocation9 + $0x5c0] sm:$0xff] %v8136_v30  ;;  %8202 = vst [vmem:[#allocation9 + $0x5d0] sm:$0xff] %v8138_v55  ;;  %v8137_v48 = vsel %vm8009_vm5, %v7692_v54, %v8073_v9  ;;  %v8139_v8 = vsel %vm8011_vm2, %v7781_v46, %v8075_v51  ;;  %v7696_v53 = vpop.f32.mrb[10].mxu0  ;;  %v7785_v62 = vpop.f32.mrb[6].mxu1 }
 0x83d   :  { %8201 = vst [vmem:[#allocation9 + $0x5c8] sm:$0xff] %v8137_v48  ;;  %8203 = vst [vmem:[#allocation9 + $0x5d8] sm:$0xff] %v8139_v8  ;;  %vm8024_vm15 = vcmp.gt.f32.partialorder %v7696_v53, 0.0  ;;  %v8088_v6 = vmul.f32 %v7696_v53, %v12075_v15  ;;  %vm8026_vm7 = vcmp.gt.f32.partialorder %v7785_v62, 0.0  ;;  %v8090_v32 = vmul.f32 %v7785_v62, %v12075_v15  ;;  %v7698_v39 = vpop.f32.mrb[11].mxu0  ;;  %v7787_v52 = vpop.f32.mrb[7].mxu1 }
 0x83e   :  { %vm8025_vm4 = vcmp.gt.f32.partialorder %v7698_v39, 0.0  ;;  %v8089_v1 = vmul.f32 %v7698_v39, %v12075_v15  ;;  %vm8027_vm11 = vcmp.gt.f32.partialorder %v7787_v52, 0.0  ;;  %v8091_v49 = vmul.f32 %v7787_v52, %v12075_v15 }
 0x83f   :  { %v8152_v45 = vsel %vm8024_vm15, %v7696_v53, %v8088_v6  ;;  %v8154_v17 = vsel %vm8026_vm7, %v7785_v62, %v8090_v32 }
 0x840   :  { %8216 = vst [vmem:[#allocation9 + $0x7c0] sm:$0xff] %v8152_v45  ;;  %8218 = vst [vmem:[#allocation9 + $0x7d0] sm:$0xff] %v8154_v17  ;;  %v8153_v58 = vsel %vm8025_vm4, %v7698_v39, %v8089_v1  ;;  %v8155_v43 = vsel %vm8027_vm11, %v7787_v52, %v8091_v49  ;;  %v7856_v59 = vpop.f32.mrb[12].mxu0  ;;  %v7945_v25 = vpop.f32.mrb[8].mxu1 }
 0x841   :  { %8217 = vst [vmem:[#allocation9 + $0x7c8] sm:$0xff] %v8153_v58  ;;  %8219 = vst [vmem:[#allocation9 + $0x7d8] sm:$0xff] %v8155_v43  ;;  %vm7980_vm3 = vcmp.gt.f32.partialorder %v7856_v59, 0.0  ;;  %v8044_v42 = vmul.f32 %v7856_v59, %v12075_v15  ;;  %vm7982_vm12 = vcmp.gt.f32.partialorder %v7945_v25, 0.0  ;;  %v8046_v13 = vmul.f32 %v7945_v25, %v12075_v15  ;;  %v7858_v0 = vpop.f32.mrb[13].mxu0  ;;  %v7947_v4 = vpop.f32.mrb[9].mxu1 }
 0x842   :  { %vm7981_vm13 = vcmp.gt.f32.partialorder %v7858_v0, 0.0  ;;  %v8045_v19 = vmul.f32 %v7858_v0, %v12075_v15  ;;  %vm7983_vm6 = vcmp.gt.f32.partialorder %v7947_v4, 0.0  ;;  %v8047_v12 = vmul.f32 %v7947_v4, %v12075_v15 }
 0x843   :  { %v8108_v29 = vsel %vm7980_vm3, %v7856_v59, %v8044_v42  ;;  %v8110_v38 = vsel %vm7982_vm12, %v7945_v25, %v8046_v13 }
 0x844   :  { %8172 = vst [vmem:[#allocation9 + $0x1e0] sm:$0xff] %v8108_v29  ;;  %8174 = vst [vmem:[#allocation9 + $0x1f0] sm:$0xff] %v8110_v38  ;;  %v8109_v14 = vsel %vm7981_vm13, %v7858_v0, %v8045_v19  ;;  %v8111_v44 = vsel %vm7983_vm6, %v7947_v4, %v8047_v12  ;;  %v7862_v16 = vpop.f32.mrb[14].mxu0  ;;  %v7951_v24 = vpop.f32.mrb[10].mxu1 }
 0x845   :  { %8173 = vst [vmem:[#allocation9 + $0x1e8] sm:$0xff] %v8109_v14  ;;  %8175 = vst [vmem:[#allocation9 + $0x1f8] sm:$0xff] %v8111_v44  ;;  %vm7996_vm0 = vcmp.gt.f32.partialorder %v7862_v16, 0.0  ;;  %v8060_v33 = vmul.f32 %v7862_v16, %v12075_v15  ;;  %vm7998_vm8 = vcmp.gt.f32.partialorder %v7951_v24, 0.0  ;;  %v8062_v50 = vmul.f32 %v7951_v24, %v12075_v15  ;;  %v7864_v27 = vpop.f32.mrb[15].mxu0  ;;  %v7953_v23 = vpop.f32.mrb[11].mxu1 }
 0x846   :  { %vm7997_vm9 = vcmp.gt.f32.partialorder %v7864_v27, 0.0  ;;  %v8061_v26 = vmul.f32 %v7864_v27, %v12075_v15  ;;  %vm7999_vm10 = vcmp.gt.f32.partialorder %v7953_v23, 0.0  ;;  %v8063_v5 = vmul.f32 %v7953_v23, %v12075_v15 }
 0x847   :  { %v8124_v41 = vsel %vm7996_vm0, %v7862_v16, %v8060_v33  ;;  %v8126_v47 = vsel %vm7998_vm8, %v7951_v24, %v8062_v50 }
 0x848   :  { %8188 = vst [vmem:[#allocation9 + $0x3e0] sm:$0xff] %v8124_v41  ;;  %8190 = vst [vmem:[#allocation9 + $0x3f0] sm:$0xff] %v8126_v47  ;;  %v8125_v20 = vsel %vm7997_vm9, %v7864_v27, %v8061_v26  ;;  %v8127_v7 = vsel %vm7999_vm10, %v7953_v23, %v8063_v5  ;;  %v7868_v28 = vpop.f32.mrb[16].mxu0  ;;  %v7957_v56 = vpop.f32.mrb[12].mxu1 }
 0x849   :  { %8189 = vst [vmem:[#allocation9 + $0x3e8] sm:$0xff] %v8125_v20  ;;  %8191 = vst [vmem:[#allocation9 + $0x3f8] sm:$0xff] %v8127_v7  ;;  %vm8012_vm1 = vcmp.gt.f32.partialorder %v7868_v28, 0.0  ;;  %v8076_v40 = vmul.f32 %v7868_v28, %v12075_v15  ;;  %vm8014_vm14 = vcmp.gt.f32.partialorder %v7957_v56, 0.0  ;;  %v8078_v21 = vmul.f32 %v7957_v56, %v12075_v15  ;;  %v7870_v11 = vpop.f32.mrb[17].mxu0  ;;  %v7959_v35 = vpop.f32.mrb[13].mxu1 }
 0x84a   :  { %vm8013_vm5 = vcmp.gt.f32.partialorder %v7870_v11, 0.0  ;;  %v8077_v61 = vmul.f32 %v7870_v11, %v12075_v15  ;;  %vm8015_vm2 = vcmp.gt.f32.partialorder %v7959_v35, 0.0  ;;  %v8079_v3 = vmul.f32 %v7959_v35, %v12075_v15 }
 0x84b   :  { %v8140_v2 = vsel %vm8012_vm1, %v7868_v28, %v8076_v40  ;;  %v8142_v60 = vsel %vm8014_vm14, %v7957_v56, %v8078_v21 }
 0x84c   :  { %8204 = vst [vmem:[#allocation9 + $0x5e0] sm:$0xff] %v8140_v2  ;;  %8206 = vst [vmem:[#allocation9 + $0x5f0] sm:$0xff] %v8142_v60  ;;  %v8141_v34 = vsel %vm8013_vm5, %v7870_v11, %v8077_v61  ;;  %v8143_v22 = vsel %vm8015_vm2, %v7959_v35, %v8079_v3  ;;  %v7874_v57 = vpop.f32.mrb[18].mxu0  ;;  %v7963_v37 = vpop.f32.mrb[14].mxu1 }
 0x84d   :  { %8205 = vst [vmem:[#allocation9 + $0x5e8] sm:$0xff] %v8141_v34  ;;  %8207 = vst [vmem:[#allocation9 + $0x5f8] sm:$0xff] %v8143_v22  ;;  %vm8028_vm15 = vcmp.gt.f32.partialorder %v7874_v57, 0.0  ;;  %v8092_v63 = vmul.f32 %v7874_v57, %v12075_v15  ;;  %vm8030_vm7 = vcmp.gt.f32.partialorder %v7963_v37, 0.0  ;;  %v8094_v18 = vmul.f32 %v7963_v37, %v12075_v15  ;;  %v7876_v10 = vpop.f32.mrb[19].mxu0  ;;  %v7965_v36 = vpop.f32.mrb[15].mxu1 }
 0x84e   :  { %vm8029_vm4 = vcmp.gt.f32.partialorder %v7876_v10, 0.0  ;;  %v8093_v31 = vmul.f32 %v7876_v10, %v12075_v15  ;;  %vm8031_vm11 = vcmp.gt.f32.partialorder %v7965_v36, 0.0  ;;  %v8095_v54 = vmul.f32 %v7965_v36, %v12075_v15 }
 0x84f   :  { %v8156_v46 = vsel %vm8028_vm15, %v7874_v57, %v8092_v63  ;;  %v8158_v9 = vsel %vm8030_vm7, %v7963_v37, %v8094_v18 }
 0x850   :  { %8220 = vst [vmem:[#allocation9 + $0x7e0] sm:$0xff] %v8156_v46  ;;  %8222 = vst [vmem:[#allocation9 + $0x7f0] sm:$0xff] %v8158_v9  ;;  %v8157_v51 = vsel %vm8029_vm4, %v7876_v10, %v8093_v31  ;;  %v8159_v30 = vsel %vm8031_vm11, %v7965_v36, %v8095_v54 }
 0x851   :  { %8221 = vst [vmem:[#allocation9 + $0x7e8] sm:$0xff] %v8157_v51  ;;  %8223 = vst [vmem:[#allocation9 + $0x7f8] sm:$0xff] %v8159_v30 }
 0x852   :  { %10078 = shalt.err (!%p10075_p3)
}
 0x853   :  { %s10079_s26 = scalar_lea.hbm %s12638_s9, 32768 }
 0x854   :  { %p10080_p4 = scmp.ne.s32.totalorder %s12638_s9, %s10079_s26  ;;  %p10083_p5 = scmp.lt.u32.totalorder %s10079_s26, %s12638_s9 }
 0x856   :  { %p10085_p6 = pnand %p10083_p5, %p10080_p4 }
 0x858   :  { %10088 = shalt.err (!%p10085_p6)
}
 0x859   :  { %8235 = dma.vmem_to_hbm [thread:$0]  %s8230_s0, 32768, %s12638_s9, [#allocation6], %s10097_s23, %s10097_s23, %s10098_s24  }
 0x85a   :  { %10093 = dma.done.wait [#allocation6], 32768  }
 0x85b   :  { %10094 = vsyncadd [#allocation6], 4294934528 }
 0x85c   :  { %8239 = vsyncpa [#allocation5], 1 }
 0x85d   :  { %8240 = vsyncpa [#allocation6], 1 }
 0x85e   :  { %8241 = vsyncpa [#allocation7], 1 }

</bundles_post_ra>
